<compile_context>
chip_gen: v5e
topology: v5e:2x2
jax: 0.10.0
libtpu: 0.0.40
codegen_flags: <defaults>
</compile_context>

<pallas_src>
import jax
import jax.numpy as jnp
from jax import lax
from jax.experimental import pallas as pl
from jax.experimental.pallas import tpu as pltpu

# ----------------------------- configuration --------------------------------
NUM_CLASSES = 22
NUM_JOINTS = 33
KP_EMBED = 64            # keypoint_embed_dim (module default 256; small demo size)
KP_DIM = 2 * KP_EMBED    # 128
MAX_SEQ_LEN = 16
VIDEO_EMBED = 128        # surrogate hidden size (real TimeSformer: 768)
PATCH = 16
CLS_HIDDEN = 256
MASK_NEG = -1e30

assert KP_DIM == VIDEO_EMBED  # lets keypoint LN params share the 128-wide vector bank

# rows of the packed (24, 128) small-vector bank
(_G1, _B1, _G2, _B2, _GF, _BF, _BO, _BB2,
 _KG, _KB, _BQ, _BK, _BV) = range(13)
_BB1 = 13       # 4 rows: MLP bias (512 = 4 x 128)
_CB1 = 17       # 2 rows: classifier hidden bias (256 = 2 x 128)
_CB2 = 19       # 1 row : classifier output bias (padded to 128)
_MSK = 20       # 1 row : additive key-padding mask {0, -1e30}
_NVEC = 24


def _round_up(x, m):
    return (x + m - 1) // m * m


# ------------------------------ fused kernel ---------------------------------
def _make_fused_kernel(T, N, NP, BB):
    DV = VIDEO_EMBED
    scale = 1.0 / float(DV) ** 0.5

    def layernorm(z, g, b, eps):
        mu = jnp.mean(z, axis=-1, keepdims=True)
        var = jnp.mean((z - mu) ** 2, axis=-1, keepdims=True)
        return (z - mu) * lax.rsqrt(var + eps) * g + b

    def kernel(kp_ref, x_ref,
               kptab_ref, tavg_ref,
               vwp_ref, vpe_ref, wqkv_ref, wo_ref, w1_ref, w2_ref,
               vecs_ref, sel_ref, cw1_ref, cw2_ref,
               out_ref):
        vecs = vecs_ref[...]                                     # (24, 128) f32
        row = lambda i: vecs[i:i + 1, :]

        # ------------------------- keypoint branch --------------------------
        # joint-mean was applied host-side (linear proj commutes with the mean)
        kptab = kptab_ref[...]                                   # (8 + BB*T, 128)
        proj = jnp.dot(kp_ref[...], kptab[0:8, :],
                       preferred_element_type=jnp.float32)       # (BB*T, 2*KP_EMBED)
        fm = proj + kptab[8:8 + BB * T, :]       # temporal pos-emb (+ folded kp biases)
        fm = layernorm(fm, row(_KG), row(_KB), 1e-5)             # torch LayerNorm eps
        fm = jnp.maximum(fm, 0.0)                                # kp_processor ReLU
        kfeat = jnp.dot(tavg_ref[...], fm,
                        preferred_element_type=jnp.float32)      # time-mean -> (BB, 128)

        # --------------------- video branch (surrogate) ----------------------
        emb = jnp.dot(x_ref[...], vwp_ref[...],
                      preferred_element_type=jnp.float32)        # (BB*N, DV) stacked
        vpe = vpe_ref[...]                                       # (NP, DV)
        pe_patch = vpe[0:N, :]                                   # pos-emb + patch bias
        clspad = vpe[N:NP, :]                                    # CLS row + zero padding
        pieces = []
        for b in range(BB):                                      # 8-row aligned concat
            pieces.append(emb[b * N:(b + 1) * N, :] + pe_patch)
            pieces.append(clspad)
        tok = jnp.concatenate(pieces, axis=0)                    # (BB*NP, DV) f32

        # --- single pre-LN self-attention block, stacked QKV projection ---
        h = layernorm(tok, row(_G1), row(_B1), 1e-6).astype(jnp.bfloat16)
        qkv = jnp.dot(h, wqkv_ref[...],
                      preferred_element_type=jnp.float32)        # (BB*NP, 3*DV)
        mask = row(_MSK)[:, 0:NP]                                # (1, NP) additive bias
        att = []
        for b in range(BB):                                      # per-sample attention
            o = b * NP
            qkv_b = qkv[o:o + NP, :]
            qb = (qkv_b[:, 0:DV] + row(_BQ)).astype(jnp.bfloat16)
            kb = (qkv_b[:, DV:2 * DV] + row(_BK)).astype(jnp.bfloat16)
            vb = (qkv_b[:, 2 * DV:3 * DV] + row(_BV)).astype(jnp.bfloat16)
            s = lax.dot_general(qb, kb, (((1,), (1,)), ((), ())),
                                preferred_element_type=jnp.float32) * scale + mask
            s = s - jnp.max(s, axis=-1, keepdims=True)
            p = jnp.exp(s)
            p = p * pl.reciprocal(jnp.sum(p, axis=-1, keepdims=True), approx=True)
            att.append(jnp.dot(p.astype(jnp.bfloat16), vb,
                               preferred_element_type=jnp.float32))
        a = jnp.concatenate(att, axis=0)                         # (BB*NP, DV)
        tok = tok + jnp.dot(a.astype(jnp.bfloat16), wo_ref[...],
                            preferred_element_type=jnp.float32) + row(_BO)

        # --- MLP block (stacked), GELU in bf16 ---
        h2 = layernorm(tok, row(_G2), row(_B2), 1e-6).astype(jnp.bfloat16)
        bb1 = jnp.concatenate([row(_BB1 + i) for i in range(4)], axis=1)   # (1, 4*DV)
        m = jnp.dot(h2, w1_ref[...], preferred_element_type=jnp.float32) + bb1
        m = m.astype(jnp.bfloat16)
        m = 0.5 * m * (1.0 + jnp.tanh(0.7978845608028654 *
                                      (m + 0.044715 * m * m * m)))   # gelu (tanh approx)
        tok = tok + jnp.dot(m, w2_ref[...],
                            preferred_element_type=jnp.float32) + row(_BB2)

        # final LN only on the CLS rows (LayerNorm is row-wise; only CLS is read out)
        cls_rows = jnp.dot(sel_ref[...], tok,
                           preferred_element_type=jnp.float32)   # (BB, DV)
        vfeat = layernorm(cls_rows, row(_GF), row(_BF), 1e-6)

        # --------------- classifier (dropout = identity at inference) ---------------
        feat = jnp.concatenate([vfeat, kfeat], axis=1).astype(jnp.bfloat16)  # (BB, 2*DV)
        cb1 = jnp.concatenate([row(_CB1), row(_CB1 + 1)], axis=1)            # (1, 256)
        hc = jnp.dot(feat, cw1_ref[...], preferred_element_type=jnp.float32) + cb1
        hc = jnp.maximum(hc, 0.0).astype(jnp.bfloat16)
        out_ref[...] = (jnp.dot(hc, cw2_ref[...], preferred_element_type=jnp.float32)
                        + row(_CB2))                             # lane-dense (BB, 128)

    return kernel


# ------------------------- one-time parameter packing -------------------------
def _pack_params(params, *, batch, T, H, W):
    assert T <= MAX_SEQ_LEN
    p = PATCH
    DV = VIDEO_EMBED
    D = KP_EMBED
    N = T * (H // p) * (W // p)
    P = 3 * p * p
    assert N % 8 == 0, "patch count must be sublane aligned"
    NP = _round_up(N + 1, 8)
    n_valid = N + 1
    assert NP <= 128  # TODO(synk): move the attn mask out of the 128-lane bank for larger N
    BB = min(8, batch)                      # samples per grid step

    f32 = jnp.float32
    bf = lambda a: a.astype(jnp.bfloat16)

    # keypoint table: rows [0:8] block-diag projection; rows [8:] pos-emb(+bias) tiled per sample
    z4 = jnp.zeros((4, D), f32)
    kp_wblk = jnp.concatenate(
        [jnp.concatenate([params["kp_w"], z4], axis=1),
         jnp.concatenate([z4, params["kpv_w"]], axis=1)], axis=0)             # (8, 2D)
    kppe = (params["temporal_pos_embedding"][:T]
            + jnp.concatenate([params["kp_b"], params["kpv_b"]], axis=1))     # (T, 2D)
    kp_tab = jnp.concatenate([kp_wblk, jnp.tile(kppe, (BB, 1))], axis=0)      # (8+BB*T, 2D)

    # tiny reduction / selection matrices
    tavg = jnp.kron(jnp.eye(BB, dtype=f32), jnp.full((1, T), 1.0 / T, f32))   # (BB, BB*T)
    sel = jnp.zeros((BB, BB * NP), f32).at[
        jnp.arange(BB), jnp.arange(BB) * NP + N].set(1.0)                     # picks CLS rows

    # padded token table: rows [0,N)=pos-emb+patch bias, row N=CLS(+pos-emb), rest zeros
    pe = params["v_pe"]                                                       # (N+1, DV), row 0 = CLS
    vpe_pad = jnp.concatenate(
        [pe[1:N + 1] + params["v_bp"],
         params["v_cls"] + pe[0:1],
         jnp.zeros((NP - N - 1, DV), f32)], axis=0)                           # (NP, DV)

    wqkv = bf(jnp.concatenate([params["v_wq"], params["v_wk"], params["v_wv"]], axis=1))

    # (24, 128) small-vector bank
    mask_row = jnp.where(jnp.arange(128) < n_valid, 0.0, MASK_NEG).astype(f32)[None, :]
    cb2_pad = jnp.zeros((1, 128), f32).at[:, :NUM_CLASSES].set(params["cls_b2"])
    rows = [params["v_g1"], params["v_b1"], params["v_g2"], params["v_b2"],
            params["v_gf"], params["v_bf"], params["v_bo"], params["v_bb2"],
            params["ln_g"], params["ln_b"],
            params["v_bq"], params["v_bk"], params["v_bv"]]
    rows += [params["v_bb1"][:, i * 128:(i + 1) * 128] for i in range(4)]
    rows += [params["cls_b1"][:, 0:128], params["cls_b1"][:, 128:256]]
    rows += [cb2_pad, mask_row]
    vecs = jnp.concatenate(rows, axis=0)
    vecs = jnp.pad(vecs, ((0, _NVEC - vecs.shape[0]), (0, 0)))                # (24, 128)

    w2c_pad = jnp.zeros((CLS_HIDDEN, 128), f32).at[:, :NUM_CLASSES].set(params["cls_w2"])

    weights = (kp_tab, tavg,
               bf(params["v_wp"]), vpe_pad, wqkv, bf(params["v_wo"]),
               bf(params["v_w1"]), bf(params["v_w2"]),
               vecs, sel, bf(params["cls_w1"]), bf(w2c_pad))
    dims = dict(BB=BB, T=T, N=N, NP=NP, P=P)
    return weights, dims


# ------------------------------ host-side glue --------------------------------
def _patchify(video_bt3hw):
    B, T, C, H, W = video_bt3hw.shape
    p = PATCH
    v = video_bt3hw.reshape(B, T, C, H // p, p, W // p, p)
    v = jnp.transpose(v, (0, 1, 3, 5, 2, 4, 6))                  # (B,T,nh,nw,C,p,p)
    return v.reshape(B, T * (H // p) * (W // p), C * p * p)


def _forward(video, keypoints, weights, *, BB, T, N, NP, P):
    B, Tk, F = keypoints.shape
    J = NUM_JOINTS
    assert Tk == T and F == 2 * J * 4
    B_pad = _round_up(B, BB)
    G = B_pad // BB

    # ---- keypoints: joint-mean BEFORE the linear projection (exact; proj is linear,
    # ReLU comes after the mean+LN) -> (B, T, 8) = [mean pos(4) | mean vel(4)] ----
    kp = keypoints.astype(jnp.float32).reshape(B, T, 2, J, 4).mean(axis=3).reshape(B, T, 8)
    kp = jnp.pad(kp, ((0, B_pad - B), (0, 0), (0, 0))).reshape(B_pad * T, 8)

    # ---- video preprocessing (same NCTHW heuristic as the torch module) ----
    if video.ndim == 5 and video.shape[1] == 3:
        video = jnp.transpose(video, (0, 2, 1, 3, 4))             # -> [B, T, 3, H, W]
    # TODO(synk): at real 224x224 resolution, move patch extraction into the kernel via an
    # index_map gather over (t, nh, nw) tiles instead of this HBM transpose.
    patches = _patchify(video.astype(jnp.bfloat16))               # bf16 before the transpose
    assert patches.shape[1] == N and patches.shape[2] == P
    patches = jnp.pad(patches, ((0, B_pad - B), (0, 0), (0, 0))).reshape(B_pad * N, P)

    # constant-index weights: single-buffered (no pointless double-buffer VMEM)
    w_specs = [pl.BlockSpec(w.shape, lambda g: (0, 0), pipeline_mode=pl.Buffered(1))
               for w in weights]

    out = pl.pallas_call(
        _make_fused_kernel(T, N, NP, BB),
        out_shape=jax.ShapeDtypeStruct((B_pad, 128), jnp.float32),
        grid_spec=pltpu.PrefetchScalarGridSpec(
            num_scalar_prefetch=0,
            grid=(G,),
            in_specs=[pl.BlockSpec((BB * T, 8), lambda g: (g, 0)),
                      pl.BlockSpec((BB * N, P), lambda g: (g, 0))] + w_specs,
            out_specs=pl.BlockSpec((BB, 128), lambda g: (g, 0))),
        compiler_params=pltpu.CompilerParams(
            dimension_semantics=("parallel",),
            vmem_limit_bytes=32 * 1024 * 1024),
    )(kp, patches, *weights)
    return out[:B, :NUM_CLASSES]


def make_forward(params, *, batch, T, H, W):
    """One-time parameter packing (hoisted out of the per-call jit) + jitted forward."""
    weights, dims = _pack_params(params, batch=batch, T=T, H=H, W=W)

    @jax.jit
    def forward(video, keypoints):
        return _forward(video, keypoints, weights,
                        BB=dims["BB"], T=dims["T"], N=dims["N"],
                        NP=dims["NP"], P=dims["P"])

    return forward


# ----------------------------- deterministic init ----------------------------
def init_params(key, T, H, W):
    p = PATCH
    n_tokens = T * (H // p) * (W // p) + 1
    D, DV = KP_EMBED, VIDEO_EMBED
    ks = iter(jax.random.split(key, 40))

    def nrm(shape, scale=0.02):
        return (scale * jax.random.normal(next(ks), shape)).astype(jnp.float32)

    zeros = lambda shape: jnp.zeros(shape, jnp.float32)
    ones = lambda shape: jnp.ones(shape, jnp.float32)

    return {
        # keypoint branch
        "kp_w": nrm((4, D)), "kp_b": zeros((1, D)),
        "kpv_w": nrm((4, D)), "kpv_b": zeros((1, D)),
        "temporal_pos_embedding": jax.random.normal(
            next(ks), (MAX_SEQ_LEN, 2 * D)).astype(jnp.float32),
        "ln_g": ones((1, 2 * D)), "ln_b": zeros((1, 2 * D)),
        # video branch surrogate
        "v_wp": nrm((3 * p * p, DV)), "v_bp": zeros((1, DV)),
        "v_cls": nrm((1, DV)), "v_pe": nrm((n_tokens, DV)),
        "v_g1": ones((1, DV)), "v_b1": zeros((1, DV)),
        "v_wq": nrm((DV, DV)), "v_bq": zeros((1, DV)),
        "v_wk": nrm((DV, DV)), "v_bk": zeros((1, DV)),
        "v_wv": nrm((DV, DV)), "v_bv": zeros((1, DV)),
        "v_wo": nrm((DV, DV)), "v_bo": zeros((1, DV)),
        "v_g2": ones((1, DV)), "v_b2": zeros((1, DV)),
        "v_w1": nrm((DV, 4 * DV)), "v_bb1": zeros((1, 4 * DV)),
        "v_w2": nrm((4 * DV, DV)), "v_bb2": zeros((1, DV)),
        "v_gf": ones((1, DV)), "v_bf": zeros((1, DV)),
        # classifier
        "cls_w1": nrm((DV + 2 * D, CLS_HIDDEN)), "cls_b1": zeros((1, CLS_HIDDEN)),
        "cls_w2": nrm((CLS_HIDDEN, NUM_CLASSES)), "cls_b2": zeros((1, NUM_CLASSES)),
    }


# ------------------------------------ main ------------------------------------
if __name__ == "__main__":
    key = jax.random.PRNGKey(0)
    k_video, k_kp, k_params = jax.random.split(key, 3)

    B, T, H, W = 4, 8, 32, 32
    video = jax.random.normal(k_video, (B, 3, T, H, W), dtype=jnp.float32)   # NCTHW
    keypoints = jax.random.normal(k_kp, (B, T, NUM_JOINTS * 2 * 4), dtype=jnp.float32)
    params = init_params(k_params, T, H, W)

    forward = make_forward(params, batch=B, T=T, H=H, W=W)
    out = jax.block_until_ready(forward(video, keypoints))
    assert out.shape == (B, NUM_CLASSES), out.shape
    assert bool(jnp.all(jnp.isfinite(out)))
    print("KERNEL_OK")
</pallas_src>

<mosaic_0001>
module attributes {stable_mosaic.version = 11 : i64} {
  func.func @kernel(%arg0: i32, %arg1: memref<32x8xf32, #tpu.memory_space<vmem>>, %arg2: memref<128x768xbf16, #tpu.memory_space<vmem>>, %arg3: memref<40x128xf32, #tpu.memory_space<vmem>>, %arg4: memref<4x32xf32, #tpu.memory_space<vmem>>, %arg5: memref<768x128xbf16, #tpu.memory_space<vmem>>, %arg6: memref<40x128xf32, #tpu.memory_space<vmem>>, %arg7: memref<128x384xbf16, #tpu.memory_space<vmem>>, %arg8: memref<128x128xbf16, #tpu.memory_space<vmem>>, %arg9: memref<128x512xbf16, #tpu.memory_space<vmem>>, %arg10: memref<512x128xbf16, #tpu.memory_space<vmem>>, %arg11: memref<24x128xf32, #tpu.memory_space<vmem>>, %arg12: memref<4x160xf32, #tpu.memory_space<vmem>>, %arg13: memref<256x256xbf16, #tpu.memory_space<vmem>>, %arg14: memref<256x128xbf16, #tpu.memory_space<vmem>>, %arg15: memref<4x128xf32, #tpu.memory_space<vmem>>) attributes {dimension_semantics = [#tpu.dimension_semantics<parallel>], iteration_bounds = array<i64: 1>, scalar_prefetch = 0 : i64, scratch_operands = 0 : i64, tpu.core_type = #tpu.core_type<tc>, window_params = [{transform_indices = @transform_0, window_bounds = array<i64: 32, 8>}, {transform_indices = @transform_1, window_bounds = array<i64: 128, 768>}, {pipeline_mode = #tpu.pipeline_mode<synchronous>, transform_indices = @transform_2, window_bounds = array<i64: 40, 128>}, {pipeline_mode = #tpu.pipeline_mode<synchronous>, transform_indices = @transform_3, window_bounds = array<i64: 4, 32>}, {pipeline_mode = #tpu.pipeline_mode<synchronous>, transform_indices = @transform_4, window_bounds = array<i64: 768, 128>}, {pipeline_mode = #tpu.pipeline_mode<synchronous>, transform_indices = @transform_5, window_bounds = array<i64: 40, 128>}, {pipeline_mode = #tpu.pipeline_mode<synchronous>, transform_indices = @transform_6, window_bounds = array<i64: 128, 384>}, {pipeline_mode = #tpu.pipeline_mode<synchronous>, transform_indices = @transform_7, window_bounds = array<i64: 128, 128>}, {pipeline_mode = #tpu.pipeline_mode<synchronous>, transform_indices = @transform_8, window_bounds = array<i64: 128, 512>}, {pipeline_mode = #tpu.pipeline_mode<synchronous>, transform_indices = @transform_9, window_bounds = array<i64: 512, 128>}, {pipeline_mode = #tpu.pipeline_mode<synchronous>, transform_indices = @transform_10, window_bounds = array<i64: 24, 128>}, {pipeline_mode = #tpu.pipeline_mode<synchronous>, transform_indices = @transform_11, window_bounds = array<i64: 4, 160>}, {pipeline_mode = #tpu.pipeline_mode<synchronous>, transform_indices = @transform_12, window_bounds = array<i64: 256, 256>}, {pipeline_mode = #tpu.pipeline_mode<synchronous>, transform_indices = @transform_13, window_bounds = array<i64: 256, 128>}, {transform_indices = @transform_14, window_bounds = array<i64: 4, 128>}]} {
    %c0 = arith.constant 0 : index
    %c0_0 = arith.constant 0 : index
    %0 = vector.load %arg11[%c0, %c0_0] : memref<24x128xf32, #tpu.memory_space<vmem>>, vector<24x128xf32>
    %c0_1 = arith.constant 0 : index
    %c0_2 = arith.constant 0 : index
    %1 = vector.load %arg3[%c0_1, %c0_2] : memref<40x128xf32, #tpu.memory_space<vmem>>, vector<40x128xf32>
    %c0_3 = arith.constant 0 : index
    %c0_4 = arith.constant 0 : index
    %2 = vector.load %arg1[%c0_3, %c0_4] : memref<32x8xf32, #tpu.memory_space<vmem>>, vector<32x8xf32>
    %3 = vector.extract_strided_slice %1 {offsets = [0, 0], sizes = [8, 128], strides = [1, 1]} : vector<40x128xf32> to vector<8x128xf32>
    %cst = arith.constant dense<0.000000e+00> : vector<32x128xf32>
    %4 = tpu.matmul %2, %3, %cst {dimension_numbers = #tpu.dot_dimension_numbers<[1], [0], [0], [1], [0, 0, 1, 1], [], []>} : vector<32x8xf32>, vector<8x128xf32>, vector<32x128xf32> -> vector<32x128xf32>
    %5 = vector.extract_strided_slice %1 {offsets = [8, 0], sizes = [32, 128], strides = [1, 1]} : vector<40x128xf32> to vector<32x128xf32>
    %6 = arith.addf %4, %5 : vector<32x128xf32>
    %7 = vector.extract_strided_slice %0 {offsets = [8, 0], sizes = [1, 128], strides = [1, 1]} : vector<24x128xf32> to vector<1x128xf32>
    %8 = vector.extract_strided_slice %0 {offsets = [9, 0], sizes = [1, 128], strides = [1, 1]} : vector<24x128xf32> to vector<1x128xf32>
    %cst_5 = arith.constant dense<0.000000e+00> : vector<32xf32>
    %9 = vector.multi_reduction <add>, %6, %cst_5 [1] : vector<32x128xf32> to vector<32xf32>
    %10 = vector.shape_cast %9 : vector<32xf32> to vector<32x1xf32>
    %cst_6 = arith.constant 1.280000e+02 : f32
    %11 = vector.broadcast %cst_6 : f32 to vector<32x1xf32>
    %12 = arith.divf %10, %11 : vector<32x1xf32>
    %13 = vector.broadcast %12 : vector<32x1xf32> to vector<32x128xf32>
    %14 = arith.subf %6, %13 : vector<32x128xf32>
    %15 = arith.mulf %14, %14 : vector<32x128xf32>
    %cst_7 = arith.constant dense<0.000000e+00> : vector<32xf32>
    %16 = vector.multi_reduction <add>, %15, %cst_7 [1] : vector<32x128xf32> to vector<32xf32>
    %17 = vector.shape_cast %16 : vector<32xf32> to vector<32x1xf32>
    %cst_8 = arith.constant 1.280000e+02 : f32
    %18 = vector.broadcast %cst_8 : f32 to vector<32x1xf32>
    %19 = arith.divf %17, %18 : vector<32x1xf32>
    %20 = vector.broadcast %12 : vector<32x1xf32> to vector<32x128xf32>
    %21 = arith.subf %6, %20 : vector<32x128xf32>
    %cst_9 = arith.constant 9.99999974E-6 : f32
    %22 = vector.broadcast %cst_9 : f32 to vector<32x1xf32>
    %23 = arith.addf %19, %22 : vector<32x1xf32>
    %24 = math.rsqrt %23 : vector<32x1xf32>
    %25 = vector.broadcast %24 : vector<32x1xf32> to vector<32x128xf32>
    %26 = arith.mulf %21, %25 : vector<32x128xf32>
    %27 = vector.broadcast %7 : vector<1x128xf32> to vector<32x128xf32>
    %28 = arith.mulf %26, %27 : vector<32x128xf32>
    %29 = vector.broadcast %8 : vector<1x128xf32> to vector<32x128xf32>
    %30 = arith.addf %28, %29 : vector<32x128xf32>
    %cst_10 = arith.constant 0.000000e+00 : f32
    %31 = vector.broadcast %cst_10 : f32 to vector<32x128xf32>
    %32 = arith.maximumf %30, %31 : vector<32x128xf32>
    %c0_11 = arith.constant 0 : index
    %c0_12 = arith.constant 0 : index
    %33 = vector.load %arg4[%c0_11, %c0_12] : memref<4x32xf32, #tpu.memory_space<vmem>>, vector<4x32xf32>
    %cst_13 = arith.constant dense<0.000000e+00> : vector<4x128xf32>
    %34 = tpu.matmul %33, %32, %cst_13 {dimension_numbers = #tpu.dot_dimension_numbers<[1], [0], [0], [1], [0, 0, 1, 1], [], []>} : vector<4x32xf32>, vector<32x128xf32>, vector<4x128xf32> -> vector<4x128xf32>
    %c0_14 = arith.constant 0 : index
    %c0_15 = arith.constant 0 : index
    %35 = vector.load %arg2[%c0_14, %c0_15] : memref<128x768xbf16, #tpu.memory_space<vmem>>, vector<128x768xbf16>
    %c0_16 = arith.constant 0 : index
    %c0_17 = arith.constant 0 : index
    %36 = vector.load %arg5[%c0_16, %c0_17] : memref<768x128xbf16, #tpu.memory_space<vmem>>, vector<768x128xbf16>
    %cst_18 = arith.constant dense<0.000000e+00> : vector<128x128xf32>
    %37 = tpu.matmul %35, %36, %cst_18 {dimension_numbers = #tpu.dot_dimension_numbers<[1], [0], [0], [1], [0, 0, 1, 1], [], []>} : vector<128x768xbf16>, vector<768x128xbf16>, vector<128x128xf32> -> vector<128x128xf32>
    %c0_19 = arith.constant 0 : index
    %c0_20 = arith.constant 0 : index
    %38 = vector.load %arg6[%c0_19, %c0_20] : memref<40x128xf32, #tpu.memory_space<vmem>>, vector<40x128xf32>
    %39 = vector.extract_strided_slice %38 {offsets = [0, 0], sizes = [32, 128], strides = [1, 1]} : vector<40x128xf32> to vector<32x128xf32>
    %40 = vector.extract_strided_slice %38 {offsets = [32, 0], sizes = [8, 128], strides = [1, 1]} : vector<40x128xf32> to vector<8x128xf32>
    %41 = vector.extract_strided_slice %37 {offsets = [0, 0], sizes = [32, 128], strides = [1, 1]} : vector<128x128xf32> to vector<32x128xf32>
    %42 = arith.addf %41, %39 : vector<32x128xf32>
    %43 = vector.extract_strided_slice %37 {offsets = [32, 0], sizes = [32, 128], strides = [1, 1]} : vector<128x128xf32> to vector<32x128xf32>
    %44 = arith.addf %43, %39 : vector<32x128xf32>
    %45 = vector.extract_strided_slice %37 {offsets = [64, 0], sizes = [32, 128], strides = [1, 1]} : vector<128x128xf32> to vector<32x128xf32>
    %46 = arith.addf %45, %39 : vector<32x128xf32>
    %47 = vector.extract_strided_slice %37 {offsets = [96, 0], sizes = [32, 128], strides = [1, 1]} : vector<128x128xf32> to vector<32x128xf32>
    %48 = arith.addf %47, %39 : vector<32x128xf32>
    %49 = tpu.concatenate %42, %40, %44, %40, %46, %40, %48, %40 in 0 : vector<32x128xf32>, vector<8x128xf32>, vector<32x128xf32>, vector<8x128xf32>, vector<32x128xf32>, vector<8x128xf32>, vector<32x128xf32>, vector<8x128xf32> -> vector<160x128xf32>
    %50 = vector.extract_strided_slice %0 {offsets = [0, 0], sizes = [1, 128], strides = [1, 1]} : vector<24x128xf32> to vector<1x128xf32>
    %51 = vector.extract_strided_slice %0 {offsets = [1, 0], sizes = [1, 128], strides = [1, 1]} : vector<24x128xf32> to vector<1x128xf32>
    %cst_21 = arith.constant dense<0.000000e+00> : vector<160xf32>
    %52 = vector.multi_reduction <add>, %49, %cst_21 [1] : vector<160x128xf32> to vector<160xf32>
    %53 = vector.shape_cast %52 : vector<160xf32> to vector<160x1xf32>
    %cst_22 = arith.constant 1.280000e+02 : f32
    %54 = vector.broadcast %cst_22 : f32 to vector<160x1xf32>
    %55 = arith.divf %53, %54 : vector<160x1xf32>
    %56 = vector.broadcast %55 : vector<160x1xf32> to vector<160x128xf32>
    %57 = arith.subf %49, %56 : vector<160x128xf32>
    %58 = arith.mulf %57, %57 : vector<160x128xf32>
    %cst_23 = arith.constant dense<0.000000e+00> : vector<160xf32>
    %59 = vector.multi_reduction <add>, %58, %cst_23 [1] : vector<160x128xf32> to vector<160xf32>
    %60 = vector.shape_cast %59 : vector<160xf32> to vector<160x1xf32>
    %cst_24 = arith.constant 1.280000e+02 : f32
    %61 = vector.broadcast %cst_24 : f32 to vector<160x1xf32>
    %62 = arith.divf %60, %61 : vector<160x1xf32>
    %63 = vector.broadcast %55 : vector<160x1xf32> to vector<160x128xf32>
    %64 = arith.subf %49, %63 : vector<160x128xf32>
    %cst_25 = arith.constant 9.99999997E-7 : f32
    %65 = vector.broadcast %cst_25 : f32 to vector<160x1xf32>
    %66 = arith.addf %62, %65 : vector<160x1xf32>
    %67 = math.rsqrt %66 : vector<160x1xf32>
    %68 = vector.broadcast %67 : vector<160x1xf32> to vector<160x128xf32>
    %69 = arith.mulf %64, %68 : vector<160x128xf32>
    %70 = vector.broadcast %50 : vector<1x128xf32> to vector<160x128xf32>
    %71 = arith.mulf %69, %70 : vector<160x128xf32>
    %72 = vector.broadcast %51 : vector<1x128xf32> to vector<160x128xf32>
    %73 = arith.addf %71, %72 : vector<160x128xf32>
    %74 = arith.truncf %73 : vector<160x128xf32> to vector<160x128xbf16>
    %c0_26 = arith.constant 0 : index
    %c0_27 = arith.constant 0 : index
    %75 = vector.load %arg7[%c0_26, %c0_27] : memref<128x384xbf16, #tpu.memory_space<vmem>>, vector<128x384xbf16>
    %cst_28 = arith.constant dense<0.000000e+00> : vector<160x384xf32>
    %76 = tpu.matmul %74, %75, %cst_28 {dimension_numbers = #tpu.dot_dimension_numbers<[1], [0], [0], [1], [0, 0, 1, 1], [], []>} : vector<160x128xbf16>, vector<128x384xbf16>, vector<160x384xf32> -> vector<160x384xf32>
    %77 = vector.extract_strided_slice %0 {offsets = [20, 0], sizes = [1, 128], strides = [1, 1]} : vector<24x128xf32> to vector<1x128xf32>
    %78 = vector.extract_strided_slice %77 {offsets = [0, 0], sizes = [1, 40], strides = [1, 1]} : vector<1x128xf32> to vector<1x40xf32>
    %79 = vector.extract_strided_slice %76 {offsets = [0, 0], sizes = [40, 384], strides = [1, 1]} : vector<160x384xf32> to vector<40x384xf32>
    %80 = vector.extract_strided_slice %79 {offsets = [0, 0], sizes = [40, 128], strides = [1, 1]} : vector<40x384xf32> to vector<40x128xf32>
    %81 = vector.extract_strided_slice %0 {offsets = [10, 0], sizes = [1, 128], strides = [1, 1]} : vector<24x128xf32> to vector<1x128xf32>
    %82 = vector.broadcast %81 : vector<1x128xf32> to vector<40x128xf32>
    %83 = arith.addf %80, %82 : vector<40x128xf32>
    %84 = arith.truncf %83 : vector<40x128xf32> to vector<40x128xbf16>
    %85 = vector.extract_strided_slice %79 {offsets = [0, 128], sizes = [40, 128], strides = [1, 1]} : vector<40x384xf32> to vector<40x128xf32>
    %86 = vector.extract_strided_slice %0 {offsets = [11, 0], sizes = [1, 128], strides = [1, 1]} : vector<24x128xf32> to vector<1x128xf32>
    %87 = vector.broadcast %86 : vector<1x128xf32> to vector<40x128xf32>
    %88 = arith.addf %85, %87 : vector<40x128xf32>
    %89 = arith.truncf %88 : vector<40x128xf32> to vector<40x128xbf16>
    %90 = vector.extract_strided_slice %79 {offsets = [0, 256], sizes = [40, 128], strides = [1, 1]} : vector<40x384xf32> to vector<40x128xf32>
    %91 = vector.extract_strided_slice %0 {offsets = [12, 0], sizes = [1, 128], strides = [1, 1]} : vector<24x128xf32> to vector<1x128xf32>
    %92 = vector.broadcast %91 : vector<1x128xf32> to vector<40x128xf32>
    %93 = arith.addf %90, %92 : vector<40x128xf32>
    %94 = arith.truncf %93 : vector<40x128xf32> to vector<40x128xbf16>
    %cst_29 = arith.constant dense<0.000000e+00> : vector<40x40xf32>
    %95 = tpu.matmul %84, %89, %cst_29 {dimension_numbers = #tpu.dot_dimension_numbers<[1], [1], [0], [0], [0, 0, 1, 0], [], []>} : vector<40x128xbf16>, vector<40x128xbf16>, vector<40x40xf32> -> vector<40x40xf32>
    %cst_30 = arith.constant 0.0883883461 : f32
    %96 = vector.broadcast %cst_30 : f32 to vector<40x40xf32>
    %97 = arith.mulf %95, %96 : vector<40x40xf32>
    %98 = vector.broadcast %78 : vector<1x40xf32> to vector<40x40xf32>
    %99 = arith.addf %97, %98 : vector<40x40xf32>
    %cst_31 = arith.constant dense<0xFF800000> : vector<40xf32>
    %100 = vector.multi_reduction <maximumf>, %99, %cst_31 [1] : vector<40x40xf32> to vector<40xf32>
    %101 = vector.shape_cast %100 : vector<40xf32> to vector<40x1xf32>
    %102 = vector.broadcast %101 : vector<40x1xf32> to vector<40x40xf32>
    %103 = arith.subf %99, %102 : vector<40x40xf32>
    %104 = math.exp %103 : vector<40x40xf32>
    %cst_32 = arith.constant dense<0.000000e+00> : vector<40xf32>
    %105 = vector.multi_reduction <add>, %104, %cst_32 [1] : vector<40x40xf32> to vector<40xf32>
    %106 = vector.shape_cast %105 : vector<40xf32> to vector<40x1xf32>
    %107 = tpu.reciprocal %106 {approx = true} : vector<40x1xf32> -> vector<40x1xf32>
    %108 = vector.broadcast %107 : vector<40x1xf32> to vector<40x40xf32>
    %109 = arith.mulf %104, %108 : vector<40x40xf32>
    %110 = arith.truncf %109 : vector<40x40xf32> to vector<40x40xbf16>
    %cst_33 = arith.constant dense<0.000000e+00> : vector<40x128xf32>
    %111 = tpu.matmul %110, %94, %cst_33 {dimension_numbers = #tpu.dot_dimension_numbers<[1], [0], [0], [1], [0, 0, 1, 1], [], []>} : vector<40x40xbf16>, vector<40x128xbf16>, vector<40x128xf32> -> vector<40x128xf32>
    %112 = vector.extract_strided_slice %76 {offsets = [40, 0], sizes = [40, 384], strides = [1, 1]} : vector<160x384xf32> to vector<40x384xf32>
    %113 = vector.extract_strided_slice %112 {offsets = [0, 0], sizes = [40, 128], strides = [1, 1]} : vector<40x384xf32> to vector<40x128xf32>
    %114 = vector.extract_strided_slice %0 {offsets = [10, 0], sizes = [1, 128], strides = [1, 1]} : vector<24x128xf32> to vector<1x128xf32>
    %115 = vector.broadcast %114 : vector<1x128xf32> to vector<40x128xf32>
    %116 = arith.addf %113, %115 : vector<40x128xf32>
    %117 = arith.truncf %116 : vector<40x128xf32> to vector<40x128xbf16>
    %118 = vector.extract_strided_slice %112 {offsets = [0, 128], sizes = [40, 128], strides = [1, 1]} : vector<40x384xf32> to vector<40x128xf32>
    %119 = vector.extract_strided_slice %0 {offsets = [11, 0], sizes = [1, 128], strides = [1, 1]} : vector<24x128xf32> to vector<1x128xf32>
    %120 = vector.broadcast %119 : vector<1x128xf32> to vector<40x128xf32>
    %121 = arith.addf %118, %120 : vector<40x128xf32>
    %122 = arith.truncf %121 : vector<40x128xf32> to vector<40x128xbf16>
    %123 = vector.extract_strided_slice %112 {offsets = [0, 256], sizes = [40, 128], strides = [1, 1]} : vector<40x384xf32> to vector<40x128xf32>
    %124 = vector.extract_strided_slice %0 {offsets = [12, 0], sizes = [1, 128], strides = [1, 1]} : vector<24x128xf32> to vector<1x128xf32>
    %125 = vector.broadcast %124 : vector<1x128xf32> to vector<40x128xf32>
    %126 = arith.addf %123, %125 : vector<40x128xf32>
    %127 = arith.truncf %126 : vector<40x128xf32> to vector<40x128xbf16>
    %cst_34 = arith.constant dense<0.000000e+00> : vector<40x40xf32>
    %128 = tpu.matmul %117, %122, %cst_34 {dimension_numbers = #tpu.dot_dimension_numbers<[1], [1], [0], [0], [0, 0, 1, 0], [], []>} : vector<40x128xbf16>, vector<40x128xbf16>, vector<40x40xf32> -> vector<40x40xf32>
    %cst_35 = arith.constant 0.0883883461 : f32
    %129 = vector.broadcast %cst_35 : f32 to vector<40x40xf32>
    %130 = arith.mulf %128, %129 : vector<40x40xf32>
    %131 = vector.broadcast %78 : vector<1x40xf32> to vector<40x40xf32>
    %132 = arith.addf %130, %131 : vector<40x40xf32>
    %cst_36 = arith.constant dense<0xFF800000> : vector<40xf32>
    %133 = vector.multi_reduction <maximumf>, %132, %cst_36 [1] : vector<40x40xf32> to vector<40xf32>
    %134 = vector.shape_cast %133 : vector<40xf32> to vector<40x1xf32>
    %135 = vector.broadcast %134 : vector<40x1xf32> to vector<40x40xf32>
    %136 = arith.subf %132, %135 : vector<40x40xf32>
    %137 = math.exp %136 : vector<40x40xf32>
    %cst_37 = arith.constant dense<0.000000e+00> : vector<40xf32>
    %138 = vector.multi_reduction <add>, %137, %cst_37 [1] : vector<40x40xf32> to vector<40xf32>
    %139 = vector.shape_cast %138 : vector<40xf32> to vector<40x1xf32>
    %140 = tpu.reciprocal %139 {approx = true} : vector<40x1xf32> -> vector<40x1xf32>
    %141 = vector.broadcast %140 : vector<40x1xf32> to vector<40x40xf32>
    %142 = arith.mulf %137, %141 : vector<40x40xf32>
    %143 = arith.truncf %142 : vector<40x40xf32> to vector<40x40xbf16>
    %cst_38 = arith.constant dense<0.000000e+00> : vector<40x128xf32>
    %144 = tpu.matmul %143, %127, %cst_38 {dimension_numbers = #tpu.dot_dimension_numbers<[1], [0], [0], [1], [0, 0, 1, 1], [], []>} : vector<40x40xbf16>, vector<40x128xbf16>, vector<40x128xf32> -> vector<40x128xf32>
    %145 = vector.extract_strided_slice %76 {offsets = [80, 0], sizes = [40, 384], strides = [1, 1]} : vector<160x384xf32> to vector<40x384xf32>
    %146 = vector.extract_strided_slice %145 {offsets = [0, 0], sizes = [40, 128], strides = [1, 1]} : vector<40x384xf32> to vector<40x128xf32>
    %147 = vector.extract_strided_slice %0 {offsets = [10, 0], sizes = [1, 128], strides = [1, 1]} : vector<24x128xf32> to vector<1x128xf32>
    %148 = vector.broadcast %147 : vector<1x128xf32> to vector<40x128xf32>
    %149 = arith.addf %146, %148 : vector<40x128xf32>
    %150 = arith.truncf %149 : vector<40x128xf32> to vector<40x128xbf16>
    %151 = vector.extract_strided_slice %145 {offsets = [0, 128], sizes = [40, 128], strides = [1, 1]} : vector<40x384xf32> to vector<40x128xf32>
    %152 = vector.extract_strided_slice %0 {offsets = [11, 0], sizes = [1, 128], strides = [1, 1]} : vector<24x128xf32> to vector<1x128xf32>
    %153 = vector.broadcast %152 : vector<1x128xf32> to vector<40x128xf32>
    %154 = arith.addf %151, %153 : vector<40x128xf32>
    %155 = arith.truncf %154 : vector<40x128xf32> to vector<40x128xbf16>
    %156 = vector.extract_strided_slice %145 {offsets = [0, 256], sizes = [40, 128], strides = [1, 1]} : vector<40x384xf32> to vector<40x128xf32>
    %157 = vector.extract_strided_slice %0 {offsets = [12, 0], sizes = [1, 128], strides = [1, 1]} : vector<24x128xf32> to vector<1x128xf32>
    %158 = vector.broadcast %157 : vector<1x128xf32> to vector<40x128xf32>
    %159 = arith.addf %156, %158 : vector<40x128xf32>
    %160 = arith.truncf %159 : vector<40x128xf32> to vector<40x128xbf16>
    %cst_39 = arith.constant dense<0.000000e+00> : vector<40x40xf32>
    %161 = tpu.matmul %150, %155, %cst_39 {dimension_numbers = #tpu.dot_dimension_numbers<[1], [1], [0], [0], [0, 0, 1, 0], [], []>} : vector<40x128xbf16>, vector<40x128xbf16>, vector<40x40xf32> -> vector<40x40xf32>
    %cst_40 = arith.constant 0.0883883461 : f32
    %162 = vector.broadcast %cst_40 : f32 to vector<40x40xf32>
    %163 = arith.mulf %161, %162 : vector<40x40xf32>
    %164 = vector.broadcast %78 : vector<1x40xf32> to vector<40x40xf32>
    %165 = arith.addf %163, %164 : vector<40x40xf32>
    %cst_41 = arith.constant dense<0xFF800000> : vector<40xf32>
    %166 = vector.multi_reduction <maximumf>, %165, %cst_41 [1] : vector<40x40xf32> to vector<40xf32>
    %167 = vector.shape_cast %166 : vector<40xf32> to vector<40x1xf32>
    %168 = vector.broadcast %167 : vector<40x1xf32> to vector<40x40xf32>
    %169 = arith.subf %165, %168 : vector<40x40xf32>
    %170 = math.exp %169 : vector<40x40xf32>
    %cst_42 = arith.constant dense<0.000000e+00> : vector<40xf32>
    %171 = vector.multi_reduction <add>, %170, %cst_42 [1] : vector<40x40xf32> to vector<40xf32>
    %172 = vector.shape_cast %171 : vector<40xf32> to vector<40x1xf32>
    %173 = tpu.reciprocal %172 {approx = true} : vector<40x1xf32> -> vector<40x1xf32>
    %174 = vector.broadcast %173 : vector<40x1xf32> to vector<40x40xf32>
    %175 = arith.mulf %170, %174 : vector<40x40xf32>
    %176 = arith.truncf %175 : vector<40x40xf32> to vector<40x40xbf16>
    %cst_43 = arith.constant dense<0.000000e+00> : vector<40x128xf32>
    %177 = tpu.matmul %176, %160, %cst_43 {dimension_numbers = #tpu.dot_dimension_numbers<[1], [0], [0], [1], [0, 0, 1, 1], [], []>} : vector<40x40xbf16>, vector<40x128xbf16>, vector<40x128xf32> -> vector<40x128xf32>
    %178 = vector.extract_strided_slice %76 {offsets = [120, 0], sizes = [40, 384], strides = [1, 1]} : vector<160x384xf32> to vector<40x384xf32>
    %179 = vector.extract_strided_slice %178 {offsets = [0, 0], sizes = [40, 128], strides = [1, 1]} : vector<40x384xf32> to vector<40x128xf32>
    %180 = vector.extract_strided_slice %0 {offsets = [10, 0], sizes = [1, 128], strides = [1, 1]} : vector<24x128xf32> to vector<1x128xf32>
    %181 = vector.broadcast %180 : vector<1x128xf32> to vector<40x128xf32>
    %182 = arith.addf %179, %181 : vector<40x128xf32>
    %183 = arith.truncf %182 : vector<40x128xf32> to vector<40x128xbf16>
    %184 = vector.extract_strided_slice %178 {offsets = [0, 128], sizes = [40, 128], strides = [1, 1]} : vector<40x384xf32> to vector<40x128xf32>
    %185 = vector.extract_strided_slice %0 {offsets = [11, 0], sizes = [1, 128], strides = [1, 1]} : vector<24x128xf32> to vector<1x128xf32>
    %186 = vector.broadcast %185 : vector<1x128xf32> to vector<40x128xf32>
    %187 = arith.addf %184, %186 : vector<40x128xf32>
    %188 = arith.truncf %187 : vector<40x128xf32> to vector<40x128xbf16>
    %189 = vector.extract_strided_slice %178 {offsets = [0, 256], sizes = [40, 128], strides = [1, 1]} : vector<40x384xf32> to vector<40x128xf32>
    %190 = vector.extract_strided_slice %0 {offsets = [12, 0], sizes = [1, 128], strides = [1, 1]} : vector<24x128xf32> to vector<1x128xf32>
    %191 = vector.broadcast %190 : vector<1x128xf32> to vector<40x128xf32>
    %192 = arith.addf %189, %191 : vector<40x128xf32>
    %193 = arith.truncf %192 : vector<40x128xf32> to vector<40x128xbf16>
    %cst_44 = arith.constant dense<0.000000e+00> : vector<40x40xf32>
    %194 = tpu.matmul %183, %188, %cst_44 {dimension_numbers = #tpu.dot_dimension_numbers<[1], [1], [0], [0], [0, 0, 1, 0], [], []>} : vector<40x128xbf16>, vector<40x128xbf16>, vector<40x40xf32> -> vector<40x40xf32>
    %cst_45 = arith.constant 0.0883883461 : f32
    %195 = vector.broadcast %cst_45 : f32 to vector<40x40xf32>
    %196 = arith.mulf %194, %195 : vector<40x40xf32>
    %197 = vector.broadcast %78 : vector<1x40xf32> to vector<40x40xf32>
    %198 = arith.addf %196, %197 : vector<40x40xf32>
    %cst_46 = arith.constant dense<0xFF800000> : vector<40xf32>
    %199 = vector.multi_reduction <maximumf>, %198, %cst_46 [1] : vector<40x40xf32> to vector<40xf32>
    %200 = vector.shape_cast %199 : vector<40xf32> to vector<40x1xf32>
    %201 = vector.broadcast %200 : vector<40x1xf32> to vector<40x40xf32>
    %202 = arith.subf %198, %201 : vector<40x40xf32>
    %203 = math.exp %202 : vector<40x40xf32>
    %cst_47 = arith.constant dense<0.000000e+00> : vector<40xf32>
    %204 = vector.multi_reduction <add>, %203, %cst_47 [1] : vector<40x40xf32> to vector<40xf32>
    %205 = vector.shape_cast %204 : vector<40xf32> to vector<40x1xf32>
    %206 = tpu.reciprocal %205 {approx = true} : vector<40x1xf32> -> vector<40x1xf32>
    %207 = vector.broadcast %206 : vector<40x1xf32> to vector<40x40xf32>
    %208 = arith.mulf %203, %207 : vector<40x40xf32>
    %209 = arith.truncf %208 : vector<40x40xf32> to vector<40x40xbf16>
    %cst_48 = arith.constant dense<0.000000e+00> : vector<40x128xf32>
    %210 = tpu.matmul %209, %193, %cst_48 {dimension_numbers = #tpu.dot_dimension_numbers<[1], [0], [0], [1], [0, 0, 1, 1], [], []>} : vector<40x40xbf16>, vector<40x128xbf16>, vector<40x128xf32> -> vector<40x128xf32>
    %211 = tpu.concatenate %111, %144, %177, %210 in 0 : vector<40x128xf32>, vector<40x128xf32>, vector<40x128xf32>, vector<40x128xf32> -> vector<160x128xf32>
    %212 = arith.truncf %211 : vector<160x128xf32> to vector<160x128xbf16>
    %c0_49 = arith.constant 0 : index
    %c0_50 = arith.constant 0 : index
    %213 = vector.load %arg8[%c0_49, %c0_50] : memref<128x128xbf16, #tpu.memory_space<vmem>>, vector<128x128xbf16>
    %cst_51 = arith.constant dense<0.000000e+00> : vector<160x128xf32>
    %214 = tpu.matmul %212, %213, %cst_51 {dimension_numbers = #tpu.dot_dimension_numbers<[1], [0], [0], [1], [0, 0, 1, 1], [], []>} : vector<160x128xbf16>, vector<128x128xbf16>, vector<160x128xf32> -> vector<160x128xf32>
    %215 = arith.addf %49, %214 : vector<160x128xf32>
    %216 = vector.extract_strided_slice %0 {offsets = [6, 0], sizes = [1, 128], strides = [1, 1]} : vector<24x128xf32> to vector<1x128xf32>
    %217 = vector.broadcast %216 : vector<1x128xf32> to vector<160x128xf32>
    %218 = arith.addf %215, %217 : vector<160x128xf32>
    %219 = vector.extract_strided_slice %0 {offsets = [2, 0], sizes = [1, 128], strides = [1, 1]} : vector<24x128xf32> to vector<1x128xf32>
    %220 = vector.extract_strided_slice %0 {offsets = [3, 0], sizes = [1, 128], strides = [1, 1]} : vector<24x128xf32> to vector<1x128xf32>
    %cst_52 = arith.constant dense<0.000000e+00> : vector<160xf32>
    %221 = vector.multi_reduction <add>, %218, %cst_52 [1] : vector<160x128xf32> to vector<160xf32>
    %222 = vector.shape_cast %221 : vector<160xf32> to vector<160x1xf32>
    %cst_53 = arith.constant 1.280000e+02 : f32
    %223 = vector.broadcast %cst_53 : f32 to vector<160x1xf32>
    %224 = arith.divf %222, %223 : vector<160x1xf32>
    %225 = vector.broadcast %224 : vector<160x1xf32> to vector<160x128xf32>
    %226 = arith.subf %218, %225 : vector<160x128xf32>
    %227 = arith.mulf %226, %226 : vector<160x128xf32>
    %cst_54 = arith.constant dense<0.000000e+00> : vector<160xf32>
    %228 = vector.multi_reduction <add>, %227, %cst_54 [1] : vector<160x128xf32> to vector<160xf32>
    %229 = vector.shape_cast %228 : vector<160xf32> to vector<160x1xf32>
    %cst_55 = arith.constant 1.280000e+02 : f32
    %230 = vector.broadcast %cst_55 : f32 to vector<160x1xf32>
    %231 = arith.divf %229, %230 : vector<160x1xf32>
    %232 = vector.broadcast %224 : vector<160x1xf32> to vector<160x128xf32>
    %233 = arith.subf %218, %232 : vector<160x128xf32>
    %cst_56 = arith.constant 9.99999997E-7 : f32
    %234 = vector.broadcast %cst_56 : f32 to vector<160x1xf32>
    %235 = arith.addf %231, %234 : vector<160x1xf32>
    %236 = math.rsqrt %235 : vector<160x1xf32>
    %237 = vector.broadcast %236 : vector<160x1xf32> to vector<160x128xf32>
    %238 = arith.mulf %233, %237 : vector<160x128xf32>
    %239 = vector.broadcast %219 : vector<1x128xf32> to vector<160x128xf32>
    %240 = arith.mulf %238, %239 : vector<160x128xf32>
    %241 = vector.broadcast %220 : vector<1x128xf32> to vector<160x128xf32>
    %242 = arith.addf %240, %241 : vector<160x128xf32>
    %243 = arith.truncf %242 : vector<160x128xf32> to vector<160x128xbf16>
    %244 = vector.extract_strided_slice %0 {offsets = [13, 0], sizes = [1, 128], strides = [1, 1]} : vector<24x128xf32> to vector<1x128xf32>
    %245 = vector.extract_strided_slice %0 {offsets = [14, 0], sizes = [1, 128], strides = [1, 1]} : vector<24x128xf32> to vector<1x128xf32>
    %246 = vector.extract_strided_slice %0 {offsets = [15, 0], sizes = [1, 128], strides = [1, 1]} : vector<24x128xf32> to vector<1x128xf32>
    %247 = vector.extract_strided_slice %0 {offsets = [16, 0], sizes = [1, 128], strides = [1, 1]} : vector<24x128xf32> to vector<1x128xf32>
    %248 = tpu.concatenate %244, %245, %246, %247 in 1 : vector<1x128xf32>, vector<1x128xf32>, vector<1x128xf32>, vector<1x128xf32> -> vector<1x512xf32>
    %c0_57 = arith.constant 0 : index
    %c0_58 = arith.constant 0 : index
    %249 = vector.load %arg9[%c0_57, %c0_58] : memref<128x512xbf16, #tpu.memory_space<vmem>>, vector<128x512xbf16>
    %cst_59 = arith.constant dense<0.000000e+00> : vector<160x512xf32>
    %250 = tpu.matmul %243, %249, %cst_59 {dimension_numbers = #tpu.dot_dimension_numbers<[1], [0], [0], [1], [0, 0, 1, 1], [], []>} : vector<160x128xbf16>, vector<128x512xbf16>, vector<160x512xf32> -> vector<160x512xf32>
    %251 = vector.broadcast %248 : vector<1x512xf32> to vector<160x512xf32>
    %252 = arith.addf %250, %251 : vector<160x512xf32>
    %253 = arith.truncf %252 : vector<160x512xf32> to vector<160x512xbf16>
    %cst_60 = arith.constant 5.000000e-01 : bf16
    %254 = vector.broadcast %cst_60 : bf16 to vector<160x512xbf16>
    %255 = arith.mulf %254, %253 : vector<160x512xbf16>
    %cst_61 = arith.constant 4.467770e-02 : bf16
    %256 = vector.broadcast %cst_61 : bf16 to vector<160x512xbf16>
    %257 = arith.mulf %256, %253 : vector<160x512xbf16>
    %258 = arith.mulf %257, %253 : vector<160x512xbf16>
    %259 = arith.mulf %258, %253 : vector<160x512xbf16>
    %260 = arith.addf %253, %259 : vector<160x512xbf16>
    %cst_62 = arith.constant 7.968750e-01 : bf16
    %261 = vector.broadcast %cst_62 : bf16 to vector<160x512xbf16>
    %262 = arith.mulf %261, %260 : vector<160x512xbf16>
    %263 = math.tanh %262 : vector<160x512xbf16>
    %cst_63 = arith.constant 1.000000e+00 : bf16
    %264 = vector.broadcast %cst_63 : bf16 to vector<160x512xbf16>
    %265 = arith.addf %264, %263 : vector<160x512xbf16>
    %266 = arith.mulf %255, %265 : vector<160x512xbf16>
    %c0_64 = arith.constant 0 : index
    %c0_65 = arith.constant 0 : index
    %267 = vector.load %arg10[%c0_64, %c0_65] : memref<512x128xbf16, #tpu.memory_space<vmem>>, vector<512x128xbf16>
    %cst_66 = arith.constant dense<0.000000e+00> : vector<160x128xf32>
    %268 = tpu.matmul %266, %267, %cst_66 {dimension_numbers = #tpu.dot_dimension_numbers<[1], [0], [0], [1], [0, 0, 1, 1], [], []>} : vector<160x512xbf16>, vector<512x128xbf16>, vector<160x128xf32> -> vector<160x128xf32>
    %269 = arith.addf %218, %268 : vector<160x128xf32>
    %270 = vector.extract_strided_slice %0 {offsets = [7, 0], sizes = [1, 128], strides = [1, 1]} : vector<24x128xf32> to vector<1x128xf32>
    %271 = vector.broadcast %270 : vector<1x128xf32> to vector<160x128xf32>
    %272 = arith.addf %269, %271 : vector<160x128xf32>
    %c0_67 = arith.constant 0 : index
    %c0_68 = arith.constant 0 : index
    %273 = vector.load %arg12[%c0_67, %c0_68] : memref<4x160xf32, #tpu.memory_space<vmem>>, vector<4x160xf32>
    %cst_69 = arith.constant dense<0.000000e+00> : vector<4x128xf32>
    %274 = tpu.matmul %273, %272, %cst_69 {dimension_numbers = #tpu.dot_dimension_numbers<[1], [0], [0], [1], [0, 0, 1, 1], [], []>} : vector<4x160xf32>, vector<160x128xf32>, vector<4x128xf32> -> vector<4x128xf32>
    %275 = vector.extract_strided_slice %0 {offsets = [4, 0], sizes = [1, 128], strides = [1, 1]} : vector<24x128xf32> to vector<1x128xf32>
    %276 = vector.extract_strided_slice %0 {offsets = [5, 0], sizes = [1, 128], strides = [1, 1]} : vector<24x128xf32> to vector<1x128xf32>
    %cst_70 = arith.constant dense<0.000000e+00> : vector<4xf32>
    %277 = vector.multi_reduction <add>, %274, %cst_70 [1] : vector<4x128xf32> to vector<4xf32>
    %278 = vector.shape_cast %277 : vector<4xf32> to vector<4x1xf32>
    %cst_71 = arith.constant 1.280000e+02 : f32
    %279 = vector.broadcast %cst_71 : f32 to vector<4x1xf32>
    %280 = arith.divf %278, %279 : vector<4x1xf32>
    %281 = vector.broadcast %280 : vector<4x1xf32> to vector<4x128xf32>
    %282 = arith.subf %274, %281 : vector<4x128xf32>
    %283 = arith.mulf %282, %282 : vector<4x128xf32>
    %cst_72 = arith.constant dense<0.000000e+00> : vector<4xf32>
    %284 = vector.multi_reduction <add>, %283, %cst_72 [1] : vector<4x128xf32> to vector<4xf32>
    %285 = vector.shape_cast %284 : vector<4xf32> to vector<4x1xf32>
    %cst_73 = arith.constant 1.280000e+02 : f32
    %286 = vector.broadcast %cst_73 : f32 to vector<4x1xf32>
    %287 = arith.divf %285, %286 : vector<4x1xf32>
    %288 = vector.broadcast %280 : vector<4x1xf32> to vector<4x128xf32>
    %289 = arith.subf %274, %288 : vector<4x128xf32>
    %cst_74 = arith.constant 9.99999997E-7 : f32
    %290 = vector.broadcast %cst_74 : f32 to vector<4x1xf32>
    %291 = arith.addf %287, %290 : vector<4x1xf32>
    %292 = math.rsqrt %291 : vector<4x1xf32>
    %293 = vector.broadcast %292 : vector<4x1xf32> to vector<4x128xf32>
    %294 = arith.mulf %289, %293 : vector<4x128xf32>
    %295 = vector.broadcast %275 : vector<1x128xf32> to vector<4x128xf32>
    %296 = arith.mulf %294, %295 : vector<4x128xf32>
    %297 = vector.broadcast %276 : vector<1x128xf32> to vector<4x128xf32>
    %298 = arith.addf %296, %297 : vector<4x128xf32>
    %299 = tpu.concatenate %298, %34 in 1 : vector<4x128xf32>, vector<4x128xf32> -> vector<4x256xf32>
    %300 = arith.truncf %299 : vector<4x256xf32> to vector<4x256xbf16>
    %301 = vector.extract_strided_slice %0 {offsets = [17, 0], sizes = [1, 128], strides = [1, 1]} : vector<24x128xf32> to vector<1x128xf32>
    %302 = vector.extract_strided_slice %0 {offsets = [18, 0], sizes = [1, 128], strides = [1, 1]} : vector<24x128xf32> to vector<1x128xf32>
    %303 = tpu.concatenate %301, %302 in 1 : vector<1x128xf32>, vector<1x128xf32> -> vector<1x256xf32>
    %c0_75 = arith.constant 0 : index
    %c0_76 = arith.constant 0 : index
    %304 = vector.load %arg13[%c0_75, %c0_76] : memref<256x256xbf16, #tpu.memory_space<vmem>>, vector<256x256xbf16>
    %cst_77 = arith.constant dense<0.000000e+00> : vector<4x256xf32>
    %305 = tpu.matmul %300, %304, %cst_77 {dimension_numbers = #tpu.dot_dimension_numbers<[1], [0], [0], [1], [0, 0, 1, 1], [], []>} : vector<4x256xbf16>, vector<256x256xbf16>, vector<4x256xf32> -> vector<4x256xf32>
    %306 = vector.broadcast %303 : vector<1x256xf32> to vector<4x256xf32>
    %307 = arith.addf %305, %306 : vector<4x256xf32>
    %cst_78 = arith.constant 0.000000e+00 : f32
    %308 = vector.broadcast %cst_78 : f32 to vector<4x256xf32>
    %309 = arith.maximumf %307, %308 : vector<4x256xf32>
    %310 = arith.truncf %309 : vector<4x256xf32> to vector<4x256xbf16>
    %c0_79 = arith.constant 0 : index
    %c0_80 = arith.constant 0 : index
    %311 = vector.load %arg14[%c0_79, %c0_80] : memref<256x128xbf16, #tpu.memory_space<vmem>>, vector<256x128xbf16>
    %cst_81 = arith.constant dense<0.000000e+00> : vector<4x128xf32>
    %312 = tpu.matmul %310, %311, %cst_81 {dimension_numbers = #tpu.dot_dimension_numbers<[1], [0], [0], [1], [0, 0, 1, 1], [], []>} : vector<4x256xbf16>, vector<256x128xbf16>, vector<4x128xf32> -> vector<4x128xf32>
    %313 = vector.extract_strided_slice %0 {offsets = [19, 0], sizes = [1, 128], strides = [1, 1]} : vector<24x128xf32> to vector<1x128xf32>
    %314 = vector.broadcast %313 : vector<1x128xf32> to vector<4x128xf32>
    %315 = arith.addf %312, %314 : vector<4x128xf32>
    %c0_82 = arith.constant 0 : index
    %c0_83 = arith.constant 0 : index
    %316 = vector.load %arg15[%c0_82, %c0_83] : memref<4x128xf32, #tpu.memory_space<vmem>>, vector<4x128xf32>
    tpu.vector_store %arg15[%c0_82, %c0_83], %315 {strides = array<i32>} : memref<4x128xf32, #tpu.memory_space<vmem>>, vector<4x128xf32>,
    return
  }
  func.func @transform_0(%arg0: i32) -> (i32, i32) {
    %c0_i32 = arith.constant 0 : i32
    %c0_i32_0 = arith.constant 0 : i32
    return %arg0, %c0_i32 : i32, i32
  }
  func.func @transform_1(%arg0: i32) -> (i32, i32) {
    %c0_i32 = arith.constant 0 : i32
    %c0_i32_0 = arith.constant 0 : i32
    return %arg0, %c0_i32 : i32, i32
  }
  func.func @transform_2(%arg0: i32) -> (i32, i32) {
    %c0_i32 = arith.constant 0 : i32
    %c0_i32_0 = arith.constant 0 : i32
    %c0_i32_1 = arith.constant 0 : i32
    return %c0_i32, %c0_i32_0 : i32, i32
  }
  func.func @transform_3(%arg0: i32) -> (i32, i32) {
    %c0_i32 = arith.constant 0 : i32
    %c0_i32_0 = arith.constant 0 : i32
    %c0_i32_1 = arith.constant 0 : i32
    return %c0_i32, %c0_i32_0 : i32, i32
  }
  func.func @transform_4(%arg0: i32) -> (i32, i32) {
    %c0_i32 = arith.constant 0 : i32
    %c0_i32_0 = arith.constant 0 : i32
    %c0_i32_1 = arith.constant 0 : i32
    return %c0_i32, %c0_i32_0 : i32, i32
  }
  func.func @transform_5(%arg0: i32) -> (i32, i32) {
    %c0_i32 = arith.constant 0 : i32
    %c0_i32_0 = arith.constant 0 : i32
    %c0_i32_1 = arith.constant 0 : i32
    return %c0_i32, %c0_i32_0 : i32, i32
  }
  func.func @transform_6(%arg0: i32) -> (i32, i32) {
    %c0_i32 = arith.constant 0 : i32
    %c0_i32_0 = arith.constant 0 : i32
    %c0_i32_1 = arith.constant 0 : i32
    return %c0_i32, %c0_i32_0 : i32, i32
  }
  func.func @transform_7(%arg0: i32) -> (i32, i32) {
    %c0_i32 = arith.constant 0 : i32
    %c0_i32_0 = arith.constant 0 : i32
    %c0_i32_1 = arith.constant 0 : i32
    return %c0_i32, %c0_i32_0 : i32, i32
  }
  func.func @transform_8(%arg0: i32) -> (i32, i32) {
    %c0_i32 = arith.constant 0 : i32
    %c0_i32_0 = arith.constant 0 : i32
    %c0_i32_1 = arith.constant 0 : i32
    return %c0_i32, %c0_i32_0 : i32, i32
  }
  func.func @transform_9(%arg0: i32) -> (i32, i32) {
    %c0_i32 = arith.constant 0 : i32
    %c0_i32_0 = arith.constant 0 : i32
    %c0_i32_1 = arith.constant 0 : i32
    return %c0_i32, %c0_i32_0 : i32, i32
  }
  func.func @transform_10(%arg0: i32) -> (i32, i32) {
    %c0_i32 = arith.constant 0 : i32
    %c0_i32_0 = arith.constant 0 : i32
    %c0_i32_1 = arith.constant 0 : i32
    return %c0_i32, %c0_i32_0 : i32, i32
  }
  func.func @transform_11(%arg0: i32) -> (i32, i32) {
    %c0_i32 = arith.constant 0 : i32
    %c0_i32_0 = arith.constant 0 : i32
    %c0_i32_1 = arith.constant 0 : i32
    return %c0_i32, %c0_i32_0 : i32, i32
  }
  func.func @transform_12(%arg0: i32) -> (i32, i32) {
    %c0_i32 = arith.constant 0 : i32
    %c0_i32_0 = arith.constant 0 : i32
    %c0_i32_1 = arith.constant 0 : i32
    return %c0_i32, %c0_i32_0 : i32, i32
  }
  func.func @transform_13(%arg0: i32) -> (i32, i32) {
    %c0_i32 = arith.constant 0 : i32
    %c0_i32_0 = arith.constant 0 : i32
    %c0_i32_1 = arith.constant 0 : i32
    return %c0_i32, %c0_i32_0 : i32, i32
  }
  func.func @transform_14(%arg0: i32) -> (i32, i32) {
    %c0_i32 = arith.constant 0 : i32
    %c0_i32_0 = arith.constant 0 : i32
    return %arg0, %c0_i32 : i32, i32
  }
}

</mosaic_0001>

<bundles_post_ra>
// kernel: forward.1
= control target key start
LH: loop header
LB: loop body
LE: loop exit
PB: predicated region body
PF: predicated region fallthrough
CT: control target
= control target key end

     0   :  { %vm61_vm0 = vcmask 64512   ;;  %s12208_s0 = inlined_call_operand.vmem [shape: f32[32,8], index: 0, kind: input, shape index: {}]   ;;  %s12209_s1 = inlined_call_operand.vmem [shape: bf16[128,768], index: 1, kind: input, shape index: {}]   ;;  %s12210_s2 = inlined_call_operand.vmem [shape: f32[40,128], index: 2, kind: input, shape index: {}]   ;;  %s12211_s3 = inlined_call_operand.vmem [shape: f32[4,32], index: 3, kind: input, shape index: {}]   ;;  %s12212_s4 = inlined_call_operand.vmem [shape: bf16[768,128], index: 4, kind: input, shape index: {}]   ;;  %s12213_s5 = inlined_call_operand.vmem [shape: f32[40,128], index: 5, kind: input, shape index: {}]   ;;  %s12214_s6 = inlined_call_operand.vmem [shape: bf16[128,384], index: 6, kind: input, shape index: {}]   ;;  %s12215_s7 = inlined_call_operand.vmem [shape: bf16[128,128], index: 7, kind: input, shape index: {}]   ;;  %s12216_s8 = inlined_call_operand.vmem [shape: bf16[128,512], index: 8, kind: input, shape index: {}]   ;;  %s12217_s9 = inlined_call_operand.vmem [shape: bf16[512,128], index: 9, kind: input, shape index: {}]   ;;  %s12218_s10 = inlined_call_operand.vmem [shape: f32[24,128], index: 10, kind: input, shape index: {}]   ;;  %s12219_s11 = inlined_call_operand.vmem [shape: f32[4,160], index: 11, kind: input, shape index: {}]   ;;  %s12220_s12 = inlined_call_operand.vmem [shape: bf16[256,256], index: 12, kind: input, shape index: {}]   ;;  %s12221_s13 = inlined_call_operand.vmem [shape: bf16[256,128], index: 13, kind: input, shape index: {}]   ;;  %s12222_s14 = inlined_call_operand.hbm [shape: f32[4,128], index: 14, kind: output, shape index: {}]  }
   0x1   :  { %v52_v0 = vld [vmem:[%s12210_s2] sm:$0xff] }
   0x2   :  { %v57_v1 = vld [vmem:[%s12208_s0] sm:$0xff]  ;;  %89 = vmatpush.msra.mxu0 %v52_v0 }
   0x3   :  { %6484 = vmatmul.msk.f32.vlgmr.msra.gmra.mxu0 %vm61_vm0, %v57_v1 }
   0x4   :  { %19 = vsyncpa [#allocation3], 0  ;;  %v58_v2 = vld [vmem:[%s12208_s0 + $0x8] sm:$0xff]  ;;  %v59_v3 = vld [vmem:[%s12208_s0 + $0x10] sm:$0xff]  ;;  %v8079_v17 = vmov 128.0   ;;  %vm205_vm14 = vcmask 261120  }
   0x5   :  { %v60_v4 = vld [vmem:[%s12208_s0 + $0x18] sm:$0xff]  ;;  %v54_v6 = vld [vmem:[%s12210_s2 + $0x10] sm:$0xff]  ;;  %v53_v9 = vld [vmem:[%s12210_s2 + $0x8] sm:$0xff]  ;;  %7720 = vrcp.f32 %v8079_v17  ;;  %s6475_s29 = sshll.u32 %s12222_s14, 4  ;;  %s6476_s29 = int_to_ptr.hbm [resolvable:$true] %s6475_s29 }
   0x6   :  { %v56_v12 = vld [vmem:[%s12210_s2 + $0x20] sm:$0xff]  ;;  %v55_v15 = vld [vmem:[%s12210_s2 + $0x18] sm:$0xff]  ;;  %v7516_v21 = vld [vmem:[%s12212_s4 + $0x30] sm:$0xff] }
   0x7   :  { %v7517_v18 = vld [vmem:[%s12212_s4 + $0x38] sm:$0xff]  ;;  %v7515_v22 = vld [vmem:[%s12212_s4 + $0x28] sm:$0xff]  ;;  %v7514_v25 = vld [vmem:[%s12212_s4 + $0x20] sm:$0xff] }
   0x8   :  { %901 = vmatpush.bf16.msra.mxu2 %v7517_v18  ;;  %v7513_v27 = vld [vmem:[%s12212_s4 + $0x18] sm:$0xff]  ;;  %v7512_v29 = vld [vmem:[%s12212_s4 + $0x10] sm:$0xff]  ;;  %v7511_v31 = vld [vmem:[%s12212_s4 + $0x8] sm:$0xff] }
   0x9   :  { %v7510_v34 = vld [vmem:[%s12212_s4] sm:$0xff]  ;;  %v7465_v36 = vld [vmem:[%s12209_s1 + $0x14] sm:$0xf0]  ;;  %v6515_v46 = vld [vmem:[%s12209_s1 + $0x30] sm:$0xf] }
   0xa   :  { %v6491_v35 = vld [vmem:[%s12209_s1] sm:$0xf]  ;;  %v7471_v47 = vld [vmem:[%s12209_s1 + $0x44] sm:$0xf0]  ;;  %v7477_v55 = vld [vmem:[%s12209_s1 + $0x74] sm:$0xf0] }
   0xb   :  { %6485 = vmatmul.msk.f32.gmra.mxu0 %vm61_vm0, %v58_v2  ;;  %v7721_v19 = vpop.eup %7720  ;;  %v6492_v38 = vor.u32 %v7465_v36, %v6491_v35  ;;  %v6516_v49 = vor.u32 %v7471_v47, %v6515_v46  ;;  %v6539_v54 = vld [vmem:[%s12209_s1 + $0x60] sm:$0xf]  ;;  %v6563_v57 = vld [vmem:[%s12209_s1 + $0x90] sm:$0xf]  ;;  %v7483_v58 = vld [vmem:[%s12209_s1 + $0xa4] sm:$0xf0] }
   0xc   :  { %v112_v20 = vmul.f32 128.0, %v7721_v19  ;;  %902 = vmatpush.bf16.msra.mxu2 %v7516_v21  ;;  %vm116_vm1 = vweird.f32 %v7721_v19  ;;  %v6540_v56 = vor.u32 %v7477_v55, %v6539_v54  ;;  %v6564_v59 = vor.u32 %v7483_v58, %v6563_v57  ;;  %v6587_v60 = vld [vmem:[%s12209_s1 + $0xc0] sm:$0xf]  ;;  %v7489_v61 = vld [vmem:[%s12209_s1 + $0xd4] sm:$0xf0]  ;;  %v7535_v18 = vld [vmem:[%s12212_s4 + $0xc8] sm:$0xff] }
   0xd   :  { %v6588_v62 = vor.u32 %v7489_v61, %v6587_v60  ;;  %v6611_v63 = vld [vmem:[%s12209_s1 + $0xf0] sm:$0xf]  ;;  %v7495_v0 = vld [vmem:[%s12209_s1 + $0x104] sm:$0xf0]  ;;  %v6635_v2 = vld [vmem:[%s12209_s1 + $0x120] sm:$0xf] }
   0xe   :  { %v113_v23 = vsub.f32 1.0, %v112_v20  ;;  %v6612_v1 = vor.u32 %v7495_v0, %v6611_v63  ;;  %v7534_v21 = vld [vmem:[%s12212_s4 + $0xc0] sm:$0xff]  ;;  %v7549_v54 = vld [vmem:[%s12212_s4 + $0x138] sm:$0xff]  ;;  %v50_v61 = vld [vmem:[%s12218_s10 + $0x8] sm:$0xff] }
   0xf   :  { %v7533_v57 = vld [vmem:[%s12212_s4 + $0xb8] sm:$0xff]  ;;  %v7548_v0 = vld [vmem:[%s12212_s4 + $0x130] sm:$0xff] }
  0x10   :  { %903 = vmatpush.bf16.msra.mxu2 %v7515_v22  ;;  %v114_v24 = vmul.f32 %v7721_v19, %v113_v23  ;;  %v7493_v22 = vld [vmem:[%s12209_s1 + $0xfc] sm:$0xf]  ;;  %v6621_v23 = vld [vmem:[%s12209_s1 + $0x110] sm:$0xf0]  ;;  %999 = vmatpush.bf16.msrb.mxu0 %v7533_v57  ;;  %v6499_v57 = vld [vmem:[%s12209_s1 + $0x8] sm:$0xf] }
  0x12   :  { %v115_v26 = vadd.f32 %v7721_v19, %v114_v24  ;;  %v6624_v24 = vor.u32 %v7493_v22, %v6621_v23 }
  0x13   :  { %6486 = vmatmul.msk.f32.gmra.mxu0 %vm61_vm0, %v59_v3  ;;  %v7501_v3 = vld [vmem:[%s12209_s1 + $0x134] sm:$0xf0] }
  0x14   :  { %904 = vmatpush.bf16.msra.mxu2 %v7514_v25  ;;  %v8198_v28 = vsel %vm116_vm1, %v7721_v19, %v115_v26 }
  0x15   :  { %12296 = vst [vmem:[#allocation5_spill] sm:$0xff] %v8198_v28 }
  0x18   :  { %905 = vmatpush.bf16.msra.mxu2 %v7513_v27 }
  0x1b   :  { %6487 = vmatmul.msk.f32.gmra.mxu0 %vm61_vm0, %v60_v4  ;;  %v6636_v4 = vor.u32 %v7501_v3, %v6635_v2 }
  0x1c   :  { %906 = vmatpush.bf16.msra.mxu2 %v7512_v29 }
  0x20   :  { %907 = vmatpush.bf16.msra.mxu2 %v7511_v31 }
  0x24   :  { %908 = vmatpush.bf16.msra.mxu2 %v7510_v34 }
  0x27   :  { %909 = vmatmul.bf16.vlgmr.msra.gmra.mxu2 %v6492_v38 }
  0x37   :  { %914 = vmatmul.bf16.gmra.mxu2 %v6516_v49  ;;  %v6645_v49 = vld [vmem:[%s12209_s1 + $0x140] sm:$0xf0] }
  0x47   :  { %919 = vmatmul.bf16.gmra.mxu2 %v6540_v56 }
  0x57   :  { %924 = vmatmul.bf16.gmra.mxu2 %v6564_v59 }
  0x67   :  { %929 = vmatmul.bf16.gmra.mxu2 %v6588_v62 }
  0x77   :  { %934 = vmatmul.bf16.gmra.mxu2 %v6612_v1 }
  0x80   :  { %v91_v5 = vpop.f32.mrf.mxu0 }
  0x81   :  { %v92_v11 = vadd.f32 %v91_v5, %v53_v9  ;;  %v7541_v5 = vld [vmem:[%s12212_s4 + $0xf8] sm:$0xff]  ;;  %v6659_v9 = vld [vmem:[%s12209_s1 + $0x150] sm:$0xf] }
  0x82   :  { %7702 = vmatpush.bf16.msrb.mxu2 %v7541_v5  ;;  %1048 = vmatpush.bf16.msra.mxu1 %v7541_v5  ;;  %v7520_v5 = vld [vmem:[%s12212_s4 + $0x50] sm:$0xff] }
  0x87   :  { %939 = vmatmul.bf16.gmra.mxu2 %v6636_v4  ;;  %v7532_v4 = vld [vmem:[%s12212_s4 + $0xb0] sm:$0xff] }
  0x88   :  { %v94_v7 = vpop.f32.mrf.mxu0  ;;  %1000 = vmatpush.bf16.msrb.mxu0 %v7532_v4  ;;  %v7521_v4 = vld [vmem:[%s12212_s4 + $0x58] sm:$0xff] }
  0x89   :  { %v95_v8 = vadd.f32 %v94_v7, %v54_v6  ;;  %v7540_v6 = vld [vmem:[%s12212_s4 + $0xf0] sm:$0xff]  ;;  %v7539_v7 = vld [vmem:[%s12212_s4 + $0xe8] sm:$0xff] }
  0x8a   :  { %7703 = vmatpush.bf16.msrb.mxu2 %v7540_v6  ;;  %1049 = vmatpush.bf16.msra.mxu1 %v7540_v6 }
  0x8b   :  { %105 = vadd.xlane.f32.xlu1 %v95_v8 }
  0x8e   :  { %7704 = vmatpush.bf16.msrb.mxu2 %v7539_v7  ;;  %1050 = vmatpush.bf16.msra.mxu1 %v7539_v7  ;;  %v190_v7 = vperm.slane %v50_v61, 0 }
  0x90   :  { %v97_v10 = vpop.f32.mrf.mxu0 }
  0x91   :  { %v98_v16 = vadd.f32 %v97_v10, %v55_v15  ;;  %v7507_v10 = vld [vmem:[%s12209_s1 + $0x164] sm:$0xf0]  ;;  %v7536_v15 = vld [vmem:[%s12212_s4 + $0xd0] sm:$0xff] }
  0x93   :  { %103 = vadd.xlane.f32.xlu1 %v92_v11 }
  0x98   :  { %v100_v13 = vpop.f32.mrf.mxu0 }
  0x99   :  { %v101_v14 = vadd.f32 %v100_v13, %v56_v12  ;;  %v7537_v13 = vld [vmem:[%s12212_s4 + $0xd8] sm:$0xff] }
  0x9b   :  { %109 = vadd.xlane.f32.xlu0 %v101_v14 }
  0xa3   :  { %107 = vadd.xlane.f32.xlu0 %v98_v16 }
  0xfe   :  { %v106_v30 = vpop.xlane.xlu1 %105 }
  0xff   :  { %v119_v32 = vmul.f32 %v8198_v28, %v106_v30 }
 0x101   :  { %v8207_v33 = vsub.f32 %v95_v8, %v119_v32  ;;  %v7538_v8 = vld [vmem:[%s12212_s4 + $0xe0] sm:$0xff]  ;;  %v8322_v32 = vpop.f32.mrf.mxu2 }
 0x102   :  { %7705 = vmatpush.bf16.msrb.mxu2 %v7538_v8  ;;  %1051 = vmatpush.bf16.msra.mxu1 %v7538_v8 }
 0x103   :  { %v127_v37 = vmul.f32 %v8207_v33, %v8207_v33 }
 0x105   :  { %132 = vadd.xlane.f32.xlu0 %v127_v37 }
 0x106   :  { %v104_v39 = vpop.xlane.xlu1 %103  ;;  %7706 = vmatpush.bf16.msrb.mxu2 %v7537_v13  ;;  %1052 = vmatpush.bf16.msra.mxu1 %v7537_v13  ;;  %v195_v13 = vperm.slane %v50_v61, 1  ;;  %v6501_v61 = vld [vmem:[%s12209_s1 + $0x20] sm:$0xf0] }
 0x107   :  { %v118_v40 = vmul.f32 %v8198_v28, %v104_v39 }
 0x109   :  { %v8221_v41 = vsub.f32 %v92_v11, %v118_v40  ;;  %v6660_v11 = vor.u32 %v7507_v10, %v6659_v9  ;;  %v7547_v10 = vld [vmem:[%s12212_s4 + $0x128] sm:$0xff] }
 0x10a   :  { %7707 = vmatpush.bf16.msrb.mxu2 %v7536_v15  ;;  %1053 = vmatpush.bf16.msra.mxu1 %v7536_v15  ;;  %v7531_v15 = vld [vmem:[%s12212_s4 + $0xa8] sm:$0xff] }
 0x10b   :  { %v126_v42 = vmul.f32 %v8221_v41, %v8221_v41  ;;  %944 = vmatmul.bf16.gmra.mxu2 %v6660_v11  ;;  %1001 = vmatpush.bf16.msrb.mxu0 %v7531_v15  ;;  %v7469_v11 = vld [vmem:[%s12209_s1 + $0x3c] sm:$0xf]  ;;  %v7519_v15 = vld [vmem:[%s12212_s4 + $0x48] sm:$0xff] }
 0x10d   :  { %130 = vadd.xlane.f32.xlu1 %v126_v42 }
 0x10e   :  { %v110_v43 = vpop.xlane.xlu0 %109  ;;  %7708 = vmatpush.bf16.msrb.mxu2 %v7535_v18  ;;  %1054 = vmatpush.bf16.msra.mxu1 %v7535_v18 }
 0x10f   :  { %v121_v44 = vmul.f32 %v8198_v28, %v110_v43 }
 0x111   :  { %v8226_v45 = vsub.f32 %v101_v14, %v121_v44  ;;  %v8329_v44 = vpop.f32.mrf.mxu2 }
 0x112   :  { %7709 = vmatpush.bf16.msrb.mxu2 %v7534_v21  ;;  %1055 = vmatpush.bf16.msra.mxu1 %v7534_v21 }
 0x113   :  { %v129_v48 = vmul.f32 %v8226_v45, %v8226_v45 }
 0x115   :  { %136 = vadd.xlane.f32.xlu2 %v129_v48  ;;  %v7499_v48 = vld [vmem:[%s12209_s1 + $0x12c] sm:$0xf] }
 0x116   :  { %v108_v50 = vpop.xlane.xlu0 %107  ;;  %1097 = vmatpush.bf16.msra.mxu2 %v7549_v54  ;;  %v6507_v54 = vld [vmem:[%s12209_s1 + $0x10] sm:$0xf] }
 0x117   :  { %v120_v51 = vmul.f32 %v8198_v28, %v108_v50  ;;  %v6648_v50 = vor.u32 %v7499_v48, %v6645_v49  ;;  %v7524_v48 = vld [vmem:[%s12212_s4 + $0x70] sm:$0xff]  ;;  %v204_v49 = vld [vmem:[%s12211_s3] sm:$0xf] }
 0x119   :  { %v8237_v52 = vsub.f32 %v98_v16, %v120_v51  ;;  %v8348_v63 = vpop.f32.mrf.mxu2 }
 0x11a   :  { %1098 = vmatpush.bf16.msra.mxu2 %v7548_v0 }
 0x11b   :  { %v128_v53 = vmul.f32 %v8237_v52, %v8237_v52  ;;  %1081 = vmatmul.bf16.vlgmr.msrb.gmra.mxu2 %v6624_v24  ;;  %v7530_v24 = vld [vmem:[%s12212_s4 + $0xa0] sm:$0xff] }
 0x11c   :  { %1002 = vmatpush.bf16.msrb.mxu0 %v7530_v24  ;;  %v6547_v24 = vld [vmem:[%s12209_s1 + $0x68] sm:$0xf] }
 0x11d   :  { %134 = vadd.xlane.f32.xlu2 %v128_v53 }
 0x11e   :  { %1099 = vmatpush.bf16.msra.mxu2 %v7547_v10  ;;  %v7472_v10 = vld [vmem:[%s12209_s1 + $0x4c] sm:$0xf0] }
 0x12b   :  { %1086 = vmatmul.bf16.gmra.mxu2 %v6648_v50  ;;  %v7527_v50 = vld [vmem:[%s12212_s4 + $0x88] sm:$0xff] }
 0x178   :  { %v133_v12 = vpop.xlane.xlu0 %132 }
 0x179   :  { %v139_v14 = vmul.f32 %v133_v12, %v8198_v28 }
 0x17b   :  { %v8296_v16 = vadd.f32 1e-05, %v139_v14 }
 0x17d   :  { %7722 = vrsqrt.f32 %v8296_v16  ;;  %vm162_vm5 = vweird.f32 %v8296_v16 }
 0x180   :  { %v131_v17 = vpop.xlane.xlu1 %130 }
 0x181   :  { %v138_v19 = vmul.f32 %v131_v17, %v8198_v28 }
 0x183   :  { %v8303_v20 = vadd.f32 1e-05, %v138_v19  ;;  %v8315_v26 = vpop.eup %7722  ;;  %v8384_v19 = vpop.f32.mrf.mxu2 }
 0x184   :  { %v157_v31 = vmul.f32 %v8315_v26, %v8296_v16  ;;  %vm163_vm3 = vweird.f32 %v8315_v26 }
 0x185   :  { %7724 = vrsqrt.f32 %v8303_v20  ;;  %vm8361_vm8 = vmor %vm162_vm5, %vm163_vm3  ;;  %vm152_vm9 = vweird.f32 %v8303_v20 }
 0x186   :  { %v158_v35 = vmul.f32 %v8315_v26, %v157_v31 }
 0x188   :  { %v137_v25 = vpop.xlane.xlu2 %136  ;;  %v159_v42 = vmul.f32 0.5, %v158_v35 }
 0x189   :  { %v141_v27 = vmul.f32 %v137_v25, %v8198_v28  ;;  %v6669_v25 = vld [vmem:[%s12209_s1 + $0x170] sm:$0xf0] }
 0x18a   :  { %v160_v51 = vsub.f32 1.5, %v159_v42 }
 0x18b   :  { %v8318_v29 = vpop.eup %7724  ;;  %v145_v30 = vadd.f32 1e-05, %v141_v27 }
 0x18c   :  { %v147_v34 = vmul.f32 %v8318_v29, %v8303_v20  ;;  %v161_v59 = vmul.f32 %v8315_v26, %v160_v51  ;;  %vm153_vm7 = vweird.f32 %v8318_v29  ;;  %v7546_v20 = vld [vmem:[%s12212_s4 + $0x120] sm:$0xff] }
 0x18d   :  { %7726 = vrsqrt.f32 %v145_v30  ;;  %vm182_vm4 = vweird.f32 %v145_v30  ;;  %vm8373_vm10 = vmor %vm152_vm9, %vm153_vm7  ;;  %1100 = vmatpush.bf16.msra.mxu2 %v7546_v20  ;;  %v7542_v51 = vld [vmem:[%s12212_s4 + $0x100] sm:$0xff] }
 0x18e   :  { %v148_v38 = vmul.f32 %v8318_v29, %v147_v34  ;;  %v165_v9 = vsel %vm8361_vm8, %v8315_v26, %v161_v59  ;;  %v7529_v34 = vld [vmem:[%s12212_s4 + $0x98] sm:$0xff] }
 0x18f   :  { %v187_v17 = vmul.f32 %v165_v9, %v8207_v33  ;;  %v7505_v33 = vld [vmem:[%s12209_s1 + $0x15c] sm:$0xf]  ;;  %1003 = vmatpush.bf16.msrb.mxu0 %v7529_v34  ;;  %v6517_v34 = vld [vmem:[%s12209_s1 + $0x48] sm:$0xf0] }
 0x190   :  { %v135_v36 = vpop.xlane.xlu2 %134  ;;  %v149_v46 = vmul.f32 0.5, %v148_v38 }
 0x191   :  { %v140_v37 = vmul.f32 %v135_v36, %v8198_v28  ;;  %v192_v27 = vmul.f32 %v190_v7, %v187_v17  ;;  %v7462_v17 = vld [vmem:[%s12209_s1 + $0x4] sm:$0xf] }
 0x192   :  { %v150_v55 = vsub.f32 1.5, %v149_v46  ;;  %v7543_v46 = vld [vmem:[%s12212_s4 + $0x108] sm:$0xff] }
 0x193   :  { %v7727_v39 = vpop.eup %7726  ;;  %v144_v40 = vadd.f32 1e-05, %v140_v37  ;;  %v197_v36 = vadd.f32 %v195_v13, %v192_v27  ;;  %v8406_v37 = vpop.f32.mrf.mxu2  ;;  %v6549_v27 = vld [vmem:[%s12209_s1 + $0x80] sm:$0xf0] }
 0x194   :  { %v177_v43 = vmul.f32 %v7727_v39, %v145_v30  ;;  %vm183_vm2 = vweird.f32 %v7727_v39  ;;  %v151_v1 = vmul.f32 %v8318_v29, %v150_v55 }
 0x195   :  { %7728 = vrsqrt.f32 %v144_v40  ;;  %vm184_vm6 = vmor %vm182_vm4, %vm183_vm2  ;;  %vm172_vm12 = vweird.f32 %v144_v40  ;;  %v201_v42 = vmax.f32 %v197_v36, 0.0 }
 0x196   :  { %v178_v47 = vmul.f32 %v7727_v39, %v177_v43  ;;  %v155_v14 = vsel %vm8373_vm10, %v8318_v29, %v151_v1  ;;  %v6672_v29 = vor.u32 %v7505_v33, %v6669_v25  ;;  %v7525_v43 = vld [vmem:[%s12212_s4 + $0x78] sm:$0xff]  ;;  %v7523_v1 = vld [vmem:[%s12212_s4 + $0x68] sm:$0xff]  ;;  %v7478_v25 = vld [vmem:[%s12209_s1 + $0x7c] sm:$0xf0] }
 0x197   :  { %v186_v22 = vmul.f32 %v155_v14, %v8221_v41  ;;  %v7545_v41 = vld [vmem:[%s12212_s4 + $0x118] sm:$0xff] }
 0x198   :  { %v179_v53 = vmul.f32 0.5, %v178_v47  ;;  %1091 = vmatmul.bf16.gmra.mxu2 %v6672_v29 }
 0x199   :  { %v191_v31 = vmul.f32 %v190_v7, %v186_v22  ;;  %1101 = vmatpush.bf16.msra.mxu2 %v7545_v41  ;;  %v6555_v22 = vld [vmem:[%s12209_s1 + $0x70] sm:$0xf] }
 0x19a   :  { %v180_v56 = vsub.f32 1.5, %v179_v53  ;;  %v7526_v53 = vld [vmem:[%s12212_s4 + $0x80] sm:$0xff] }
 0x19b   :  { %v7729_v58 = vpop.eup %7728  ;;  %v8438_v55 = vpop.f32.mrf.mxu2 }
 0x19c   :  { %v167_v60 = vmul.f32 %v7729_v58, %v144_v40  ;;  %v181_v62 = vmul.f32 %v7727_v39, %v180_v56  ;;  %vm173_vm11 = vweird.f32 %v7729_v58  ;;  %v7528_v40 = vld [vmem:[%s12212_s4 + $0x90] sm:$0xff]  ;;  %v7467_v56 = vld [vmem:[%s12209_s1 + $0x24] sm:$0xf0] }
 0x19d   :  { %vm174_vm13 = vmor %vm172_vm12, %vm173_vm11  ;;  %1004 = vmatpush.bf16.msrb.mxu0 %v7528_v40  ;;  %v6508_v59 = vor.u32 %v7467_v56, %v6507_v54  ;;  %v6603_v56 = vld [vmem:[%s12209_s1 + $0xd0] sm:$0xf] }
 0x19e   :  { %v168_v2 = vmul.f32 %v7729_v58, %v167_v60  ;;  %v185_v3 = vsel %vm184_vm6, %v7727_v39, %v181_v62  ;;  %v196_v39 = vadd.f32 %v195_v13, %v191_v31  ;;  %v7463_v60 = vld [vmem:[%s12209_s1 + $0xc] sm:$0xf]  ;;  %v7468_v31 = vld [vmem:[%s12209_s1 + $0x34] sm:$0xf] }
 0x19f   :  { %v189_v6 = vmul.f32 %v185_v3, %v8226_v45  ;;  %v6504_v62 = vor.u32 %v7463_v60, %v6501_v61  ;;  %v6520_v36 = vor.u32 %v7468_v31, %v6517_v34  ;;  %v7490_v60 = vld [vmem:[%s12209_s1 + $0xdc] sm:$0xf0]  ;;  %v7487_v61 = vld [vmem:[%s12209_s1 + $0xcc] sm:$0xf]  ;;  %v7492_v31 = vld [vmem:[%s12209_s1 + $0xf4] sm:$0xf] }
 0x1a0   :  { %v169_v8 = vmul.f32 0.5, %v168_v2  ;;  %v200_v47 = vmax.f32 %v196_v39, 0.0  ;;  %v7522_v2 = vld [vmem:[%s12212_s4 + $0x60] sm:$0xff]  ;;  %v6571_v39 = vld [vmem:[%s12209_s1 + $0x98] sm:$0xf] }
 0x1a1   :  { %v194_v12 = vmul.f32 %v190_v7, %v189_v6  ;;  %1005 = vmatpush.bf16.msrb.mxu0 %v7527_v50  ;;  %1056 = vmatmul.bf16.vlgmr.msra.gmra.mxu1 %v6504_v62  ;;  %v6531_v6 = vld [vmem:[%s12209_s1 + $0x40] sm:$0xf]  ;;  %v7474_v50 = vld [vmem:[%s12209_s1 + $0x64] sm:$0xf]  ;;  %v6613_v34 = vld [vmem:[%s12209_s1 + $0x108] sm:$0xf0] }
 0x1a2   :  { %v170_v45 = vsub.f32 1.5, %v169_v8  ;;  %v6523_v8 = vld [vmem:[%s12209_s1 + $0x38] sm:$0xf]  ;;  %v6597_v62 = vld [vmem:[%s12209_s1 + $0xe0] sm:$0xf0] }
 0x1a3   :  { %v199_v16 = vadd.f32 %v195_v13, %v194_v12  ;;  %v8462_v3 = vpop.f32.mrf.mxu2  ;;  %v6525_v12 = vld [vmem:[%s12209_s1 + $0x50] sm:$0xf0]  ;;  %v6524_v14 = vor.u32 %v7472_v10, %v6523_v8  ;;  %v6627_v8 = vld [vmem:[%s12209_s1 + $0x100] sm:$0xf]  ;;  %v7497_v10 = vld [vmem:[%s12209_s1 + $0x114] sm:$0xf0] }
 0x1a4   :  { %v171_v18 = vmul.f32 %v7729_v58, %v170_v45  ;;  %v6528_v45 = vor.u32 %v7469_v11, %v6525_v12  ;;  %v6619_v12 = vld [vmem:[%s12209_s1 + $0xf8] sm:$0xf] }
 0x1a5   :  { %v203_v21 = vmax.f32 %v199_v16, 0.0  ;;  %1006 = vmatpush.bf16.msrb.mxu0 %v7526_v53  ;;  %v7518_v16 = vld [vmem:[%s12212_s4 + $0x40] sm:$0xff] }
 0x1a6   :  { %v175_v23 = vsel %vm174_vm13, %v7729_v58, %v171_v18  ;;  %v7466_v58 = vld [vmem:[%s12209_s1 + $0x1c] sm:$0xf0]  ;;  %v6493_v18 = vld [vmem:[%s12209_s1 + $0x18] sm:$0xf0] }
 0x1a7   :  { %221 = vmatpush.msra.mxu3 %v203_v21  ;;  %v188_v26 = vmul.f32 %v175_v23, %v8237_v52  ;;  %v7544_v52 = vld [vmem:[%s12212_s4 + $0x110] sm:$0xff]  ;;  %v6500_v0 = vor.u32 %v7466_v58, %v6499_v57  ;;  %v6496_v21 = vor.u32 %v7462_v17, %v6493_v18  ;;  %v7479_v23 = vld [vmem:[%s12209_s1 + $0x84] sm:$0xf0] }
 0x1a8   :  { %1102 = vmatpush.bf16.msra.mxu2 %v7544_v52  ;;  %v6556_v29 = vor.u32 %v7479_v23, %v6555_v22  ;;  %v6579_v52 = vld [vmem:[%s12209_s1 + $0xa0] sm:$0xf]  ;;  %v7491_v57 = vld [vmem:[%s12209_s1 + $0xe4] sm:$0xf0]  ;;  %v6651_v22 = vld [vmem:[%s12209_s1 + $0x130] sm:$0xf] }
 0x1a9   :  { %v193_v30 = vmul.f32 %v190_v7, %v188_v26  ;;  %1007 = vmatmul.bf16.vlgmr.msrb.gmra.mxu0 %v6500_v0  ;;  %v7473_v7 = vld [vmem:[%s12209_s1 + $0x54] sm:$0xf0]  ;;  %v7475_v26 = vld [vmem:[%s12209_s1 + $0x6c] sm:$0xf]  ;;  %v6595_v58 = vld [vmem:[%s12209_s1 + $0xc8] sm:$0xf]  ;;  %v6604_v0 = vor.u32 %v7491_v57, %v6603_v56 }
 0x1aa   :  { %v6552_v41 = vor.u32 %v7475_v26, %v6549_v27  ;;  %v7503_v23 = vld [vmem:[%s12209_s1 + $0x144] sm:$0xf0]  ;;  %v7502_v27 = vld [vmem:[%s12209_s1 + $0x13c] sm:$0xf0]  ;;  %v7498_v56 = vld [vmem:[%s12209_s1 + $0x124] sm:$0xf] }
 0x1ab   :  { %v198_v35 = vadd.f32 %v195_v13, %v193_v30  ;;  %v8479_v9 = vpop.f32.mrf.mxu2  ;;  %v6532_v13 = vor.u32 %v7473_v7, %v6531_v6  ;;  %v6548_v30 = vor.u32 %v7478_v25, %v6547_v24  ;;  %v7556_v25 = vld [vmem:[%s12212_s4 + $0x170] sm:$0xff]  ;;  %v6643_v26 = vld [vmem:[%s12209_s1 + $0x128] sm:$0xf]  ;;  %v6637_v57 = vld [vmem:[%s12209_s1 + $0x138] sm:$0xf0] }
 0x1ac   :  { %1103 = vmatpush.bf16.msra.mxu2 %v7543_v46  ;;  %v6573_v46 = vld [vmem:[%s12209_s1 + $0xb0] sm:$0xf0] }
 0x1ad   :  { %v202_v38 = vmax.f32 %v198_v35, 0.0 }
 0x1af   :  { %222 = vmatpush.msra.mxu3 %v202_v38  ;;  %v7485_v38 = vld [vmem:[%s12209_s1 + $0xb4] sm:$0xf0] }
 0x1b0   :  { %1104 = vmatpush.bf16.msra.mxu2 %v7542_v51  ;;  %v6541_v51 = vld [vmem:[%s12209_s1 + $0x78] sm:$0xf0] }
 0x1b1   :  { %223 = vmatpush.msra.mxu3 %v201_v42  ;;  %1061 = vmatmul.bf16.gmra.mxu1 %v6528_v45  ;;  %v7484_v42 = vld [vmem:[%s12209_s1 + $0xac] sm:$0xf0]  ;;  %v6544_v54 = vor.u32 %v7474_v50, %v6541_v51  ;;  %v6628_v45 = vor.u32 %v7497_v10, %v6627_v8  ;;  %v7464_v8 = vld [vmem:[%s12209_s1 + $0x14] sm:$0xf]  ;;  %v6509_v10 = vld [vmem:[%s12209_s1 + $0x28] sm:$0xf0] }
 0x1b3   :  { %224 = vmatpush.msra.mxu3 %v200_v47  ;;  %1105 = vmatmul.bf16.vlgmr.msra.gmra.mxu2 %v6508_v59  ;;  %v8502_v20 = vpop.f32.mrf.mxu2  ;;  %v6580_v47 = vor.u32 %v7485_v38, %v6579_v52  ;;  %v6616_v38 = vor.u32 %v7492_v31, %v6613_v34 }
 0x1b4   :  { %6488 = vmatmul.msk.f32.vlgmr.msra.gmra.mxu3 %vm205_vm14, %v204_v49  ;;  %v6572_v49 = vor.u32 %v7484_v42, %v6571_v39  ;;  %v7553_v39 = vld [vmem:[%s12212_s4 + $0x158] sm:$0xff]  ;;  %v6675_v42 = vld [vmem:[%s12209_s1 + $0x160] sm:$0xf] }
 0x1b5   :  { %950 = vmatpush.bf16.msrb.mxu3 %v7525_v43  ;;  %v7481_v43 = vld [vmem:[%s12209_s1 + $0x9c] sm:$0xf] }
 0x1b9   :  { %951 = vmatpush.bf16.msrb.mxu3 %v7524_v48  ;;  %1012 = vmatmul.bf16.gmra.mxu0 %v6524_v14  ;;  %v6576_v48 = vor.u32 %v7481_v43, %v6573_v46  ;;  %v7509_v43 = vld [vmem:[%s12209_s1 + $0x174] sm:$0xf0]  ;;  %v7552_v46 = vld [vmem:[%s12212_s4 + $0x150] sm:$0xff] }
 0x1bb   :  { %v8513_v33 = vpop.f32.mrf.mxu2 }
 0x1bd   :  { %952 = vmatpush.bf16.msrb.mxu3 %v7523_v1  ;;  %v6600_v1 = vor.u32 %v7487_v61, %v6597_v62  ;;  %v7504_v62 = vld [vmem:[%s12209_s1 + $0x154] sm:$0xf] }
 0x1c1   :  { %953 = vmatpush.bf16.msrb.mxu3 %v7522_v2  ;;  %1066 = vmatmul.bf16.gmra.mxu1 %v6552_v41  ;;  %v6596_v2 = vor.u32 %v7490_v60, %v6595_v58  ;;  %v6644_v41 = vor.u32 %v7502_v27, %v6643_v26  ;;  %v7550_v58 = vld [vmem:[%s12212_s4 + $0x140] sm:$0xff]  ;;  %v6640_v60 = vor.u32 %v7498_v56, %v6637_v57  ;;  %v7488_v57 = vld [vmem:[%s12209_s1 + $0xd4] sm:$0xf] }
 0x1c3   :  { %1110 = vmatmul.bf16.gmra.mxu2 %v6532_v13  ;;  %v8530_v35 = vpop.f32.mrf.mxu2  ;;  %v7496_v13 = vld [vmem:[%s12209_s1 + $0x10c] sm:$0xf0] }
 0x1c4   :  { %v6620_v14 = vor.u32 %v7496_v13, %v6619_v12  ;;  %v6512_v13 = vor.u32 %v7464_v8, %v6509_v10 }
 0x1c5   :  { %954 = vmatpush.bf16.msrb.mxu3 %v7521_v4  ;;  %v7480_v4 = vld [vmem:[%s12209_s1 + $0x94] sm:$0xf] }
 0x1c9   :  { %955 = vmatpush.bf16.msrb.mxu3 %v7520_v5  ;;  %1017 = vmatmul.bf16.gmra.mxu0 %v6548_v30  ;;  %v6565_v5 = vld [vmem:[%s12209_s1 + $0xa8] sm:$0xf0] }
 0x1ca   :  { %v6568_v7 = vor.u32 %v7480_v4, %v6565_v5  ;;  %v7555_v30 = vld [vmem:[%s12212_s4 + $0x168] sm:$0xff] }
 0x1cb   :  { %v8541_v40 = vpop.f32.mrf.mxu2 }
 0x1cd   :  { %956 = vmatpush.bf16.msrb.mxu3 %v7519_v15  ;;  %v7486_v15 = vld [vmem:[%s12209_s1 + $0xc4] sm:$0xf] }
 0x1d1   :  { %957 = vmatpush.bf16.msrb.mxu3 %v7518_v16  ;;  %1071 = vmatmul.bf16.gmra.mxu1 %v6576_v48  ;;  %v6589_v16 = vld [vmem:[%s12209_s1 + $0xd8] sm:$0xf0]  ;;  %v7508_v48 = vld [vmem:[%s12209_s1 + $0x16c] sm:$0xf0] }
 0x1d2   :  { %v6592_v18 = vor.u32 %v7486_v15, %v6589_v16 }
 0x1d3   :  { %1115 = vmatmul.bf16.gmra.mxu2 %v6556_v29  ;;  %v8558_v53 = vpop.f32.mrf.mxu2  ;;  %v6652_v29 = vor.u32 %v7503_v23, %v6651_v22 }
 0x1d4   :  { %958 = vmatmul.bf16.vlgmr.msrb.gmra.mxu3 %v6496_v21  ;;  %v7557_v21 = vld [vmem:[%s12212_s4 + $0x178] sm:$0xff] }
 0x1d5   :  { %1146 = vmatpush.bf16.msra.mxu3 %v7557_v21  ;;  %v6533_v21 = vld [vmem:[%s12209_s1 + $0x58] sm:$0xf0] }
 0x1d9   :  { %1022 = vmatmul.bf16.gmra.mxu0 %v6572_v49  ;;  %1147 = vmatpush.bf16.msra.mxu3 %v7556_v25  ;;  %v6676_v49 = vor.u32 %v7509_v43, %v6675_v42  ;;  %v7482_v43 = vld [vmem:[%s12209_s1 + $0xa4] sm:$0xf] }
 0x1db   :  { %v8569_v59 = vpop.f32.mrf.mxu2 }
 0x1dd   :  { %1148 = vmatpush.bf16.msra.mxu3 %v7555_v30  ;;  %v6557_v30 = vld [vmem:[%s12209_s1 + $0x88] sm:$0xf0] }
 0x1e1   :  { %1076 = vmatmul.bf16.gmra.mxu1 %v6600_v1 }
 0x1e3   :  { %1120 = vmatmul.bf16.gmra.mxu2 %v6580_v47  ;;  %v8586_v6 = vpop.f32.mrf.mxu2  ;;  %v6667_v47 = vld [vmem:[%s12209_s1 + $0x158] sm:$0xf] }
 0x1e4   :  { %963 = vmatmul.bf16.gmra.mxu3 %v6520_v36  ;;  %v7554_v36 = vld [vmem:[%s12212_s4 + $0x160] sm:$0xff]  ;;  %v6668_v50 = vor.u32 %v7508_v48, %v6667_v47 }
 0x1e5   :  { %1149 = vmatpush.bf16.msra.mxu3 %v7554_v36 }
 0x1e9   :  { %1027 = vmatmul.bf16.gmra.mxu0 %v6596_v2  ;;  %1150 = vmatpush.bf16.msra.mxu3 %v7553_v39 }
 0x1eb   :  { %v8594_v11 = vpop.f32.mrf.mxu2 }
 0x1ec   :  { %12301 = vst [vmem:[#allocation6_spill] sm:$0xff] %v8594_v11 }
 0x1ed   :  { %1151 = vmatpush.bf16.msra.mxu3 %v7552_v46  ;;  %v6581_v46 = vld [vmem:[%s12209_s1 + $0xb8] sm:$0xf0] }
 0x1f3   :  { %1125 = vmatmul.bf16.gmra.mxu2 %v6604_v0  ;;  %v8608_v17 = vpop.f32.mrf.mxu2  ;;  %v6661_v0 = vld [vmem:[%s12209_s1 + $0x168] sm:$0xf0] }
 0x1f4   :  { %968 = vmatmul.bf16.gmra.mxu3 %v6544_v54  ;;  %v7551_v54 = vld [vmem:[%s12212_s4 + $0x148] sm:$0xff]  ;;  %v6664_v2 = vor.u32 %v7504_v62, %v6661_v0 }
 0x1f5   :  { %1152 = vmatpush.bf16.msra.mxu3 %v7551_v54 }
 0x1f9   :  { %1032 = vmatmul.bf16.gmra.mxu0 %v6620_v14  ;;  %1153 = vmatpush.bf16.msra.mxu3 %v7550_v58  ;;  %v6605_v58 = vld [vmem:[%s12209_s1 + $0xe8] sm:$0xf0] }
 0x1fa   :  { %v6608_v0 = vor.u32 %v7488_v57, %v6605_v58 }
 0x1fb   :  { %v8619_v24 = vpop.f32.mrf.mxu2 }
 0x203   :  { %1130 = vmatmul.bf16.gmra.mxu2 %v6628_v45  ;;  %v8642_v52 = vpop.f32.mrf.mxu2 }
 0x204   :  { %973 = vmatmul.bf16.gmra.mxu3 %v6568_v7 }
 0x209   :  { %1037 = vmatmul.bf16.gmra.mxu0 %v6644_v41  ;;  %v7476_v41 = vld [vmem:[%s12209_s1 + $0x74] sm:$0xf] }
 0x20a   :  { %v6560_v36 = vor.u32 %v7476_v41, %v6557_v30 }
 0x20b   :  { %v8662_v51 = vpop.f32.mrf.mxu2 }
 0x213   :  { %1135 = vmatmul.bf16.gmra.mxu2 %v6652_v29 }
 0x214   :  { %978 = vmatmul.bf16.gmra.mxu3 %v6592_v18  ;;  %v7470_v18 = vld [vmem:[%s12209_s1 + $0x44] sm:$0xf] }
 0x215   :  { %v6536_v23 = vor.u32 %v7470_v18, %v6533_v21  ;;  %v7494_v18 = vld [vmem:[%s12209_s1 + $0x104] sm:$0xf]  ;;  %v6629_v21 = vld [vmem:[%s12209_s1 + $0x118] sm:$0xf0] }
 0x216   :  { %v6632_v41 = vor.u32 %v7494_v18, %v6629_v21 }
 0x219   :  { %1042 = vmatmul.bf16.gmra.mxu0 %v6668_v50 }
 0x21b   :  { %v8676_v61 = vpop.f32.mrf.mxu2 }
 0x21c   :  { %12302 = vst [vmem:[#allocation7_spill] sm:$0xff] %v8676_v61 }
 0x223   :  { %1140 = vmatmul.bf16.gmra.mxu2 %v6676_v49  ;;  %v8684_v1 = vpop.f32.mrf.mxu2  ;;  %v6584_v49 = vor.u32 %v7482_v43, %v6581_v46 }
 0x224   :  { %983 = vmatmul.bf16.gmra.mxu3 %v6616_v38  ;;  %12303 = vst [vmem:[#allocation8_spill] sm:$0xff] %v8684_v1 }
 0x226   :  { %v8686_v4 = vpop.f32.mrf.mxu0 }
 0x22e   :  { %v8698_v12 = vpop.f32.mrf.mxu0 }
 0x234   :  { %988 = vmatmul.bf16.gmra.mxu3 %v6640_v60 }
 0x236   :  { %v8688_v5 = vpop.f32.mrf.mxu2  ;;  %v8704_v15 = vpop.f32.mrf.mxu0 }
 0x237   :  { %v8690_v7 = vpop.f32.mrf.mxu3 }
 0x238   :  { %12304 = vst [vmem:[#allocation9_spill] sm:$0xff] %v8690_v7  ;;  %v6653_v7 = vld [vmem:[%s12209_s1 + $0x148] sm:$0xf0] }
 0x23e   :  { %v8700_v45 = vpop.f32.mrf.mxu2  ;;  %v8716_v25 = vpop.f32.mrf.mxu0 }
 0x244   :  { %993 = vmatmul.bf16.gmra.mxu3 %v6664_v2 }
 0x246   :  { %v8706_v16 = vpop.f32.mrf.mxu2  ;;  %v8722_v29 = vpop.f32.mrf.mxu0 }
 0x24e   :  { %v8718_v26 = vpop.f32.mrf.mxu2  ;;  %v8734_v38 = vpop.f32.mrf.mxu0 }
 0x254   :  { %1154 = vmatmul.bf16.vlgmr.msra.gmra.mxu3 %v6512_v13 }
 0x256   :  { %v8732_v34 = vpop.f32.mrf.mxu2  ;;  %v8748_v48 = vpop.f32.mrf.mxu0 }
 0x257   :  { %v8702_v14 = vpop.f32.mrf.mxu3 }
 0x25e   :  { %v8738_v42 = vpop.f32.mrf.mxu2  ;;  %v8754_v56 = vpop.f32.mrf.mxu0 }
 0x25f   :  { %v8714_v22 = vpop.f32.mrf.mxu3 }
 0x260   :  { %v962_v11 = vadd.f32 %v8714_v22, %v8329_v44 }
 0x264   :  { %1159 = vmatmul.bf16.gmra.mxu3 %v6536_v23 }
 0x266   :  { %v8750_v50 = vpop.f32.mrf.mxu2  ;;  %v8766_v2 = vpop.f32.mrf.mxu0 }
 0x267   :  { %v8720_v27 = vpop.f32.mrf.mxu3 }
 0x26e   :  { %v8762_v60 = vpop.f32.mrf.mxu2  ;;  %v8772_v13 = vpop.f32.mrf.mxu0 }
 0x26f   :  { %v8730_v31 = vpop.f32.mrf.mxu3 }
 0x274   :  { %1164 = vmatmul.bf16.gmra.mxu3 %v6560_v36 }
 0x276   :  { %v8770_v10 = vpop.f32.mrf.mxu2  ;;  %v1033_v43 = vpop.f32.mrf.mxu0 }
 0x277   :  { %v8736_v39 = vpop.f32.mrf.mxu3 }
 0x27e   :  { %v8782_v30 = vpop.f32.mrf.mxu2 }
 0x27f   :  { %v8746_v47 = vpop.f32.mrf.mxu3 }
 0x284   :  { %1169 = vmatmul.bf16.gmra.mxu3 %v6584_v49 }
 0x286   :  { %v1131_v57 = vpop.f32.mrf.mxu2 }
 0x287   :  { %v8752_v54 = vpop.f32.mrf.mxu3 }
 0x28f   :  { %v8764_v62 = vpop.f32.mrf.mxu3 }
 0x294   :  { %1174 = vmatmul.bf16.gmra.mxu3 %v6608_v0  ;;  %v7500_v0 = vld [vmem:[%s12209_s1 + $0x134] sm:$0xf] }
 0x297   :  { %v8768_v8 = vpop.f32.mrf.mxu3 }
 0x29f   :  { %v8780_v23 = vpop.f32.mrf.mxu3 }
 0x2a4   :  { %1179 = vmatmul.bf16.gmra.mxu3 %v6632_v41  ;;  %v6656_v41 = vor.u32 %v7500_v0, %v6653_v7  ;;  %v960_v7 = vadd.f32 %v8702_v14, %v8322_v32 }
 0x2a7   :  { %v984_v36 = vpop.f32.mrf.mxu3 }
 0x2a8   :  { %v985_v46 = vadd.f32 %v984_v36, %v8530_v35  ;;  %v7506_v35 = vld [vmem:[%s12209_s1 + $0x164] sm:$0xf] }
 0x2aa   :  { %v1034_v49 = vadd.f32 %v1033_v43, %v985_v46  ;;  %v1057_v46 = vpop.f32.mrf.mxu1 }
 0x2ac   :  { %v1083_v58 = vadd.f32 %v8608_v17, %v1034_v49  ;;  %v6677_v17 = vld [vmem:[%s12209_s1 + $0x178] sm:$0xf0] }
 0x2ad   :  { %v6680_v43 = vor.u32 %v7506_v35, %v6677_v17  ;;  %v1011_v35 = vadd.f32 %v8698_v12, %v962_v11  ;;  %v8833_v12 = vld [vmem:[%s12213_s5 + $0x8] sm:$0xff] }
 0x2ae   :  { %v8792_v18 = vadd.f32 %v1131_v57, %v1083_v58  ;;  %v1009_v57 = vadd.f32 %v8686_v4, %v960_v7  ;;  %v965_v7 = vadd.f32 %v8720_v27, %v8348_v63  ;;  %v967_v63 = vadd.f32 %v8730_v31, %v8384_v19  ;;  %v8851_v19 = vld [vmem:[%s12213_s5 + $0x20] sm:$0xff] }
 0x2af   :  { %v8794_v21 = vpop.f32.mrf.mxu3 }
 0x2b0   :  { %v1014_v11 = vadd.f32 %v8704_v15, %v965_v7  ;;  %v1016_v15 = vadd.f32 %v8716_v25, %v967_v63  ;;  %v8865_v7 = vld [vmem:[%s12213_s5 + $0x18] sm:$0xff] }
 0x2b2   :  { %v1059_v58 = vpop.f32.mrf.mxu1 }
 0x2b3   :  { %v1060_v4 = vadd.f32 %v1059_v58, %v1011_v35 }
 0x2b4   :  { %1184 = vmatmul.bf16.gmra.mxu3 %v6656_v41  ;;  %v1058_v41 = vadd.f32 %v1057_v46, %v1009_v57 }
 0x2b5   :  { %v1109_v44 = vadd.f32 %v8700_v45, %v1060_v4 }
 0x2b6   :  { %v1107_v61 = vadd.f32 %v8688_v5, %v1058_v41  ;;  %v8846_v41 = vld [vmem:[%s12213_s5 + $0x10] sm:$0xff] }
 0x2b7   :  { %v8796_v1 = vpop.f32.mrf.mxu3 }
 0x2ba   :  { %v1062_v14 = vpop.f32.mrf.mxu1 }
 0x2bb   :  { %v1063_v22 = vadd.f32 %v1062_v14, %v1014_v11 }
 0x2bd   :  { %v1112_v45 = vadd.f32 %v8706_v16, %v1063_v22 }
 0x2bf   :  { %v8804_v36 = vpop.f32.mrf.mxu3 }
 0x2c2   :  { %v1064_v57 = vpop.f32.mrf.mxu1 }
 0x2c3   :  { %v1065_v31 = vadd.f32 %v1064_v57, %v1016_v15 }
 0x2c4   :  { %1189 = vmatmul.bf16.gmra.mxu3 %v6680_v43  ;;  %v8820_v43 = vld [vmem:[%s12213_s5] sm:$0xff] }
 0x2c7   :  { %v8806_v49 = vpop.f32.mrf.mxu3 }
 0x2ca   :  { %v1067_v25 = vpop.f32.mrf.mxu1 }
 0x2cf   :  { %v8811_v0 = vpop.f32.mrf.mxu3 }
 0x2d7   :  { %v1155_v17 = vpop.f32.mrf.mxu3 }
 0x2d8   :  { %v1156_v32 = vadd.f32 %v1155_v17, %v1107_v61  ;;  %v970_v17 = vadd.f32 %v8736_v39, %v8406_v37  ;;  %v972_v39 = vadd.f32 %v8746_v47, %v8438_v55 }
 0x2da   :  { %v8825_v46 = vadd.f32 %v8820_v43, %v1156_v32  ;;  %v1114_v32 = vadd.f32 %v8718_v26, %v1065_v31  ;;  %v1019_v14 = vadd.f32 %v8722_v29, %v970_v17  ;;  %v1021_v29 = vadd.f32 %v8734_v38, %v972_v39 }
 0x2dc   :  { %1216 = vadd.xlane.f32.xlu2 %v8825_v46  ;;  %v1068_v37 = vadd.f32 %v1067_v25, %v1019_v14 }
 0x2de   :  { %v1117_v26 = vadd.f32 %v8732_v34, %v1068_v37  ;;  %v977_v37 = vadd.f32 %v8764_v62, %v8479_v9 }
 0x2df   :  { %v1157_v5 = vpop.f32.mrf.mxu3 }
 0x2e0   :  { %v1158_v61 = vadd.f32 %v1157_v5, %v1109_v44  ;;  %v1069_v5 = vpop.f32.mrf.mxu1 }
 0x2e1   :  { %v1070_v63 = vadd.f32 %v1069_v5, %v1021_v29 }
 0x2e2   :  { %v8838_v27 = vadd.f32 %v8833_v12, %v1158_v61 }
 0x2e3   :  { %v1119_v55 = vadd.f32 %v8738_v42, %v1070_v63  ;;  %v975_v42 = vadd.f32 %v8752_v54, %v8462_v3  ;;  %v1026_v3 = vadd.f32 %v8754_v56, %v977_v37 }
 0x2e4   :  { %1218 = vadd.xlane.f32.xlu0 %v8838_v27 }
 0x2e7   :  { %v1160_v58 = vpop.f32.mrf.mxu3 }
 0x2e8   :  { %v1161_v35 = vadd.f32 %v1160_v58, %v1112_v45  ;;  %v1072_v25 = vpop.f32.mrf.mxu1 }
 0x2ea   :  { %v8856_v16 = vadd.f32 %v8846_v41, %v1161_v35 }
 0x2ec   :  { %1220 = vadd.xlane.f32.xlu1 %v8856_v16  ;;  %1224 = vadd.xlane.f32.xlu0 %v8851_v19 }
 0x2ef   :  { %v1162_v4 = vpop.f32.mrf.mxu3 }
 0x2f0   :  { %v1163_v44 = vadd.f32 %v1162_v4, %v1114_v32  ;;  %v1024_v32 = vadd.f32 %v8748_v48, %v975_v42  ;;  %v1074_v54 = vpop.f32.mrf.mxu1 }
 0x2f2   :  { %v8870_v11 = vadd.f32 %v8865_v7, %v1163_v44  ;;  %v1073_v44 = vadd.f32 %v1072_v25, %v1024_v32 }
 0x2f4   :  { %1222 = vadd.xlane.f32.xlu2 %v8870_v11 }
 0x2f7   :  { %v1165_v61 = vpop.f32.mrf.mxu3 }
 0x2f8   :  { %v1166_v22 = vadd.f32 %v1165_v61, %v1117_v26  ;;  %v1122_v26 = vadd.f32 %v8750_v50, %v1073_v44  ;;  %v1075_v61 = vadd.f32 %v1074_v54, %v1026_v3  ;;  %v1077_v54 = vpop.f32.mrf.mxu1 }
 0x2fa   :  { %v8876_v57 = vadd.f32 %v8820_v43, %v1166_v22  ;;  %v1124_v50 = vadd.f32 %v8762_v60, %v1075_v61  ;;  %v987_v61 = vadd.f32 %v8794_v21, %v8541_v40 }
 0x2fc   :  { %1226 = vadd.xlane.f32.xlu1 %v8876_v57 }
 0x2ff   :  { %v1167_v47 = vpop.f32.mrf.mxu3 }
 0x300   :  { %v1168_v45 = vadd.f32 %v1167_v47, %v1119_v55 }
 0x302   :  { %v8881_v15 = vadd.f32 %v8833_v12, %v1168_v45 }
 0x304   :  { %1228 = vadd.xlane.f32.xlu1 %v8881_v15 }
 0x307   :  { %v1170_v34 = vpop.f32.mrf.mxu3 }
 0x308   :  { %v1171_v29 = vadd.f32 %v1170_v34, %v1122_v26 }
 0x30a   :  { %v8909_v9 = vadd.f32 %v8846_v41, %v1171_v29 }
 0x30f   :  { %v1172_v38 = vpop.f32.mrf.mxu3 }
 0x310   :  { %v1173_v55 = vadd.f32 %v1172_v38, %v1124_v50 }
 0x317   :  { %v8884_v58 = vpop.f32.mrf.mxu3 }
 0x31f   :  { %v8886_v35 = vpop.f32.mrf.mxu3 }
 0x327   :  { %v1180_v31 = vpop.f32.mrf.mxu3 }
 0x328   :  { %v8889_v17 = vadd.f32 %v1180_v31, %v8792_v18  ;;  %v8921_v31 = vadd.f32 %v8865_v7, %v1173_v55  ;;  %v1133_v55 = vpop.f32.mrf.mxu2 }
 0x32f   :  { %v1182_v40 = vpop.f32.mrf.mxu3 }
 0x34f   :  { %v1217_v14 = vpop.xlane.xlu2 %1216 }
 0x350   :  { %v1250_v4 = vmul.f32 %v1217_v14, %v8198_v28 }
 0x352   :  { %v8898_v39 = vsub.f32 %v8825_v46, %v1250_v4 }
 0x354   :  { %v1284_v18 = vmul.f32 %v8898_v39, %v8898_v39 }
 0x356   :  { %1301 = vadd.xlane.f32.xlu2 %v1284_v18 }
 0x357   :  { %v1219_v48 = vpop.xlane.xlu0 %1218 }
 0x358   :  { %v1251_v5 = vmul.f32 %v1219_v48, %v8198_v28 }
 0x35a   :  { %v8906_v22 = vsub.f32 %v8838_v27, %v1251_v5 }
 0x35c   :  { %v1285_v62 = vmul.f32 %v8906_v22, %v8906_v22 }
 0x35e   :  { %1303 = vadd.xlane.f32.xlu0 %v1285_v62  ;;  %1230 = vadd.xlane.f32.xlu2 %v8909_v9 }
 0x35f   :  { %v1221_v56 = vpop.xlane.xlu1 %1220  ;;  %v1225_v63 = vpop.xlane.xlu0 %1224 }
 0x360   :  { %v1252_v47 = vmul.f32 %v1221_v56, %v8198_v28  ;;  %v1254_v34 = vmul.f32 %v1225_v63, %v8198_v28 }
 0x362   :  { %v8917_v45 = vsub.f32 %v8856_v16, %v1252_v47  ;;  %v8927_v60 = vsub.f32 %v8851_v19, %v1254_v34  ;;  %v980_v19 = vadd.f32 %v8768_v8, %v8502_v20  ;;  %v1035_v20 = vpop.f32.mrf.mxu0 }
 0x363   :  { %v1036_v56 = vadd.f32 %v1035_v20, %v987_v61  ;;  %v6937_v61 = vld [vmem:[%s12214_s6 + $0x84] sm:$0xf0] }
 0x364   :  { %v1286_v42 = vmul.f32 %v8917_v45, %v8917_v45  ;;  %v1288_v14 = vmul.f32 %v8927_v60, %v8927_v60  ;;  %v1029_v3 = vadd.f32 %v8766_v2, %v980_v19 }
 0x365   :  { %v1085_v63 = vadd.f32 %v8619_v24, %v1036_v56  ;;  %v7580_v24 = vld [vmem:[%s12214_s6 + $0xb0] sm:$0xf0]  ;;  %v7570_v56 = vld [vmem:[%s12214_s6 + $0x64] sm:$0xf] }
 0x366   :  { %1305 = vadd.xlane.f32.xlu0 %v1286_v42  ;;  %1232 = vadd.xlane.f32.xlu2 %v8921_v31  ;;  %v1078_v5 = vadd.f32 %v1077_v54, %v1029_v3  ;;  %v6935_v54 = vld [vmem:[%s12214_s6 + $0x78] sm:$0xf] }
 0x367   :  { %v1223_v38 = vpop.xlane.xlu2 %1222  ;;  %v1134_v21 = vadd.f32 %v1133_v55, %v1085_v63  ;;  %v6925_v63 = vld [vmem:[%s12214_s6 + $0x6c] sm:$0xf0] }
 0x368   :  { %v1253_v25 = vmul.f32 %v1223_v38, %v8198_v28  ;;  %v1127_v50 = vadd.f32 %v8770_v10, %v1078_v5  ;;  %v6959_v10 = vld [vmem:[%s12214_s6 + $0xa8] sm:$0xf]  ;;  %v6928_v55 = vor.u32 %v7570_v56, %v6925_v63  ;;  %v6943_v56 = vld [vmem:[%s12214_s6 + $0x80] sm:$0xf] }
 0x369   :  { %v1183_v34 = vadd.f32 %v1182_v40, %v1134_v21  ;;  %v6960_v38 = vor.u32 %v7580_v24, %v6959_v10  ;;  %v6911_v40 = vld [vmem:[%s12214_s6 + $0x48] sm:$0xf]  ;;  %v7568_v21 = vld [vmem:[%s12214_s6 + $0x50] sm:$0xf0]  ;;  %v6913_v24 = vld [vmem:[%s12214_s6 + $0x54] sm:$0xf0] }
 0x36a   :  { %v8931_v32 = vsub.f32 %v8870_v11, %v1253_v25  ;;  %v1176_v2 = vadd.f32 %v8884_v58, %v1127_v50  ;;  %v7579_v58 = vld [vmem:[%s12214_s6 + $0xac] sm:$0xf]  ;;  %v6961_v25 = vld [vmem:[%s12214_s6 + $0xb4] sm:$0xf0]  ;;  %v6912_v10 = vor.u32 %v7568_v21, %v6911_v40 }
 0x36b   :  { %v8962_v42 = vadd.f32 %v8865_v7, %v1183_v34  ;;  %1762 = vmatpush.bf16.msra.mxu0 %v6960_v38  ;;  %v7571_v50 = vld [vmem:[%s12214_s6 + $0x68] sm:$0xf0]  ;;  %v7581_v38 = vld [vmem:[%s12214_s6 + $0xb8] sm:$0xf0] }
 0x36c   :  { %v1287_v4 = vmul.f32 %v8931_v32, %v8931_v32  ;;  %v8958_v47 = vadd.f32 %v8820_v43, %v1176_v2  ;;  %v7567_v34 = vld [vmem:[%s12214_s6 + $0x4c] sm:$0xf] }
 0x36e   :  { %1309 = vadd.xlane.f32.xlu0 %v1288_v14  ;;  %1307 = vadd.xlane.f32.xlu1 %v1287_v4  ;;  %v6964_v14 = vor.u32 %v7579_v58, %v6961_v25  ;;  %v6947_v4 = vld [vmem:[%s12214_s6 + $0x90] sm:$0xf]  ;;  %v6916_v25 = vor.u32 %v7567_v34, %v6913_v24  ;;  %v982_v34 = vadd.f32 %v8780_v23, %v8513_v33  ;;  %v7559_v24 = vld [vmem:[%s12214_s6 + $0x8] sm:$0xf0]  ;;  %v6931_v23 = vld [vmem:[%s12214_s6 + $0x68] sm:$0xf] }
 0x36f   :  { %v1227_v44 = vpop.xlane.xlu1 %1226  ;;  %v6967_v58 = vld [vmem:[%s12214_s6 + $0xb0] sm:$0xf] }
 0x370   :  { %v1255_v37 = vmul.f32 %v1227_v44, %v8198_v28  ;;  %1821 = vmatpush.bf16.msrb.mxu1 %v6964_v14  ;;  %v7577_v44 = vld [vmem:[%s12214_s6 + $0x98] sm:$0xf0]  ;;  %v6968_v14 = vor.u32 %v7581_v38, %v6967_v58  ;;  %v7558_v58 = vld [vmem:[%s12214_s6 + $0x4] sm:$0xf]  ;;  %v6877_v33 = vld [vmem:[%s12214_s6 + $0xc] sm:$0xf0] }
 0x371   :  { %v6948_v19 = vor.u32 %v7577_v44, %v6947_v4  ;;  %v6899_v4 = vld [vmem:[%s12214_s6 + $0x30] sm:$0xf]  ;;  %v7565_v44 = vld [vmem:[%s12214_s6 + $0x38] sm:$0xf0] }
 0x372   :  { %v8941_v18 = vsub.f32 %v8876_v57, %v1255_v37  ;;  %v7576_v37 = vld [vmem:[%s12214_s6 + $0x94] sm:$0xf]  ;;  %7710 = vmatpush.bf16.msrb.mxu2 %v6968_v14 }
 0x373   :  { %1763 = vmatpush.bf16.msra.mxu0 %v6948_v19  ;;  %v6900_v19 = vor.u32 %v7565_v44, %v6899_v4  ;;  %v6880_v4 = vor.u32 %v7558_v58, %v6877_v33  ;;  %v7572_v44 = vld [vmem:[%s12214_s6 + $0x70] sm:$0xf0] }
 0x374   :  { %v1289_v26 = vmul.f32 %v8941_v18, %v8941_v18 }
 0x376   :  { %1311 = vadd.xlane.f32.xlu1 %v1289_v26  ;;  %v6949_v26 = vld [vmem:[%s12214_s6 + $0x9c] sm:$0xf0] }
 0x377   :  { %v1229_v48 = vpop.xlane.xlu1 %1228  ;;  %v6952_v3 = vor.u32 %v7576_v37, %v6949_v26  ;;  %v7564_v37 = vld [vmem:[%s12214_s6 + $0x34] sm:$0xf]  ;;  %v6901_v26 = vld [vmem:[%s12214_s6 + $0x3c] sm:$0xf0] }
 0x378   :  { %v1256_v29 = vmul.f32 %v1229_v48, %v8198_v28  ;;  %v7574_v48 = vld [vmem:[%s12214_s6 + $0x80] sm:$0xf0] }
 0x379   :  { %1822 = vmatpush.bf16.msrb.mxu1 %v6952_v3  ;;  %v6936_v5 = vor.u32 %v7574_v48, %v6935_v54  ;;  %v6955_v3 = vld [vmem:[%s12214_s6 + $0x98] sm:$0xf]  ;;  %v7578_v54 = vld [vmem:[%s12214_s6 + $0xa0] sm:$0xf0]  ;;  %v6904_v48 = vor.u32 %v7564_v37, %v6901_v26  ;;  %v6932_v37 = vor.u32 %v7572_v44, %v6931_v23  ;;  %v6919_v26 = vld [vmem:[%s12214_s6 + $0x50] sm:$0xf] }
 0x37a   :  { %v8950_v62 = vsub.f32 %v8881_v15, %v1256_v29  ;;  %v7573_v29 = vld [vmem:[%s12214_s6 + $0x7c] sm:$0xf] }
 0x37b   :  { %v6940_v20 = vor.u32 %v7573_v29, %v6937_v61  ;;  %1764 = vmatpush.bf16.msra.mxu0 %v6936_v5  ;;  %v6956_v29 = vor.u32 %v7578_v54, %v6955_v3  ;;  %v6887_v5 = vld [vmem:[%s12214_s6 + $0x18] sm:$0xf]  ;;  %v7562_v61 = vld [vmem:[%s12214_s6 + $0x20] sm:$0xf0]  ;;  %v7569_v3 = vld [vmem:[%s12214_s6 + $0x58] sm:$0xf0]  ;;  %v1079_v54 = vpop.f32.mrf.mxu1 }
 0x37c   :  { %v1290_v8 = vmul.f32 %v8950_v62, %v8950_v62 }
 0x37d   :  { %1823 = vmatpush.bf16.msrb.mxu1 %v6940_v20  ;;  %7711 = vmatpush.bf16.msrb.mxu2 %v6956_v29  ;;  %v7561_v20 = vld [vmem:[%s12214_s6 + $0x1c] sm:$0xf] }
 0x37e   :  { %1313 = vadd.xlane.f32.xlu2 %v1290_v8  ;;  %v6923_v8 = vld [vmem:[%s12214_s6 + $0x60] sm:$0xf] }
 0x37f   :  { %v6924_v2 = vor.u32 %v7571_v50, %v6923_v8  ;;  %v6888_v8 = vor.u32 %v7562_v61, %v6887_v5  ;;  %v6889_v50 = vld [vmem:[%s12214_s6 + $0x24] sm:$0xf0] }
 0x381   :  { %1765 = vmatpush.bf16.msra.mxu0 %v6924_v2  ;;  %1824 = vmatpush.bf16.msrb.mxu1 %v6928_v55  ;;  %v7575_v2 = vld [vmem:[%s12214_s6 + $0x88] sm:$0xf0]  ;;  %v6892_v55 = vor.u32 %v7561_v20, %v6889_v50  ;;  %v1038_v20 = vpop.f32.mrf.mxu0 }
 0x382   :  { %v6944_v40 = vor.u32 %v7575_v2, %v6943_v56  ;;  %v6907_v56 = vld [vmem:[%s12214_s6 + $0x38] sm:$0xf]  ;;  %v7566_v2 = vld [vmem:[%s12214_s6 + $0x40] sm:$0xf0] }
 0x384   :  { %7712 = vmatpush.bf16.msrb.mxu2 %v6944_v40 }
 0x385   :  { %1766 = vmatpush.bf16.msra.mxu0 %v6912_v10  ;;  %1825 = vmatpush.bf16.msrb.mxu1 %v6916_v25  ;;  %v6875_v10 = vld [vmem:[%s12214_s6] sm:$0xf] }
 0x386   :  { %1234 = vadd.xlane.f32.xlu2 %v8958_v47  ;;  %v6876_v25 = vor.u32 %v7559_v24, %v6875_v10 }
 0x388   :  { %7713 = vmatpush.bf16.msrb.mxu2 %v6932_v37 }
 0x389   :  { %1767 = vmatpush.bf16.msra.mxu0 %v6900_v19  ;;  %1826 = vmatpush.bf16.msrb.mxu1 %v6904_v48  ;;  %v1031_v19 = vadd.f32 %v8772_v13, %v982_v34  ;;  %v6920_v48 = vor.u32 %v7569_v3, %v6919_v26  ;;  %v6908_v34 = vor.u32 %v7566_v2, %v6907_v56 }
 0x38b   :  { %v1080_v50 = vadd.f32 %v1079_v54, %v1031_v19  ;;  %v1136_v19 = vpop.f32.mrf.mxu2  ;;  %v992_v54 = vadd.f32 %v8804_v36, %v8569_v59  ;;  %v7560_v59 = vld [vmem:[%s12214_s6 + $0x10] sm:$0xf0] }
 0x38c   :  { %7714 = vmatpush.bf16.msrb.mxu2 %v6920_v48 }
 0x38d   :  { %1768 = vmatpush.bf16.msra.mxu0 %v6888_v8  ;;  %1827 = vmatpush.bf16.msrb.mxu1 %v6892_v55  ;;  %v1129_v24 = vadd.f32 %v8782_v30, %v1080_v50 }
 0x38e   :  { %1240 = vadd.xlane.f32.xlu2 %v8962_v42 }
 0x38f   :  { %v1178_v23 = vadd.f32 %v8886_v35, %v1129_v24 }
 0x390   :  { %7715 = vmatpush.bf16.msrb.mxu2 %v6908_v34 }
 0x391   :  { %1769 = vmatpush.bf16.msra.mxu0 %v6876_v25  ;;  %1828 = vmatpush.bf16.msrb.mxu1 %v6880_v4  ;;  %v9149_v36 = vadd.f32 %v8833_v12, %v1178_v23 }
 0x395   :  { %1880 = vmatpush.bf16.msrb.mxu0 %v6968_v14 }
 0x399   :  { %1881 = vmatpush.bf16.msrb.mxu0 %v6956_v29 }
 0x39d   :  { %1882 = vmatpush.bf16.msrb.mxu0 %v6944_v40  ;;  %v6883_v40 = vld [vmem:[%s12214_s6 + $0x8] sm:$0xf] }
 0x39e   :  { %v6884_v56 = vor.u32 %v7560_v59, %v6883_v40 }
 0x3a1   :  { %1883 = vmatpush.bf16.msrb.mxu0 %v6932_v37 }
 0x3a5   :  { %1884 = vmatpush.bf16.msrb.mxu0 %v6920_v48 }
 0x3a9   :  { %1885 = vmatpush.bf16.msrb.mxu0 %v6908_v34 }
 0x3c9   :  { %v1302_v63 = vpop.xlane.xlu2 %1301 }
 0x3ca   :  { %v1335_v21 = vmul.f32 %v1302_v63, %v8198_v28  ;;  %v990_v63 = vadd.f32 %v8796_v1, %v8558_v53  ;;  %v6895_v53 = vld [vmem:[%s12214_s6 + $0x20] sm:$0xf]  ;;  %v7563_v1 = vld [vmem:[%s12214_s6 + $0x28] sm:$0xf0] }
 0x3cb   :  { %v9128_v33 = vor.u32 %v7563_v1, %v6895_v53  ;;  %v49_v1 = vld [vmem:[%s12218_s10] sm:$0xff] }
 0x3cc   :  { %v9079_v38 = vadd.f32 1e-06, %v1335_v21  ;;  %v1039_v25 = vadd.f32 %v1038_v20, %v990_v63  ;;  %v1040_v20 = vpop.f32.mrf.mxu0 }
 0x3cd   :  { %7716 = vmatpush.bf16.msrb.mxu2 %v9128_v33  ;;  %v1041_v63 = vadd.f32 %v1040_v20, %v992_v54  ;;  %v9174_v54 = vperm.slane %v49_v1, 0  ;;  %1886 = vmatpush.bf16.msrb.mxu0 %v9128_v33 }
 0x3ce   :  { %7730 = vrsqrt.f32 %v9079_v38  ;;  %v1088_v35 = vadd.f32 %v8642_v52, %v1039_v25  ;;  %vm1375_vm0 = vweird.f32 %v9079_v38 }
 0x3d1   :  { %v1304_v5 = vpop.xlane.xlu0 %1303  ;;  %v1231_v61 = vpop.xlane.xlu2 %1230  ;;  %7717 = vmatpush.bf16.msrb.mxu2 %v6884_v56  ;;  %1887 = vmatpush.bf16.msrb.mxu0 %v6884_v56 }
 0x3d2   :  { %v1336_v8 = vmul.f32 %v1304_v5, %v8198_v28  ;;  %v1257_v13 = vmul.f32 %v1231_v61, %v8198_v28 }
 0x3d4   :  { %v9106_v14 = vpop.eup %7730  ;;  %v9110_v55 = vadd.f32 1e-06, %v1336_v8  ;;  %v9113_v21 = vsub.f32 %v8909_v9, %v1257_v13  ;;  %v1185_v8 = vpop.f32.mrf.mxu3 }
 0x3d5   :  { %v1370_v10 = vmul.f32 %v9106_v14, %v9079_v38  ;;  %vm1376_vm15 = vweird.f32 %v9106_v14 }
 0x3d6   :  { %7732 = vrsqrt.f32 %v9110_v55  ;;  %v1291_v29 = vmul.f32 %v9113_v21, %v9113_v21  ;;  %vm9159_vm1 = vmor %vm1375_vm0, %vm1376_vm15  ;;  %vm1385_vm3 = vweird.f32 %v9110_v55 }
 0x3d7   :  { %v1371_v58 = vmul.f32 %v9106_v14, %v1370_v10 }
 0x3d8   :  { %1315 = vadd.xlane.f32.xlu0 %v1291_v29  ;;  %v1137_v29 = vadd.f32 %v1136_v19, %v1088_v35 }
 0x3d9   :  { %v1372_v4 = vmul.f32 0.5, %v1371_v58  ;;  %v1306_v30 = vpop.xlane.xlu0 %1305  ;;  %v1233_v44 = vpop.xlane.xlu2 %1232 }
 0x3da   :  { %v1337_v26 = vmul.f32 %v1306_v30, %v8198_v28  ;;  %v1258_v3 = vmul.f32 %v1233_v44, %v8198_v28  ;;  %v1186_v23 = vadd.f32 %v1185_v8, %v1137_v29  ;;  %v1090_v30 = vadd.f32 %v8662_v51, %v1041_v63 }
 0x3db   :  { %v1373_v5 = vsub.f32 1.5, %v1372_v4  ;;  %v9181_v51 = vadd.f32 %v8846_v41, %v8889_v17 }
 0x3dc   :  { %v7733_v61 = vpop.eup %7732  ;;  %v9139_v13 = vadd.f32 1e-06, %v1337_v26  ;;  %v9142_v50 = vsub.f32 %v8921_v31, %v1258_v3  ;;  %v1138_v26 = vpop.f32.mrf.mxu2  ;;  %v9184_v34 = vadd.f32 %v8820_v43, %v1186_v23 }
 0x3dd   :  { %v1380_v37 = vmul.f32 %v7733_v61, %v9110_v55  ;;  %v1374_v52 = vmul.f32 %v9106_v14, %v1373_v5  ;;  %vm1386_vm2 = vweird.f32 %v7733_v61  ;;  %v1187_v20 = vpop.f32.mrf.mxu3  ;;  %v1139_v8 = vadd.f32 %v1138_v26, %v1090_v30 }
 0x3de   :  { %7734 = vrsqrt.f32 %v9139_v13  ;;  %v1292_v2 = vmul.f32 %v9142_v50, %v9142_v50  ;;  %vm1387_vm4 = vmor %vm1385_vm3, %vm1386_vm2  ;;  %vm1395_vm6 = vweird.f32 %v9139_v13 }
 0x3df   :  { %v1381_v10 = vmul.f32 %v7733_v61, %v1380_v37  ;;  %v1378_v38 = vsel %vm9159_vm1, %v9106_v14, %v1374_v52  ;;  %v1188_v17 = vadd.f32 %v1187_v20, %v1139_v8 }
 0x3e0   :  { %1236 = vadd.xlane.f32.xlu0 %v9149_v36  ;;  %1317 = vadd.xlane.f32.xlu1 %v1292_v2  ;;  %v1539_v40 = vmul.f32 %v1378_v38, %v8898_v39  ;;  %v9192_v2 = vperm.slane %v49_v1, 1 }
 0x3e1   :  { %v1382_v58 = vmul.f32 0.5, %v1381_v10  ;;  %v1310_v53 = vpop.xlane.xlu0 %1309  ;;  %v1308_v25 = vpop.xlane.xlu1 %1307 }
 0x3e2   :  { %v1339_v48 = vmul.f32 %v1310_v53, %v8198_v28  ;;  %v1338_v4 = vmul.f32 %v1308_v25, %v8198_v28  ;;  %v1557_v52 = vmul.f32 %v9174_v54, %v1539_v40  ;;  %v995_v40 = vadd.f32 %v8806_v49, %v8586_v6 }
 0x3e3   :  { %v1383_v44 = vsub.f32 1.5, %v1382_v58  ;;  %v9200_v58 = vadd.f32 %v8833_v12, %v1188_v17 }
 0x3e4   :  { %v7735_v19 = vpop.eup %7734  ;;  %v9172_v3 = vadd.f32 1e-06, %v1339_v48  ;;  %v1355_v5 = vadd.f32 1e-06, %v1338_v4  ;;  %v1575_v53 = vadd.f32 %v9192_v2, %v1557_v52  ;;  %v1141_v49 = vpop.f32.mrf.mxu2 }
 0x3e5   :  { %v1384_v35 = vmul.f32 %v7733_v61, %v1383_v44  ;;  %v1390_v14 = vmul.f32 %v7735_v19, %v9139_v13  ;;  %vm1396_vm5 = vweird.f32 %v7735_v19  ;;  %v1043_v44 = vpop.f32.mrf.mxu0 }
 0x3e6   :  { %7736 = vrsqrt.f32 %v9172_v3  ;;  %vm1397_vm7 = vmor %vm1395_vm6, %vm1396_vm5  ;;  %vm1405_vm9 = vweird.f32 %v1355_v5  ;;  %vm1415_vm11 = vweird.f32 %v9172_v3 }
 0x3e7   :  { %v1388_v59 = vsel %vm1387_vm4, %v7733_v61, %v1384_v35  ;;  %v1391_v37 = vmul.f32 %v7735_v19, %v1390_v14  ;;  %7738 = vrsqrt.f32 %v1355_v5 }
 0x3e8   :  { %v1540_v39 = vmul.f32 %v1388_v59, %v8906_v22  ;;  %1242 = vadd.xlane.f32.xlu0 %v9184_v34  ;;  %1238 = vadd.xlane.f32.xlu1 %v9181_v51 }
 0x3e9   :  { %v1392_v55 = vmul.f32 0.5, %v1391_v37  ;;  %v1312_v43 = vpop.xlane.xlu1 %1311  ;;  %v1044_v37 = vadd.f32 %v1043_v44, %v995_v40 }
 0x3ea   :  { %v1340_v63 = vmul.f32 %v1312_v43, %v8198_v28  ;;  %v1558_v61 = vmul.f32 %v9174_v54, %v1540_v39 }
 0x3eb   :  { %v1393_v10 = vsub.f32 1.5, %v1392_v55 }
 0x3ec   :  { %v9196_v33 = vpop.eup %7736  ;;  %v1357_v22 = vadd.f32 1e-06, %v1340_v63  ;;  %v1576_v29 = vadd.f32 %v9192_v2, %v1558_v61  ;;  %v12307_v63 = vld [vmem:[#allocation7_spill] sm:$0xff] }
 0x3ed   :  { %v7739_v24 = vpop.eup %7738  ;;  %v1394_v1 = vmul.f32 %v7735_v19, %v1393_v10  ;;  %v1410_v25 = vmul.f32 %v9196_v33, %v9172_v3  ;;  %vm1416_vm12 = vweird.f32 %v9196_v33  ;;  %v1093_v61 = vadd.f32 %v12307_v63, %v1044_v37  ;;  %v12308_v10 = vld [vmem:[#allocation6_spill] sm:$0xff] }
 0x3ee   :  { %v1400_v23 = vmul.f32 %v7739_v24, %v1355_v5  ;;  %7740 = vrsqrt.f32 %v1357_v22  ;;  %v9205_v38 = vpack.c.bf16 %v1576_v29, %v1575_v53  ;;  %vm1406_vm8 = vweird.f32 %v7739_v24  ;;  %v1190_v53 = vpop.f32.mrf.mxu3  ;;  %vm9232_vm15 = vmor %vm1415_vm11, %vm1416_vm12 }
 0x3ef   :  { %v1398_v48 = vsel %vm1397_vm7, %v7735_v19, %v1394_v1  ;;  %v1411_v4 = vmul.f32 %v9196_v33, %v1410_v25  ;;  %vm1407_vm10 = vmor %vm1405_vm9, %vm1406_vm8  ;;  %vm1425_vm0 = vweird.f32 %v1357_v22  ;;  %vm2068_vm11 = vcmask 1043456  }
 0x3f0   :  { %v1401_v56 = vmul.f32 %v7739_v24, %v1400_v23  ;;  %1244 = vadd.xlane.f32.xlu0 %v9200_v58  ;;  %1770 = vmatmul.bf16.vlgmr.msra.gmra.mxu0 %v9205_v38  ;;  %v1541_v35 = vmul.f32 %v1398_v48, %v8917_v45 }
 0x3f1   :  { %1829 = vmatmul.bf16.vlgmr.msrb.gmra.mxu1 %v9205_v38  ;;  %v9211_v12 = vpop.xlane.xlu2 %1313  ;;  %v1412_v20 = vmul.f32 0.5, %v1411_v4  ;;  %v1142_v4 = vadd.f32 %v1141_v49, %v1093_v61 }
 0x3f2   :  { %v1402_v30 = vmul.f32 0.5, %v1401_v56  ;;  %v1559_v43 = vmul.f32 %v9174_v54, %v1541_v35  ;;  %v1341_v49 = vmul.f32 %v9211_v12, %v8198_v28 }
 0x3f3   :  { %v1413_v52 = vsub.f32 1.5, %v1412_v20  ;;  %v12311_v20 = vld [vmem:[#allocation8_spill] sm:$0xff] }
 0x3f4   :  { %v7741_v26 = vpop.eup %7740  ;;  %v1403_v13 = vsub.f32 1.5, %v1402_v30  ;;  %v1577_v25 = vadd.f32 %v9192_v2, %v1559_v43 }
 0x3f5   :  { %v1420_v14 = vmul.f32 %v7741_v26, %v1357_v22  ;;  %vm1426_vm13 = vweird.f32 %v7741_v26  ;;  %v1414_v23 = vmul.f32 %v9196_v33, %v1413_v52 }
 0x3f6   :  { %v1404_v8 = vmul.f32 %v7739_v24, %v1403_v13  ;;  %vm1427_vm1 = vmor %vm1425_vm0, %vm1426_vm13  ;;  %v1191_v13 = vadd.f32 %v1190_v53, %v1142_v4 }
 0x3f7   :  { %v1421_v59 = vmul.f32 %v7741_v26, %v1420_v14  ;;  %v1418_v35 = vsel %vm9232_vm15, %v9196_v33, %v1414_v23  ;;  %v1192_v33 = vpop.f32.mrf.mxu3 }
 0x3f8   :  { %v1408_v19 = vsel %vm1407_vm10, %v7739_v24, %v1404_v8  ;;  %v1045_v24 = vpop.f32.mrf.mxu0  ;;  %v1543_v37 = vmul.f32 %v1418_v35, %v8927_v60 }
 0x3f9   :  { %v1542_v39 = vmul.f32 %v1408_v19, %v8931_v32  ;;  %v1422_v17 = vmul.f32 0.5, %v1421_v59  ;;  %v1235_v55 = vpop.xlane.xlu2 %1234  ;;  %v997_v32 = vadd.f32 %v8811_v0, %v12308_v10  ;;  %v9249_v19 = vadd.f32 %v8846_v41, %v1191_v13 }
 0x3fa   :  { %v1259_v6 = vmul.f32 %v1235_v55, %v8198_v28 }
 0x3fb   :  { %v1423_v45 = vsub.f32 1.5, %v1422_v17  ;;  %v1560_v5 = vmul.f32 %v9174_v54, %v1542_v39  ;;  %v1046_v30 = vadd.f32 %v1045_v24, %v997_v32 }
 0x3fc   :  { %v9227_v29 = vsub.f32 %v8958_v47, %v1259_v6 }
 0x3fd   :  { %v1424_v1 = vmul.f32 %v7741_v26, %v1423_v45  ;;  %v1578_v3 = vadd.f32 %v9192_v2, %v1560_v5  ;;  %v1095_v8 = vadd.f32 %v12311_v20, %v1046_v30  ;;  %v1358_v45 = vadd.f32 1e-06, %v1341_v49 }
 0x3fe   :  { %v1293_v0 = vmul.f32 %v9227_v29, %v9227_v29 }
 0x3ff   :  { %v1593_v48 = vpack.c.bf16 %v1578_v3, %v1577_v25  ;;  %v1428_v44 = vsel %vm1427_vm1, %v7741_v26, %v1424_v1  ;;  %v1143_v26 = vpop.f32.mrf.mxu2  ;;  %7742 = vrsqrt.f32 %v1358_v45  ;;  %vm1435_vm3 = vweird.f32 %v1358_v45 }
 0x400   :  { %1319 = vadd.xlane.f32.xlu1 %v1293_v0  ;;  %v1544_v14 = vmul.f32 %v1428_v44, %v8941_v18  ;;  %v1144_v55 = vadd.f32 %v1143_v26, %v1095_v8  ;;  %v1561_v18 = vmul.f32 %v9174_v54, %v1543_v37 }
 0x401   :  { %1775 = vmatmul.bf16.gmra.mxu0 %v1593_v48  ;;  %1834 = vmatmul.bf16.gmra.mxu1 %v1593_v48  ;;  %v1241_v40 = vpop.xlane.xlu2 %1240 }
 0x402   :  { %1893 = vmatmul.bf16.vlgmr.msrb.gmra.mxu2 %v1593_v48  ;;  %v1262_v22 = vmul.f32 %v1241_v40, %v8198_v28  ;;  %v1562_v17 = vmul.f32 %v9174_v54, %v1544_v14  ;;  %v1193_v43 = vadd.f32 %v1192_v33, %v1144_v55  ;;  %v9258_v60 = vadd.f32 %v9192_v2, %v1561_v18 }
 0x404   :  { %v9245_v59 = vsub.f32 %v8962_v42, %v1262_v22  ;;  %v1580_v52 = vadd.f32 %v9192_v2, %v1562_v17  ;;  %v9261_v41 = vadd.f32 %v8865_v7, %v1193_v43 }
 0x405   :  { %v7743_v5 = vpop.eup %7742 }
 0x406   :  { %v1296_v39 = vmul.f32 %v9245_v59, %v9245_v59  ;;  %v1594_v6 = vpack.c.bf16 %v1580_v52, %v9258_v60  ;;  %v1430_v63 = vmul.f32 %v7743_v5, %v1358_v45  ;;  %vm1436_vm2 = vweird.f32 %v7743_v5 }
 0x407   :  { %vm1437_vm4 = vmor %vm1435_vm3, %vm1436_vm2 }
 0x408   :  { %1246 = vadd.xlane.f32.xlu1 %v9249_v19  ;;  %1325 = vadd.xlane.f32.xlu0 %v1296_v39  ;;  %v1431_v61 = vmul.f32 %v7743_v5, %v1430_v63 }
 0x40a   :  { %v1432_v24 = vmul.f32 0.5, %v1431_v61 }
 0x40c   :  { %v1433_v53 = vsub.f32 1.5, %v1432_v24 }
 0x40e   :  { %v1434_v48 = vmul.f32 %v7743_v5, %v1433_v53 }
 0x410   :  { %1248 = vadd.xlane.f32.xlu1 %v9261_v41  ;;  %v1438_v40 = vsel %vm1437_vm4, %v7743_v5, %v1434_v48 }
 0x411   :  { %1780 = vmatmul.bf16.gmra.mxu0 %v1594_v6  ;;  %1839 = vmatmul.bf16.gmra.mxu1 %v1594_v6  ;;  %v1545_v26 = vmul.f32 %v1438_v40, %v8950_v62 }
 0x412   :  { %1898 = vmatmul.bf16.gmra.mxu2 %v1594_v6 }
 0x413   :  { %v1563_v6 = vmul.f32 %v9174_v54, %v1545_v26 }
 0x44b   :  { %v1316_v10 = vpop.xlane.xlu0 %1315 }
 0x44c   :  { %v1342_v32 = vmul.f32 %v1316_v10, %v8198_v28 }
 0x44e   :  { %v1359_v7 = vadd.f32 1e-06, %v1342_v32  ;;  %v1581_v32 = vadd.f32 %v9192_v2, %v1563_v6 }
 0x450   :  { %7744 = vrsqrt.f32 %v1359_v7  ;;  %vm1445_vm6 = vweird.f32 %v1359_v7 }
 0x453   :  { %v1237_v1 = vpop.xlane.xlu0 %1236  ;;  %v1318_v25 = vpop.xlane.xlu1 %1317 }
 0x454   :  { %v1260_v3 = vmul.f32 %v1237_v1, %v8198_v28  ;;  %v1343_v23 = vmul.f32 %v1318_v25, %v8198_v28 }
 0x456   :  { %v7745_v56 = vpop.eup %7744  ;;  %v9271_v12 = vsub.f32 %v9149_v36, %v1260_v3  ;;  %v1360_v0 = vadd.f32 1e-06, %v1343_v23 }
 0x457   :  { %v1440_v4 = vmul.f32 %v7745_v56, %v1359_v7  ;;  %vm1446_vm5 = vweird.f32 %v7745_v56 }
 0x458   :  { %7746 = vrsqrt.f32 %v1360_v0  ;;  %v1294_v30 = vmul.f32 %v9271_v12, %v9271_v12  ;;  %vm1447_vm7 = vmor %vm1445_vm6, %vm1446_vm5  ;;  %vm1455_vm9 = vweird.f32 %v1360_v0 }
 0x459   :  { %v1441_v44 = vmul.f32 %v7745_v56, %v1440_v4 }
 0x45a   :  { %1321 = vadd.xlane.f32.xlu2 %v1294_v30 }
 0x45b   :  { %v1442_v13 = vmul.f32 0.5, %v1441_v44  ;;  %v1243_v35 = vpop.xlane.xlu0 %1242  ;;  %v1239_v22 = vpop.xlane.xlu1 %1238 }
 0x45c   :  { %v1261_v14 = vmul.f32 %v1239_v22, %v8198_v28  ;;  %v1263_v17 = vmul.f32 %v1243_v35, %v8198_v28 }
 0x45d   :  { %v1443_v20 = vsub.f32 1.5, %v1442_v13 }
 0x45e   :  { %v7747_v8 = vpop.eup %7746  ;;  %v9278_v37 = vsub.f32 %v9181_v51, %v1261_v14  ;;  %v9286_v45 = vsub.f32 %v9184_v34, %v1263_v17 }
 0x45f   :  { %v1444_v39 = vmul.f32 %v7745_v56, %v1443_v20  ;;  %v1450_v33 = vmul.f32 %v7747_v8, %v1360_v0  ;;  %vm1456_vm8 = vweird.f32 %v7747_v8 }
 0x460   :  { %v1295_v55 = vmul.f32 %v9278_v37, %v9278_v37  ;;  %v1297_v24 = vmul.f32 %v9286_v45, %v9286_v45  ;;  %vm1457_vm10 = vmor %vm1455_vm9, %vm1456_vm8 }
 0x461   :  { %v1448_v18 = vsel %vm1447_vm7, %v7745_v56, %v1444_v39  ;;  %v1451_v43 = vmul.f32 %v7747_v8, %v1450_v33  ;;  %v8046_v33 = vld [vmem:[%s12218_s10 + $0x8] sm:$0xff] }
 0x462   :  { %v1546_v52 = vmul.f32 %v1448_v18, %v9113_v21  ;;  %1323 = vadd.xlane.f32.xlu2 %v1295_v55  ;;  %v9318_v17 = vperm.slane %v8046_v33, 3 }
 0x463   :  { %v1452_v62 = vmul.f32 0.5, %v1451_v43  ;;  %v1245_v49 = vpop.xlane.xlu0 %1244 }
 0x464   :  { %v1264_v5 = vmul.f32 %v1245_v49, %v8198_v28  ;;  %v1564_v63 = vmul.f32 %v9174_v54, %v1546_v52 }
 0x465   :  { %v1453_v61 = vsub.f32 1.5, %v1452_v62  ;;  %v9321_v62 = vperm.slane %v8046_v33, 4 }
 0x466   :  { %v9291_v10 = vsub.f32 %v9200_v58, %v1264_v5  ;;  %v1582_v21 = vadd.f32 %v9192_v2, %v1564_v63 }
 0x467   :  { %v1454_v7 = vmul.f32 %v7747_v8, %v1453_v61 }
 0x468   :  { %v1298_v53 = vmul.f32 %v9291_v10, %v9291_v10  ;;  %v1595_v1 = vpack.c.bf16 %v1582_v21, %v1581_v32 }
 0x469   :  { %v1458_v25 = vsel %vm1457_vm10, %v7747_v8, %v1454_v7 }
 0x46a   :  { %1327 = vadd.xlane.f32.xlu2 %v1297_v24  ;;  %1329 = vadd.xlane.f32.xlu0 %v1298_v53  ;;  %v1547_v3 = vmul.f32 %v1458_v25, %v9142_v50 }
 0x46b   :  { %1785 = vmatmul.bf16.gmra.mxu0 %v1595_v1  ;;  %1844 = vmatmul.bf16.gmra.mxu1 %v1595_v1 }
 0x46c   :  { %1903 = vmatmul.bf16.gmra.mxu2 %v1595_v1  ;;  %v1565_v56 = vmul.f32 %v9174_v54, %v1547_v3 }
 0x46d   :  { %v1771_v6 = vpop.f32.mrf.mxu0 }
 0x46e   :  { %v1830_v23 = vpop.f32.mrf.mxu1  ;;  %v1583_v48 = vadd.f32 %v9192_v2, %v1565_v56 }
 0x46f   :  { %v1949_v56 = vadd.f32 %v9318_v17, %v1830_v23 }
 0x470   :  { %v1596_v30 = vpack.c.bf16 %v9258_v60, %v1583_v48 }
 0x473   :  { %v1320_v0 = vpop.xlane.xlu1 %1319 }
 0x475   :  { %v1773_v1 = vpop.f32.mrf.mxu0 }
 0x476   :  { %v1832_v4 = vpop.f32.mrf.mxu1 }
 0x477   :  { %v1950_v25 = vadd.f32 %v9318_v17, %v1832_v4 }
 0x479   :  { %v1954_v48 = vpack.c.bf16 %v1950_v25, %v1949_v56 }
 0x47b   :  { %1790 = vmatmul.bf16.gmra.mxu0 %v1596_v30  ;;  %1849 = vmatmul.bf16.gmra.mxu1 %v1596_v30  ;;  %v1247_v44 = vpop.xlane.xlu1 %1246 }
 0x47c   :  { %1908 = vmatmul.bf16.gmra.mxu2 %v1596_v30  ;;  %v1265_v40 = vmul.f32 %v1247_v44, %v8198_v28  ;;  %v9331_v30 = vperm.slane %v8046_v33, 2 }
 0x47e   :  { %v9305_v13 = vsub.f32 %v9249_v19, %v1265_v40  ;;  %v1835_v35 = vpop.f32.mrf.mxu1  ;;  %v1941_v44 = vadd.f32 %v9331_v30, %v1773_v1  ;;  %v1940_v40 = vadd.f32 %v9331_v30, %v1771_v6 }
 0x47f   :  { %v1951_v61 = vadd.f32 %v9318_v17, %v1835_v35  ;;  %v1776_v35 = vpop.f32.mrf.mxu0 }
 0x480   :  { %v1299_v50 = vmul.f32 %v9305_v13, %v9305_v13  ;;  %v1942_v4 = vadd.f32 %v9331_v30, %v1776_v35 }
 0x482   :  { %1331 = vadd.xlane.f32.xlu1 %v1299_v50  ;;  %v1945_v50 = vpack.c.bf16 %v1941_v44, %v1940_v40 }
 0x483   :  { %v1249_v22 = vpop.xlane.xlu1 %1248 }
 0x484   :  { %v1266_v14 = vmul.f32 %v1249_v22, %v8198_v28 }
 0x485   :  { %v1894_v20 = vpop.f32.mrf.mxu2 }
 0x486   :  { %v9311_v8 = vsub.f32 %v9261_v41, %v1266_v14  ;;  %v1837_v26 = vpop.f32.mrf.mxu1  ;;  %v1960_v53 = vadd.f32 %v9321_v62, %v1894_v20  ;;  %v1344_v20 = vmul.f32 %v1320_v0, %v8198_v28 }
 0x487   :  { %v1952_v49 = vadd.f32 %v9318_v17, %v1837_v26  ;;  %v1778_v22 = vpop.f32.mrf.mxu0 }
 0x488   :  { %v1300_v39 = vmul.f32 %v9311_v8, %v9311_v8  ;;  %v1943_v14 = vadd.f32 %v9331_v30, %v1778_v22  ;;  %v1361_v26 = vadd.f32 1e-06, %v1344_v20 }
 0x489   :  { %v1955_v21 = vpack.c.bf16 %v1952_v49, %v1951_v61 }
 0x48a   :  { %1333 = vadd.xlane.f32.xlu2 %v1300_v39  ;;  %v1946_v23 = vpack.c.bf16 %v1943_v14, %v1942_v4  ;;  %7748 = vrsqrt.f32 %v1361_v26  ;;  %vm1465_vm13 = vweird.f32 %v1361_v26 }
 0x48d   :  { %v1896_v55 = vpop.f32.mrf.mxu2 }
 0x48e   :  { %v1840_v18 = vpop.f32.mrf.mxu1  ;;  %v1961_v7 = vadd.f32 %v9321_v62, %v1896_v55  ;;  %v1326_v55 = vpop.xlane.xlu0 %1325 }
 0x48f   :  { %v1953_v43 = vadd.f32 %v9318_v17, %v1840_v18  ;;  %v1781_v39 = vpop.f32.mrf.mxu0 }
 0x490   :  { %v1964_v3 = vpack.c.bf16 %v1961_v7, %v1960_v53  ;;  %v1944_v33 = vadd.f32 %v9331_v30, %v1781_v39  ;;  %v7749_v18 = vpop.eup %7748 }
 0x491   :  { %v1956_v52 = vpack.c.bf16 %v1953_v43, %v1953_v43  ;;  %v1347_v43 = vmul.f32 %v1326_v55, %v8198_v28  ;;  %v1460_v6 = vmul.f32 %v7749_v18, %v1361_v26  ;;  %vm1466_vm12 = vweird.f32 %v7749_v18 }
 0x492   :  { %vm1467_vm15 = vmor %vm1465_vm13, %vm1466_vm12 }
 0x493   :  { %1971 = vmatpush.bf16.xpose.msrb.mxu3 %v1956_v52  ;;  %v1947_v52 = vpack.c.bf16 %v1944_v33, %v1944_v33  ;;  %v9340_v49 = vadd.f32 1e-06, %v1347_v43 }
 0x495   :  { %v1899_v5 = vpop.f32.mrf.mxu2  ;;  %7750 = vrsqrt.f32 %v9340_v49  ;;  %vm1495_vm7 = vweird.f32 %v9340_v49 }
 0x496   :  { %v1962_v63 = vadd.f32 %v9321_v62, %v1899_v5  ;;  %v1461_v5 = vmul.f32 %v7749_v18, %v1460_v6  ;;  %v9352_v39 = vpop.f32.mrf.mxu1 }
 0x498   :  { %v1965_v32 = vpack.c.bf16 %v1962_v63, %v1962_v63 }
 0x49a   :  { %v2070_v24 = vsel %vm2068_vm11, %v1965_v32, 0  ;;  %v1462_v32 = vmul.f32 0.5, %v1461_v5 }
 0x49b   :  { %2077 = vmatpush.bf16.msra.mxu0 %v2070_v24  ;;  %1972 = vmatpush.bf16.xpose.msrb.mxu3 %v1955_v21  ;;  %v9344_v24 = vpop.eup %7750 }
 0x49c   :  { %v1463_v21 = vsub.f32 1.5, %v1462_v32  ;;  %v1490_v56 = vmul.f32 %v9344_v24, %v9340_v49  ;;  %vm1496_vm4 = vweird.f32 %v9344_v24 }
 0x49d   :  { %vm1497_vm8 = vmor %vm1495_vm7, %vm1496_vm4  ;;  %vm2000_vm7 = vcmask 326656  }
 0x49e   :  { %v1491_v35 = vmul.f32 %v9344_v24, %v1490_v56 }
 0x49f   :  { %2078 = vmatpush.bf16.msra.mxu0 %v1964_v3  ;;  %v1464_v3 = vmul.f32 %v7749_v18, %v1463_v21  ;;  %v9357_v21 = vpop.f32.mrf.mxu2 }
 0x4a0   :  { %v1492_v55 = vmul.f32 0.5, %v1491_v35 }
 0x4a1   :  { %v1468_v40 = vsel %vm1467_vm15, %v7749_v18, %v1464_v3 }
 0x4a3   :  { %1973 = vmatpush.bf16.xpose.msrb.mxu3 %v1954_v48 }
 0x4aa   :  { %1974 = vmatmul.bf16.vlgmr.msrb.gmra.mxu3 %v1945_v50 }
 0x4ba   :  { %1979 = vmatmul.bf16.gmra.mxu3 %v1946_v23  ;;  %v1548_v23 = vmul.f32 %v1468_v40, %v9227_v29 }
 0x4bc   :  { %v1566_v5 = vmul.f32 %v9174_v54, %v1548_v23 }
 0x4ca   :  { %1984 = vmatmul.bf16.gmra.mxu3 %v1947_v52 }
 0x4cd   :  { %v1322_v63 = vpop.xlane.xlu2 %1321 }
 0x4ce   :  { %v1345_v0 = vmul.f32 %v1322_v63, %v8198_v28  ;;  %v1493_v63 = vsub.f32 1.5, %v1492_v55 }
 0x4d0   :  { %v1362_v61 = vadd.f32 1e-06, %v1345_v0  ;;  %v1494_v56 = vmul.f32 %v9344_v24, %v1493_v63 }
 0x4d2   :  { %7752 = vrsqrt.f32 %v1362_v61  ;;  %vm1475_vm1 = vweird.f32 %v1362_v61 }
 0x4d5   :  { %v1324_v7 = vpop.xlane.xlu2 %1323 }
 0x4d6   :  { %v1346_v53 = vmul.f32 %v1324_v7, %v8198_v28 }
 0x4d8   :  { %v7753_v1 = vpop.eup %7752  ;;  %v1363_v25 = vadd.f32 1e-06, %v1346_v53 }
 0x4d9   :  { %v1470_v48 = vmul.f32 %v7753_v1, %v1362_v61  ;;  %vm1476_vm0 = vweird.f32 %v7753_v1 }
 0x4da   :  { %7754 = vrsqrt.f32 %v1363_v25  ;;  %vm1477_vm2 = vmor %vm1475_vm1, %vm1476_vm0  ;;  %vm1485_vm5 = vweird.f32 %v1363_v25 }
 0x4db   :  { %v1471_v44 = vmul.f32 %v7753_v1, %v1470_v48 }
 0x4dd   :  { %v1472_v50 = vmul.f32 0.5, %v1471_v44  ;;  %v1328_v22 = vpop.xlane.xlu2 %1327  ;;  %v1330_v32 = vpop.xlane.xlu0 %1329 }
 0x4de   :  { %v1348_v14 = vmul.f32 %v1328_v22, %v8198_v28  ;;  %v1349_v61 = vmul.f32 %v1330_v32, %v8198_v28 }
 0x4df   :  { %v1473_v4 = vsub.f32 1.5, %v1472_v50 }
 0x4e0   :  { %v7755_v20 = vpop.eup %7754  ;;  %v1365_v33 = vadd.f32 1e-06, %v1348_v14  ;;  %v9367_v50 = vadd.f32 1e-06, %v1349_v61  ;;  %v1498_v14 = vsel %vm1497_vm8, %v9344_v24, %v1494_v56 }
 0x4e1   :  { %v1474_v43 = vmul.f32 %v7753_v1, %v1473_v4  ;;  %v1480_v26 = vmul.f32 %v7755_v20, %v1363_v25  ;;  %vm1486_vm3 = vweird.f32 %v7755_v20  ;;  %v1551_v25 = vmul.f32 %v1498_v14, %v9245_v59 }
 0x4e2   :  { %7756 = vrsqrt.f32 %v1365_v33  ;;  %vm1487_vm6 = vmor %vm1485_vm5, %vm1486_vm3  ;;  %vm1505_vm10 = vweird.f32 %v1365_v33 }
 0x4e3   :  { %v1478_v18 = vsel %vm1477_vm2, %v7753_v1, %v1474_v43  ;;  %v1481_v52 = vmul.f32 %v7755_v20, %v1480_v26  ;;  %v1584_v1 = vadd.f32 %v9192_v2, %v1566_v5  ;;  %7758 = vrsqrt.f32 %v9367_v50 }
 0x4e4   :  { %v1549_v6 = vmul.f32 %v1478_v18, %v9271_v12  ;;  %v1569_v26 = vmul.f32 %v9174_v54, %v1551_v25  ;;  %vm1515_vm2 = vweird.f32 %v9367_v50 }
 0x4e5   :  { %v1482_v0 = vmul.f32 0.5, %v1481_v52 }
 0x4e6   :  { %v1567_v29 = vmul.f32 %v9174_v54, %v1549_v6 }
 0x4e7   :  { %v1483_v7 = vsub.f32 1.5, %v1482_v0  ;;  %v1587_v0 = vadd.f32 %v9192_v2, %v1569_v26 }
 0x4e8   :  { %v9360_v53 = vpop.f32.mrf.mxu1  ;;  %v1585_v3 = vadd.f32 %v9192_v2, %v1567_v29  ;;  %v7757_v12 = vpop.eup %7756 }
 0x4e9   :  { %v1484_v48 = vmul.f32 %v7755_v20, %v1483_v7  ;;  %v1500_v44 = vmul.f32 %v7757_v12, %v1365_v33  ;;  %v9377_v52 = vpop.eup %7758  ;;  %vm1506_vm9 = vweird.f32 %v7757_v12 }
 0x4ea   :  { %v1597_v40 = vpack.c.bf16 %v1585_v3, %v1584_v1  ;;  %v1510_v32 = vmul.f32 %v9377_v52, %v9367_v50  ;;  %vm1507_vm12 = vmor %vm1505_vm10, %vm1506_vm9  ;;  %vm1516_vm15 = vweird.f32 %v9377_v52 }
 0x4eb   :  { %v1488_v35 = vsel %vm1487_vm6, %v7755_v20, %v1484_v48  ;;  %v1501_v22 = vmul.f32 %v7757_v12, %v1500_v44  ;;  %vm1517_vm3 = vmor %vm1515_vm2, %vm1516_vm15 }
 0x4ec   :  { %1795 = vmatmul.bf16.gmra.mxu0 %v1597_v40  ;;  %1854 = vmatmul.bf16.gmra.mxu1 %v1597_v40  ;;  %v1550_v4 = vmul.f32 %v1488_v35, %v9278_v37  ;;  %v1511_v61 = vmul.f32 %v9377_v52, %v1510_v32 }
 0x4ed   :  { %1913 = vmatmul.bf16.gmra.mxu2 %v1597_v40  ;;  %v1502_v23 = vmul.f32 0.5, %v1501_v22 }
 0x4ee   :  { %v1568_v20 = vmul.f32 %v9174_v54, %v1550_v4  ;;  %v1512_v33 = vmul.f32 0.5, %v1511_v61 }
 0x4ef   :  { %v9371_v55 = vpop.f32.mrf.mxu2  ;;  %v1503_v43 = vsub.f32 1.5, %v1502_v23 }
 0x4f0   :  { %v1847_v49 = vpop.f32.mrf.mxu1  ;;  %v1586_v37 = vadd.f32 %v9192_v2, %v1568_v20  ;;  %v1513_v25 = vsub.f32 1.5, %v1512_v33 }
 0x4f1   :  { %v1504_v6 = vmul.f32 %v7757_v12, %v1503_v43 }
 0x4f2   :  { %v1598_v29 = vpack.c.bf16 %v1587_v0, %v1586_v37 }
 0x4f3   :  { %v1508_v7 = vsel %vm1507_vm12, %v7757_v12, %v1504_v6  ;;  %v1514_v6 = vmul.f32 %v9377_v52, %v1513_v25 }
 0x4f4   :  { %v1552_v3 = vmul.f32 %v1508_v7, %v9286_v45 }
 0x4f5   :  { %v1332_v18 = vpop.xlane.xlu1 %1331 }
 0x4f6   :  { %v1350_v24 = vmul.f32 %v1332_v18, %v8198_v28  ;;  %v1570_v12 = vmul.f32 %v9174_v54, %v1552_v3 }
 0x4f7   :  { %v1906_v5 = vpop.f32.mrf.mxu2 }
 0x4f8   :  { %v1367_v63 = vadd.f32 1e-06, %v1350_v24  ;;  %v1850_v59 = vpop.f32.mrf.mxu1  ;;  %v1588_v45 = vadd.f32 %v9192_v2, %v1570_v12  ;;  %v2113_v33 = vadd.f32 %v9321_v62, %v1906_v5  ;;  %v2104_v12 = vadd.f32 %v9318_v17, %v9360_v53 }
 0x4f9   :  { %v2106_v24 = vadd.f32 %v9318_v17, %v1850_v59  ;;  %v2103_v5 = vadd.f32 %v9318_v17, %v9352_v39 }
 0x4fa   :  { %7760 = vrsqrt.f32 %v1367_v63  ;;  %vm1525_vm0 = vweird.f32 %v1367_v63 }
 0x4fb   :  { %v2108_v25 = vpack.c.bf16 %v2104_v12, %v2103_v5 }
 0x4fc   :  { %1800 = vmatmul.bf16.gmra.mxu0 %v1598_v29  ;;  %1859 = vmatmul.bf16.gmra.mxu1 %v1598_v29 }
 0x4fd   :  { %1918 = vmatmul.bf16.gmra.mxu2 %v1598_v29  ;;  %v1334_v1 = vpop.xlane.xlu2 %1333  ;;  %v2105_v29 = vadd.f32 %v9318_v17, %v1847_v49 }
 0x4fe   :  { %v1351_v56 = vmul.f32 %v1334_v1, %v8198_v28  ;;  %v1599_v1 = vpack.c.bf16 %v1588_v45, %v9258_v60 }
 0x4ff   :  { %v1909_v48 = vpop.f32.mrf.mxu2 }
 0x500   :  { %v7761_v44 = vpop.eup %7760  ;;  %v9387_v40 = vadd.f32 1e-06, %v1351_v56  ;;  %v1852_v35 = vpop.f32.mrf.mxu1  ;;  %v2114_v56 = vadd.f32 %v9321_v62, %v1909_v48  ;;  %v2112_v48 = vadd.f32 %v9321_v62, %v9371_v55 }
 0x501   :  { %v1520_v22 = vmul.f32 %v7761_v44, %v1367_v63  ;;  %v2107_v14 = vadd.f32 %v9318_v17, %v1852_v35  ;;  %vm1526_vm13 = vweird.f32 %v7761_v44  ;;  %v2109_v63 = vpack.c.bf16 %v2106_v24, %v2105_v29  ;;  %v1783_v24 = vpop.f32.mrf.mxu0 }
 0x502   :  { %7762 = vrsqrt.f32 %v9387_v40  ;;  %vm9399_vm1 = vmor %vm1525_vm0, %vm1526_vm13  ;;  %v1518_v35 = vsel %vm1517_vm3, %v9377_v52, %v1514_v6  ;;  %v2111_v52 = vadd.f32 %v9321_v62, %v9357_v21  ;;  %vm1535_vm5 = vweird.f32 %v9387_v40 }
 0x503   :  { %v1521_v4 = vmul.f32 %v7761_v44, %v1520_v22  ;;  %v2110_v23 = vpack.c.bf16 %v2107_v14, %v2107_v14  ;;  %v2117_v22 = vpack.c.bf16 %v2114_v56, %v2113_v33  ;;  %v1553_v14 = vmul.f32 %v1518_v35, %v9291_v10 }
 0x504   :  { %v2095_v7 = vadd.f32 %v9331_v30, %v1783_v24 }
 0x505   :  { %v1522_v20 = vmul.f32 0.5, %v1521_v4  ;;  %2124 = vmatpush.bf16.xpose.msra.mxu1 %v2110_v23  ;;  %v2116_v4 = vpack.c.bf16 %v2112_v48, %v2111_v52  ;;  %v1571_v55 = vmul.f32 %v9174_v54, %v1553_v14 }
 0x507   :  { %v1523_v43 = vsub.f32 1.5, %v1522_v20  ;;  %v1911_v26 = vpop.f32.mrf.mxu2  ;;  %v1589_v53 = vadd.f32 %v9192_v2, %v1571_v55 }
 0x508   :  { %v7763_v18 = vpop.eup %7762  ;;  %v2115_v37 = vadd.f32 %v9321_v62, %v1911_v26 }
 0x509   :  { %v1524_v0 = vmul.f32 %v7761_v44, %v1523_v43  ;;  %v1530_v32 = vmul.f32 %v7763_v18, %v9387_v40  ;;  %vm1536_vm4 = vweird.f32 %v7763_v18 }
 0x50a   :  { %v2118_v61 = vpack.c.bf16 %v2115_v37, %v2115_v37  ;;  %vm1537_vm6 = vmor %vm1535_vm5, %vm1536_vm4  ;;  %v51_v37 = vld [vmem:[%s12218_s10 + $0x10] sm:$0xff] }
 0x50b   :  { %v1528_v59 = vsel %vm9399_vm1, %v7761_v44, %v1524_v0  ;;  %v1531_v3 = vmul.f32 %v7763_v18, %v1530_v32  ;;  %v9435_v40 = vperm.slane %v51_v37, 4  ;;  %v1786_v32 = vpop.f32.mrf.mxu0 }
 0x50c   :  { %v2220_v49 = vsel %vm2068_vm11, %v2118_v61, 0  ;;  %1805 = vmatmul.bf16.gmra.mxu0 %v1599_v1  ;;  %1864 = vmatmul.bf16.gmra.mxu1 %v1599_v1  ;;  %v1554_v50 = vmul.f32 %v1528_v59, %v9305_v13  ;;  %v2096_v29 = vadd.f32 %v9331_v30, %v1786_v32 }
 0x50d   :  { %2227 = vmatpush.bf16.msra.mxu3 %v2220_v49  ;;  %1923 = vmatmul.bf16.gmra.mxu2 %v1599_v1  ;;  %v1532_v44 = vmul.f32 0.5, %v1531_v3 }
 0x50e   :  { %2125 = vmatpush.bf16.xpose.msra.mxu1 %v2109_v63  ;;  %v1572_v13 = vmul.f32 %v9174_v54, %v1554_v50  ;;  %v2100_v59 = vpack.c.bf16 %v2096_v29, %v2095_v7 }
 0x50f   :  { %v1533_v23 = vsub.f32 1.5, %v1532_v44 }
 0x510   :  { %v1590_v10 = vadd.f32 %v9192_v2, %v1572_v13 }
 0x511   :  { %2228 = vmatpush.bf16.msra.mxu3 %v2117_v22  ;;  %v1534_v20 = vmul.f32 %v7763_v18, %v1533_v23 }
 0x512   :  { %v1600_v21 = vpack.c.bf16 %v1590_v10, %v1589_v53 }
 0x513   :  { %v1538_v39 = vsel %vm1537_vm6, %v7763_v18, %v1534_v20  ;;  %v1788_v1 = vpop.f32.mrf.mxu0 }
 0x514   :  { %v1555_v45 = vmul.f32 %v1538_v39, %v9311_v8  ;;  %v2097_v22 = vadd.f32 %v9331_v30, %v1788_v1 }
 0x515   :  { %2229 = vmatpush.bf16.msra.mxu3 %v2116_v4 }
 0x516   :  { %2126 = vmatpush.bf16.xpose.msra.mxu1 %v2108_v25  ;;  %v1573_v43 = vmul.f32 %v9174_v54, %v1555_v45 }
 0x518   :  { %v1591_v26 = vadd.f32 %v9192_v2, %v1573_v43 }
 0x51a   :  { %v1601_v6 = vpack.c.bf16 %v9258_v60, %v1591_v26 }
 0x51b   :  { %v1791_v33 = vpop.f32.mrf.mxu0 }
 0x51c   :  { %1810 = vmatmul.bf16.gmra.mxu0 %v1600_v21  ;;  %1869 = vmatmul.bf16.gmra.mxu1 %v1600_v21  ;;  %v2098_v48 = vadd.f32 %v9331_v30, %v1791_v33 }
 0x51d   :  { %1928 = vmatmul.bf16.gmra.mxu2 %v1600_v21 }
 0x523   :  { %v1793_v23 = vpop.f32.mrf.mxu0 }
 0x524   :  { %v2099_v55 = vadd.f32 %v9331_v30, %v1793_v23 }
 0x526   :  { %v2102_v10 = vpack.c.bf16 %v2099_v55, %v2099_v55 }
 0x52c   :  { %1815 = vmatmul.bf16.gmra.mxu0 %v1601_v6  ;;  %1874 = vmatmul.bf16.gmra.mxu1 %v1601_v6 }
 0x52d   :  { %1933 = vmatmul.bf16.gmra.mxu2 %v1601_v6  ;;  %v1975_v18 = vpop.f32.mrf.mxu3 }
 0x52e   :  { %v1989_v0 = vmul.f32 0.088388346, %v1975_v18 }
 0x530   :  { %v9438_v54 = vadd.f32 %v9435_v40, %v1989_v0 }
 0x532   :  { %v2001_v2 = vsel %vm2000_vm7, %v9438_v54, -inf }
 0x533   :  { %2002 = vmax.xlane.f32.xlu0 %v2001_v2 }
 0x535   :  { %v1977_v8 = vpop.f32.mrf.mxu3 }
 0x536   :  { %v1990_v60 = vmul.f32 0.088388346, %v1977_v8 }
 0x538   :  { %v9445_v61 = vadd.f32 %v9435_v40, %v1990_v60 }
 0x53a   :  { %v2004_v3 = vsel %vm2000_vm7, %v9445_v61, -inf }
 0x53b   :  { %2005 = vmax.xlane.f32.xlu1 %v2004_v3 }
 0x53c   :  { %1888 = vmatmul.bf16.vlgmr.msrb.gmra.mxu0 %v9205_v38  ;;  %2127 = vmatmul.bf16.vlgmr.msra.gmra.mxu1 %v2100_v59  ;;  %v2101_v38 = vpack.c.bf16 %v2098_v48, %v2097_v22 }
 0x53d   :  { %v1980_v56 = vpop.f32.mrf.mxu3 }
 0x53e   :  { %v1991_v63 = vmul.f32 0.088388346, %v1980_v56 }
 0x540   :  { %v9451_v49 = vadd.f32 %v9435_v40, %v1991_v63 }
 0x542   :  { %v2007_v35 = vsel %vm2000_vm7, %v9451_v49, -inf }
 0x543   :  { %2008 = vmax.xlane.f32.xlu2 %v2007_v35 }
 0x545   :  { %v1982_v50 = vpop.f32.mrf.mxu3 }
 0x546   :  { %v1992_v44 = vmul.f32 0.088388346, %v1982_v50 }
 0x548   :  { %v9458_v14 = vadd.f32 %v9435_v40, %v1992_v44 }
 0x54a   :  { %v2010_v12 = vsel %vm2000_vm7, %v9458_v14, -inf }
 0x54b   :  { %2011 = vmax.xlane.f32.xlu0 %v2010_v12 }
 0x54c   :  { %2132 = vmatmul.bf16.gmra.mxu1 %v2101_v38 }
 0x54d   :  { %v1985_v52 = vpop.f32.mrf.mxu3 }
 0x54e   :  { %v1993_v5 = vmul.f32 0.088388346, %v1985_v52 }
 0x550   :  { %v9463_v13 = vadd.f32 %v9435_v40, %v1993_v5 }
 0x552   :  { %v2013_v4 = vsel %vm2000_vm7, %v9463_v13, -inf }
 0x553   :  { %2014 = vmax.xlane.f32.xlu1 %v2013_v4 }
 0x555   :  { %v1987_v25 = vpop.f32.mrf.mxu3 }
 0x55c   :  { %2137 = vmatmul.bf16.gmra.mxu1 %v2102_v10 }
 0x569   :  { %v9468_v20 = vpop.f32.mrf.mxu0  ;;  %v9470_v53 = vpop.f32.mrf.mxu1 }
 0x570   :  { %v1914_v21 = vpop.f32.mrf.mxu2 }
 0x571   :  { %v9472_v39 = vpop.f32.mrf.mxu0  ;;  %v9474_v45 = vpop.f32.mrf.mxu1  ;;  %v2261_v48 = vadd.f32 %v9321_v62, %v1914_v21 }
 0x578   :  { %v1916_v43 = vpop.f32.mrf.mxu2 }
 0x579   :  { %v9476_v26 = vpop.f32.mrf.mxu0  ;;  %v9478_v24 = vpop.f32.mrf.mxu1  ;;  %v2262_v63 = vadd.f32 %v9321_v62, %v1916_v43 }
 0x57b   :  { %v2266_v44 = vpack.c.bf16 %v2262_v63, %v2261_v48 }
 0x580   :  { %v1919_v37 = vpop.f32.mrf.mxu2 }
 0x581   :  { %v9480_v6 = vpop.f32.mrf.mxu0  ;;  %v9482_v18 = vpop.f32.mrf.mxu1  ;;  %v2263_v56 = vadd.f32 %v9321_v62, %v1919_v37 }
 0x588   :  { %v1921_v0 = vpop.f32.mrf.mxu2 }
 0x589   :  { %v9484_v32 = vpop.f32.mrf.mxu0  ;;  %v1865_v2 = vpop.f32.mrf.mxu1  ;;  %v2264_v59 = vadd.f32 %v9321_v62, %v1921_v0 }
 0x58a   :  { %v2257_v63 = vadd.f32 %v9318_v17, %v1865_v2 }
 0x58b   :  { %v2267_v35 = vpack.c.bf16 %v2264_v59, %v2263_v56 }
 0x590   :  { %v1924_v8 = vpop.f32.mrf.mxu2 }
 0x591   :  { %v2265_v29 = vadd.f32 %v9321_v62, %v1924_v8  ;;  %v9487_v60 = vpop.f32.mrf.mxu0  ;;  %v1867_v7 = vpop.f32.mrf.mxu1 }
 0x593   :  { %v2268_v1 = vpack.c.bf16 %v2265_v29, %v2265_v29 }
 0x595   :  { %v2370_v3 = vsel %vm2068_vm11, %v2268_v1, 0 }
 0x596   :  { %2377 = vmatpush.bf16.msrb.mxu1 %v2370_v3 }
 0x599   :  { %v9493_v33 = vpop.f32.mrf.mxu0  ;;  %v1870_v50 = vpop.f32.mrf.mxu1 }
 0x59a   :  { %2378 = vmatpush.bf16.msrb.mxu1 %v2267_v35  ;;  %v2404_v3 = vadd.f32 %v9318_v17, %v1870_v50 }
 0x59e   :  { %2379 = vmatpush.bf16.msrb.mxu1 %v2266_v44 }
 0x5a1   :  { %v9496_v22 = vpop.f32.mrf.mxu0  ;;  %v1872_v38 = vpop.f32.mrf.mxu1 }
 0x5a2   :  { %v2405_v43 = vadd.f32 %v9318_v17, %v1872_v38  ;;  %v2403_v38 = vadd.f32 %v9318_v17, %v1867_v7 }
 0x5a6   :  { %v2003_v37 = vpop.xlane.xlu0 %2002 }
 0x5a7   :  { %v2016_v1 = vsub.f32 %v9438_v54, %v2003_v37 }
 0x5a9   :  { %v9498_v12 = vpop.f32.mrf.mxu0  ;;  %v1875_v52 = vpop.f32.mrf.mxu1  ;;  %v2021_v35 = vmul.f32 1.442695, %v2016_v1 }
 0x5aa   :  { %v2406_v55 = vadd.f32 %v9318_v17, %v1875_v52 }
 0x5ab   :  { %7764 = vpow2.f32 %v2021_v35 }
 0x5ac   :  { %v2409_v8 = vpack.c.bf16 %v2406_v55, %v2405_v43  ;;  %v2260_v43 = vpack.c.bf16 %v2257_v63, %v2257_v63 }
 0x5ae   :  { %v2006_v56 = vpop.xlane.xlu1 %2005 }
 0x5af   :  { %v2017_v55 = vsub.f32 %v9445_v61, %v2006_v56  ;;  %v2256_v61 = vadd.f32 %v9318_v17, %v9482_v18  ;;  %v2254_v18 = vadd.f32 %v9318_v17, %v9474_v45 }
 0x5b1   :  { %v9500_v5 = vpop.f32.mrf.mxu0  ;;  %v1877_v4 = vpop.f32.mrf.mxu1 }
 0x5b2   :  { %v2407_v23 = vadd.f32 %v9318_v17, %v1877_v4 }
 0x5b4   :  { %v2410_v25 = vpack.c.bf16 %v2407_v23, %v2407_v23 }
 0x5b6   :  { %2424 = vmatpush.bf16.xpose.msrb.mxu3 %v2410_v25  ;;  %v2009_v52 = vpop.xlane.xlu2 %2008  ;;  %v2408_v25 = vpack.c.bf16 %v2404_v3, %v2403_v38 }
 0x5b7   :  { %v2018_v2 = vsub.f32 %v9451_v49, %v2009_v52  ;;  %v2255_v49 = vadd.f32 %v9318_v17, %v9478_v24 }
 0x5b9   :  { %v1889_v10 = vpop.f32.mrf.mxu0  ;;  %v2128_v21 = vpop.f32.mrf.mxu1  ;;  %v2025_v37 = vmul.f32 1.442695, %v2018_v2  ;;  %v2259_v63 = vpack.c.bf16 %v2256_v61, %v2255_v49 }
 0x5ba   :  { %v2142_v0 = vmul.f32 0.088388346, %v2128_v21  ;;  %v1958_v4 = vadd.f32 %v9321_v62, %v1889_v10  ;;  %v2023_v10 = vmul.f32 1.442695, %v2017_v55 }
 0x5bc   :  { %v9506_v29 = vadd.f32 %v2142_v0, %v9435_v40  ;;  %7766 = vpow2.f32 %v2023_v10 }
 0x5bd   :  { %7768 = vpow2.f32 %v2025_v37 }
 0x5be   :  { %2425 = vmatpush.bf16.xpose.msrb.mxu3 %v2409_v8  ;;  %v2152_v59 = vsel %vm2000_vm7, %v9506_v29, -inf  ;;  %v2012_v8 = vpop.xlane.xlu0 %2011 }
 0x5bf   :  { %2153 = vmax.xlane.f32.xlu2 %v2152_v59  ;;  %v9525_v59 = vpop.eup %7764  ;;  %v2019_v56 = vsub.f32 %v9458_v14, %v2012_v8  ;;  %v2253_v14 = vadd.f32 %v9318_v17, %v9470_v53 }
 0x5c0   :  { %v2031_v35 = vsel %vm2000_vm7, %v9525_v59, 0.0 }
 0x5c1   :  { %v1891_v48 = vpop.f32.mrf.mxu0  ;;  %v2130_v44 = vpop.f32.mrf.mxu1 }
 0x5c2   :  { %v1959_v54 = vadd.f32 %v9321_v62, %v1891_v48  ;;  %v2143_v23 = vmul.f32 0.088388346, %v2130_v44  ;;  %v2027_v44 = vmul.f32 1.442695, %v2019_v56  ;;  %v9536_v38 = vpop.eup %7766 }
 0x5c4   :  { %v1963_v21 = vpack.c.bf16 %v1959_v54, %v1958_v4  ;;  %v9518_v50 = vadd.f32 %v2143_v23, %v9435_v40  ;;  %v9538_v4 = vpop.eup %7768  ;;  %7770 = vpow2.f32 %v2027_v44 }
 0x5c5   :  { %v2037_v45 = vsel %vm2000_vm7, %v9538_v4, 0.0 }
 0x5c6   :  { %2079 = vmatpush.bf16.msra.mxu0 %v1963_v21  ;;  %2426 = vmatpush.bf16.xpose.msrb.mxu3 %v2408_v25  ;;  %v2155_v7 = vsel %vm2000_vm7, %v9518_v50, -inf  ;;  %v2015_v54 = vpop.xlane.xlu1 %2014  ;;  %v2258_v25 = vpack.c.bf16 %v2254_v18, %v2253_v14  ;;  %v2034_v21 = vsel %vm2000_vm7, %v9536_v38, 0.0 }
 0x5c7   :  { %2156 = vmax.xlane.f32.xlu0 %v2155_v7  ;;  %v2020_v55 = vsub.f32 %v9463_v13, %v2015_v54 }
 0x5c9   :  { %v2133_v0 = vpop.f32.mrf.mxu1  ;;  %v2029_v53 = vmul.f32 1.442695, %v2020_v55 }
 0x5ca   :  { %2274 = vmatpush.bf16.xpose.msrb.mxu0 %v2260_v43  ;;  %v2144_v1 = vmul.f32 0.088388346, %v2133_v0  ;;  %v9549_v7 = vpop.eup %7770 }
 0x5cb   :  { %7772 = vpow2.f32 %v2029_v53  ;;  %v2040_v13 = vsel %vm2000_vm7, %v9549_v7, 0.0 }
 0x5cc   :  { %v2149_v3 = vadd.f32 %v2144_v1, %v9435_v40  ;;  %v1926_v1 = vpop.f32.mrf.mxu2 }
 0x5ce   :  { %v2158_v48 = vsel %vm2000_vm7, %v2149_v3, -inf }
 0x5cf   :  { %2032 = vadd.xlane.f32.xlu0 %v2031_v35  ;;  %2159 = vmax.xlane.f32.xlu1 %v2158_v48 }
 0x5d1   :  { %v2135_v24 = vpop.f32.mrf.mxu1  ;;  %v9555_v61 = vpop.eup %7772 }
 0x5d2   :  { %2275 = vmatpush.bf16.xpose.msrb.mxu0 %v2259_v63  ;;  %v2145_v52 = vmul.f32 0.088388346, %v2135_v24  ;;  %v2043_v8 = vsel %vm2000_vm7, %v9555_v61, 0.0 }
 0x5d4   :  { %v2150_v23 = vadd.f32 %v2145_v52, %v9435_v40  ;;  %v1929_v49 = vpop.f32.mrf.mxu2 }
 0x5d6   :  { %v2161_v43 = vsel %vm2000_vm7, %v2150_v23, -inf }
 0x5d7   :  { %2038 = vadd.xlane.f32.xlu0 %v2037_v45  ;;  %2035 = vadd.xlane.f32.xlu1 %v2034_v21 }
 0x5d8   :  { %2162 = vmax.xlane.f32.xlu2 %v2161_v43 }
 0x5d9   :  { %v2138_v17 = vpop.f32.mrf.mxu1 }
 0x5da   :  { %2276 = vmatpush.bf16.xpose.msrb.mxu0 %v2258_v25  ;;  %v2146_v2 = vmul.f32 0.088388346, %v2138_v17 }
 0x5dc   :  { %v2151_v10 = vadd.f32 %v2146_v2, %v9435_v40  ;;  %v1931_v48 = vpop.f32.mrf.mxu2 }
 0x5de   :  { %v2164_v37 = vsel %vm2000_vm7, %v2151_v10, -inf }
 0x5df   :  { %2041 = vadd.xlane.f32.xlu1 %v2040_v13 }
 0x5e0   :  { %2165 = vmax.xlane.f32.xlu2 %v2164_v37 }
 0x5e1   :  { %v2140_v0 = vpop.f32.mrf.mxu1 }
 0x5e4   :  { %v1934_v54 = vpop.f32.mrf.mxu2 }
 0x5e8   :  { %2044 = vadd.xlane.f32.xlu2 %v2043_v8 }
 0x5ec   :  { %v1936_v53 = vpop.f32.mrf.mxu2 }
 0x5ed   :  { %v2415_v0 = vadd.f32 %v9321_v62, %v1936_v53 }
 0x632   :  { %v2154_v56 = vpop.xlane.xlu2 %2153 }
 0x633   :  { %v2167_v63 = vsub.f32 %v9506_v29, %v2154_v56 }
 0x635   :  { %v2172_v35 = vmul.f32 1.442695, %v2167_v63  ;;  %v2418_v63 = vpack.c.bf16 %v2415_v0, %v2415_v0 }
 0x637   :  { %7774 = vpow2.f32 %v2172_v35 }
 0x63a   :  { %v2157_v18 = vpop.xlane.xlu0 %2156 }
 0x63b   :  { %v2168_v44 = vsub.f32 %v9518_v50, %v2157_v18 }
 0x63d   :  { %v9561_v24 = vpop.eup %7774  ;;  %v2174_v52 = vmul.f32 1.442695, %v2168_v44 }
 0x63e   :  { %v2182_v14 = vsel %vm2000_vm7, %v9561_v24, 0.0 }
 0x63f   :  { %7776 = vpow2.f32 %v2174_v52  ;;  %2183 = vadd.xlane.f32.xlu0 %v2182_v14 }
 0x642   :  { %v2160_v25 = vpop.xlane.xlu1 %2159  ;;  %v2033_v43 = vpop.xlane.xlu0 %2032 }
 0x643   :  { %v2169_v55 = vsub.f32 %v2149_v3, %v2160_v25 }
 0x645   :  { %v9565_v45 = vpop.eup %7776  ;;  %v2176_v29 = vmul.f32 1.442695, %v2169_v55  ;;  %v2414_v55 = vadd.f32 %v9321_v62, %v1934_v54  ;;  %v2411_v54 = vadd.f32 %v9321_v62, %v1926_v1 }
 0x646   :  { %v2185_v21 = vsel %vm2000_vm7, %v9565_v45, 0.0 }
 0x647   :  { %7778 = vpow2.f32 %v2176_v29  ;;  %2186 = vadd.xlane.f32.xlu1 %v2185_v21 }
 0x648   :  { %7780 = vrcp.f32 %v2033_v43  ;;  %v2520_v43 = vsel %vm2068_vm11, %v2418_v63, 0  ;;  %v2246_v63 = vadd.f32 %v9331_v30, %v9472_v39 }
 0x64a   :  { %v2036_v50 = vpop.xlane.xlu1 %2035  ;;  %v2039_v21 = vpop.xlane.xlu0 %2038 }
 0x64b   :  { %v2163_v17 = vpop.xlane.xlu2 %2162  ;;  %7782 = vrcp.f32 %v2036_v50 }
 0x64c   :  { %v2170_v2 = vsub.f32 %v2150_v23, %v2163_v17 }
 0x64d   :  { %v9569_v13 = vpop.eup %7778 }
 0x64e   :  { %v2178_v37 = vmul.f32 1.442695, %v2170_v2  ;;  %v2188_v3 = vsel %vm2000_vm7, %v9569_v13, 0.0  ;;  %v7781_v8 = vpop.eup %7780 }
 0x64f   :  { %2189 = vadd.xlane.f32.xlu2 %v2188_v3  ;;  %v2051_v35 = vmul.f32 %v7781_v8, %v9525_v59  ;;  %v2413_v59 = vadd.f32 %v9321_v62, %v1931_v48 }
 0x650   :  { %7784 = vpow2.f32 %v2178_v37 }
 0x651   :  { %v7783_v56 = vpop.eup %7782 }
 0x652   :  { %v2052_v18 = vmul.f32 %v7783_v56, %v9536_v38  ;;  %v2042_v52 = vpop.xlane.xlu1 %2041  ;;  %v2412_v38 = vadd.f32 %v9321_v62, %v1929_v49 }
 0x653   :  { %v2166_v44 = vpop.xlane.xlu2 %2165  ;;  %7786 = vrcp.f32 %v2042_v52 }
 0x654   :  { %v2171_v23 = vsub.f32 %v2151_v10, %v2166_v44  ;;  %v2056_v14 = vpack.c.bf16 %v2052_v18, %v2051_v35  ;;  %v2417_v10 = vpack.c.bf16 %v2414_v55, %v2413_v59  ;;  %v2416_v2 = vpack.c.bf16 %v2412_v38, %v2411_v54 }
 0x655   :  { %v2245_v35 = vadd.f32 %v9331_v30, %v9468_v20  ;;  %v2247_v18 = vadd.f32 %v9331_v30, %v9476_v26 }
 0x656   :  { %v7785_v25 = vpop.eup %7784  ;;  %v2180_v29 = vmul.f32 1.442695, %v2171_v23  ;;  %6969 = vmatmul.msk.bf16.vlgmr.msra.gmra.mxu0 %vm2000_vm7, %v2056_v14 }
 0x657   :  { %v2191_v50 = vsel %vm2000_vm7, %v7785_v25, 0.0  ;;  %2527 = vmatpush.bf16.msra.mxu0 %v2520_v43 }
 0x658   :  { %7788 = vpow2.f32 %v2180_v29  ;;  %2192 = vadd.xlane.f32.xlu0 %v2191_v50 }
 0x659   :  { %7790 = vrcp.f32 %v2039_v21  ;;  %v7787_v17 = vpop.eup %7786 }
 0x65a   :  { %v2054_v48 = vmul.f32 %v7787_v17, %v9549_v7  ;;  %v2250_v7 = vpack.c.bf16 %v2246_v63, %v2245_v35 }
 0x65b   :  { %2528 = vmatpush.bf16.msra.mxu0 %v2417_v10  ;;  %v2045_v8 = vpop.xlane.xlu2 %2044 }
 0x65c   :  { %7792 = vrcp.f32 %v2045_v8 }
 0x65e   :  { %v7789_v53 = vpop.eup %7788 }
 0x65f   :  { %v2194_v37 = vsel %vm2000_vm7, %v7789_v53, 0.0  ;;  %v7791_v3 = vpop.eup %7790  ;;  %2529 = vmatpush.bf16.msra.mxu0 %v2416_v2 }
 0x660   :  { %2195 = vadd.xlane.f32.xlu1 %v2194_v37  ;;  %v2053_v0 = vmul.f32 %v7791_v3, %v9538_v4  ;;  %v2248_v4 = vadd.f32 %v9331_v30, %v9480_v6 }
 0x662   :  { %v2057_v56 = vpack.c.bf16 %v2054_v48, %v2053_v0  ;;  %v7793_v49 = vpop.eup %7792  ;;  %v2251_v44 = vpack.c.bf16 %v2248_v4, %v2247_v18  ;;  %v2399_v4 = vadd.f32 %v9331_v30, %v9500_v5 }
 0x663   :  { %v2055_v62 = vmul.f32 %v7793_v49, %v9555_v61  ;;  %v2249_v61 = vadd.f32 %v9331_v30, %v9484_v32 }
 0x664   :  { %v2402_v18 = vpack.c.bf16 %v2399_v4, %v2399_v4 }
 0x665   :  { %v2058_v1 = vpack.c.bf16 %v2055_v62, %v2055_v62  ;;  %v2252_v52 = vpack.c.bf16 %v2249_v61, %v2249_v61 }
 0x666   :  { %6970 = vmatmul.msk.bf16.gmra.mxu0 %vm2000_vm7, %v2057_v56  ;;  %v2397_v56 = vadd.f32 %v9331_v30, %v9496_v22 }
 0x676   :  { %6971 = vmatmul.msk.bf16.gmra.mxu0 %vm2000_vm7, %v2058_v1 }
 0x686   :  { %2277 = vmatmul.bf16.vlgmr.msrb.gmra.mxu0 %v2250_v7 }
 0x696   :  { %2282 = vmatmul.bf16.gmra.mxu0 %v2251_v44 }
 0x6a6   :  { %2287 = vmatmul.bf16.gmra.mxu0 %v2252_v52 }
 0x6b2   :  { %v2184_v23 = vpop.xlane.xlu0 %2183 }
 0x6b3   :  { %7794 = vrcp.f32 %v2184_v23 }
 0x6b9   :  { %v7795_v20 = vpop.eup %7794 }
 0x6ba   :  { %v2187_v39 = vpop.xlane.xlu1 %2186  ;;  %v2202_v55 = vmul.f32 %v7795_v20, %v9561_v24 }
 0x6bb   :  { %7796 = vrcp.f32 %v2187_v39 }
 0x6c1   :  { %v7797_v14 = vpop.eup %7796 }
 0x6c2   :  { %v2203_v6 = vmul.f32 %v7797_v14, %v9565_v45  ;;  %v2190_v26 = vpop.xlane.xlu2 %2189 }
 0x6c3   :  { %7798 = vrcp.f32 %v2190_v26 }
 0x6c4   :  { %v2207_v29 = vpack.c.bf16 %v2203_v6, %v2202_v55 }
 0x6c6   :  { %6972 = vmatmul.msk.bf16.vlgmr.msra.gmra.mxu3 %vm2000_vm7, %v2207_v29 }
 0x6c9   :  { %v7799_v32 = vpop.eup %7798 }
 0x6ca   :  { %v2204_v50 = vmul.f32 %v7799_v32, %v9569_v13  ;;  %v2396_v13 = vadd.f32 %v9331_v30, %v9493_v33 }
 0x6cb   :  { %v2193_v21 = vpop.xlane.xlu0 %2192 }
 0x6cc   :  { %7800 = vrcp.f32 %v2193_v21 }
 0x6d2   :  { %v7801_v43 = vpop.eup %7800 }
 0x6d3   :  { %v2205_v59 = vmul.f32 %v7801_v43, %v7785_v25  ;;  %v9603_v38 = vpop.f32.mrf.mxu0  ;;  %v2196_v10 = vpop.xlane.xlu1 %2195  ;;  %v2395_v25 = vadd.f32 %v9331_v30, %v9487_v60 }
 0x6d4   :  { %7802 = vrcp.f32 %v2196_v10 }
 0x6d5   :  { %v2208_v54 = vpack.c.bf16 %v2205_v59, %v2204_v50  ;;  %v2400_v0 = vpack.c.bf16 %v2396_v13, %v2395_v25 }
 0x6d7   :  { %6973 = vmatmul.msk.bf16.gmra.mxu3 %vm2000_vm7, %v2208_v54 }
 0x6da   :  { %v7803_v45 = vpop.eup %7802 }
 0x6db   :  { %v9606_v24 = vpop.f32.mrf.mxu0  ;;  %v2206_v17 = vmul.f32 %v7803_v45, %v7789_v53  ;;  %v2398_v53 = vadd.f32 %v9331_v30, %v9498_v12 }
 0x6dd   :  { %v2209_v37 = vpack.c.bf16 %v2206_v17, %v2206_v17  ;;  %v2401_v62 = vpack.c.bf16 %v2398_v53, %v2397_v56 }
 0x6e3   :  { %v9608_v2 = vpop.f32.mrf.mxu0 }
 0x6e7   :  { %6974 = vmatmul.msk.bf16.gmra.mxu3 %vm2000_vm7, %v2209_v37 }
 0x6eb   :  { %v9611_v3 = vpop.f32.mrf.mxu0 }
 0x6f3   :  { %v9617_v48 = vpop.f32.mrf.mxu0 }
 0x6f7   :  { %2427 = vmatmul.bf16.vlgmr.msrb.gmra.mxu3 %v2400_v0 }
 0x6fb   :  { %v2093_v8 = vpop.f32.mrf.mxu0 }
 0x703   :  { %v2278_v49 = vpop.f32.mrf.mxu0 }
 0x704   :  { %v2292_v1 = vmul.f32 0.088388346, %v2278_v49 }
 0x706   :  { %v2297_v33 = vadd.f32 %v2292_v1, %v9435_v40 }
 0x707   :  { %2432 = vmatmul.bf16.gmra.mxu3 %v2401_v62 }
 0x708   :  { %v2302_v63 = vsel %vm2000_vm7, %v2297_v33, -inf }
 0x709   :  { %2303 = vmax.xlane.f32.xlu2 %v2302_v63 }
 0x70b   :  { %v2280_v60 = vpop.f32.mrf.mxu0 }
 0x70c   :  { %v2293_v35 = vmul.f32 0.088388346, %v2280_v60 }
 0x70e   :  { %v2298_v7 = vadd.f32 %v2293_v35, %v9435_v40 }
 0x710   :  { %v2305_v12 = vsel %vm2000_vm7, %v2298_v7, -inf }
 0x711   :  { %2306 = vmax.xlane.f32.xlu0 %v2305_v12 }
 0x713   :  { %v2283_v22 = vpop.f32.mrf.mxu0 }
 0x714   :  { %v2294_v44 = vmul.f32 0.088388346, %v2283_v22 }
 0x716   :  { %v2299_v61 = vadd.f32 %v2294_v44, %v9435_v40 }
 0x717   :  { %2437 = vmatmul.bf16.gmra.mxu3 %v2402_v18 }
 0x718   :  { %v2308_v52 = vsel %vm2000_vm7, %v2299_v61, -inf }
 0x719   :  { %2309 = vmax.xlane.f32.xlu1 %v2308_v52 }
 0x71b   :  { %v2285_v23 = vpop.f32.mrf.mxu0 }
 0x71c   :  { %v2295_v39 = vmul.f32 0.088388346, %v2285_v23 }
 0x71e   :  { %v2300_v20 = vadd.f32 %v2295_v39, %v9435_v40 }
 0x720   :  { %v2311_v14 = vsel %vm2000_vm7, %v2300_v20, -inf }
 0x721   :  { %2312 = vmax.xlane.f32.xlu2 %v2311_v14 }
 0x723   :  { %v2288_v30 = vpop.f32.mrf.mxu0 }
 0x724   :  { %v2296_v5 = vmul.f32 0.088388346, %v2288_v30 }
 0x726   :  { %v2301_v55 = vadd.f32 %v2296_v5, %v9435_v40 }
 0x728   :  { %v2314_v6 = vsel %vm2000_vm7, %v2301_v55, -inf }
 0x729   :  { %2315 = vmax.xlane.f32.xlu0 %v2314_v6 }
 0x72b   :  { %v2290_v29 = vpop.f32.mrf.mxu0 }
 0x749   :  { %v9635_v26 = vpop.f32.mrf.mxu3 }
 0x751   :  { %v9637_v21 = vpop.f32.mrf.mxu3 }
 0x75a   :  { %v9639_v32 = vpop.f32.mrf.mxu3 }
 0x762   :  { %v9641_v43 = vpop.f32.mrf.mxu3 }
 0x76a   :  { %v9643_v50 = vpop.f32.mrf.mxu3 }
 0x772   :  { %v2243_v59 = vpop.f32.mrf.mxu3 }
 0x77a   :  { %v2428_v10 = vpop.f32.mrf.mxu3 }
 0x77b   :  { %v2442_v54 = vmul.f32 0.088388346, %v2428_v10 }
 0x77c   :  { %v2304_v45 = vpop.xlane.xlu2 %2303 }
 0x77d   :  { %v2447_v17 = vadd.f32 %v2442_v54, %v9435_v40  ;;  %v2317_v37 = vsub.f32 %v2297_v33, %v2304_v45 }
 0x77f   :  { %v2452_v13 = vsel %vm2000_vm7, %v2447_v17, -inf  ;;  %v2322_v25 = vmul.f32 1.442695, %v2317_v37 }
 0x780   :  { %2453 = vmax.xlane.f32.xlu1 %v2452_v13 }
 0x781   :  { %7804 = vpow2.f32 %v2322_v25 }
 0x782   :  { %v2430_v0 = vpop.f32.mrf.mxu3 }
 0x783   :  { %v2443_v8 = vmul.f32 0.088388346, %v2430_v0 }
 0x784   :  { %v2307_v53 = vpop.xlane.xlu0 %2306 }
 0x785   :  { %v2448_v56 = vadd.f32 %v2443_v8, %v9435_v40  ;;  %v2318_v49 = vsub.f32 %v2298_v7, %v2307_v53 }
 0x787   :  { %v2455_v62 = vsel %vm2000_vm7, %v2448_v56, -inf  ;;  %v9649_v1 = vpop.eup %7804  ;;  %v2324_v63 = vmul.f32 1.442695, %v2318_v49 }
 0x788   :  { %2456 = vmax.xlane.f32.xlu2 %v2455_v62  ;;  %v2332_v33 = vsel %vm2000_vm7, %v9649_v1, 0.0 }
 0x789   :  { %7806 = vpow2.f32 %v2324_v63  ;;  %2333 = vadd.xlane.f32.xlu0 %v2332_v33 }
 0x78a   :  { %v2433_v60 = vpop.f32.mrf.mxu3 }
 0x78b   :  { %v2444_v35 = vmul.f32 0.088388346, %v2433_v60 }
 0x78c   :  { %v2310_v4 = vpop.xlane.xlu1 %2309 }
 0x78d   :  { %v2449_v12 = vadd.f32 %v2444_v35, %v9435_v40  ;;  %v2319_v22 = vsub.f32 %v2299_v61, %v2310_v4 }
 0x78f   :  { %v2458_v18 = vsel %vm2000_vm7, %v2449_v12, -inf  ;;  %v9655_v7 = vpop.eup %7806  ;;  %v2326_v44 = vmul.f32 1.442695, %v2319_v22 }
 0x790   :  { %2459 = vmax.xlane.f32.xlu2 %v2458_v18  ;;  %v2335_v52 = vsel %vm2000_vm7, %v9655_v7, 0.0 }
 0x791   :  { %7808 = vpow2.f32 %v2326_v44  ;;  %2336 = vadd.xlane.f32.xlu1 %v2335_v52  ;;  %v7589_v44 = vld [vmem:[%s12215_s7 + $0x38] sm:$0xff] }
 0x792   :  { %v2435_v23 = vpop.f32.mrf.mxu3  ;;  %2619 = vmatpush.bf16.msra.mxu1 %v7589_v44 }
 0x793   :  { %v2445_v39 = vmul.f32 0.088388346, %v2435_v23 }
 0x794   :  { %v2313_v14 = vpop.xlane.xlu2 %2312 }
 0x795   :  { %v2450_v30 = vadd.f32 %v2445_v39, %v9435_v40  ;;  %v2320_v5 = vsub.f32 %v2300_v20, %v2313_v14 }
 0x797   :  { %v2461_v6 = vsel %vm2000_vm7, %v2450_v30, -inf  ;;  %v9661_v61 = vpop.eup %7808  ;;  %v2328_v29 = vmul.f32 1.442695, %v2320_v5 }
 0x798   :  { %2462 = vmax.xlane.f32.xlu0 %v2461_v6  ;;  %v2338_v59 = vsel %vm2000_vm7, %v9661_v61, 0.0  ;;  %v7587_v6 = vld [vmem:[%s12215_s7 + $0x28] sm:$0xff] }
 0x799   :  { %7810 = vpow2.f32 %v2328_v29  ;;  %2339 = vadd.xlane.f32.xlu1 %v2338_v59  ;;  %v7586_v59 = vld [vmem:[%s12215_s7 + $0x20] sm:$0xff] }
 0x79a   :  { %v2438_v10 = vpop.f32.mrf.mxu3 }
 0x79b   :  { %v2446_v54 = vmul.f32 0.088388346, %v2438_v10 }
 0x79c   :  { %v2316_v45 = vpop.xlane.xlu0 %2315 }
 0x79d   :  { %v9666_v37 = vadd.f32 %v2446_v54, %v9435_v40  ;;  %v2321_v13 = vsub.f32 %v2301_v55, %v2316_v45 }
 0x79f   :  { %v2464_v20 = vsel %vm2000_vm7, %v9666_v37, -inf  ;;  %v9670_v25 = vpop.eup %7810  ;;  %v2330_v0 = vmul.f32 1.442695, %v2321_v13 }
 0x7a0   :  { %2465 = vmax.xlane.f32.xlu0 %v2464_v20  ;;  %v2341_v8 = vsel %vm2000_vm7, %v9670_v25, 0.0 }
 0x7a1   :  { %7812 = vpow2.f32 %v2330_v0  ;;  %2342 = vadd.xlane.f32.xlu2 %v2341_v8 }
 0x7a2   :  { %v2440_v53 = vpop.f32.mrf.mxu3 }
 0x7a7   :  { %v9674_v49 = vpop.eup %7812 }
 0x7a8   :  { %v2344_v40 = vsel %vm2000_vm7, %v9674_v49, 0.0 }
 0x7a9   :  { %2345 = vadd.xlane.f32.xlu1 %v2344_v40 }
 0x7f3   :  { %v2454_v55 = vpop.xlane.xlu1 %2453 }
 0x7f4   :  { %v2467_v62 = vsub.f32 %v2447_v17, %v2454_v55 }
 0x7f6   :  { %v2472_v63 = vmul.f32 1.442695, %v2467_v62 }
 0x7f8   :  { %7814 = vpow2.f32 %v2472_v63 }
 0x7fb   :  { %v2457_v33 = vpop.xlane.xlu2 %2456 }
 0x7fc   :  { %v2468_v60 = vsub.f32 %v2448_v56, %v2457_v33  ;;  %v2334_v18 = vpop.xlane.xlu0 %2333  ;;  %v7588_v56 = vld [vmem:[%s12215_s7 + $0x30] sm:$0xff] }
 0x7fd   :  { %2620 = vmatpush.bf16.msra.mxu1 %v7588_v56 }
 0x7fe   :  { %v9678_v35 = vpop.eup %7814  ;;  %v2474_v4 = vmul.f32 1.442695, %v2468_v60 }
 0x7ff   :  { %v2482_v22 = vsel %vm2000_vm7, %v9678_v35, 0.0 }
 0x800   :  { %7816 = vpow2.f32 %v2474_v4  ;;  %2483 = vadd.xlane.f32.xlu2 %v2482_v22  ;;  %v7583_v4 = vld [vmem:[%s12215_s7 + $0x8] sm:$0xff] }
 0x801   :  { %7818 = vrcp.f32 %v2334_v18  ;;  %2621 = vmatpush.bf16.msra.mxu1 %v7587_v6  ;;  %v7582_v18 = vld [vmem:[%s12215_s7] sm:$0xff] }
 0x803   :  { %v2460_v52 = vpop.xlane.xlu2 %2459 }
 0x804   :  { %v2469_v17 = vsub.f32 %v2449_v12, %v2460_v52  ;;  %v2337_v23 = vpop.xlane.xlu1 %2336 }
 0x805   :  { %7820 = vrcp.f32 %v2337_v23  ;;  %2622 = vmatpush.bf16.msra.mxu1 %v7586_v59  ;;  %v2548_v59 = vpack.c.bf16 %v9639_v32, %v9637_v21 }
 0x806   :  { %v9688_v39 = vpop.eup %7816  ;;  %v2476_v14 = vmul.f32 1.442695, %v2469_v17 }
 0x807   :  { %v2485_v5 = vsel %vm2000_vm7, %v9688_v39, 0.0  ;;  %v7819_v12 = vpop.eup %7818 }
 0x808   :  { %7822 = vpow2.f32 %v2476_v14  ;;  %2486 = vadd.xlane.f32.xlu0 %v2485_v5  ;;  %v2352_v45 = vmul.f32 %v7819_v12, %v9649_v1 }
 0x80b   :  { %v2463_v29 = vpop.xlane.xlu0 %2462  ;;  %v7821_v10 = vpop.eup %7820 }
 0x80c   :  { %v2470_v54 = vsub.f32 %v2450_v30, %v2463_v29  ;;  %v2353_v13 = vmul.f32 %v7821_v10, %v9655_v7  ;;  %v2340_v40 = vpop.xlane.xlu1 %2339  ;;  %v7585_v30 = vld [vmem:[%s12215_s7 + $0x18] sm:$0xff]  ;;  %v7584_v7 = vld [vmem:[%s12215_s7 + $0x10] sm:$0xff]  ;;  %v2547_v29 = vpack.c.bf16 %v9635_v26, %v9617_v48 }
 0x80d   :  { %2623 = vmatpush.bf16.msra.mxu1 %v7585_v30 }
 0x80e   :  { %v9700_v20 = vpop.eup %7822  ;;  %v2478_v0 = vmul.f32 1.442695, %v2470_v54  ;;  %v2357_v8 = vpack.c.bf16 %v2353_v13, %v2352_v45 }
 0x80f   :  { %v2488_v53 = vsel %vm2000_vm7, %v9700_v20, 0.0 }
 0x810   :  { %7824 = vpow2.f32 %v2478_v0  ;;  %2489 = vadd.xlane.f32.xlu1 %v2488_v53  ;;  %6975 = vmatmul.msk.bf16.vlgmr.msrb.gmra.mxu1 %vm2000_vm7, %v2357_v8 }
 0x811   :  { %7826 = vrcp.f32 %v2340_v40  ;;  %2624 = vmatpush.bf16.msra.mxu1 %v7584_v7 }
 0x813   :  { %v2466_v1 = vpop.xlane.xlu0 %2465 }
 0x814   :  { %v2471_v55 = vsub.f32 %v9666_v37, %v2466_v1  ;;  %v2343_v62 = vpop.xlane.xlu2 %2342 }
 0x815   :  { %7828 = vrcp.f32 %v2343_v62  ;;  %2625 = vmatpush.bf16.msra.mxu1 %v7583_v4 }
 0x816   :  { %v7825_v63 = vpop.eup %7824  ;;  %v2480_v33 = vmul.f32 1.442695, %v2471_v55 }
 0x817   :  { %v2491_v60 = vsel %vm2000_vm7, %v7825_v63, 0.0  ;;  %v7827_v22 = vpop.eup %7826 }
 0x818   :  { %7830 = vpow2.f32 %v2480_v33  ;;  %2492 = vadd.xlane.f32.xlu2 %v2491_v60  ;;  %v2354_v44 = vmul.f32 %v7827_v22, %v9661_v61  ;;  %v2545_v61 = vpack.c.bf16 %v9606_v24, %v9603_v38  ;;  %v2549_v38 = vpack.c.bf16 %v9643_v50, %v9641_v43 }
 0x819   :  { %2626 = vmatpush.bf16.msra.mxu1 %v7582_v18 }
 0x81b   :  { %v7829_v37 = vpop.eup %7828 }
 0x81c   :  { %v2355_v52 = vmul.f32 %v7829_v37, %v9670_v25  ;;  %v2346_v23 = vpop.xlane.xlu1 %2345  ;;  %v2546_v25 = vpack.c.bf16 %v9611_v3, %v9608_v2 }
 0x81d   :  { %7832 = vrcp.f32 %v2346_v23 }
 0x81e   :  { %v7831_v17 = vpop.eup %7830  ;;  %v2358_v14 = vpack.c.bf16 %v2355_v52, %v2354_v44 }
 0x81f   :  { %v2494_v56 = vsel %vm2000_vm7, %v7831_v17, 0.0 }
 0x820   :  { %2495 = vadd.xlane.f32.xlu0 %v2494_v56  ;;  %6976 = vmatmul.msk.bf16.gmra.mxu1 %vm2000_vm7, %v2358_v14 }
 0x823   :  { %v7833_v5 = vpop.eup %7832 }
 0x824   :  { %v2356_v6 = vmul.f32 %v7833_v5, %v9674_v49  ;;  %v9772_v5 = vld [vmem:[%s12213_s5 + $0x20] sm:$0xff] }
 0x826   :  { %v2359_v12 = vpack.c.bf16 %v2356_v6, %v2356_v6 }
 0x830   :  { %6977 = vmatmul.msk.bf16.gmra.mxu1 %vm2000_vm7, %v2359_v12 }
 0x840   :  { %2627 = vmatmul.bf16.vlgmr.msra.gmra.mxu1 %v2545_v61 }
 0x850   :  { %2632 = vmatmul.bf16.gmra.mxu1 %v2546_v25 }
 0x860   :  { %2637 = vmatmul.bf16.gmra.mxu1 %v2547_v29 }
 0x870   :  { %2642 = vmatmul.bf16.gmra.mxu1 %v2548_v59 }
 0x873   :  { %v2484_v49 = vpop.xlane.xlu2 %2483 }
 0x874   :  { %7834 = vrcp.f32 %v2484_v49 }
 0x87a   :  { %v7835_v24 = vpop.eup %7834 }
 0x87b   :  { %v2487_v10 = vpop.xlane.xlu0 %2486  ;;  %v2502_v2 = vmul.f32 %v7835_v24, %v9678_v35 }
 0x87c   :  { %7836 = vrcp.f32 %v2487_v10 }
 0x880   :  { %2647 = vmatmul.bf16.gmra.mxu1 %v2549_v38 }
 0x882   :  { %v7837_v54 = vpop.eup %7836 }
 0x883   :  { %v2503_v3 = vmul.f32 %v7837_v54, %v9688_v39  ;;  %v2490_v26 = vpop.xlane.xlu1 %2489 }
 0x884   :  { %7838 = vrcp.f32 %v2490_v26 }
 0x885   :  { %v2507_v48 = vpack.c.bf16 %v2503_v3, %v2502_v2 }
 0x887   :  { %6978 = vmatmul.msk.bf16.vlgmr.msra.gmra.mxu0 %vm2000_vm7, %v2507_v48 }
 0x88a   :  { %v7839_v45 = vpop.eup %7838 }
 0x88b   :  { %v2493_v21 = vpop.xlane.xlu2 %2492  ;;  %v2504_v0 = vmul.f32 %v7839_v45, %v9700_v20 }
 0x88c   :  { %7840 = vrcp.f32 %v2493_v21 }
 0x88d   :  { %v2381_v32 = vpop.f32.mrf.mxu1 }
 0x892   :  { %v7841_v13 = vpop.eup %7840 }
 0x893   :  { %v2505_v43 = vmul.f32 %v7841_v13, %v7825_v63  ;;  %v2496_v50 = vpop.xlane.xlu0 %2495  ;;  %v9744_v63 = vld [vmem:[%s12218_s10] sm:$0xff] }
 0x894   :  { %7842 = vrcp.f32 %v2496_v50  ;;  %v9747_v33 = vperm.slane %v9744_v63, 6 }
 0x895   :  { %v2508_v8 = vpack.c.bf16 %v2505_v43, %v2504_v0  ;;  %v2383_v53 = vpop.f32.mrf.mxu1 }
 0x896   :  { %v2550_v40 = vpack.c.bf16 %v2383_v53, %v2381_v32 }
 0x897   :  { %6979 = vmatmul.msk.bf16.gmra.mxu0 %vm2000_vm7, %v2508_v8 }
 0x898   :  { %2652 = vmatmul.bf16.gmra.mxu1 %v2550_v40 }
 0x89a   :  { %v7843_v35 = vpop.eup %7842 }
 0x89b   :  { %v2506_v30 = vmul.f32 %v7843_v35, %v7831_v17 }
 0x89d   :  { %v2386_v39 = vpop.f32.mrf.mxu1  ;;  %v2509_v1 = vpack.c.bf16 %v2506_v30, %v2506_v30 }
 0x8a5   :  { %v2388_v7 = vpop.f32.mrf.mxu1 }
 0x8a6   :  { %v2551_v55 = vpack.c.bf16 %v2388_v7, %v2386_v39 }
 0x8a7   :  { %6980 = vmatmul.msk.bf16.gmra.mxu0 %vm2000_vm7, %v2509_v1 }
 0x8a8   :  { %2657 = vmatmul.bf16.gmra.mxu1 %v2551_v55 }
 0x8ad   :  { %v2391_v62 = vpop.f32.mrf.mxu1 }
 0x8b5   :  { %v2393_v20 = vpop.f32.mrf.mxu1 }
 0x8bd   :  { %v2628_v60 = vpop.f32.mrf.mxu1 }
 0x8be   :  { %v2678_v4 = vadd.f32 %v2628_v60, %v8825_v46 }
 0x8c0   :  { %v9751_v22 = vadd.f32 %v9747_v33, %v2678_v4 }
 0x8c2   :  { %12314 = vst [vmem:[#allocation7_spill] sm:$0xff] %v9751_v22  ;;  %2719 = vadd.xlane.f32.xlu1 %v9751_v22 }
 0x8c5   :  { %v2630_v18 = vpop.f32.mrf.mxu1 }
 0x8c6   :  { %v2679_v37 = vadd.f32 %v2630_v18, %v8838_v27 }
 0x8c8   :  { %v9756_v44 = vadd.f32 %v9747_v33, %v2679_v37 }
 0x8ca   :  { %12315 = vst [vmem:[#allocation6_spill] sm:$0xff] %v9756_v44  ;;  %2721 = vadd.xlane.f32.xlu2 %v9756_v44 }
 0x8cd   :  { %v2633_v52 = vpop.f32.mrf.mxu1 }
 0x8ce   :  { %v2680_v17 = vadd.f32 %v2633_v52, %v8856_v16 }
 0x8d0   :  { %v9761_v23 = vadd.f32 %v9747_v33, %v2680_v17 }
 0x8d2   :  { %12316 = vst [vmem:[#allocation8_spill] sm:$0xff] %v9761_v23  ;;  %2723 = vadd.xlane.f32.xlu0 %v9761_v23 }
 0x8d5   :  { %v2635_v46 = vpop.f32.mrf.mxu1 }
 0x8d6   :  { %v2681_v56 = vadd.f32 %v2635_v46, %v8870_v11 }
 0x8d8   :  { %v9766_v14 = vadd.f32 %v9747_v33, %v2681_v56 }
 0x8da   :  { %12317 = vst [vmem:[#allocation10_spill] sm:$0xff] %v9766_v14  ;;  %2725 = vadd.xlane.f32.xlu1 %v9766_v14 }
 0x8dd   :  { %v2638_v27 = vpop.f32.mrf.mxu1 }
 0x8de   :  { %v2682_v16 = vadd.f32 %v9772_v5, %v2638_v27 }
 0x8e0   :  { %v9776_v6 = vadd.f32 %v9747_v33, %v2682_v16 }
 0x8e2   :  { %12318 = vst [vmem:[#allocation11_spill] sm:$0xff] %v9776_v6  ;;  %2727 = vadd.xlane.f32.xlu2 %v9776_v6 }
 0x8e5   :  { %v2640_v12 = vpop.f32.mrf.mxu1 }
 0x8e6   :  { %v2683_v11 = vadd.f32 %v2640_v12, %v8876_v57 }
 0x8e8   :  { %v9781_v61 = vadd.f32 %v9747_v33, %v2683_v11 }
 0x8ea   :  { %12319 = vst [vmem:[#allocation12_spill] sm:$0xff] %v9781_v61  ;;  %2729 = vadd.xlane.f32.xlu0 %v9781_v61 }
 0x8ed   :  { %v2643_v25 = vpop.f32.mrf.mxu1 }
 0x8ee   :  { %v2684_v29 = vadd.f32 %v2643_v25, %v8881_v15 }
 0x8f0   :  { %v9786_v59 = vadd.f32 %v9747_v33, %v2684_v29 }
 0x8f2   :  { %12320 = vst [vmem:[#allocation13_spill] sm:$0xff] %v9786_v59  ;;  %2731 = vadd.xlane.f32.xlu0 %v9786_v59 }
 0x8f5   :  { %v2645_v26 = vpop.f32.mrf.mxu1 }
 0x8f6   :  { %v2685_v43 = vadd.f32 %v2645_v26, %v8909_v9 }
 0x8f8   :  { %v9801_v53 = vadd.f32 %v9747_v33, %v2685_v43 }
 0x8fa   :  { %12321 = vst [vmem:[#allocation14_spill] sm:$0xff] %v9801_v53 }
 0x8fd   :  { %v2648_v13 = vpop.f32.mrf.mxu1 }
 0x8fe   :  { %v2686_v30 = vadd.f32 %v2648_v13, %v8921_v31  ;;  %v7127_v13 = vld [vmem:[%s12216_s8 + $0xe0] sm:$0xf] }
 0x900   :  { %v9812_v7 = vadd.f32 %v9747_v33, %v2686_v30 }
 0x902   :  { %12322 = vst [vmem:[#allocation15_spill] sm:$0xff] %v9812_v7 }
 0x904   :  { %v2531_v49 = vpop.f32.mrf.mxu0 }
 0x905   :  { %v2552_v10 = vpack.c.bf16 %v2531_v49, %v2391_v62  ;;  %v2650_v35 = vpop.f32.mrf.mxu1 }
 0x906   :  { %v2687_v60 = vadd.f32 %v9772_v5, %v2650_v35  ;;  %v7621_v35 = vld [vmem:[%s12216_s8 + $0xf4] sm:$0xf0] }
 0x907   :  { %2662 = vmatmul.bf16.gmra.mxu1 %v2552_v10 }
 0x908   :  { %v9823_v18 = vadd.f32 %v9747_v33, %v2687_v60  ;;  %v7616_v60 = vld [vmem:[%s12216_s8 + $0xcc] sm:$0xf0] }
 0x90a   :  { %12323 = vst [vmem:[#allocation16_spill] sm:$0xff] %v9823_v18 }
 0x90c   :  { %v2533_v38 = vpop.f32.mrf.mxu0 }
 0x914   :  { %v2536_v24 = vpop.f32.mrf.mxu0 }
 0x915   :  { %v2553_v54 = vpack.c.bf16 %v2536_v24, %v2533_v38  ;;  %v2653_v62 = vpop.f32.mrf.mxu1 }
 0x916   :  { %v2688_v17 = vadd.f32 %v2653_v62, %v8958_v47 }
 0x917   :  { %2667 = vmatmul.bf16.gmra.mxu1 %v2553_v54 }
 0x918   :  { %v9834_v16 = vadd.f32 %v9747_v33, %v2688_v17  ;;  %v7119_v17 = vld [vmem:[%s12216_s8 + $0xc8] sm:$0xf] }
 0x91a   :  { %12324 = vst [vmem:[#allocation17_spill] sm:$0xff] %v9834_v16 }
 0x91c   :  { %v2538_v57 = vpop.f32.mrf.mxu0 }
 0x91d   :  { %v2655_v56 = vpop.f32.mrf.mxu1 }
 0x91e   :  { %v2689_v25 = vadd.f32 %v2655_v56, %v9149_v36 }
 0x920   :  { %v9845_v10 = vadd.f32 %v9747_v33, %v2689_v25  ;;  %v7121_v25 = vld [vmem:[%s12216_s8 + $0xd8] sm:$0xf0] }
 0x922   :  { %12325 = vst [vmem:[#allocation18_spill] sm:$0xff] %v9845_v10 }
 0x924   :  { %v2541_v2 = vpop.f32.mrf.mxu0 }
 0x925   :  { %v2554_v3 = vpack.c.bf16 %v2541_v2, %v2538_v57  ;;  %v2658_v49 = vpop.f32.mrf.mxu1 }
 0x926   :  { %v2690_v54 = vadd.f32 %v2658_v49, %v9181_v51  ;;  %v7095_v49 = vld [vmem:[%s12216_s8 + $0xa0] sm:$0xf] }
 0x927   :  { %2672 = vmatmul.bf16.gmra.mxu1 %v2554_v3 }
 0x928   :  { %v9856_v2 = vadd.f32 %v9747_v33, %v2690_v54 }
 0x92a   :  { %12326 = vst [vmem:[#allocation19_spill] sm:$0xff] %v9856_v2 }
 0x92c   :  { %v2543_v48 = vpop.f32.mrf.mxu0 }
 0x92d   :  { %v2660_v48 = vpop.f32.mrf.mxu1 }
 0x92e   :  { %v2691_v26 = vadd.f32 %v2660_v48, %v8962_v42  ;;  %v7620_v42 = vld [vmem:[%s12216_s8 + $0xec] sm:$0xf0]  ;;  %v7613_v48 = vld [vmem:[%s12216_s8 + $0xb4] sm:$0xf0] }
 0x92f   :  { %v7128_v43 = vor.u32 %v7620_v42, %v7127_v13  ;;  %v7105_v13 = vld [vmem:[%s12216_s8 + $0xb8] sm:$0xf0] }
 0x931   :  { %3375 = vmatpush.bf16.msra.mxu3 %v7128_v43  ;;  %v7608_v43 = vld [vmem:[%s12216_s8 + $0x8c] sm:$0xf0] }
 0x935   :  { %v2720_v21 = vpop.xlane.xlu1 %2719 }
 0x936   :  { %v2759_v15 = vmul.f32 %v2720_v21, %v8198_v28  ;;  %v9863_v21 = vadd.f32 %v9747_v33, %v2691_v26 }
 0x938   :  { %v9791_v32 = vsub.f32 %v9751_v22, %v2759_v15  ;;  %12327 = vst [vmem:[#allocation20_spill] sm:$0xff] %v9863_v21 }
 0x93a   :  { %v2799_v45 = vmul.f32 %v9791_v32, %v9791_v32 }
 0x93c   :  { %2819 = vadd.xlane.f32.xlu1 %v2799_v45 }
 0x93d   :  { %v2722_v0 = vpop.xlane.xlu2 %2721 }
 0x93e   :  { %v2760_v50 = vmul.f32 %v2722_v0, %v8198_v28  ;;  %v7618_v0 = vld [vmem:[%s12216_s8 + $0xe4] sm:$0xf] }
 0x940   :  { %v9798_v8 = vsub.f32 %v9756_v44, %v2760_v50  ;;  %v7129_v50 = vld [vmem:[%s12216_s8 + $0xf0] sm:$0xf0] }
 0x942   :  { %v2800_v40 = vmul.f32 %v9798_v8, %v9798_v8 }
 0x944   :  { %2733 = vadd.xlane.f32.xlu1 %v9801_v53  ;;  %2821 = vadd.xlane.f32.xlu2 %v2800_v40  ;;  %v7135_v40 = vld [vmem:[%s12216_s8 + $0xe8] sm:$0xf] }
 0x945   :  { %v2724_v39 = vpop.xlane.xlu0 %2723  ;;  %v7136_v30 = vor.u32 %v7621_v35, %v7135_v40  ;;  %v7081_v35 = vld [vmem:[%s12216_s8 + $0x90] sm:$0xf0] }
 0x946   :  { %v2761_v9 = vmul.f32 %v2724_v39, %v8198_v28  ;;  %v7132_v39 = vor.u32 %v7618_v0, %v7129_v50  ;;  %v7079_v0 = vld [vmem:[%s12216_s8 + $0x80] sm:$0xf]  ;;  %v7606_v50 = vld [vmem:[%s12216_s8 + $0x84] sm:$0xf] }
 0x947   :  { %3493 = vmatpush.bf16.msrb.mxu0 %v7136_v30  ;;  %v7080_v40 = vor.u32 %v7608_v43, %v7079_v0  ;;  %v7609_v30 = vld [vmem:[%s12216_s8 + $0x94] sm:$0xf0]  ;;  %v7057_v0 = vld [vmem:[%s12216_s8 + $0x58] sm:$0xf0] }
 0x948   :  { %v9809_v1 = vsub.f32 %v9761_v23, %v2761_v9  ;;  %v7619_v9 = vld [vmem:[%s12216_s8 + $0xec] sm:$0xf]  ;;  %3434 = vmatpush.bf16.msra.mxu2 %v7132_v39  ;;  %v7087_v39 = vld [vmem:[%s12216_s8 + $0x88] sm:$0xf] }
 0x94a   :  { %v2801_v55 = vmul.f32 %v9809_v1, %v9809_v1 }
 0x94c   :  { %2735 = vadd.xlane.f32.xlu1 %v9812_v7  ;;  %2823 = vadd.xlane.f32.xlu2 %v2801_v55  ;;  %v7137_v55 = vld [vmem:[%s12216_s8 + $0xf8] sm:$0xf0] }
 0x94d   :  { %v2726_v20 = vpop.xlane.xlu1 %2725  ;;  %v7140_v62 = vor.u32 %v7619_v9, %v7137_v55  ;;  %v7084_v9 = vor.u32 %v7606_v50, %v7081_v35  ;;  %v7088_v55 = vor.u32 %v7609_v30, %v7087_v39  ;;  %v7031_v50 = vld [vmem:[%s12216_s8 + $0x20] sm:$0xf]  ;;  %v7594_v35 = vld [vmem:[%s12216_s8 + $0x24] sm:$0xf]  ;;  %v7033_v30 = vld [vmem:[%s12216_s8 + $0x30] sm:$0xf0] }
 0x94e   :  { %v2762_v31 = vmul.f32 %v2726_v20, %v8198_v28  ;;  %v7111_v20 = vld [vmem:[%s12216_s8 + $0xc0] sm:$0xf] }
 0x94f   :  { %3552 = vmatpush.bf16.msrb.mxu1 %v7140_v62  ;;  %v7607_v62 = vld [vmem:[%s12216_s8 + $0x8c] sm:$0xf] }
 0x950   :  { %v9820_v4 = vsub.f32 %v9766_v14, %v2762_v31  ;;  %v7614_v31 = vld [vmem:[%s12216_s8 + $0xc4] sm:$0xf] }
 0x952   :  { %v2802_v37 = vmul.f32 %v9820_v4, %v9820_v4 }
 0x954   :  { %2825 = vadd.xlane.f32.xlu0 %v2802_v37  ;;  %2737 = vadd.xlane.f32.xlu2 %v9823_v18  ;;  %v7112_v37 = vor.u32 %v7616_v60, %v7111_v20  ;;  %v7089_v20 = vld [vmem:[%s12216_s8 + $0x98] sm:$0xf0] }
 0x955   :  { %v2728_v52 = vpop.xlane.xlu2 %2727  ;;  %v7092_v60 = vor.u32 %v7607_v62, %v7089_v20  ;;  %v7036_v20 = vor.u32 %v7594_v35, %v7033_v30 }
 0x956   :  { %v2763_v46 = vmul.f32 %v2728_v52, %v8198_v28  ;;  %v7113_v52 = vld [vmem:[%s12216_s8 + $0xd0] sm:$0xf0]  ;;  %3376 = vmatpush.bf16.msra.mxu3 %v7112_v37  ;;  %v7604_v37 = vld [vmem:[%s12216_s8 + $0x6c] sm:$0xf0] }
 0x957   :  { %v7116_v56 = vor.u32 %v7614_v31, %v7113_v52  ;;  %v7063_v31 = vld [vmem:[%s12216_s8 + $0x60] sm:$0xf]  ;;  %v7602_v52 = vld [vmem:[%s12216_s8 + $0x64] sm:$0xf] }
 0x958   :  { %v9831_v27 = vsub.f32 %v9776_v6, %v2763_v46  ;;  %v7617_v46 = vld [vmem:[%s12216_s8 + $0xd4] sm:$0xf0] }
 0x959   :  { %3435 = vmatpush.bf16.msra.mxu2 %v7116_v56  ;;  %v7071_v56 = vld [vmem:[%s12216_s8 + $0x68] sm:$0xf] }
 0x95a   :  { %v2803_v12 = vmul.f32 %v9831_v27, %v9831_v27 }
 0x95c   :  { %2827 = vadd.xlane.f32.xlu0 %v2803_v12  ;;  %2739 = vadd.xlane.f32.xlu2 %v9834_v16  ;;  %v7120_v12 = vor.u32 %v7617_v46, %v7119_v17  ;;  %v7064_v17 = vor.u32 %v7604_v37, %v7063_v31  ;;  %v7065_v46 = vld [vmem:[%s12216_s8 + $0x70] sm:$0xf0]  ;;  %v7595_v31 = vld [vmem:[%s12216_s8 + $0x2c] sm:$0xf]  ;;  %v7041_v37 = vld [vmem:[%s12216_s8 + $0x38] sm:$0xf0] }
 0x95d   :  { %v2730_v11 = vpop.xlane.xlu0 %2729 }
 0x95e   :  { %v2764_v47 = vmul.f32 %v2730_v11, %v8198_v28  ;;  %v7615_v11 = vld [vmem:[%s12216_s8 + $0xcc] sm:$0xf]  ;;  %3494 = vmatpush.bf16.msrb.mxu0 %v7120_v12  ;;  %v7605_v12 = vld [vmem:[%s12216_s8 + $0x74] sm:$0xf0] }
 0x960   :  { %v9842_v29 = vsub.f32 %v9781_v61, %v2764_v47  ;;  %v7124_v47 = vor.u32 %v7615_v11, %v7121_v25  ;;  %v7068_v11 = vor.u32 %v7602_v52, %v7065_v46  ;;  %v7072_v25 = vor.u32 %v7605_v12, %v7071_v56  ;;  %v7015_v46 = vld [vmem:[%s12216_s8] sm:$0xf]  ;;  %v7592_v56 = vld [vmem:[%s12216_s8 + $0xc] sm:$0xf0]  ;;  %v7590_v12 = vld [vmem:[%s12216_s8 + $0x4] sm:$0xf] }
 0x962   :  { %v2804_v38 = vmul.f32 %v9842_v29, %v9842_v29  ;;  %3553 = vmatpush.bf16.msrb.mxu1 %v7124_v47  ;;  %v7603_v47 = vld [vmem:[%s12216_s8 + $0x6c] sm:$0xf] }
 0x964   :  { %2741 = vadd.xlane.f32.xlu0 %v9845_v10  ;;  %2829 = vadd.xlane.f32.xlu1 %v2804_v38  ;;  %v7612_v38 = vld [vmem:[%s12216_s8 + $0xac] sm:$0xf0] }
 0x965   :  { %v2732_v24 = vpop.xlane.xlu0 %2731  ;;  %v7096_v54 = vor.u32 %v7612_v38, %v7095_v49  ;;  %v7073_v49 = vld [vmem:[%s12216_s8 + $0x78] sm:$0xf0] }
 0x966   :  { %v2765_v36 = vmul.f32 %v2732_v24, %v8198_v28  ;;  %v7610_v24 = vld [vmem:[%s12216_s8 + $0xa4] sm:$0xf]  ;;  %v7076_v38 = vor.u32 %v7603_v47, %v7073_v49  ;;  %v7017_v47 = vld [vmem:[%s12216_s8 + $0x10] sm:$0xf0]  ;;  %v7023_v49 = vld [vmem:[%s12216_s8 + $0x8] sm:$0xf] }
 0x967   :  { %3377 = vmatpush.bf16.msra.mxu3 %v7096_v54  ;;  %v7600_v54 = vld [vmem:[%s12216_s8 + $0x4c] sm:$0xf0] }
 0x968   :  { %v9853_v57 = vsub.f32 %v9786_v59, %v2765_v36  ;;  %v7097_v36 = vld [vmem:[%s12216_s8 + $0xb0] sm:$0xf0] }
 0x969   :  { %v7100_v26 = vor.u32 %v7610_v24, %v7097_v36  ;;  %v7047_v24 = vld [vmem:[%s12216_s8 + $0x40] sm:$0xf]  ;;  %v7598_v36 = vld [vmem:[%s12216_s8 + $0x44] sm:$0xf] }
 0x96a   :  { %v2805_v3 = vmul.f32 %v9853_v57, %v9853_v57 }
 0x96b   :  { %3436 = vmatpush.bf16.msra.mxu2 %v7100_v26  ;;  %3378 = vmatpush.bf16.msra.mxu3 %v7080_v40  ;;  %v7055_v26 = vld [vmem:[%s12216_s8 + $0x48] sm:$0xf]  ;;  %v7596_v40 = vld [vmem:[%s12216_s8 + $0x2c] sm:$0xf0] }
 0x96c   :  { %2743 = vadd.xlane.f32.xlu0 %v9856_v2  ;;  %2831 = vadd.xlane.f32.xlu1 %v2805_v3  ;;  %v7103_v3 = vld [vmem:[%s12216_s8 + $0xa8] sm:$0xf]  ;;  %v7032_v39 = vor.u32 %v7596_v40, %v7031_v50 }
 0x96f   :  { %3437 = vmatpush.bf16.msra.mxu2 %v7084_v9  ;;  %3379 = vmatpush.bf16.msra.mxu3 %v7064_v17  ;;  %v7039_v9 = vld [vmem:[%s12216_s8 + $0x28] sm:$0xf]  ;;  %v7044_v17 = vor.u32 %v7595_v31, %v7041_v37 }
 0x973   :  { %3438 = vmatpush.bf16.msra.mxu2 %v7068_v11 }
 0x974   :  { %2745 = vadd.xlane.f32.xlu1 %v9863_v21 }
 0x984   :  { %v2663_v51 = vpop.f32.mrf.mxu1 }
 0x985   :  { %v2692_v15 = vadd.f32 %v9772_v5, %v2663_v51  ;;  %v7104_v51 = vor.u32 %v7613_v48, %v7103_v3  ;;  %v7048_v3 = vor.u32 %v7600_v54, %v7047_v24  ;;  %v7049_v48 = vld [vmem:[%s12216_s8 + $0x50] sm:$0xf0]  ;;  %v7593_v24 = vld [vmem:[%s12216_s8 + $0x14] sm:$0xf0]  ;;  %v7591_v54 = vld [vmem:[%s12216_s8 + $0xc] sm:$0xf] }
 0x987   :  { %v9868_v45 = vadd.f32 %v9747_v33, %v2692_v15  ;;  %v7611_v15 = vld [vmem:[%s12216_s8 + $0xac] sm:$0xf]  ;;  %3495 = vmatpush.bf16.msrb.mxu0 %v7104_v51  ;;  %v7601_v51 = vld [vmem:[%s12216_s8 + $0x54] sm:$0xf0]  ;;  %3380 = vmatpush.bf16.msra.mxu3 %v7048_v3  ;;  %v7024_v3 = vor.u32 %v7593_v24, %v7023_v49 }
 0x988   :  { %v7108_v42 = vor.u32 %v7611_v15, %v7105_v13  ;;  %v7052_v15 = vor.u32 %v7598_v36, %v7049_v48  ;;  %v7056_v13 = vor.u32 %v7601_v51, %v7055_v26  ;;  %v7025_v36 = vld [vmem:[%s12216_s8 + $0x18] sm:$0xf0] }
 0x989   :  { %12328 = vst [vmem:[#allocation21_spill] sm:$0xff] %v9868_v45  ;;  %2747 = vadd.xlane.f32.xlu1 %v9868_v45  ;;  %v7028_v48 = vor.u32 %v7591_v54, %v7025_v36 }
 0x98a   :  { %3554 = vmatpush.bf16.msrb.mxu1 %v7108_v42  ;;  %v7599_v42 = vld [vmem:[%s12216_s8 + $0x4c] sm:$0xf]  ;;  %3439 = vmatpush.bf16.msra.mxu2 %v7052_v15 }
 0x98b   :  { %3496 = vmatpush.bf16.msrb.mxu0 %v7088_v55  ;;  %v7060_v43 = vor.u32 %v7599_v42, %v7057_v0  ;;  %v7597_v55 = vld [vmem:[%s12216_s8 + $0x34] sm:$0xf0]  ;;  %3381 = vmatpush.bf16.msra.mxu3 %v7032_v39 }
 0x98c   :  { %v2665_v39 = vpop.f32.mrf.mxu1 }
 0x98d   :  { %v2693_v24 = vadd.f32 %v2665_v39, %v9184_v34 }
 0x98e   :  { %3555 = vmatpush.bf16.msrb.mxu1 %v7092_v60  ;;  %v7040_v60 = vor.u32 %v7597_v55, %v7039_v9  ;;  %3440 = vmatpush.bf16.msra.mxu2 %v7036_v20 }
 0x98f   :  { %3497 = vmatpush.bf16.msrb.mxu0 %v7072_v25  ;;  %v7016_v25 = vor.u32 %v7592_v56, %v7015_v46 }
 0x991   :  { %3382 = vmatpush.bf16.msra.mxu3 %v7016_v25 }
 0x992   :  { %3556 = vmatpush.bf16.msrb.mxu1 %v7076_v38  ;;  %v7020_v38 = vor.u32 %v7590_v12, %v7017_v47 }
 0x993   :  { %3498 = vmatpush.bf16.msrb.mxu0 %v7056_v13 }
 0x994   :  { %3441 = vmatpush.bf16.msra.mxu2 %v7020_v38  ;;  %v2668_v54 = vpop.f32.mrf.mxu1 }
 0x996   :  { %3557 = vmatpush.bf16.msrb.mxu1 %v7060_v43 }
 0x997   :  { %3499 = vmatpush.bf16.msrb.mxu0 %v7040_v60 }
 0x99a   :  { %3558 = vmatpush.bf16.msrb.mxu1 %v7044_v17 }
 0x99b   :  { %3500 = vmatpush.bf16.msrb.mxu0 %v7024_v3 }
 0x99e   :  { %3559 = vmatpush.bf16.msrb.mxu1 %v7028_v48 }
 0x9af   :  { %v2820_v62 = vpop.xlane.xlu1 %2819 }
 0x9b0   :  { %v2859_v52 = vmul.f32 %v2820_v62, %v8198_v28 }
 0x9b2   :  { %v2879_v11 = vadd.f32 1e-06, %v2859_v52 }
 0x9b4   :  { %7844 = vrsqrt.f32 %v2879_v11  ;;  %vm2905_vm9 = vweird.f32 %v2879_v11 }
 0x9b7   :  { %v2734_v26 = vpop.xlane.xlu1 %2733  ;;  %v2822_v51 = vpop.xlane.xlu2 %2821 }
 0x9b8   :  { %v2766_v15 = vmul.f32 %v2734_v26, %v8198_v28  ;;  %v2860_v13 = vmul.f32 %v2822_v51, %v8198_v28  ;;  %v10082_v51 = vperm.slane %v9744_v63, 2 }
 0x9ba   :  { %v7845_v42 = vpop.eup %7844  ;;  %v10067_v0 = vsub.f32 %v9801_v53, %v2766_v15  ;;  %v2880_v43 = vadd.f32 1e-06, %v2860_v13 }
 0x9bb   :  { %v2900_v50 = vmul.f32 %v7845_v42, %v2879_v11  ;;  %vm2906_vm8 = vweird.f32 %v7845_v42 }
 0x9bc   :  { %7846 = vrsqrt.f32 %v2880_v43  ;;  %v2806_v40 = vmul.f32 %v10067_v0, %v10067_v0  ;;  %vm2907_vm10 = vmor %vm2905_vm9, %vm2906_vm8  ;;  %vm2915_vm13 = vweird.f32 %v2880_v43 }
 0x9bd   :  { %v2901_v35 = vmul.f32 %v7845_v42, %v2900_v50  ;;  %v10089_v50 = vadd.f32 %v9747_v33, %v2693_v24 }
 0x9be   :  { %2833 = vadd.xlane.f32.xlu2 %v2806_v40 }
 0x9bf   :  { %v2902_v30 = vmul.f32 0.5, %v2901_v35  ;;  %v2736_v9 = vpop.xlane.xlu1 %2735  ;;  %v2824_v55 = vpop.xlane.xlu2 %2823  ;;  %12329 = vst [vmem:[#allocation22_spill] sm:$0xff] %v10089_v50 }
 0x9c0   :  { %v2767_v62 = vmul.f32 %v2736_v9, %v8198_v28  ;;  %v2861_v20 = vmul.f32 %v2824_v55, %v8198_v28 }
 0x9c1   :  { %v2903_v60 = vsub.f32 1.5, %v2902_v30  ;;  %v10094_v30 = vperm.slane %v9744_v63, 3 }
 0x9c2   :  { %v7847_v31 = vpop.eup %7846  ;;  %v10074_v37 = vsub.f32 %v9812_v7, %v2767_v62  ;;  %v2881_v52 = vadd.f32 1e-06, %v2861_v20 }
 0x9c3   :  { %v2904_v17 = vmul.f32 %v7845_v42, %v2903_v60  ;;  %v2910_v46 = vmul.f32 %v7847_v31, %v2880_v43  ;;  %vm2916_vm12 = vweird.f32 %v7847_v31 }
 0x9c4   :  { %7848 = vrsqrt.f32 %v2881_v52  ;;  %v2807_v56 = vmul.f32 %v10074_v37, %v10074_v37  ;;  %vm2917_vm15 = vmor %vm2915_vm13, %vm2916_vm12  ;;  %vm2925_vm1 = vweird.f32 %v2881_v52 }
 0x9c5   :  { %v2911_v12 = vmul.f32 %v7847_v31, %v2910_v46  ;;  %v2908_v25 = vsel %vm2907_vm10, %v7845_v42, %v2904_v17  ;;  %v2694_v17 = vadd.f32 %v2668_v54, %v9200_v58 }
 0x9c6   :  { %2835 = vadd.xlane.f32.xlu2 %v2807_v56  ;;  %v3099_v11 = vmul.f32 %v2908_v25, %v9791_v32  ;;  %v2670_v56 = vpop.f32.mrf.mxu1 }
 0x9c7   :  { %v2912_v47 = vmul.f32 0.5, %v2911_v12  ;;  %v2738_v49 = vpop.xlane.xlu2 %2737  ;;  %v2826_v38 = vpop.xlane.xlu0 %2825 }
 0x9c8   :  { %v2768_v36 = vmul.f32 %v2738_v49, %v8198_v28  ;;  %v2862_v3 = vmul.f32 %v2826_v38, %v8198_v28  ;;  %v3120_v32 = vmul.f32 %v10082_v51, %v3099_v11 }
 0x9c9   :  { %v2913_v48 = vsub.f32 1.5, %v2912_v47 }
 0x9ca   :  { %v7849_v26 = vpop.eup %7848  ;;  %v10086_v15 = vsub.f32 %v9823_v18, %v2768_v36  ;;  %v2882_v13 = vadd.f32 1e-06, %v2862_v3  ;;  %v3141_v12 = vadd.f32 %v10094_v30, %v3120_v32  ;;  %v10114_v36 = vadd.f32 %v9747_v33, %v2694_v17 }
 0x9cb   :  { %v2914_v42 = vmul.f32 %v7847_v31, %v2913_v48  ;;  %v2920_v34 = vmul.f32 %v7849_v26, %v2881_v52  ;;  %vm2926_vm0 = vweird.f32 %v7849_v26 }
 0x9cc   :  { %7850 = vrsqrt.f32 %v2882_v13  ;;  %v2808_v40 = vmul.f32 %v10086_v15, %v10086_v15  ;;  %12330 = vst [vmem:[#allocation23_spill] sm:$0xff] %v10114_v36  ;;  %vm10116_vm2 = vmor %vm2925_vm1, %vm2926_vm0  ;;  %vm2935_vm4 = vweird.f32 %v2882_v13 }
 0x9cd   :  { %v2918_v35 = vsel %vm2917_vm15, %v7847_v31, %v2914_v42  ;;  %v2921_v39 = vmul.f32 %v7849_v26, %v2920_v34 }
 0x9ce   :  { %v3100_v9 = vmul.f32 %v2918_v35, %v9798_v8  ;;  %2837 = vadd.xlane.f32.xlu0 %v2808_v40  ;;  %2749 = vadd.xlane.f32.xlu2 %v10089_v50  ;;  %v2695_v35 = vadd.f32 %v2670_v56, %v9249_v19 }
 0x9cf   :  { %v2922_v43 = vmul.f32 0.5, %v2921_v39  ;;  %v2740_v55 = vpop.xlane.xlu2 %2739  ;;  %v2828_v62 = vpop.xlane.xlu0 %2827 }
 0x9d0   :  { %v3121_v20 = vmul.f32 %v10082_v51, %v3100_v9  ;;  %v2769_v60 = vmul.f32 %v2740_v55, %v8198_v28  ;;  %v2863_v31 = vmul.f32 %v2828_v62, %v8198_v28  ;;  %v10134_v19 = vadd.f32 %v9747_v33, %v2695_v35 }
 0x9d1   :  { %v2923_v63 = vsub.f32 1.5, %v2922_v43 }
 0x9d2   :  { %v7851_v46 = vpop.eup %7850  ;;  %v3142_v8 = vadd.f32 %v10094_v30, %v3121_v20  ;;  %v10106_v25 = vsub.f32 %v9834_v16, %v2769_v60  ;;  %v10108_v47 = vadd.f32 1e-06, %v2863_v31  ;;  %v2673_v20 = vpop.f32.mrf.mxu1  ;;  %12333 = vst [vmem:[#allocation24_spill] sm:$0xff] %v10134_v19 }
 0x9d3   :  { %v2924_v49 = vmul.f32 %v7849_v26, %v2923_v63  ;;  %v2930_v38 = vmul.f32 %v7851_v46, %v2882_v13  ;;  %vm2936_vm3 = vweird.f32 %v7851_v46 }
 0x9d4   :  { %7852 = vrsqrt.f32 %v10108_v47  ;;  %v3161_v24 = vpack.c.bf16 %v3142_v8, %v3141_v12  ;;  %v2809_v58 = vmul.f32 %v10106_v25, %v10106_v25  ;;  %vm2937_vm5 = vmor %vm2935_vm4, %vm2936_vm3  ;;  %vm2945_vm7 = vweird.f32 %v10108_v47 }
 0x9d5   :  { %v2931_v54 = vmul.f32 %v7851_v46, %v2930_v38  ;;  %v2928_v48 = vsel %vm10116_vm2, %v7849_v26, %v2924_v49 }
 0x9d6   :  { %3383 = vmatmul.bf16.vlgmr.msra.gmra.mxu3 %v3161_v24  ;;  %3442 = vmatmul.bf16.vlgmr.msra.gmra.mxu2 %v3161_v24  ;;  %v3101_v9 = vmul.f32 %v2928_v48, %v9809_v1 }
 0x9d7   :  { %v2932_v11 = vmul.f32 0.5, %v2931_v54  ;;  %3501 = vmatmul.bf16.vlgmr.msrb.gmra.mxu0 %v3161_v24  ;;  %2839 = vadd.xlane.f32.xlu0 %v2809_v58  ;;  %v2830_v42 = vpop.xlane.xlu1 %2829  ;;  %v2742_v34 = vpop.xlane.xlu0 %2741  ;;  %v2696_v58 = vadd.f32 %v2673_v20, %v9261_v41 }
 0x9d8   :  { %2751 = vadd.xlane.f32.xlu2 %v10114_v36  ;;  %3560 = vmatmul.bf16.vlgmr.msrb.gmra.mxu1 %v3161_v24  ;;  %v2864_v52 = vmul.f32 %v2830_v42, %v8198_v28  ;;  %v2770_v40 = vmul.f32 %v2742_v34, %v8198_v28  ;;  %v3122_v63 = vmul.f32 %v10082_v51, %v3101_v9 }
 0x9d9   :  { %v2933_v39 = vsub.f32 1.5, %v2932_v11 }
 0x9da   :  { %v7853_v32 = vpop.eup %7852  ;;  %v2884_v26 = vadd.f32 1e-06, %v2864_v52  ;;  %v10128_v43 = vsub.f32 %v9845_v10, %v2770_v40  ;;  %v10151_v52 = vadd.f32 %v9747_v33, %v2696_v58  ;;  %v2675_v41 = vpop.f32.mrf.mxu1 }
 0x9db   :  { %v2934_v55 = vmul.f32 %v7851_v46, %v2933_v39  ;;  %v2940_v62 = vmul.f32 %v7853_v32, %v10108_v47  ;;  %vm2946_vm6 = vweird.f32 %v7853_v32  ;;  %v2697_v47 = vadd.f32 %v9772_v5, %v2675_v41 }
 0x9dc   :  { %7854 = vrsqrt.f32 %v2884_v26  ;;  %v2810_v60 = vmul.f32 %v10128_v43, %v10128_v43  ;;  %12334 = vst [vmem:[#allocation25_spill] sm:$0xff] %v10151_v52  ;;  %vm2947_vm8 = vmor %vm2945_vm7, %vm2946_vm6  ;;  %vm2955_vm10 = vweird.f32 %v2884_v26 }
 0x9dd   :  { %v2938_v31 = vsel %vm2937_vm5, %v7851_v46, %v2934_v55  ;;  %v2941_v17 = vmul.f32 %v7853_v32, %v2940_v62 }
 0x9de   :  { %v3102_v1 = vmul.f32 %v2938_v31, %v9820_v4  ;;  %2841 = vadd.xlane.f32.xlu1 %v2810_v60  ;;  %v3143_v4 = vadd.f32 %v10094_v30, %v3122_v63  ;;  %v10163_v31 = vadd.f32 %v9747_v33, %v2697_v47 }
 0x9df   :  { %v2942_v56 = vmul.f32 0.5, %v2941_v17  ;;  %2753 = vadd.xlane.f32.xlu0 %v10134_v19  ;;  %v2832_v13 = vpop.xlane.xlu1 %2831  ;;  %v2744_v12 = vpop.xlane.xlu0 %2743 }
 0x9e0   :  { %v2771_v8 = vmul.f32 %v2744_v12, %v8198_v28  ;;  %v3123_v49 = vmul.f32 %v10082_v51, %v3102_v1  ;;  %12335 = vst [vmem:[#allocation26_spill] sm:$0xff] %v10163_v31 }
 0x9e1   :  { %v2943_v38 = vsub.f32 1.5, %v2942_v56 }
 0x9e2   :  { %v7855_v24 = vpop.eup %7854  ;;  %v10143_v46 = vsub.f32 %v9856_v2, %v2771_v8  ;;  %v3144_v54 = vadd.f32 %v10094_v30, %v3123_v49  ;;  %v2865_v49 = vmul.f32 %v2832_v13, %v8198_v28 }
 0x9e3   :  { %v2944_v3 = vmul.f32 %v7853_v32, %v2943_v38  ;;  %v2950_v48 = vmul.f32 %v7855_v24, %v2884_v26  ;;  %vm2956_vm9 = vweird.f32 %v7855_v24 }
 0x9e4   :  { %v3162_v11 = vpack.c.bf16 %v3144_v54, %v3143_v4  ;;  %v2811_v42 = vmul.f32 %v10143_v46, %v10143_v46  ;;  %vm2957_vm12 = vmor %vm2955_vm10, %vm2956_vm9  ;;  %v2885_v38 = vadd.f32 1e-06, %v2865_v49 }
 0x9e5   :  { %v2951_v34 = vmul.f32 %v7855_v24, %v2950_v48  ;;  %v2948_v40 = vsel %vm2947_vm8, %v7853_v32, %v2944_v3 }
 0x9e6   :  { %3388 = vmatmul.bf16.gmra.mxu3 %v3162_v11  ;;  %3447 = vmatmul.bf16.gmra.mxu2 %v3162_v11  ;;  %v3103_v62 = vmul.f32 %v2948_v40, %v9831_v27  ;;  %7856 = vrsqrt.f32 %v2885_v38  ;;  %vm2965_vm15 = vweird.f32 %v2885_v38 }
 0x9e7   :  { %v2952_v35 = vmul.f32 0.5, %v2951_v34  ;;  %3506 = vmatmul.bf16.gmra.mxu0 %v3162_v11  ;;  %2843 = vadd.xlane.f32.xlu1 %v2811_v42  ;;  %v2746_v39 = vpop.xlane.xlu1 %2745 }
 0x9e8   :  { %3565 = vmatmul.bf16.gmra.mxu1 %v3162_v11  ;;  %2755 = vadd.xlane.f32.xlu0 %v10151_v52  ;;  %v2772_v9 = vmul.f32 %v2746_v39, %v8198_v28  ;;  %v3124_v5 = vmul.f32 %v10082_v51, %v3103_v62 }
 0x9e9   :  { %v2953_v55 = vsub.f32 1.5, %v2952_v35 }
 0x9ea   :  { %v10158_v20 = vsub.f32 %v9863_v21, %v2772_v9  ;;  %v3145_v63 = vadd.f32 %v10094_v30, %v3124_v5 }
 0x9eb   :  { %v2954_v60 = vmul.f32 %v7855_v24, %v2953_v55 }
 0x9ec   :  { %v2812_v32 = vmul.f32 %v10158_v20, %v10158_v20 }
 0x9ed   :  { %v2958_v17 = vsel %vm2957_vm12, %v7855_v24, %v2954_v60  ;;  %v7857_v24 = vpop.eup %7856 }
 0x9ee   :  { %v3104_v1 = vmul.f32 %v2958_v17, %v9842_v29  ;;  %2845 = vadd.xlane.f32.xlu2 %v2812_v32  ;;  %v2960_v58 = vmul.f32 %v7857_v24, %v2885_v38  ;;  %vm2966_vm13 = vweird.f32 %v7857_v24 }
 0x9ef   :  { %2757 = vadd.xlane.f32.xlu1 %v10163_v31  ;;  %vm2967_vm0 = vmor %vm2965_vm15, %vm2966_vm13 }
 0x9f0   :  { %v3125_v27 = vmul.f32 %v10082_v51, %v3104_v1  ;;  %v2961_v4 = vmul.f32 %v7857_v24, %v2960_v58 }
 0x9f2   :  { %v3146_v26 = vadd.f32 %v10094_v30, %v3125_v27  ;;  %v2962_v11 = vmul.f32 0.5, %v2961_v4 }
 0x9f4   :  { %v3163_v56 = vpack.c.bf16 %v3146_v26, %v3145_v63  ;;  %v2963_v42 = vsub.f32 1.5, %v2962_v11 }
 0x9f6   :  { %3393 = vmatmul.bf16.gmra.mxu3 %v3163_v56  ;;  %3452 = vmatmul.bf16.gmra.mxu2 %v3163_v56  ;;  %v2964_v39 = vmul.f32 %v7857_v24, %v2963_v42 }
 0x9f7   :  { %3511 = vmatmul.bf16.gmra.mxu0 %v3163_v56 }
 0x9f8   :  { %3570 = vmatmul.bf16.gmra.mxu1 %v3163_v56  ;;  %v2968_v47 = vsel %vm2967_vm0, %v7857_v24, %v2964_v39 }
 0x9f9   :  { %v3105_v27 = vmul.f32 %v2968_v47, %v9853_v57 }
 0x9fb   :  { %v3126_v57 = vmul.f32 %v10082_v51, %v3105_v27 }
 0x9fc   :  { %v2748_v33 = vpop.xlane.xlu1 %2747 }
 0x9fd   :  { %v2773_v12 = vmul.f32 %v2748_v33, %v8198_v28  ;;  %v3147_v42 = vadd.f32 %v10094_v30, %v3126_v57 }
 0x9ff   :  { %v10173_v29 = vsub.f32 %v9868_v45, %v2773_v12 }
 0xa01   :  { %v2813_v8 = vmul.f32 %v10173_v29, %v10173_v29 }
 0xa03   :  { %2847 = vadd.xlane.f32.xlu2 %v2813_v8 }
 0xa31   :  { %v2834_v54 = vpop.xlane.xlu2 %2833 }
 0xa32   :  { %v2866_v3 = vmul.f32 %v2834_v54, %v8198_v28 }
 0xa34   :  { %v2886_v48 = vadd.f32 1e-06, %v2866_v3 }
 0xa36   :  { %7858 = vrsqrt.f32 %v2886_v48  ;;  %vm2975_vm2 = vweird.f32 %v2886_v48 }
 0xa39   :  { %v2836_v34 = vpop.xlane.xlu2 %2835 }
 0xa3a   :  { %v2867_v41 = vmul.f32 %v2836_v34, %v8198_v28 }
 0xa3c   :  { %v7859_v40 = vpop.eup %7858  ;;  %v10180_v35 = vadd.f32 1e-06, %v2867_v41 }
 0xa3d   :  { %v2970_v13 = vmul.f32 %v7859_v40, %v2886_v48  ;;  %vm2976_vm1 = vweird.f32 %v7859_v40 }
 0xa3e   :  { %7860 = vrsqrt.f32 %v10180_v35  ;;  %vm2977_vm3 = vmor %vm2975_vm2, %vm2976_vm1  ;;  %vm2985_vm6 = vweird.f32 %v10180_v35 }
 0xa3f   :  { %v2971_v9 = vmul.f32 %v7859_v40, %v2970_v13 }
 0xa41   :  { %v2972_v55 = vmul.f32 0.5, %v2971_v9  ;;  %v2838_v62 = vpop.xlane.xlu0 %2837  ;;  %v2750_v60 = vpop.xlane.xlu2 %2749 }
 0xa42   :  { %v2868_v32 = vmul.f32 %v2838_v62, %v8198_v28  ;;  %v2774_v17 = vmul.f32 %v2750_v60, %v8198_v28 }
 0xa43   :  { %v2973_v1 = vsub.f32 1.5, %v2972_v55  ;;  %v8050_v55 = vld [vmem:[%s12218_s10 + $0x10] sm:$0xff] }
 0xa44   :  { %v10185_v5 = vpop.eup %7860  ;;  %v2888_v63 = vadd.f32 1e-06, %v2868_v32  ;;  %v10189_v26 = vsub.f32 %v10089_v50, %v2774_v17  ;;  %v3177_v62 = vrot.slane %v8050_v55, 3 }
 0xa45   :  { %v2974_v56 = vmul.f32 %v7859_v40, %v2973_v1  ;;  %v2980_v33 = vmul.f32 %v10185_v5, %v10180_v35  ;;  %vm2986_vm4 = vweird.f32 %v10185_v5 }
 0xa46   :  { %7862 = vrsqrt.f32 %v2888_v63  ;;  %v2814_v12 = vmul.f32 %v10189_v26, %v10189_v26  ;;  %v10222_v57 = vperm.slane %v3177_v62, 5  ;;  %vm2995_vm7 = vweird.f32 %v2888_v63  ;;  %vm2987_vm8 = vmor %vm2985_vm6, %vm2986_vm4 }
 0xa47   :  { %v2978_v8 = vsel %vm2977_vm3, %v7859_v40, %v2974_v56  ;;  %v2981_v49 = vmul.f32 %v10185_v5, %v2980_v33 }
 0xa48   :  { %v3106_v38 = vmul.f32 %v2978_v8, %v10067_v0  ;;  %2849 = vadd.xlane.f32.xlu0 %v2814_v12  ;;  %v8049_v0 = vld [vmem:[%s12218_s10 + $0x8] sm:$0xff] }
 0xa49   :  { %v2982_v24 = vmul.f32 0.5, %v2981_v49  ;;  %v3174_v40 = vrot.slane %v8049_v0, 2  ;;  %v3172_v8 = vrot.slane %v8049_v0, 1 }
 0xa4a   :  { %v2840_v58 = vpop.xlane.xlu0 %2839  ;;  %v3127_v4 = vmul.f32 %v10082_v51, %v3106_v38 }
 0xa4b   :  { %v2752_v54 = vpop.xlane.xlu2 %2751  ;;  %v2869_v48 = vmul.f32 %v2840_v58, %v8198_v28  ;;  %v2983_v39 = vsub.f32 1.5, %v2982_v24  ;;  %v10216_v27 = vperm.slane %v3174_v40, 5  ;;  %v10235_v35 = vperm.slane %v3172_v8, 5 }
 0xa4c   :  { %v7863_v3 = vpop.eup %7862  ;;  %v2775_v11 = vmul.f32 %v2752_v54, %v8198_v28  ;;  %v3148_v34 = vadd.f32 %v10094_v30, %v3127_v4 }
 0xa4d   :  { %v2990_v41 = vmul.f32 %v7863_v3, %v2888_v63  ;;  %v10212_v60 = vadd.f32 1e-06, %v2869_v48  ;;  %v2984_v56 = vmul.f32 %v10185_v5, %v2983_v39  ;;  %vm2996_vm5 = vweird.f32 %v7863_v3  ;;  %12339 = vst [vmem:[#allocation30_spill] sm:$0xff] %v10235_v35 }
 0xa4e   :  { %v10207_v13 = vsub.f32 %v10114_v36, %v2775_v11  ;;  %v3164_v9 = vpack.c.bf16 %v3148_v34, %v3147_v42  ;;  %vm2997_vm9 = vmor %vm2995_vm7, %vm2996_vm5  ;;  %v10233_v34 = vperm.slane %v8049_v0, 5 }
 0xa4f   :  { %v2991_v47 = vmul.f32 %v7863_v3, %v2990_v41  ;;  %7864 = vrsqrt.f32 %v10212_v60  ;;  %v2988_v42 = vsel %vm2987_vm8, %v10185_v5, %v2984_v56  ;;  %vm3005_vm12 = vweird.f32 %v10212_v60 }
 0xa50   :  { %12336 = vst [vmem:[#allocation27_spill] sm:$0xff] %v10207_v13  ;;  %3398 = vmatmul.bf16.gmra.mxu3 %v3164_v9  ;;  %3457 = vmatmul.bf16.gmra.mxu2 %v3164_v9  ;;  %v2815_v32 = vmul.f32 %v10207_v13, %v10207_v13 }
 0xa51   :  { %v2992_v17 = vmul.f32 0.5, %v2991_v47  ;;  %3516 = vmatmul.bf16.gmra.mxu0 %v3164_v9  ;;  %3575 = vmatmul.bf16.gmra.mxu1 %v3164_v9  ;;  %v2842_v1 = vpop.xlane.xlu1 %2841  ;;  %12338 = vst [vmem:[#allocation29_spill] sm:$0xff] %v10233_v34  ;;  %v3107_v9 = vmul.f32 %v2988_v42, %v10074_v37 }
 0xa52   :  { %2851 = vadd.xlane.f32.xlu1 %v2815_v32  ;;  %v2870_v33 = vmul.f32 %v2842_v1, %v8198_v28  ;;  %v2754_v12 = vpop.xlane.xlu0 %2753 }
 0xa53   :  { %v2993_v49 = vsub.f32 1.5, %v2992_v17  ;;  %v2776_v38 = vmul.f32 %v2754_v12, %v8198_v28  ;;  %v3128_v8 = vmul.f32 %v10082_v51, %v3107_v9 }
 0xa54   :  { %v3502_v24 = vpop.f32.mrf.mxu0  ;;  %v10226_v4 = vadd.f32 1e-06, %v2870_v33 }
 0xa55   :  { %v2994_v58 = vmul.f32 %v7863_v3, %v2993_v49  ;;  %v10229_v54 = vsub.f32 %v10134_v19, %v2776_v38  ;;  %v3503_v48 = vadd.f32 %v3502_v24, %v10216_v27  ;;  %v3561_v11 = vpop.f32.mrf.mxu1  ;;  %v10243_v0 = vpop.eup %7864 }
 0xa56   :  { %v3562_v41 = vadd.f32 %v3561_v11, %v10222_v57  ;;  %7866 = vrsqrt.f32 %v10226_v4  ;;  %v3000_v49 = vmul.f32 %v10243_v0, %v10212_v60  ;;  %vm3006_vm10 = vweird.f32 %v10243_v0 }
 0xa57   :  { %12337 = vst [vmem:[#allocation28_spill] sm:$0xff] %v10229_v54  ;;  %v2998_v63 = vsel %vm2997_vm9, %v7863_v3, %v2994_v58  ;;  %v2816_v40 = vmul.f32 %v10229_v54, %v10229_v54  ;;  %vm10316_vm13 = vmor %vm3005_vm12, %vm3006_vm10  ;;  %vm3015_vm15 = vweird.f32 %v10226_v4 }
 0xa58   :  { %v3108_v39 = vmul.f32 %v2998_v63, %v10086_v15  ;;  %v3612_v47 = vpack.c.bf16 %v3562_v41, %v3503_v48 }
 0xa59   :  { %2853 = vadd.xlane.f32.xlu2 %v2816_v40  ;;  %v3384_v5 = vpop.f32.mrf.mxu3  ;;  %v3443_v55 = vpop.f32.mrf.mxu2 }
 0xa5a   :  { %v3385_v62 = vadd.f32 %v3384_v5, %v10233_v34  ;;  %v3444_v3 = vadd.f32 %v3443_v55, %v10235_v35  ;;  %v2844_v32 = vpop.xlane.xlu1 %2843  ;;  %v10247_v17 = vunpack.c.l.bf16 %v3612_v47  ;;  %v10249_v1 = vunpack.c.h.bf16 %v3612_v47 }
 0xa5b   :  { %v2871_v15 = vmul.f32 %v2844_v32, %v8198_v28  ;;  %v2756_v37 = vpop.xlane.xlu0 %2755  ;;  %v3129_v12 = vmul.f32 %v10082_v51, %v3108_v39  ;;  %v3149_v55 = vadd.f32 %v10094_v30, %v3128_v8 }
 0xa5c   :  { %v3611_v56 = vpack.c.bf16 %v3444_v3, %v3385_v62  ;;  %v2777_v33 = vmul.f32 %v2756_v37, %v8198_v28  ;;  %v3853_v38 = vmul.f32 0.044677734, %v10247_v17  ;;  %v3854_v24 = vmul.f32 0.044677734, %v10249_v1  ;;  %v10261_v48 = vpop.eup %7866  ;;  %v3504_v39 = vpop.f32.mrf.mxu0 }
 0xa5d   :  { %v10265_v42 = vadd.f32 1e-06, %v2871_v15  ;;  %v3563_v9 = vpop.f32.mrf.mxu1  ;;  %v3150_v47 = vadd.f32 %v10094_v30, %v3129_v12  ;;  %v3001_v62 = vmul.f32 %v10243_v0, %v3000_v49  ;;  %v3010_v3 = vmul.f32 %v10261_v48, %v10226_v4 }
 0xa5e   :  { %v10259_v58 = vunpack.c.l.bf16 %v3611_v56  ;;  %v10263_v11 = vunpack.c.h.bf16 %v3611_v56  ;;  %v3932_v63 = vpack.c.bf16 %v3854_v24, %v3853_v38  ;;  %v10269_v40 = vsub.f32 %v10151_v52, %v2777_v33 }
 0xa5f   :  { %7868 = vrsqrt.f32 %v10265_v42  ;;  %v3505_v56 = vadd.f32 %v3504_v39, %v10216_v27  ;;  %v3564_v33 = vadd.f32 %v3563_v9, %v10222_v57  ;;  %v3165_v24 = vpack.c.bf16 %v3150_v47, %v3149_v55 }
 0xa60   :  { %v3851_v41 = vmul.f32 0.044677734, %v10259_v58  ;;  %12340 = vst [vmem:[#allocation31_spill] sm:$0xff] %v10269_v40  ;;  %v3852_v5 = vmul.f32 0.044677734, %v10263_v11  ;;  %v3973_v32 = vunpack.c.l.bf16 %v3932_v63  ;;  %v3974_v15 = vunpack.c.h.bf16 %v3932_v63 }
 0xa61   :  { %v2817_v8 = vmul.f32 %v10269_v40, %v10269_v40  ;;  %v3386_v49 = vpop.f32.mrf.mxu3  ;;  %v3614_v52 = vpack.c.bf16 %v3564_v33, %v3505_v56  ;;  %v3445_v63 = vpop.f32.mrf.mxu2  ;;  %3403 = vmatmul.bf16.gmra.mxu3 %v3165_v24  ;;  %3462 = vmatmul.bf16.gmra.mxu2 %v3165_v24  ;;  %vm3016_vm0 = vweird.f32 %v10261_v48  ;;  %v10364_v4 = vmul.f32 0.5, %v10263_v11 }
 0xa62   :  { %v3931_v37 = vpack.c.bf16 %v3852_v5, %v3851_v41  ;;  %v4053_v12 = vmul.f32 %v3973_v32, %v10247_v17  ;;  %v4054_v38 = vmul.f32 %v3974_v15, %v10249_v1  ;;  %v3002_v41 = vmul.f32 0.5, %v3001_v62  ;;  %3521 = vmatmul.bf16.gmra.mxu0 %v3165_v24  ;;  %3580 = vmatmul.bf16.gmra.mxu1 %v3165_v24  ;;  %vm10351_vm1 = vmor %vm3015_vm15, %vm3016_vm0 }
 0xa63   :  { %v3011_v5 = vmul.f32 %v10261_v48, %v3010_v3  ;;  %v10287_v32 = vunpack.c.l.bf16 %v3614_v52  ;;  %v3387_v47 = vadd.f32 %v3386_v49, %v10233_v34  ;;  %2855 = vadd.xlane.f32.xlu0 %v2817_v8  ;;  %v3446_v62 = vadd.f32 %v3445_v63, %v10235_v35 }
 0xa64   :  { %v3971_v36 = vunpack.c.l.bf16 %v3931_v37  ;;  %v3972_v19 = vunpack.c.h.bf16 %v3931_v37  ;;  %v4132_v22 = vpack.c.bf16 %v4054_v38, %v4053_v12  ;;  %v10290_v37 = vunpack.c.h.bf16 %v3614_v52 }
 0xa65   :  { %v10293_v3 = vpop.eup %7868  ;;  %v3857_v33 = vmul.f32 0.044677734, %v10287_v32  ;;  %v3003_v12 = vsub.f32 1.5, %v3002_v41  ;;  %v3613_v63 = vpack.c.bf16 %v3446_v62, %v3387_v47  ;;  %vm3025_vm2 = vweird.f32 %v10265_v42 }
 0xa66   :  { %v4051_v39 = vmul.f32 %v3971_v36, %v10259_v58  ;;  %v4052_v9 = vmul.f32 %v3972_v19, %v10263_v11  ;;  %v4173_v55 = vunpack.c.l.bf16 %v4132_v22  ;;  %v4174_v15 = vunpack.c.h.bf16 %v4132_v22 }
 0xa67   :  { %v3858_v49 = vmul.f32 0.044677734, %v10290_v37  ;;  %v3012_v22 = vmul.f32 0.5, %v3011_v5  ;;  %v3020_v8 = vmul.f32 %v10293_v3, %v10265_v42  ;;  %v10304_v23 = vunpack.c.l.bf16 %v3613_v63 }
 0xa68   :  { %v4131_v56 = vpack.c.bf16 %v4052_v9, %v4051_v39  ;;  %v4253_v36 = vmul.f32 %v4173_v55, %v10247_v17  ;;  %v4254_v19 = vmul.f32 %v4174_v15, %v10249_v1  ;;  %v2846_v15 = vpop.xlane.xlu2 %2845  ;;  %v3004_v5 = vmul.f32 %v10243_v0, %v3003_v12 }
 0xa69   :  { %v3934_v55 = vpack.c.bf16 %v3858_v49, %v3857_v33  ;;  %v3013_v47 = vsub.f32 1.5, %v3012_v22  ;;  %v3021_v62 = vmul.f32 %v10293_v3, %v3020_v8  ;;  %v3855_v8 = vmul.f32 0.044677734, %v10304_v23 }
 0xa6a   :  { %v4171_v38 = vunpack.c.l.bf16 %v4131_v56  ;;  %v4172_v24 = vunpack.c.h.bf16 %v4131_v56  ;;  %v4332_v52 = vpack.c.bf16 %v4254_v19, %v4253_v36  ;;  %v10306_v56 = vunpack.c.h.bf16 %v3613_v63  ;;  %v2758_v63 = vpop.xlane.xlu1 %2757 }
 0xa6b   :  { %v3977_v19 = vunpack.c.l.bf16 %v3934_v55  ;;  %v3978_v14 = vunpack.c.h.bf16 %v3934_v55  ;;  %vm3026_vm3 = vweird.f32 %v10293_v3 }
 0xa6c   :  { %v4251_v39 = vmul.f32 %v4171_v38, %v10259_v58  ;;  %v4252_v9 = vmul.f32 %v4172_v24, %v10263_v11  ;;  %v4373_v44 = vunpack.c.l.bf16 %v4332_v52  ;;  %v4374_v41 = vunpack.c.h.bf16 %v4332_v52  ;;  %vm10393_vm4 = vmor %vm3025_vm2, %vm3026_vm3 }
 0xa6d   :  { %v2872_v38 = vmul.f32 %v2846_v15, %v8198_v28  ;;  %v4057_v52 = vmul.f32 %v3977_v19, %v10287_v32  ;;  %v4058_v22 = vmul.f32 %v3978_v14, %v10290_v37  ;;  %v10337_v19 = vmul.f32 0.5, %v10249_v1 }
 0xa6e   :  { %v4331_v36 = vpack.c.bf16 %v4252_v9, %v4251_v39  ;;  %v4453_v33 = vadd.f32 %v4373_v44, %v10247_v17  ;;  %v4454_v60 = vadd.f32 %v4374_v41, %v10249_v1  ;;  %v3856_v39 = vmul.f32 0.044677734, %v10306_v56 }
 0xa6f   :  { %v3008_v44 = vsel %vm10316_vm13, %v10243_v0, %v3004_v5  ;;  %v10330_v9 = vmul.f32 0.5, %v10247_v17  ;;  %v4134_v14 = vpack.c.bf16 %v4058_v22, %v4057_v52  ;;  %v2778_v41 = vmul.f32 %v2758_v63, %v8198_v28 }
 0xa70   :  { %v4371_v24 = vunpack.c.l.bf16 %v4331_v36  ;;  %v4372_v49 = vunpack.c.h.bf16 %v4331_v36  ;;  %v3014_v36 = vmul.f32 %v10261_v48, %v3013_v47  ;;  %v3022_v0 = vmul.f32 0.5, %v3021_v62 }
 0xa71   :  { %v3933_v5 = vpack.c.bf16 %v3856_v39, %v3855_v8  ;;  %v4532_v12 = vpack.c.bf16 %v4454_v60, %v4453_v33  ;;  %v4177_v6 = vunpack.c.l.bf16 %v4134_v14  ;;  %v4178_v61 = vunpack.c.h.bf16 %v4134_v14  ;;  %v3566_v33 = vpop.f32.mrf.mxu1 }
 0xa72   :  { %v4451_v55 = vadd.f32 %v4371_v24, %v10259_v58  ;;  %v4452_v15 = vadd.f32 %v4372_v49, %v10263_v11  ;;  %v10339_v59 = vadd.f32 1e-06, %v2872_v38  ;;  %v10342_v17 = vmul.f32 %v3008_v44, %v10106_v25 }
 0xa73   :  { %v10345_v24 = vmul.f32 0.5, %v10259_v58  ;;  %v3975_v49 = vunpack.c.l.bf16 %v3933_v5  ;;  %v3976_v52 = vunpack.c.h.bf16 %v3933_v5  ;;  %v4257_v62 = vmul.f32 %v4177_v6, %v10287_v32  ;;  %v3507_v58 = vpop.f32.mrf.mxu0 }
 0xa74   :  { %v4531_v47 = vpack.c.bf16 %v4452_v15, %v4451_v55  ;;  %v4258_v38 = vmul.f32 %v4178_v61, %v10290_v37  ;;  %v10358_v25 = vsub.f32 %v10163_v31, %v2778_v41  ;;  %v3018_v63 = vsel %vm10351_vm1, %v10261_v48, %v3014_v36 }
 0xa75   :  { %v4055_v60 = vmul.f32 %v3975_v49, %v10304_v23  ;;  %v4056_v22 = vmul.f32 %v3976_v52, %v10306_v56  ;;  %v4573_v8 = vunpack.c.l.bf16 %v4532_v12  ;;  %v3023_v6 = vsub.f32 1.5, %v3022_v0 }
 0xa76   :  { %12345 = vst [vmem:[#allocation32_spill] sm:$0xff] %v10358_v25  ;;  %v4334_v39 = vpack.c.bf16 %v4258_v38, %v4257_v62  ;;  %7870 = vrsqrt.f32 %v10339_v59  ;;  %v3508_v44 = vadd.f32 %v3507_v58, %v10216_v27  ;;  %v3567_v55 = vadd.f32 %v3566_v33, %v10222_v57  ;;  %v3448_v62 = vpop.f32.mrf.mxu2 }
 0xa77   :  { %v4133_v61 = vpack.c.bf16 %v4056_v22, %v4055_v60  ;;  %v2818_v48 = vmul.f32 %v10358_v25, %v10358_v25  ;;  %v4574_v15 = vunpack.c.h.bf16 %v4532_v12  ;;  %v4571_v11 = vunpack.c.l.bf16 %v4531_v47  ;;  %v3389_v12 = vpop.f32.mrf.mxu3 }
 0xa78   :  { %v4572_v14 = vunpack.c.h.bf16 %v4531_v47  ;;  %v10375_v41 = vmul.f32 %v3018_v63, %v10128_v43  ;;  %v10379_v36 = vmul.f32 0.5, %v10287_v32  ;;  %v3024_v5 = vmul.f32 %v10293_v3, %v3023_v6 }
 0xa79   :  { %v4175_v0 = vunpack.c.l.bf16 %v4133_v61  ;;  %2857 = vadd.xlane.f32.xlu1 %v2818_v48  ;;  %v4377_v49 = vunpack.c.l.bf16 %v4334_v39  ;;  %v4378_v52 = vunpack.c.h.bf16 %v4334_v39  ;;  %v4176_v1 = vunpack.c.h.bf16 %v4133_v61  ;;  %v3568_v31 = vpop.f32.mrf.mxu1 }
 0xa7a   :  { %v4653_v47 = vmul.f32 0.796875, %v4573_v8  ;;  %v10383_v38 = vmul.f32 0.5, %v10290_v37  ;;  %v3616_v58 = vpack.c.bf16 %v3567_v55, %v3508_v44  ;;  %v4654_v63 = vmul.f32 0.796875, %v4574_v15 }
 0xa7b   :  { %v4255_v43 = vmul.f32 %v4175_v0, %v10304_v23  ;;  %v4651_v60 = vmul.f32 0.796875, %v4571_v11  ;;  %v4652_v22 = vmul.f32 0.796875, %v4572_v14  ;;  %v4256_v48 = vmul.f32 %v4176_v1, %v10306_v56  ;;  %v3509_v14 = vpop.f32.mrf.mxu0 }
 0xa7c   :  { %v10386_v33 = vpop.eup %7870  ;;  %v10397_v8 = vunpack.c.l.bf16 %v3616_v58  ;;  %v10399_v39 = vunpack.c.h.bf16 %v3616_v58  ;;  %v3390_v61 = vadd.f32 %v3389_v12, %v10233_v34  ;;  %v3449_v44 = vadd.f32 %v3448_v62, %v10235_v35 }
 0xa7d   :  { %v3028_v55 = vsel %vm10393_vm4, %v10293_v3, %v3024_v5  ;;  %v4457_v15 = vadd.f32 %v4377_v49, %v10287_v32  ;;  %v4458_v42 = vadd.f32 %v4378_v52, %v10290_v37  ;;  %v4333_v11 = vpack.c.bf16 %v4256_v48, %v4255_v43 }
 0xa7e   :  { %12348 = vst [vmem:[#allocation33_spill] sm:$0xff] %v10397_v8  ;;  %v3030_v0 = vmul.f32 %v10386_v33, %v10339_v59  ;;  %v3861_v1 = vmul.f32 0.044677734, %v10397_v8  ;;  %v3862_v58 = vmul.f32 0.044677734, %v10399_v39  ;;  %v3615_v12 = vpack.c.bf16 %v3449_v44, %v3390_v61 }
 0xa7f   :  { %12349 = vst [vmem:[#allocation34_spill] sm:$0xff] %v10399_v39  ;;  %v4732_v62 = vpack.c.bf16 %v4654_v63, %v4653_v47  ;;  %v10412_v53 = vpack.c.bf16 %v4652_v22, %v4651_v60  ;;  %v4375_v6 = vunpack.c.l.bf16 %v4333_v11  ;;  %v4376_v3 = vunpack.c.h.bf16 %v4333_v11 }
 0xa80   :  { %v3936_v5 = vpack.c.bf16 %v3862_v58, %v3861_v1  ;;  %v10414_v32 = vunpack.c.l.bf16 %v3615_v12  ;;  %v10416_v37 = vunpack.c.h.bf16 %v3615_v12  ;;  %v3510_v49 = vadd.f32 %v3509_v14, %v10216_v27 }
 0xa81   :  { %v4534_v52 = vpack.c.bf16 %v4458_v42, %v4457_v15  ;;  %v4455_v43 = vadd.f32 %v4375_v6, %v10304_v23  ;;  %v4456_v48 = vadd.f32 %v4376_v3, %v10306_v56  ;;  %v3569_v61 = vadd.f32 %v3568_v31, %v10222_v57 }
 0xa82   :  { %12350 = vst [vmem:[#allocation35_spill] sm:$0xff] %v10414_v32  ;;  %v3031_v47 = vmul.f32 %v10386_v33, %v3030_v0  ;;  %v3981_v63 = vunpack.c.l.bf16 %v3936_v5  ;;  %v3982_v60 = vunpack.c.h.bf16 %v3936_v5  ;;  %v3859_v22 = vmul.f32 0.044677734, %v10414_v32 }
 0xa83   :  { %12351 = vst [vmem:[#allocation36_spill] sm:$0xff] %v10416_v37  ;;  %v4773_v44 = vunpack.c.l.bf16 %v4732_v62  ;;  %v10425_v11 = vmul.f32 %v3028_v55, %v10143_v46  ;;  %v10428_v1 = vmul.f32 0.5, %v10304_v23  ;;  %v10431_v15 = vmul.f32 0.5, %v10306_v56 }
 0xa84   :  { %v4061_v42 = vmul.f32 %v3981_v63, %v10397_v8  ;;  %v4062_v31 = vmul.f32 %v3982_v60, %v10399_v39  ;;  %v3860_v14 = vmul.f32 0.044677734, %v10416_v37  ;;  %v3618_v0 = vpack.c.bf16 %v3569_v61, %v3510_v49 }
 0xa85   :  { %v4774_v58 = vunpack.c.h.bf16 %v4732_v62  ;;  %v4771_v12 = vunpack.c.l.bf16 %v10412_v53  ;;  %v4577_v6 = vunpack.c.l.bf16 %v4534_v52  ;;  %v4533_v3 = vpack.c.bf16 %v4456_v48, %v4455_v43 }
 0xa86   :  { %v10437_v46 = vmul.f32 0.5, %v3031_v47  ;;  %v4136_v55 = vpack.c.bf16 %v4062_v31, %v4061_v42  ;;  %v3935_v23 = vpack.c.bf16 %v3860_v14, %v3859_v22  ;;  %v10439_v5 = vunpack.c.l.bf16 %v3618_v0  ;;  %v3391_v42 = vpop.f32.mrf.mxu3 }
 0xa87   :  { %v4578_v56 = vunpack.c.h.bf16 %v4534_v52  ;;  %v10441_v7 = vunpack.c.h.bf16 %v3618_v0  ;;  %v3130_v63 = vmul.f32 %v10082_v51, %v10342_v17  ;;  %v3131_v49 = vmul.f32 %v10082_v51, %v10375_v41  ;;  %v3450_v52 = vpop.f32.mrf.mxu2 }
 0xa88   :  { %v4181_v62 = vunpack.c.l.bf16 %v4136_v55  ;;  %v4182_v61 = vunpack.c.h.bf16 %v4136_v55  ;;  %v3979_v60 = vunpack.c.l.bf16 %v3935_v23  ;;  %v3980_v18 = vunpack.c.h.bf16 %v3935_v23 }
 0xa89   :  { %12352 = vst [vmem:[#allocation37_spill] sm:$0xff] %v10441_v7  ;;  %v4657_v43 = vmul.f32 0.796875, %v4577_v6  ;;  %v4575_v48 = vunpack.c.l.bf16 %v4533_v3  ;;  %v3865_v47 = vmul.f32 0.044677734, %v10439_v5  ;;  %v3866_v22 = vmul.f32 0.044677734, %v10441_v7 }
 0xa8a   :  { %v4261_v31 = vmul.f32 %v4181_v62, %v10397_v8  ;;  %v4262_v14 = vmul.f32 %v4182_v61, %v10399_v39  ;;  %v4059_v17 = vmul.f32 %v3979_v60, %v10414_v32  ;;  %v4060_v41 = vmul.f32 %v3980_v18, %v10416_v37 }
 0xa8b   :  { %v4576_v0 = vunpack.c.h.bf16 %v4533_v3  ;;  %v3938_v55 = vpack.c.bf16 %v3866_v22, %v3865_v47  ;;  %v3151_v23 = vadd.f32 %v10094_v30, %v3130_v63  ;;  %v3152_v6 = vadd.f32 %v10094_v30, %v3131_v49  ;;  %v3512_v22 = vpop.f32.mrf.mxu0 }
 0xa8c   :  { %v4658_v16 = vmul.f32 0.796875, %v4578_v56  ;;  %v4135_v10 = vpack.c.bf16 %v4060_v41, %v4059_v17  ;;  %v3392_v2 = vadd.f32 %v3391_v42, %v10233_v34  ;;  %v3451_v21 = vadd.f32 %v3450_v52, %v10235_v35  ;;  %v3571_v42 = vpop.f32.mrf.mxu1 }
 0xa8d   :  { %7872 = vtanh.f32 %v4773_v44  ;;  %v3985_v62 = vunpack.c.l.bf16 %v3938_v55  ;;  %v3986_v45 = vunpack.c.h.bf16 %v3938_v55  ;;  %v3166_v61 = vpack.c.bf16 %v3152_v6, %v3151_v23 }
 0xa8e   :  { %7874 = vtanh.f32 %v4774_v58  ;;  %v4772_v60 = vunpack.c.h.bf16 %v10412_v53  ;;  %v4655_v18 = vmul.f32 0.796875, %v4575_v48  ;;  %v4336_v3 = vpack.c.bf16 %v4262_v14, %v4261_v31 }
 0xa8f   :  { %v4656_v47 = vmul.f32 0.796875, %v4576_v0  ;;  %v4065_v63 = vmul.f32 %v3985_v62, %v10439_v5  ;;  %v4066_v49 = vmul.f32 %v3986_v45, %v10441_v7  ;;  %3408 = vmatmul.bf16.gmra.mxu3 %v3166_v61  ;;  %3467 = vmatmul.bf16.gmra.mxu2 %v3166_v61  ;;  %v3617_v56 = vpack.c.bf16 %v3451_v21, %v3392_v2 }
 0xa90   :  { %7876 = vtanh.f32 %v4771_v12  ;;  %v4734_v44 = vpack.c.bf16 %v4658_v16, %v4657_v43  ;;  %v3033_v52 = vsub.f32 1.5, %v10437_v46  ;;  %v4179_v17 = vunpack.c.l.bf16 %v4135_v10  ;;  %3526 = vmatmul.bf16.gmra.mxu0 %v3166_v61  ;;  %3585 = vmatmul.bf16.gmra.mxu1 %v3166_v61  ;;  %v2848_v43 = vpop.xlane.xlu2 %2847 }
 0xa91   :  { %v4180_v53 = vunpack.c.h.bf16 %v4135_v10  ;;  %v4138_v58 = vpack.c.bf16 %v4066_v49, %v4065_v63  ;;  %v10461_v48 = vunpack.c.l.bf16 %v3617_v56  ;;  %v10463_v31 = vunpack.c.h.bf16 %v3617_v56 }
 0xa92   :  { %7878 = vtanh.f32 %v4772_v60  ;;  %vm3035_vm5 = vweird.f32 %v10339_v59  ;;  %vm3036_vm6 = vweird.f32 %v10386_v33  ;;  %v3513_v2 = vadd.f32 %v3512_v22, %v10216_v27 }
 0xa93   :  { %v3572_v16 = vadd.f32 %v3571_v42, %v10222_v57  ;;  %v10469_v21 = vpop.eup %7872  ;;  %v4733_v45 = vpack.c.bf16 %v4656_v47, %v4655_v18  ;;  %v4381_v12 = vunpack.c.l.bf16 %v4336_v3  ;;  %v4382_v46 = vunpack.c.h.bf16 %v4336_v3  ;;  %vm10501_vm7 = vmor %vm3035_vm5, %vm3036_vm6 }
 0xa94   :  { %v3863_v10 = vmul.f32 0.044677734, %v10461_v48  ;;  %v10472_v14 = vpop.eup %7874  ;;  %v4777_v41 = vunpack.c.l.bf16 %v4734_v44  ;;  %v3034_v0 = vmul.f32 %v10386_v33, %v3033_v52  ;;  %v3864_v55 = vmul.f32 0.044677734, %v10463_v31 }
 0xa95   :  { %v3620_v23 = vpack.c.bf16 %v3572_v16, %v3513_v2  ;;  %v4259_v6 = vmul.f32 %v4179_v17, %v10414_v32  ;;  %v4260_v62 = vmul.f32 %v4180_v53, %v10416_v37  ;;  %v4185_v61 = vunpack.c.l.bf16 %v4138_v58 }
 0xa96   :  { %v4186_v60 = vunpack.c.h.bf16 %v4138_v58  ;;  %v10478_v18 = vpop.eup %7876  ;;  %v4778_v3 = vunpack.c.h.bf16 %v4734_v44  ;;  %v3937_v47 = vpack.c.bf16 %v3864_v55, %v3863_v10  ;;  %v2873_v49 = vmul.f32 %v2848_v43, %v8198_v28  ;;  %v3394_v44 = vpop.f32.mrf.mxu3 }
 0xa97   :  { %v10480_v63 = vunpack.c.l.bf16 %v3620_v23  ;;  %v4775_v56 = vunpack.c.l.bf16 %v4733_v45  ;;  %v4461_v22 = vadd.f32 %v4381_v12, %v10397_v8  ;;  %v4462_v42 = vadd.f32 %v4382_v46, %v10399_v39 }
 0xa98   :  { %v10485_v52 = vunpack.c.h.bf16 %v3620_v23  ;;  %v10487_v17 = vpop.eup %7878  ;;  %7880 = vtanh.f32 %v4777_v41  ;;  %v3983_v53 = vunpack.c.l.bf16 %v3937_v47  ;;  %v3984_v58 = vunpack.c.h.bf16 %v3937_v47  ;;  %v3453_v41 = vpop.f32.mrf.mxu2 }
 0xa99   :  { %12353 = vst [vmem:[#allocation38_spill] sm:$0xff] %v10480_v63  ;;  %v3869_v2 = vmul.f32 0.044677734, %v10480_v63  ;;  %v4335_v16 = vpack.c.bf16 %v4260_v62, %v4259_v6  ;;  %v4265_v10 = vmul.f32 %v4185_v61, %v10439_v5  ;;  %v4266_v43 = vmul.f32 %v4186_v60, %v10441_v7 }
 0xa9a   :  { %12354 = vst [vmem:[#allocation39_spill] sm:$0xff] %v10485_v52  ;;  %v3870_v55 = vmul.f32 0.044677734, %v10485_v52  ;;  %7882 = vtanh.f32 %v4778_v3  ;;  %v4063_v12 = vmul.f32 %v3983_v53, %v10461_v48  ;;  %v4064_v46 = vmul.f32 %v3984_v58, %v10463_v31 }
 0xa9b   :  { %v10495_v23 = vadd.f32 1e-06, %v2873_v49  ;;  %v4776_v50 = vunpack.c.h.bf16 %v4733_v45  ;;  %7884 = vtanh.f32 %v4775_v56  ;;  %v4536_v62 = vpack.c.bf16 %v4462_v42, %v4461_v22 }
 0xa9c   :  { %v3395_v61 = vadd.f32 %v3394_v44, %v10233_v34  ;;  %v3038_v60 = vsel %vm10501_vm7, %v10386_v33, %v3034_v0  ;;  %v4137_v3 = vpack.c.bf16 %v4064_v46, %v4063_v12  ;;  %v3940_v47 = vpack.c.bf16 %v3870_v55, %v3869_v2  ;;  %v3514_v0 = vpop.f32.mrf.mxu0  ;;  %v3573_v2 = vpop.f32.mrf.mxu1 }
 0xa9d   :  { %7886 = vrsqrt.f32 %v10495_v23  ;;  %v4379_v45 = vunpack.c.l.bf16 %v4335_v16  ;;  %v4380_v49 = vunpack.c.h.bf16 %v4335_v16  ;;  %v4338_v56 = vpack.c.bf16 %v4266_v43, %v4265_v10 }
 0xa9e   :  { %v3454_v59 = vadd.f32 %v3453_v41, %v10235_v35  ;;  %v10511_v53 = vpop.eup %7880  ;;  %v4183_v58 = vunpack.c.l.bf16 %v4137_v3  ;;  %v4184_v39 = vunpack.c.h.bf16 %v4137_v3  ;;  %v3989_v22 = vunpack.c.l.bf16 %v3940_v47 }
 0xa9f   :  { %12357 = vst [vmem:[#allocation40_spill] sm:$0xff] %v10511_v53  ;;  %v3990_v42 = vunpack.c.h.bf16 %v3940_v47  ;;  %7888 = vtanh.f32 %v4776_v50  ;;  %v3112_v44 = vmul.f32 %v3038_v60, %v10158_v20  ;;  %v4581_v6 = vunpack.c.l.bf16 %v4536_v62 }
 0xaa0   :  { %v3619_v33 = vpack.c.bf16 %v3454_v59, %v3395_v61  ;;  %v10514_v55 = vpop.eup %7882  ;;  %v4263_v16 = vmul.f32 %v4183_v58, %v10461_v48  ;;  %v4264_v10 = vmul.f32 %v4184_v39, %v10463_v31  ;;  %v4069_v43 = vmul.f32 %v3989_v22, %v10480_v63 }
 0xaa1   :  { %12358 = vst [vmem:[#allocation41_spill] sm:$0xff] %v10514_v55  ;;  %v4070_v12 = vmul.f32 %v3990_v42, %v10485_v52  ;;  %v10520_v46 = vpop.eup %7884  ;;  %v4459_v50 = vadd.f32 %v4379_v45, %v10414_v32  ;;  %v4460_v20 = vadd.f32 %v4380_v49, %v10416_v37  ;;  %v4385_v3 = vunpack.c.l.bf16 %v4338_v56 }
 0xaa2   :  { %v10524_v41 = vunpack.c.l.bf16 %v3619_v33  ;;  %v10526_v61 = vunpack.c.h.bf16 %v3619_v33  ;;  %v3515_v39 = vadd.f32 %v3514_v0, %v10216_v27  ;;  %v3574_v59 = vadd.f32 %v3573_v2, %v10222_v57 }
 0xaa3   :  { %v10528_v60 = vpop.eup %7886  ;;  %v4140_v47 = vpack.c.bf16 %v4070_v12, %v4069_v43  ;;  %v4386_v58 = vunpack.c.h.bf16 %v4338_v56  ;;  %v4582_v42 = vunpack.c.h.bf16 %v4536_v62  ;;  %v4337_v8 = vpack.c.bf16 %v4264_v10, %v4263_v16 }
 0xaa4   :  { %12359 = vst [vmem:[#allocation42_spill] sm:$0xff] %v10524_v41  ;;  %v3040_v22 = vmul.f32 %v10528_v60, %v10495_v23  ;;  %v3867_v45 = vmul.f32 0.044677734, %v10524_v41  ;;  %v3868_v49 = vmul.f32 0.044677734, %v10526_v61  ;;  %v4661_v25 = vmul.f32 0.796875, %v4581_v6 }
 0xaa5   :  { %12360 = vst [vmem:[#allocation43_spill] sm:$0xff] %v10526_v61  ;;  %v4189_v33 = vunpack.c.l.bf16 %v4140_v47  ;;  %v4190_v37 = vunpack.c.h.bf16 %v4140_v47  ;;  %v10536_v32 = vpop.eup %7888  ;;  %v3622_v12 = vpack.c.bf16 %v3574_v59, %v3515_v39  ;;  %v4535_v2 = vpack.c.bf16 %v4460_v20, %v4459_v50 }
 0xaa6   :  { %v3041_v43 = vmul.f32 %v10528_v60, %v3040_v22  ;;  %v3939_v0 = vpack.c.bf16 %v3868_v49, %v3867_v45  ;;  %v4465_v56 = vadd.f32 %v4385_v3, %v10439_v5  ;;  %v4466_v13 = vadd.f32 %v4386_v58, %v10441_v7 }
 0xaa7   :  { %v4269_v40 = vmul.f32 %v4189_v33, %v10480_v63  ;;  %v4270_v54 = vmul.f32 %v4190_v37, %v10485_v52  ;;  %v10543_v10 = vunpack.c.l.bf16 %v3622_v12  ;;  %v4383_v47 = vunpack.c.l.bf16 %v4337_v8 }
 0xaa8   :  { %v3987_v62 = vunpack.c.l.bf16 %v3939_v0  ;;  %v3988_v16 = vunpack.c.h.bf16 %v3939_v0  ;;  %v3042_v6 = vmul.f32 0.5, %v3041_v43  ;;  %v10545_v53 = vunpack.c.h.bf16 %v3622_v12 }
 0xaa9   :  { %12361 = vst [vmem:[#allocation44_spill] sm:$0xff] %v10543_v10  ;;  %v4340_v55 = vpack.c.bf16 %v4270_v54, %v4269_v40  ;;  %v4662_v22 = vmul.f32 0.796875, %v4582_v42  ;;  %v3873_v3 = vmul.f32 0.044677734, %v10543_v10  ;;  %v4579_v39 = vunpack.c.l.bf16 %v4535_v2  ;;  %v3396_v42 = vpop.f32.mrf.mxu3 }
 0xaaa   :  { %12362 = vst [vmem:[#allocation45_spill] sm:$0xff] %v10545_v53  ;;  %v4067_v50 = vmul.f32 %v3987_v62, %v10524_v41  ;;  %v4068_v20 = vmul.f32 %v3988_v16, %v10526_v61  ;;  %v4384_v37 = vunpack.c.h.bf16 %v4337_v8  ;;  %v3132_v59 = vmul.f32 %v10082_v51, %v10425_v11  ;;  %v3455_v11 = vpop.f32.mrf.mxu2 }
 0xaab   :  { %v3133_v58 = vmul.f32 %v10082_v51, %v3112_v44  ;;  %v4580_v45 = vunpack.c.h.bf16 %v4535_v2  ;;  %v10553_v49 = vpack.c.bf16 %v4466_v13, %v4465_v56  ;;  %v3874_v40 = vmul.f32 0.044677734, %v10545_v53 }
 0xaac   :  { %v4139_v54 = vpack.c.bf16 %v4068_v20, %v4067_v50  ;;  %v4463_v33 = vadd.f32 %v4383_v47, %v10461_v48  ;;  %v4389_v43 = vunpack.c.l.bf16 %v4340_v55  ;;  %v3043_v0 = vsub.f32 1.5, %v3042_v6 }
 0xaad   :  { %vm3046_vm8 = vweird.f32 %v10528_v60  ;;  %v4390_v12 = vunpack.c.h.bf16 %v4340_v55  ;;  %v3942_v16 = vpack.c.bf16 %v3874_v40, %v3873_v3  ;;  %v4464_v44 = vadd.f32 %v4384_v37, %v10463_v31 }
 0xaae   :  { %v4187_v8 = vunpack.c.l.bf16 %v4139_v54  ;;  %v4188_v62 = vunpack.c.h.bf16 %v4139_v54  ;;  %v3153_v13 = vadd.f32 %v10094_v30, %v3132_v59  ;;  %v3154_v2 = vadd.f32 %v10094_v30, %v3133_v58 }
 0xaaf   :  { %v3397_v56 = vadd.f32 %v3396_v42, %v10233_v34  ;;  %v3993_v6 = vunpack.c.l.bf16 %v3942_v16  ;;  %v3994_v20 = vunpack.c.h.bf16 %v3942_v16  ;;  %v4469_v55 = vadd.f32 %v4389_v43, %v10480_v63 }
 0xab0   :  { %v4267_v50 = vmul.f32 %v4187_v8, %v10524_v41  ;;  %v4268_v47 = vmul.f32 %v4188_v62, %v10526_v61  ;;  %v3044_v54 = vmul.f32 %v10528_v60, %v3043_v0  ;;  %v3167_v3 = vpack.c.bf16 %v3154_v2, %v3153_v13 }
 0xab1   :  { %v3456_v40 = vadd.f32 %v3455_v11, %v10235_v35  ;;  %v4470_v37 = vadd.f32 %v4390_v12, %v10485_v52  ;;  %v4073_v58 = vmul.f32 %v3993_v6, %v10543_v10  ;;  %v4074_v42 = vmul.f32 %v3994_v20, %v10545_v53 }
 0xab2   :  { %v4339_v59 = vpack.c.bf16 %v4268_v47, %v4267_v50  ;;  %v10570_v7 = vpack.c.bf16 %v4662_v22, %v4661_v25  ;;  %v4659_v8 = vmul.f32 0.796875, %v4579_v39  ;;  %vm3045_vm9 = vweird.f32 %v10495_v23  ;;  %3413 = vmatmul.bf16.gmra.mxu3 %v3167_v3  ;;  %3472 = vmatmul.bf16.gmra.mxu2 %v3167_v3 }
 0xab3   :  { %v3621_v43 = vpack.c.bf16 %v3456_v40, %v3397_v56  ;;  %v4660_v62 = vmul.f32 0.796875, %v4580_v45  ;;  %v4142_v13 = vpack.c.bf16 %v4074_v42, %v4073_v58  ;;  %3531 = vmatmul.bf16.gmra.mxu0 %v3167_v3  ;;  %3590 = vmatmul.bf16.gmra.mxu1 %v3167_v3  ;;  %v4585_v12 = vunpack.c.l.bf16 %v10553_v49  ;;  %vm10576_vm10 = vmor %vm3045_vm9, %vm3046_vm8 }
 0xab4   :  { %v4387_v0 = vunpack.c.l.bf16 %v4339_v59  ;;  %v4388_v16 = vunpack.c.h.bf16 %v4339_v59  ;;  %v4537_v11 = vpack.c.bf16 %v4464_v44, %v4463_v33  ;;  %v4540_v39 = vpack.c.bf16 %v4470_v37, %v4469_v55 }
 0xab5   :  { %v10580_v22 = vunpack.c.l.bf16 %v3621_v43  ;;  %v10582_v23 = vunpack.c.h.bf16 %v3621_v43  ;;  %v3048_v45 = vsel %vm10576_vm10, %v10528_v60, %v3044_v54  ;;  %v4193_v2 = vunpack.c.l.bf16 %v4142_v13 }
 0xab6   :  { %v4194_v56 = vunpack.c.h.bf16 %v4142_v13  ;;  %v4467_v50 = vadd.f32 %v4387_v0, %v10524_v41  ;;  %v4468_v33 = vadd.f32 %v4388_v16, %v10526_v61  ;;  %v4931_v60 = vpack.c.bf16 %v10487_v17, %v10478_v18 }
 0xab7   :  { %12365 = vst [vmem:[#allocation46_spill] sm:$0xff] %v10580_v22  ;;  %v3871_v44 = vmul.f32 0.044677734, %v10580_v22  ;;  %v3872_v47 = vmul.f32 0.044677734, %v10582_v23  ;;  %v4273_v20 = vmul.f32 %v4193_v2, %v10543_v10  ;;  %v10596_v54 = vpack.c.bf16 %v4660_v62, %v4659_v8 }
 0xab8   :  { %12366 = vst [vmem:[#allocation47_spill] sm:$0xff] %v10582_v23  ;;  %v4274_v3 = vmul.f32 %v4194_v56, %v10545_v53  ;;  %v4586_v40 = vunpack.c.h.bf16 %v10553_v49  ;;  %v10599_v37 = vmul.f32 0.796875, %v4585_v12  ;;  %v4583_v58 = vunpack.c.l.bf16 %v4537_v11 }
 0xab9   :  { %v3941_v59 = vpack.c.bf16 %v3872_v47, %v3871_v44  ;;  %v3113_v42 = vmul.f32 %v3048_v45, %v10173_v29  ;;  %v4589_v16 = vunpack.c.l.bf16 %v4540_v39  ;;  %v4539_v13 = vpack.c.bf16 %v4468_v33, %v4467_v50 }
 0xaba   :  { %v4342_v43 = vpack.c.bf16 %v4274_v3, %v4273_v20  ;;  %v4971_v18 = vunpack.c.l.bf16 %v4931_v60  ;;  %v4972_v17 = vunpack.c.h.bf16 %v4931_v60  ;;  %v4590_v8 = vunpack.c.h.bf16 %v4540_v39 }
 0xabb   :  { %v2850_v6 = vpop.xlane.xlu0 %2849  ;;  %v3991_v25 = vunpack.c.l.bf16 %v3941_v59  ;;  %v3992_v2 = vunpack.c.h.bf16 %v3941_v59  ;;  %v10607_v12 = vmul.f32 0.796875, %v4586_v40  ;;  %v4584_v29 = vunpack.c.h.bf16 %v4537_v11 }
 0xabc   :  { %v2874_v55 = vmul.f32 %v2850_v6, %v8198_v28  ;;  %v4393_v56 = vunpack.c.l.bf16 %v4342_v43  ;;  %v4394_v6 = vunpack.c.h.bf16 %v4342_v43  ;;  %v10609_v45 = vmul.f32 0.796875, %v4583_v58 }
 0xabd   :  { %v4071_v49 = vmul.f32 %v3991_v25, %v10580_v22  ;;  %v4072_v62 = vmul.f32 %v3992_v2, %v10582_v23  ;;  %v4933_v50 = vpack.c.bf16 %v10536_v32, %v10520_v46  ;;  %v4587_v33 = vunpack.c.l.bf16 %v4539_v13 }
 0xabe   :  { %v10602_v0 = vadd.f32 1e-06, %v2874_v55  ;;  %v4588_v44 = vunpack.c.h.bf16 %v4539_v13  ;;  %v3134_v20 = vmul.f32 %v10082_v51, %v3113_v42  ;;  %v4473_v39 = vadd.f32 %v4393_v56, %v10543_v10 }
 0xabf   :  { %v4141_v47 = vpack.c.bf16 %v4072_v62, %v4071_v49  ;;  %v4474_v3 = vadd.f32 %v4394_v6, %v10545_v53  ;;  %v5051_v55 = vadd.f32 1.0, %v4971_v18  ;;  %v5052_v60 = vadd.f32 1.0, %v4972_v17 }
 0xac0   :  { %7890 = vrsqrt.f32 %v10602_v0  ;;  %v4669_v59 = vmul.f32 0.796875, %v4589_v16  ;;  %v4670_v40 = vmul.f32 0.796875, %v4590_v8  ;;  %v10619_v32 = vpack.c.bf16 %v10364_v4, %v10345_v24 }
 0xac1   :  { %v4191_v43 = vunpack.c.l.bf16 %v4141_v47  ;;  %v4192_v11 = vunpack.c.h.bf16 %v4141_v47  ;;  %v4975_v46 = vunpack.c.l.bf16 %v4933_v50  ;;  %v4976_v13 = vunpack.c.h.bf16 %v4933_v50 }
 0xac2   :  { %v10621_v2 = vmul.f32 0.796875, %v4584_v29  ;;  %v4667_v56 = vmul.f32 0.796875, %v4587_v33  ;;  %v4668_v6 = vmul.f32 0.796875, %v4588_v44  ;;  %v10625_v16 = vpack.c.bf16 %v10431_v15, %v10428_v1 }
 0xac3   :  { %v4542_v18 = vpack.c.bf16 %v4474_v3, %v4473_v39  ;;  %v10629_v8 = vadd.f32 %v10094_v30, %v3134_v20  ;;  %v10631_v49 = vpack.c.bf16 %v5052_v60, %v5051_v55  ;;  %v10633_v24 = vpack.c.bf16 %v4670_v40, %v4669_v59 }
 0xac4   :  { %v4271_v4 = vmul.f32 %v4191_v43, %v10580_v22  ;;  %v4272_v62 = vmul.f32 %v4192_v11, %v10582_v23  ;;  %v5055_v33 = vadd.f32 1.0, %v4975_v46  ;;  %v5056_v1 = vadd.f32 1.0, %v4976_v13 }
 0xac5   :  { %v2852_v58 = vpop.xlane.xlu1 %2851  ;;  %12367 = vst [vmem:[#allocation48_spill] sm:$0xff] %v10633_v24  ;;  %v5171_v15 = vunpack.c.l.bf16 %v10619_v32  ;;  %v10640_v44 = vpack.c.bf16 %v4668_v6, %v4667_v56  ;;  %vm3055_vm12 = vweird.f32 %v10602_v0  ;;  %v5175_v47 = vunpack.c.l.bf16 %v10625_v16  ;;  %v12378_v24 = vld [vmem:[#allocation41_spill] sm:$0xff] }
 0xac6   :  { %v2875_v25 = vmul.f32 %v2852_v58, %v8198_v28  ;;  %v7891_v42 = vpop.eup %7890  ;;  %v4593_v20 = vunpack.c.l.bf16 %v4542_v18  ;;  %v5251_v55 = vunpack.c.l.bf16 %v10631_v49  ;;  %v5172_v60 = vunpack.c.h.bf16 %v10619_v32 }
 0xac7   :  { %v3050_v17 = vmul.f32 %v7891_v42, %v10602_v0  ;;  %12368 = vst [vmem:[#allocation49_spill] sm:$0xff] %v10640_v44  ;;  %v4594_v59 = vunpack.c.h.bf16 %v4542_v18  ;;  %v4341_v40 = vpack.c.bf16 %v4272_v62, %v4271_v4  ;;  %v10650_v11 = vpack.c.bf16 %v10337_v19, %v10330_v9 }
 0xac8   :  { %v10637_v29 = vadd.f32 1e-06, %v2875_v25  ;;  %vm3056_vm13 = vweird.f32 %v7891_v42  ;;  %v10652_v13 = vpack.c.bf16 %v5056_v1, %v5055_v33  ;;  %v10656_v56 = vpack.c.bf16 %v10383_v38, %v10379_v36 }
 0xac9   :  { %v3051_v50 = vmul.f32 %v7891_v42, %v3050_v17  ;;  %v10664_v9 = vpack.c.bf16 %v10472_v14, %v10469_v21  ;;  %v10666_v19 = vmul.f32 0.796875, %v4593_v20  ;;  %v10668_v4 = vmul.f32 %v5251_v55, %v5171_v15  ;;  %vm3057_vm15 = vmor %vm3055_vm12, %vm3056_vm13 }
 0xaca   :  { %7892 = vrsqrt.f32 %v10637_v29  ;;  %v10673_v36 = vmul.f32 0.796875, %v4594_v59  ;;  %v4391_v38 = vunpack.c.l.bf16 %v4341_v40  ;;  %v4392_v33 = vunpack.c.h.bf16 %v4341_v40 }
 0xacb   :  { %v3052_v39 = vmul.f32 0.5, %v3051_v50  ;;  %12369 = vst [vmem:[#allocation50_spill] sm:$0xff] %v10666_v19  ;;  %v5255_v1 = vunpack.c.l.bf16 %v10652_v13  ;;  %v5252_v55 = vunpack.c.h.bf16 %v10631_v49  ;;  %v4973_v59 = vunpack.c.l.bf16 %v10664_v9 }
 0xacc   :  { %v2854_v3 = vpop.xlane.xlu2 %2853  ;;  %12370 = vst [vmem:[#allocation51_spill] sm:$0xff] %v10673_v36  ;;  %vm3065_vm0 = vweird.f32 %v10637_v29 }
 0xacd   :  { %v2876_v43 = vmul.f32 %v2854_v3, %v8198_v28  ;;  %v3053_v58 = vsub.f32 1.5, %v3052_v39  ;;  %v10698_v40 = vmul.f32 %v5255_v1, %v5175_v47  ;;  %v10707_v53 = vmul.f32 %v5252_v55, %v5172_v60 }
 0xace   :  { %v3517_v25 = vpop.f32.mrf.mxu0  ;;  %v3576_v46 = vpop.f32.mrf.mxu1  ;;  %v10709_v10 = vadd.f32 1.0, %v4973_v59 }
 0xacf   :  { %v10658_v6 = vadd.f32 1e-06, %v2876_v43  ;;  %v3518_v32 = vadd.f32 %v3517_v25, %v10216_v27  ;;  %v3577_v18 = vadd.f32 %v3576_v46, %v10222_v57  ;;  %v3054_v17 = vmul.f32 %v7891_v42, %v3053_v58 }
 0xad0   :  { %v10671_v50 = vpop.eup %7892  ;;  %v4471_v25 = vadd.f32 %v4391_v38, %v10580_v22 }
 0xad1   :  { %7894 = vrsqrt.f32 %v10658_v6  ;;  %v3058_v21 = vsel %vm3057_vm15, %v7891_v42, %v3054_v17  ;;  %v3624_v14 = vpack.c.bf16 %v3577_v18, %v3518_v32  ;;  %v3060_v0 = vmul.f32 %v10671_v50, %v10637_v29 }
 0xad2   :  { %v3114_v20 = vmul.f32 %v3058_v21, %v10189_v26  ;;  %v4472_v26 = vadd.f32 %v4392_v33, %v10582_v23  ;;  %vm3066_vm1 = vweird.f32 %v10671_v50  ;;  %vm3075_vm2 = vweird.f32 %v10658_v6 }
 0xad3   :  { %v3399_v39 = vpop.f32.mrf.mxu3  ;;  %v3458_v3 = vpop.f32.mrf.mxu2  ;;  %v10687_v43 = vunpack.c.l.bf16 %v3624_v14  ;;  %v10689_v42 = vunpack.c.h.bf16 %v3624_v14  ;;  %v4974_v14 = vunpack.c.h.bf16 %v10664_v9  ;;  %v3061_v49 = vmul.f32 %v10671_v50, %v3060_v0  ;;  %vm10775_vm3 = vmor %vm3065_vm0, %vm3066_vm1 }
 0xad4   :  { %v3400_v58 = vadd.f32 %v3399_v39, %v10233_v34  ;;  %v3459_v46 = vadd.f32 %v3458_v3, %v10235_v35  ;;  %v3135_v3 = vmul.f32 %v10082_v51, %v3114_v20  ;;  %v10711_v47 = vpack.c.bf16 %v4472_v26, %v4471_v25 }
 0xad5   :  { %12371 = vst [vmem:[#allocation52_spill] sm:$0xff] %v10687_v43  ;;  %v3877_v32 = vmul.f32 0.044677734, %v10687_v43  ;;  %v3878_v18 = vmul.f32 0.044677734, %v10689_v42  ;;  %v3062_v26 = vmul.f32 0.5, %v3061_v49 }
 0xad6   :  { %12372 = vst [vmem:[#allocation53_spill] sm:$0xff] %v10689_v42  ;;  %v3519_v17 = vpop.f32.mrf.mxu0  ;;  %v3578_v21 = vpop.f32.mrf.mxu1  ;;  %v3623_v39 = vpack.c.bf16 %v3459_v46, %v3400_v58  ;;  %v3156_v20 = vadd.f32 %v10094_v30, %v3135_v3  ;;  %v12377_v3 = vld [vmem:[#allocation40_spill] sm:$0xff] }
 0xad7   :  { %v10701_v15 = vpop.eup %7894  ;;  %v3520_v38 = vadd.f32 %v3519_v17, %v10216_v27  ;;  %v3579_v33 = vadd.f32 %v3578_v21, %v10222_v57  ;;  %v3944_v62 = vpack.c.bf16 %v3878_v18, %v3877_v32  ;;  %v2856_v55 = vpop.xlane.xlu0 %2855  ;;  %v10734_v36 = vpack.c.bf16 %v12378_v24, %v12377_v3 }
 0xad8   :  { %v10713_v1 = vunpack.c.l.bf16 %v3623_v39  ;;  %v10715_v9 = vunpack.c.h.bf16 %v3623_v39  ;;  %v3070_v46 = vmul.f32 %v10701_v15, %v10658_v6  ;;  %vm3076_vm4 = vweird.f32 %v10701_v15 }
 0xad9   :  { %v3626_v58 = vpack.c.bf16 %v3579_v33, %v3520_v38  ;;  %v3997_v17 = vunpack.c.l.bf16 %v3944_v62  ;;  %v3998_v21 = vunpack.c.h.bf16 %v3944_v62  ;;  %v2877_v38 = vmul.f32 %v2856_v55, %v8198_v28  ;;  %vm10801_vm5 = vmor %vm3075_vm2, %vm3076_vm4 }
 0xada   :  { %12373 = vst [vmem:[#allocation54_spill] sm:$0xff] %v10713_v1  ;;  %v3875_v0 = vmul.f32 0.044677734, %v10713_v1  ;;  %v3876_v60 = vmul.f32 0.044677734, %v10715_v9 }
 0xadb   :  { %12374 = vst [vmem:[#allocation55_spill] sm:$0xff] %v10715_v9  ;;  %v10722_v59 = vunpack.c.l.bf16 %v3626_v58  ;;  %v10724_v25 = vunpack.c.h.bf16 %v3626_v58  ;;  %v4077_v32 = vmul.f32 %v3997_v17, %v10687_v43  ;;  %v4078_v18 = vmul.f32 %v3998_v21, %v10689_v42  ;;  %v3401_v21 = vpop.f32.mrf.mxu3  ;;  %v3460_v24 = vpop.f32.mrf.mxu2 }
 0xadc   :  { %v3943_v62 = vpack.c.bf16 %v3876_v60, %v3875_v0  ;;  %v3071_v58 = vmul.f32 %v10701_v15, %v3070_v46  ;;  %v3168_v17 = vpack.c.bf16 %v3156_v20, %v10629_v8  ;;  %v10739_v39 = vadd.f32 1e-06, %v2877_v38 }
 0xadd   :  { %12375 = vst [vmem:[#allocation56_spill] sm:$0xff] %v10722_v59  ;;  %v3881_v33 = vmul.f32 0.044677734, %v10722_v59  ;;  %v4144_v19 = vpack.c.bf16 %v4078_v18, %v4077_v32  ;;  %v3882_v49 = vmul.f32 0.044677734, %v10724_v25  ;;  %v10741_v0 = vadd.f32 1.0, %v4974_v14 }
 0xade   :  { %12376 = vst [vmem:[#allocation57_spill] sm:$0xff] %v10724_v25  ;;  %v3995_v52 = vunpack.c.l.bf16 %v3943_v62  ;;  %v3996_v63 = vunpack.c.h.bf16 %v3943_v62  ;;  %v3063_v60 = vsub.f32 1.5, %v3062_v26  ;;  %3418 = vmatmul.bf16.gmra.mxu3 %v3168_v17  ;;  %3477 = vmatmul.bf16.gmra.mxu2 %v3168_v17  ;;  %7896 = vrsqrt.f32 %v10739_v39 }
 0xadf   :  { %v4197_v55 = vunpack.c.l.bf16 %v4144_v19  ;;  %v4198_v44 = vunpack.c.h.bf16 %v4144_v19  ;;  %v3946_v23 = vpack.c.bf16 %v3882_v49, %v3881_v33  ;;  %3536 = vmatmul.bf16.gmra.mxu0 %v3168_v17  ;;  %3595 = vmatmul.bf16.gmra.mxu1 %v3168_v17  ;;  %v3402_v14 = vadd.f32 %v3401_v21, %v10233_v34 }
 0xae0   :  { %v4075_v46 = vmul.f32 %v3995_v52, %v10713_v1  ;;  %v4076_v8 = vmul.f32 %v3996_v63, %v10715_v9  ;;  %v3072_v20 = vmul.f32 0.5, %v3071_v58  ;;  %v4591_v18 = vunpack.c.l.bf16 %v10711_v47 }
 0xae1   :  { %v4277_v26 = vmul.f32 %v4197_v55, %v10687_v43  ;;  %v4278_v19 = vmul.f32 %v4198_v44, %v10689_v42  ;;  %v4001_v32 = vunpack.c.l.bf16 %v3946_v23  ;;  %v4002_v38 = vunpack.c.h.bf16 %v3946_v23 }
 0xae2   :  { %v4143_v62 = vpack.c.bf16 %v4076_v8, %v4075_v46  ;;  %v3461_v52 = vadd.f32 %v3460_v24, %v10235_v35  ;;  %v4592_v63 = vunpack.c.h.bf16 %v10711_v47  ;;  %v3064_v44 = vmul.f32 %v10671_v50, %v3063_v60 }
 0xae3   :  { %v4344_v33 = vpack.c.bf16 %v4278_v19, %v4277_v26  ;;  %v4081_v3 = vmul.f32 %v4001_v32, %v10722_v59  ;;  %v4082_v17 = vmul.f32 %v4002_v38, %v10724_v25  ;;  %v3073_v55 = vsub.f32 1.5, %v3072_v20 }
 0xae4   :  { %v4195_v49 = vunpack.c.l.bf16 %v4143_v62  ;;  %v4196_v58 = vunpack.c.h.bf16 %v4143_v62  ;;  %v3625_v21 = vpack.c.bf16 %v3461_v52, %v3402_v14  ;;  %v10757_v23 = vpop.eup %7896  ;;  %v10763_v19 = vmul.f32 0.796875, %v4591_v18  ;;  %v3522_v52 = vpop.f32.mrf.mxu0 }
 0xae5   :  { %v4397_v22 = vunpack.c.l.bf16 %v4344_v33  ;;  %v4398_v46 = vunpack.c.h.bf16 %v4344_v33  ;;  %v4146_v8 = vpack.c.bf16 %v4082_v17, %v4081_v3  ;;  %v3080_v14 = vmul.f32 %v10757_v23, %v10739_v39  ;;  %v3581_v3 = vpop.f32.mrf.mxu1 }
 0xae6   :  { %v4275_v24 = vmul.f32 %v4195_v49, %v10713_v1  ;;  %v4276_v47 = vmul.f32 %v4196_v58, %v10715_v9  ;;  %v10761_v26 = vunpack.c.l.bf16 %v3625_v21  ;;  %12380 = vst [vmem:[#allocation41_spill] sm:$0xff] %v10763_v19  ;;  %v4977_v60 = vunpack.c.l.bf16 %v10734_v36 }
 0xae7   :  { %v4201_v32 = vunpack.c.l.bf16 %v4146_v8  ;;  %v4202_v62 = vunpack.c.h.bf16 %v4146_v8  ;;  %v10769_v38 = vunpack.c.h.bf16 %v3625_v21  ;;  %v5256_v49 = vunpack.c.h.bf16 %v10652_v13 }
 0xae8   :  { %12379 = vst [vmem:[#allocation40_spill] sm:$0xff] %v10761_v26  ;;  %v4343_v20 = vpack.c.bf16 %v4276_v47, %v4275_v24  ;;  %v3879_v33 = vmul.f32 0.044677734, %v10761_v26  ;;  %v4978_v58 = vunpack.c.h.bf16 %v10734_v36  ;;  %v3068_v17 = vsel %vm10775_vm3, %v10671_v50, %v3064_v44 }
 0xae9   :  { %12381 = vst [vmem:[#allocation58_spill] sm:$0xff] %v10769_v38  ;;  %v3074_v21 = vmul.f32 %v10701_v15, %v3073_v55  ;;  %v4477_v29 = vadd.f32 %v4397_v22, %v10687_v43  ;;  %v4478_v24 = vadd.f32 %v4398_v46, %v10689_v42  ;;  %v3081_v8 = vmul.f32 %v10757_v23, %v3080_v14 }
 0xaea   :  { %v4395_v47 = vunpack.c.l.bf16 %v4343_v20  ;;  %v3880_v19 = vmul.f32 0.044677734, %v10769_v38  ;;  %v3523_v61 = vadd.f32 %v3522_v52, %v10216_v27  ;;  %v4396_v13 = vunpack.c.h.bf16 %v4343_v20  ;;  %v12387_v52 = vld [vmem:[#allocation27_spill] sm:$0xff] }
 0xaeb   :  { %v4281_v36 = vmul.f32 %v4201_v32, %v10722_v59  ;;  %v4282_v41 = vmul.f32 %v4202_v62, %v10724_v25  ;;  %v3582_v50 = vadd.f32 %v3581_v3, %v10222_v57  ;;  %v10795_v44 = vmul.f32 0.796875, %v4592_v63 }
 0xaec   :  { %v3945_v55 = vpack.c.bf16 %v3880_v19, %v3879_v33  ;;  %v5057_v46 = vadd.f32 1.0, %v4977_v60  ;;  %v10807_v14 = vpack.c.bf16 %v10741_v0, %v10709_v10  ;;  %v3078_v20 = vsel %vm10801_vm5, %v10701_v15, %v3074_v21  ;;  %v2858_v60 = vpop.xlane.xlu1 %2857  ;;  %v12388_v15 = vld [vmem:[#allocation28_spill] sm:$0xff] }
 0xaed   :  { %v4544_v63 = vpack.c.bf16 %v4478_v24, %v4477_v29  ;;  %v12386_v32 = vunpack.c.h.bf16 %v10625_v16  ;;  %v5058_v6 = vadd.f32 1.0, %v4978_v58  ;;  %v10817_v18 = vmul.f32 %v3068_v17, %v12387_v52 }
 0xaee   :  { %v3999_v3 = vunpack.c.l.bf16 %v3945_v55  ;;  %v4000_v19 = vunpack.c.h.bf16 %v3945_v55  ;;  %v3628_v33 = vpack.c.bf16 %v3582_v50, %v3523_v61  ;;  %v4475_v10 = vadd.f32 %v4395_v47, %v10713_v1  ;;  %v3404_v61 = vpop.f32.mrf.mxu3 }
 0xaef   :  { %v10814_v62 = vmul.f32 %v5256_v49, %v12386_v32  ;;  %v4476_v0 = vadd.f32 %v4396_v13, %v10715_v9  ;;  %v3082_v42 = vmul.f32 0.5, %v3081_v8  ;;  %v4346_v22 = vpack.c.bf16 %v4282_v41, %v4281_v36 }
 0xaf0   :  { %v10822_v21 = vmul.f32 %v3078_v20, %v12388_v15  ;;  %v4079_v16 = vmul.f32 %v3999_v3, %v10761_v26  ;;  %v4080_v49 = vmul.f32 %v4000_v19, %v10769_v38  ;;  %v2878_v58 = vmul.f32 %v2858_v60, %v8198_v28 }
 0xaf1   :  { %v4597_v17 = vunpack.c.l.bf16 %v4544_v63  ;;  %v4598_v29 = vunpack.c.h.bf16 %v4544_v63  ;;  %vm3085_vm6 = vweird.f32 %v10739_v39  ;;  %v10830_v47 = vpack.c.bf16 %v5058_v6, %v5057_v46  ;;  %v3463_v63 = vpop.f32.mrf.mxu2 }
 0xaf2   :  { %v4145_v41 = vpack.c.bf16 %v4080_v49, %v4079_v16  ;;  %v10832_v8 = vadd.f32 1e-06, %v2878_v58  ;;  %v10834_v13 = vunpack.c.l.bf16 %v3628_v33  ;;  %v10836_v36 = vunpack.c.h.bf16 %v3628_v33 }
 0xaf3   :  { %v4543_v50 = vpack.c.bf16 %v4476_v0, %v4475_v10  ;;  %v3083_v55 = vsub.f32 1.5, %v3082_v42  ;;  %v4401_v20 = vunpack.c.l.bf16 %v4346_v22  ;;  %v4402_v32 = vunpack.c.h.bf16 %v4346_v22  ;;  %v3524_v0 = vpop.f32.mrf.mxu0  ;;  %v3583_v22 = vpop.f32.mrf.mxu1 }
 0xaf4   :  { %12389 = vst [vmem:[#allocation27_spill] sm:$0xff] %v10834_v13  ;;  %v4199_v52 = vunpack.c.l.bf16 %v4145_v41  ;;  %v4200_v3 = vunpack.c.h.bf16 %v4145_v41  ;;  %7898 = vrsqrt.f32 %v10832_v8  ;;  %v3405_v19 = vadd.f32 %v3404_v61, %v10233_v34 }
 0xaf5   :  { %12390 = vst [vmem:[#allocation28_spill] sm:$0xff] %v10836_v36  ;;  %v4677_v46 = vmul.f32 0.796875, %v4597_v17  ;;  %v4678_v6 = vmul.f32 0.796875, %v4598_v29  ;;  %v3885_v60 = vmul.f32 0.044677734, %v10834_v13  ;;  %v3886_v15 = vmul.f32 0.044677734, %v10836_v36 }
 0xaf6   :  { %vm3086_vm7 = vweird.f32 %v10757_v23  ;;  %v4279_v33 = vmul.f32 %v4199_v52, %v10761_v26  ;;  %v4280_v42 = vmul.f32 %v4200_v3, %v10769_v38  ;;  %v3464_v10 = vadd.f32 %v3463_v63, %v10235_v35 }
 0xaf7   :  { %v10847_v16 = vmul.f32 %v10757_v23, %v3083_v55  ;;  %v3948_v49 = vpack.c.bf16 %v3886_v15, %v3885_v60  ;;  %v3525_v58 = vadd.f32 %v3524_v0, %v10216_v27  ;;  %v3584_v17 = vadd.f32 %v3583_v22, %v10222_v57  ;;  %vm10861_vm8 = vmor %vm3085_vm6, %vm3086_vm7 }
 0xaf8   :  { %v4595_v29 = vunpack.c.l.bf16 %v4543_v50  ;;  %v4481_v61 = vadd.f32 %v4401_v20, %v10722_v59  ;;  %v4482_v41 = vadd.f32 %v4402_v32, %v10724_v25  ;;  %v3627_v52 = vpack.c.bf16 %v3464_v10, %v3405_v19 }
 0xaf9   :  { %v10853_v24 = vpack.c.bf16 %v4678_v6, %v4677_v46  ;;  %v4005_v3 = vunpack.c.l.bf16 %v3948_v49  ;;  %v4006_v63 = vunpack.c.h.bf16 %v3948_v49  ;;  %v3630_v28 = vpack.c.bf16 %v3584_v17, %v3525_v58 }
 0xafa   :  { %v10855_v43 = vpop.eup %7898  ;;  %v4596_v55 = vunpack.c.h.bf16 %v4543_v50  ;;  %v4345_v20 = vpack.c.bf16 %v4280_v42, %v4279_v33  ;;  %v10865_v15 = vunpack.c.l.bf16 %v3627_v52  ;;  %v10867_v32 = vunpack.c.h.bf16 %v3627_v52 }
 0xafb   :  { %12391 = vst [vmem:[#allocation59_spill] sm:$0xff] %v10853_v24  ;;  %v3090_v50 = vmul.f32 %v10855_v43, %v10832_v8  ;;  %v4085_v46 = vmul.f32 %v4005_v3, %v10834_v13  ;;  %v4086_v39 = vmul.f32 %v4006_v63, %v10836_v36  ;;  %v10877_v6 = vmul.f32 0.796875, %v4595_v29 }
 0xafc   :  { %12394 = vst [vmem:[#allocation60_spill] sm:$0xff] %v10865_v15  ;;  %v10879_v10 = vpack.c.bf16 %v4482_v41, %v4481_v61  ;;  %v3883_v33 = vmul.f32 0.044677734, %v10865_v15  ;;  %v3884_v42 = vmul.f32 0.044677734, %v10867_v32  ;;  %v10884_v49 = vunpack.c.l.bf16 %v3630_v28 }
 0xafd   :  { %12395 = vst [vmem:[#allocation61_spill] sm:$0xff] %v10867_v32  ;;  %v3091_v0 = vmul.f32 %v10855_v43, %v3090_v50  ;;  %v4148_v22 = vpack.c.bf16 %v4086_v39, %v4085_v46  ;;  %v10886_v58 = vunpack.c.h.bf16 %v3630_v28  ;;  %v4399_v17 = vunpack.c.l.bf16 %v4345_v20 }
 0xafe   :  { %12396 = vst [vmem:[#allocation62_spill] sm:$0xff] %v10884_v49  ;;  %v4400_v52 = vunpack.c.h.bf16 %v4345_v20  ;;  %v3947_v3 = vpack.c.bf16 %v3884_v42, %v3883_v33  ;;  %v3137_v29 = vmul.f32 %v10082_v51, %v10822_v21  ;;  %v3889_v19 = vmul.f32 0.044677734, %v10884_v49  ;;  %v3406_v21 = vpop.f32.mrf.mxu3  ;;  %v3465_v42 = vpop.f32.mrf.mxu2 }
 0xaff   :  { %v3092_v63 = vmul.f32 0.5, %v3091_v0  ;;  %v4205_v61 = vunpack.c.l.bf16 %v4148_v22  ;;  %v4206_v41 = vunpack.c.h.bf16 %v4148_v22  ;;  %v10891_v24 = vmul.f32 0.796875, %v4596_v55 }
 0xb00   :  { %v4003_v25 = vunpack.c.l.bf16 %v3947_v3  ;;  %v4004_v50 = vunpack.c.h.bf16 %v3947_v3  ;;  %v3136_v46 = vmul.f32 %v10082_v51, %v10817_v18  ;;  %v3890_v33 = vmul.f32 0.044677734, %v10886_v58 }
 0xb01   :  { %v3093_v28 = vsub.f32 1.5, %v3092_v63  ;;  %v4285_v39 = vmul.f32 %v4205_v61, %v10834_v13  ;;  %v4286_v20 = vmul.f32 %v4206_v41, %v10836_v36  ;;  %v4479_v0 = vadd.f32 %v4399_v17, %v10761_v26  ;;  %v7629_v41 = vld [vmem:[%s12217_s9 + $0x38] sm:$0xff] }
 0xb02   :  { %v4480_v22 = vadd.f32 %v4400_v52, %v10769_v38  ;;  %v4083_v55 = vmul.f32 %v4003_v25, %v10865_v15  ;;  %v4084_v3 = vmul.f32 %v4004_v50, %v10867_v32  ;;  %v4601_v59 = vunpack.c.l.bf16 %v10879_v10  ;;  %v7637_v17 = vld [vmem:[%s12217_s9 + $0x78] sm:$0xff]  ;;  %5707 = vmatpush.bf16.msrb.mxu3 %v7629_v41  ;;  %v7644_v41 = vld [vmem:[%s12217_s9 + $0xb0] sm:$0xff] }
 0xb03   :  { %v4348_v18 = vpack.c.bf16 %v4286_v20, %v4285_v39  ;;  %v3950_v63 = vpack.c.bf16 %v3890_v33, %v3889_v19  ;;  %v3158_v61 = vadd.f32 %v10094_v30, %v3137_v29  ;;  %v7645_v25 = vld [vmem:[%s12217_s9 + $0xb8] sm:$0xff]  ;;  %vm3095_vm9 = vweird.f32 %v10832_v8  ;;  %5766 = vmatpush.bf16.msrb.mxu2 %v7637_v17  ;;  %v7652_v17 = vld [vmem:[%s12217_s9 + $0xf0] sm:$0xff] }
 0xb04   :  { %v4147_v52 = vpack.c.bf16 %v4084_v3, %v4083_v55  ;;  %v3407_v50 = vadd.f32 %v3406_v21, %v10233_v34  ;;  %v3466_v19 = vadd.f32 %v3465_v42, %v10235_v35  ;;  %v7653_v29 = vld [vmem:[%s12217_s9 + $0xf8] sm:$0xff]  ;;  %v3094_v39 = vmul.f32 %v10855_v43, %v3093_v28  ;;  %5825 = vmatpush.bf16.msra.mxu0 %v7645_v25  ;;  %v7628_v28 = vld [vmem:[%s12217_s9 + $0x30] sm:$0xff] }
 0xb05   :  { %vm3096_vm10 = vweird.f32 %v10855_v43  ;;  %v4009_v20 = vunpack.c.l.bf16 %v3950_v63  ;;  %v3157_v33 = vadd.f32 %v10094_v30, %v3136_v46  ;;  %v4545_v38 = vpack.c.bf16 %v4480_v22, %v4479_v0  ;;  %5884 = vmatpush.bf16.msra.mxu1 %v7653_v29  ;;  %v7636_v46 = vld [vmem:[%s12217_s9 + $0x70] sm:$0xff] }
 0xb06   :  { %v4203_v26 = vunpack.c.l.bf16 %v4147_v52  ;;  %v4204_v55 = vunpack.c.h.bf16 %v4147_v52  ;;  %v4010_v3 = vunpack.c.h.bf16 %v3950_v63  ;;  %v4405_v21 = vunpack.c.l.bf16 %v4348_v18  ;;  %vm10933_vm12 = vmor %vm3095_vm9, %vm3096_vm10  ;;  %5708 = vmatpush.bf16.msrb.mxu3 %v7628_v28  ;;  %v7651_v28 = vld [vmem:[%s12217_s9 + $0xe8] sm:$0xff] }
 0xb07   :  { %v4406_v42 = vunpack.c.h.bf16 %v4348_v18  ;;  %v4089_v9 = vmul.f32 %v4009_v20, %v10884_v49  ;;  %v3169_v1 = vpack.c.bf16 %v3158_v61, %v3157_v33  ;;  %v3629_v61 = vpack.c.bf16 %v3466_v19, %v3407_v50  ;;  %v12399_v33 = vld [vmem:[#allocation31_spill] sm:$0xff]  ;;  %5767 = vmatpush.bf16.msrb.mxu2 %v7636_v46 }
 0xb08   :  { %v4283_v22 = vmul.f32 %v4203_v26, %v10865_v15  ;;  %v4284_v18 = vmul.f32 %v4204_v55, %v10867_v32  ;;  %v4090_v63 = vmul.f32 %v4010_v3, %v10886_v58  ;;  %v4602_v8 = vunpack.c.h.bf16 %v10879_v10  ;;  %5826 = vmatpush.bf16.msra.mxu0 %v7644_v41 }
 0xb09   :  { %v3098_v25 = vsel %vm10933_vm12, %v10855_v43, %v3094_v39  ;;  %3423 = vmatmul.bf16.gmra.mxu3 %v3169_v1  ;;  %3482 = vmatmul.bf16.gmra.mxu2 %v3169_v1  ;;  %v5253_v26 = vunpack.c.l.bf16 %v10807_v14  ;;  %v5257_v52 = vunpack.c.l.bf16 %v10830_v47  ;;  %v4599_v50 = vunpack.c.l.bf16 %v4545_v38 }
 0xb0a   :  { %v4150_v19 = vpack.c.bf16 %v4090_v63, %v4089_v9  ;;  %3541 = vmatmul.bf16.gmra.mxu0 %v3169_v1  ;;  %3600 = vmatmul.bf16.gmra.mxu1 %v3169_v1  ;;  %v10952_v29 = vunpack.c.l.bf16 %v3629_v61  ;;  %v10954_v20 = vunpack.c.h.bf16 %v3629_v61  ;;  %v12400_v43 = vsel %vm10861_vm8, %v10757_v23, %v10847_v16  ;;  %v7627_v1 = vld [vmem:[%s12217_s9 + $0x28] sm:$0xff] }
 0xb0b   :  { %v3117_v10 = vmul.f32 %v12400_v43, %v12399_v33  ;;  %v4600_v39 = vunpack.c.h.bf16 %v4545_v38  ;;  %v4485_v55 = vadd.f32 %v4405_v21, %v10834_v13  ;;  %v4486_v3 = vadd.f32 %v4406_v42, %v10836_v36  ;;  %v7635_v9 = vld [vmem:[%s12217_s9 + $0x68] sm:$0xff]  ;;  %5885 = vmatpush.bf16.msra.mxu1 %v7652_v17  ;;  %5709 = vmatpush.bf16.msrb.mxu3 %v7627_v1  ;;  %v7626_v33 = vld [vmem:[%s12217_s9 + $0x20] sm:$0xff] }
 0xb0c   :  { %v10972_v60 = vpack.c.bf16 %v10891_v24, %v10877_v6  ;;  %v10974_v23 = vmul.f32 0.796875, %v4601_v59  ;;  %v12403_v38 = vld [vmem:[#allocation32_spill] sm:$0xff]  ;;  %v4347_v21 = vpack.c.bf16 %v4284_v18, %v4283_v22  ;;  %v10983_v46 = vmul.f32 0.796875, %v4602_v8  ;;  %5768 = vmatpush.bf16.msrb.mxu2 %v7635_v9 }
 0xb0d   :  { %v3118_v16 = vmul.f32 %v3098_v25, %v12403_v38  ;;  %v7643_v42 = vld [vmem:[%s12217_s9 + $0xa8] sm:$0xff]  ;;  %v3887_v24 = vmul.f32 0.044677734, %v10952_v29  ;;  %v3888_v59 = vmul.f32 0.044677734, %v10954_v20  ;;  %v12405_v6 = vunpack.c.l.bf16 %v10650_v11  ;;  %v3586_v38 = vpop.f32.mrf.mxu1 }
 0xb0e   :  { %12401 = vst [vmem:[#allocation31_spill] sm:$0xff] %v10972_v60  ;;  %v10991_v22 = vmul.f32 0.796875, %v4599_v50  ;;  %v4209_v18 = vunpack.c.l.bf16 %v4150_v19  ;;  %v4210_v63 = vunpack.c.h.bf16 %v4150_v19  ;;  %v12406_v61 = vunpack.c.l.bf16 %v10656_v56  ;;  %5827 = vmatpush.bf16.msra.mxu0 %v7643_v42 }
 0xb0f   :  { %12402 = vst [vmem:[#allocation63_spill] sm:$0xff] %v10974_v23  ;;  %v10989_v0 = vmul.f32 %v5253_v26, %v12405_v6  ;;  %v10997_v17 = vmul.f32 0.796875, %v4600_v39  ;;  %v4548_v8 = vpack.c.bf16 %v4486_v3, %v4485_v55  ;;  %v3949_v25 = vpack.c.bf16 %v3888_v59, %v3887_v24  ;;  %v7634_v26 = vld [vmem:[%s12217_s9 + $0x60] sm:$0xff]  ;;  %5886 = vmatpush.bf16.msra.mxu1 %v7651_v28 }
 0xb10   :  { %12404 = vst [vmem:[#allocation32_spill] sm:$0xff] %v10983_v46  ;;  %v10995_v41 = vmul.f32 %v5257_v52, %v12406_v61  ;;  %v4403_v19 = vunpack.c.l.bf16 %v4347_v21  ;;  %v4404_v43 = vunpack.c.h.bf16 %v4347_v21  ;;  %v3527_v52 = vpop.f32.mrf.mxu0  ;;  %v7642_v39 = vld [vmem:[%s12217_s9 + $0xa0] sm:$0xff]  ;;  %v3138_v3 = vmul.f32 %v10082_v51, %v3117_v10  ;;  %5710 = vmatpush.bf16.msrb.mxu3 %v7626_v33  ;;  %5769 = vmatpush.bf16.msrb.mxu2 %v7634_v26  ;;  %v7641_v33 = vld [vmem:[%s12217_s9 + $0x98] sm:$0xff] }
 0xb11   :  { %12407 = vst [vmem:[#allocation64_spill] sm:$0xff] %v10997_v17  ;;  %v7650_v55 = vld [vmem:[%s12217_s9 + $0xe0] sm:$0xff]  ;;  %v3139_v1 = vmul.f32 %v10082_v51, %v3118_v16  ;;  %v4007_v9 = vunpack.c.l.bf16 %v3949_v25  ;;  %v4008_v24 = vunpack.c.h.bf16 %v3949_v25  ;;  %v3528_v21 = vadd.f32 %v3527_v52, %v10216_v27  ;;  %v7625_v25 = vld [vmem:[%s12217_s9 + $0x18] sm:$0xff] }
 0xb12   :  { %v3587_v59 = vadd.f32 %v3586_v38, %v10222_v57  ;;  %v4289_v42 = vmul.f32 %v4209_v18, %v10884_v49  ;;  %v4290_v28 = vmul.f32 %v4210_v63, %v10886_v58  ;;  %v5254_v61 = vunpack.c.h.bf16 %v10807_v14  ;;  %v7633_v18 = vld [vmem:[%s12217_s9 + $0x58] sm:$0xff]  ;;  %5828 = vmatpush.bf16.msra.mxu0 %v7642_v39 }
 0xb13   :  { %v4605_v50 = vunpack.c.l.bf16 %v4548_v8  ;;  %v4087_v10 = vmul.f32 %v4007_v9, %v10952_v29  ;;  %v4088_v51 = vmul.f32 %v4008_v24, %v10954_v20  ;;  %v4606_v63 = vunpack.c.h.bf16 %v4548_v8  ;;  %5887 = vmatpush.bf16.msra.mxu1 %v7650_v55  ;;  %v7649_v26 = vld [vmem:[%s12217_s9 + $0xd8] sm:$0xff] }
 0xb14   :  { %v3632_v16 = vpack.c.bf16 %v3587_v59, %v3528_v21  ;;  %v4483_v52 = vadd.f32 %v4403_v19, %v10865_v15  ;;  %v4484_v14 = vadd.f32 %v4404_v43, %v10867_v32  ;;  %v3159_v38 = vadd.f32 %v10094_v30, %v3138_v3  ;;  %v3409_v19 = vpop.f32.mrf.mxu3  ;;  %v3468_v21 = vpop.f32.mrf.mxu2  ;;  %5711 = vmatpush.bf16.msrb.mxu3 %v7625_v25 }
 0xb15   :  { %v4149_v9 = vpack.c.bf16 %v4088_v51, %v4087_v10  ;;  %v3160_v43 = vadd.f32 %v10094_v30, %v3139_v1  ;;  %v11043_v39 = vpack.c.bf16 %v4290_v28, %v4289_v42  ;;  %v3410_v55 = vadd.f32 %v3409_v19, %v10233_v34  ;;  %5770 = vmatpush.bf16.msrb.mxu2 %v7633_v18  ;;  %v3588_v28 = vpop.f32.mrf.mxu1 }
 0xb16   :  { %v11038_v24 = vunpack.c.l.bf16 %v3632_v16  ;;  %v11040_v8 = vunpack.c.h.bf16 %v3632_v16  ;;  %v3469_v3 = vadd.f32 %v3468_v21, %v10235_v35  ;;  %v12410_v59 = vunpack.c.h.bf16 %v10650_v11  ;;  %5829 = vmatpush.bf16.msra.mxu0 %v7641_v33  ;;  %v7624_v11 = vld [vmem:[%s12217_s9 + $0x10] sm:$0xff] }
 0xb17   :  { %v4207_v36 = vunpack.c.l.bf16 %v4149_v9  ;;  %v4208_v10 = vunpack.c.h.bf16 %v4149_v9  ;;  %v11053_v13 = vmul.f32 0.796875, %v4605_v50  ;;  %v11055_v30 = vmul.f32 0.796875, %v4606_v63  ;;  %5888 = vmatpush.bf16.msra.mxu1 %v7649_v26  ;;  %v7648_v33 = vld [vmem:[%s12217_s9 + $0xd0] sm:$0xff] }
 0xb18   :  { %12408 = vst [vmem:[#allocation65_spill] sm:$0xff] %v11038_v24  ;;  %v11049_v6 = vmul.f32 %v5254_v61, %v12410_v59  ;;  %v3893_v51 = vmul.f32 0.044677734, %v11038_v24  ;;  %v3894_v16 = vmul.f32 0.044677734, %v11040_v8  ;;  %v3631_v1 = vpack.c.bf16 %v3469_v3, %v3410_v55  ;;  %v3529_v42 = vpop.f32.mrf.mxu0  ;;  %v7632_v61 = vld [vmem:[%s12217_s9 + $0x50] sm:$0xff]  ;;  %5712 = vmatpush.bf16.msrb.mxu3 %v7624_v11 }
 0xb19   :  { %12409 = vst [vmem:[#allocation66_spill] sm:$0xff] %v11040_v8  ;;  %v3170_v19 = vpack.c.bf16 %v3160_v43, %v3159_v38  ;;  %v11063_v25 = vpack.c.bf16 %v4484_v14, %v4483_v52  ;;  %v4287_v50 = vmul.f32 %v4207_v36, %v10952_v29  ;;  %v4288_v18 = vmul.f32 %v4208_v10, %v10954_v20  ;;  %v7640_v38 = vld [vmem:[%s12217_s9 + $0x90] sm:$0xff]  ;;  %v7623_v10 = vld [vmem:[%s12217_s9 + $0x8] sm:$0xff] }
 0xb1a   :  { %v3952_v63 = vpack.c.bf16 %v3894_v16, %v3893_v51  ;;  %v4409_v26 = vunpack.c.l.bf16 %v11043_v39  ;;  %v11074_v9 = vunpack.c.l.bf16 %v3631_v1  ;;  %v11076_v21 = vunpack.c.h.bf16 %v3631_v1  ;;  %5771 = vmatpush.bf16.msrb.mxu2 %v7632_v61  ;;  %v7631_v51 = vld [vmem:[%s12217_s9 + $0x48] sm:$0xff]  ;;  %v12411_v1 = vld [vmem:[#allocation35_spill] sm:$0xff]  ;;  %5830 = vmatpush.bf16.msra.mxu0 %v7640_v38 }
 0xb1b   :  { %v3530_v52 = vadd.f32 %v3529_v42, %v10216_v27  ;;  %3428 = vmatmul.bf16.gmra.mxu3 %v3170_v19  ;;  %3487 = vmatmul.bf16.gmra.mxu2 %v3170_v19  ;;  %v11079_v36 = vpack.c.bf16 %v4288_v18, %v4287_v50  ;;  %v3589_v55 = vadd.f32 %v3588_v28, %v10222_v57  ;;  %v5258_v16 = vunpack.c.h.bf16 %v10830_v47  ;;  %v7639_v18 = vld [vmem:[%s12217_s9 + $0x88] sm:$0xff] }
 0xb1c   :  { %v4013_v14 = vunpack.c.l.bf16 %v3952_v63  ;;  %v4014_v43 = vunpack.c.h.bf16 %v3952_v63  ;;  %3546 = vmatmul.bf16.gmra.mxu0 %v3170_v19  ;;  %3605 = vmatmul.bf16.gmra.mxu1 %v3170_v19  ;;  %v3891_v3 = vmul.f32 0.044677734, %v11074_v9  ;;  %v3892_v59 = vmul.f32 0.044677734, %v11076_v21  ;;  %v3411_v61 = vpop.f32.mrf.mxu3  ;;  %v3470_v50 = vpop.f32.mrf.mxu2  ;;  %v7647_v47 = vld [vmem:[%s12217_s9 + $0xc8] sm:$0xff] }
 0xb1d   :  { %v11092_v42 = vmul.f32 0.5, %v12411_v1  ;;  %5889 = vmatpush.bf16.msra.mxu1 %v7648_v33  ;;  %v12412_v63 = vld [vmem:[#allocation36_spill] sm:$0xff]  ;;  %v3634_v32 = vpack.c.bf16 %v3589_v55, %v3530_v52  ;;  %v4410_v38 = vunpack.c.h.bf16 %v11043_v39  ;;  %v11110_v33 = vadd.f32 %v4409_v26, %v10884_v49  ;;  %5713 = vmatpush.bf16.msrb.mxu3 %v7623_v10 }
 0xb1e   :  { %v4093_v19 = vmul.f32 %v4013_v14, %v11038_v24  ;;  %v4094_v11 = vmul.f32 %v4014_v43, %v11040_v8  ;;  %v11104_v1 = vmul.f32 0.5, %v12412_v63  ;;  %v3951_v28 = vpack.c.bf16 %v3892_v59, %v3891_v3  ;;  %5772 = vmatpush.bf16.msrb.mxu2 %v7631_v51  ;;  %v7622_v52 = vld [vmem:[%s12217_s9] sm:$0xff]  ;;  %5831 = vmatpush.bf16.msra.mxu0 %v7639_v18 }
 0xb1f   :  { %v3412_v14 = vadd.f32 %v3411_v61, %v10233_v34  ;;  %v3471_v43 = vadd.f32 %v3470_v50, %v10235_v35  ;;  %v4407_v15 = vunpack.c.l.bf16 %v11079_v36  ;;  %v11113_v17 = vunpack.c.l.bf16 %v3634_v32  ;;  %v7630_v39 = vld [vmem:[%s12217_s9 + $0x40] sm:$0xff] }
 0xb20   :  { %v4152_v46 = vpack.c.bf16 %v4094_v11, %v4093_v19  ;;  %v4011_v23 = vunpack.c.l.bf16 %v3951_v28  ;;  %v4012_v60 = vunpack.c.h.bf16 %v3951_v28  ;;  %v11115_v63 = vunpack.c.h.bf16 %v3634_v32  ;;  %v7638_v32 = vld [vmem:[%s12217_s9 + $0x80] sm:$0xff] }
 0xb21   :  { %12413 = vst [vmem:[#allocation35_spill] sm:$0xff] %v11113_v17  ;;  %v4408_v26 = vunpack.c.h.bf16 %v11079_v36  ;;  %v3633_v59 = vpack.c.bf16 %v3471_v43, %v3412_v14  ;;  %5890 = vmatpush.bf16.msra.mxu1 %v7647_v47  ;;  %v7646_v10 = vld [vmem:[%s12217_s9 + $0xc0] sm:$0xff]  ;;  %v3897_v19 = vmul.f32 0.044677734, %v11113_v17  ;;  %v12415_v50 = vunpack.c.h.bf16 %v10656_v56  ;;  %5714 = vmatpush.bf16.msrb.mxu3 %v7622_v52 }
 0xb22   :  { %12414 = vst [vmem:[#allocation36_spill] sm:$0xff] %v11115_v63  ;;  %v4213_v55 = vunpack.c.l.bf16 %v4152_v46  ;;  %v4214_v3 = vunpack.c.h.bf16 %v4152_v46  ;;  %v4091_v51 = vmul.f32 %v4011_v23, %v11074_v9  ;;  %v4092_v28 = vmul.f32 %v4012_v60, %v11076_v21  ;;  %5773 = vmatpush.bf16.msrb.mxu2 %v7630_v39  ;;  %5832 = vmatpush.bf16.msra.mxu0 %v7638_v32 }
 0xb23   :  { %v3898_v36 = vmul.f32 0.044677734, %v11115_v63  ;;  %v4490_v46 = vadd.f32 %v4410_v38, %v10886_v58  ;;  %v5338_v18 = vmul.f32 %v5258_v16, %v12415_v50  ;;  %v11139_v43 = vunpack.c.l.bf16 %v3633_v59 }
 0xb24   :  { %v4293_v11 = vmul.f32 %v4213_v55, %v11038_v24  ;;  %v4294_v61 = vmul.f32 %v4214_v3, %v11040_v8  ;;  %v4151_v47 = vpack.c.bf16 %v4092_v28, %v4091_v51  ;;  %v11141_v23 = vunpack.c.h.bf16 %v3633_v59 }
 0xb25   :  { %v3954_v14 = vpack.c.bf16 %v3898_v36, %v3897_v19  ;;  %v4604_v60 = vunpack.c.h.bf16 %v11063_v25  ;;  %v4487_v49 = vadd.f32 %v4407_v15, %v10952_v29  ;;  %v4488_v38 = vadd.f32 %v4408_v26, %v10954_v20  ;;  %5891 = vmatpush.bf16.msra.mxu1 %v7646_v10 }
 0xb26   :  { %v4352_v55 = vpack.c.bf16 %v4294_v61, %v4293_v11  ;;  %v4211_v3 = vunpack.c.l.bf16 %v4151_v47  ;;  %v4212_v56 = vunpack.c.h.bf16 %v4151_v47  ;;  %v3895_v59 = vmul.f32 0.044677734, %v11139_v43 }
 0xb27   :  { %v4017_v16 = vunpack.c.l.bf16 %v3954_v14  ;;  %v4018_v51 = vunpack.c.h.bf16 %v3954_v14  ;;  %v3896_v52 = vmul.f32 0.044677734, %v11141_v23  ;;  %v5414_v61 = vpack.c.bf16 %v5338_v18, %v11049_v6 }
 0xb28   :  { %v4413_v28 = vunpack.c.l.bf16 %v4352_v55  ;;  %v4414_v19 = vunpack.c.h.bf16 %v4352_v55  ;;  %v4291_v39 = vmul.f32 %v4211_v3, %v11074_v9  ;;  %v4292_v36 = vmul.f32 %v4212_v56, %v11076_v21 }
 0xb29   :  { %v4097_v15 = vmul.f32 %v4017_v16, %v11113_v17  ;;  %v4098_v26 = vmul.f32 %v4018_v51, %v11115_v63  ;;  %v3953_v11 = vpack.c.bf16 %v3896_v52, %v3895_v59  ;;  %v12416_v14 = vpack.c.bf16 %v10698_v40, %v10668_v4 }
 0xb2a   :  { %v4493_v32 = vadd.f32 %v4413_v28, %v11038_v24  ;;  %v4494_v10 = vadd.f32 %v4414_v19, %v11040_v8  ;;  %v4351_v50 = vpack.c.bf16 %v4292_v36, %v4291_v39  ;;  %v12417_v55 = vpack.c.bf16 %v10814_v62, %v10707_v53 }
 0xb2b   :  { %v4154_v47 = vpack.c.bf16 %v4098_v26, %v4097_v15  ;;  %5715 = vmatmul.bf16.vlgmr.msrb.gmra.mxu3 %v12416_v14  ;;  %v11162_v3 = vmul.f32 0.5, %v10461_v48  ;;  %v4737_v56 = vpack.c.bf16 %v10621_v2, %v10609_v45  ;;  %v4015_v51 = vunpack.c.l.bf16 %v3953_v11 }
 0xb2c   :  { %5774 = vmatmul.bf16.vlgmr.msrb.gmra.mxu2 %v12417_v55  ;;  %v4552_v16 = vpack.c.bf16 %v4494_v10, %v4493_v32  ;;  %v4016_v28 = vunpack.c.h.bf16 %v3953_v11  ;;  %v12418_v6 = vpack.c.bf16 %v10995_v41, %v10989_v0  ;;  %5892 = vmatmul.bf16.vlgmr.msra.gmra.mxu1 %v5414_v61  ;;  %v4779_v4 = vunpack.c.l.bf16 %v10596_v54 }
 0xb2d   :  { %v4411_v40 = vunpack.c.l.bf16 %v4351_v50  ;;  %v4412_v18 = vunpack.c.h.bf16 %v4351_v50  ;;  %v4217_v53 = vunpack.c.l.bf16 %v4154_v47  ;;  %v4218_v62 = vunpack.c.h.bf16 %v4154_v47 }
 0xb2e   :  { %5833 = vmatmul.bf16.vlgmr.msra.gmra.mxu0 %v12418_v6  ;;  %v12419_v48 = vunpack.c.l.bf16 %v11063_v25  ;;  %v4095_v59 = vmul.f32 %v4015_v51, %v11139_v43  ;;  %v4096_v45 = vmul.f32 %v4016_v28, %v11141_v23  ;;  %v4780_v2 = vunpack.c.h.bf16 %v10596_v54 }
 0xb2f   :  { %v4684_v52 = vmul.f32 0.796875, %v4604_v60  ;;  %v4550_v0 = vpack.c.bf16 %v4490_v46, %v11110_v33  ;;  %v4549_v41 = vpack.c.bf16 %v4488_v38, %v4487_v49  ;;  %v4613_v39 = vunpack.c.l.bf16 %v4552_v16 }
 0xb30   :  { %v4683_v19 = vmul.f32 0.796875, %v12419_v48  ;;  %v4297_v36 = vmul.f32 %v4217_v53, %v11113_v17  ;;  %v4298_v15 = vmul.f32 %v4218_v62, %v11115_v63  ;;  %v4153_v26 = vpack.c.bf16 %v4096_v45, %v4095_v59  ;;  %v3532_v55 = vpop.f32.mrf.mxu0 }
 0xb31   :  { %v4783_v32 = vunpack.c.l.bf16 %v4737_v56  ;;  %v4614_v10 = vunpack.c.h.bf16 %v4552_v16  ;;  %v4491_v25 = vadd.f32 %v4411_v40, %v11074_v9  ;;  %v4492_v11 = vadd.f32 %v4412_v18, %v11076_v21  ;;  %v3591_v16 = vpop.f32.mrf.mxu1 }
 0xb32   :  { %7900 = vtanh.f32 %v4779_v4  ;;  %v4215_v61 = vunpack.c.l.bf16 %v4153_v26  ;;  %v4216_v50 = vunpack.c.h.bf16 %v4153_v26  ;;  %v4784_v54 = vunpack.c.h.bf16 %v4737_v56 }
 0xb33   :  { %7902 = vtanh.f32 %v4780_v2  ;;  %v4609_v60 = vunpack.c.l.bf16 %v4550_v0  ;;  %v4610_v33 = vunpack.c.h.bf16 %v4550_v0  ;;  %v4607_v49 = vunpack.c.l.bf16 %v4549_v41 }
 0xb34   :  { %v3744_v46 = vmul.f32 0.5, %v10463_v31  ;;  %v4354_v38 = vpack.c.bf16 %v4298_v15, %v4297_v36  ;;  %v4295_v47 = vmul.f32 %v4215_v61, %v11139_v43  ;;  %v4296_v14 = vmul.f32 %v4216_v50, %v11141_v23 }
 0xb35   :  { %7904 = vtanh.f32 %v4783_v32  ;;  %v4608_v51 = vunpack.c.h.bf16 %v4549_v41  ;;  %v4693_v28 = vmul.f32 0.796875, %v4613_v39  ;;  %v4694_v6 = vmul.f32 0.796875, %v4614_v10 }
 0xb36   :  { %v11183_v4 = vpack.c.bf16 %v4492_v11, %v4491_v25  ;;  %v11185_v56 = vpack.c.bf16 %v4296_v14, %v4295_v47  ;;  %v3533_v40 = vadd.f32 %v3532_v55, %v10216_v27  ;;  %v3592_v18 = vadd.f32 %v3591_v16, %v10222_v57 }
 0xb37   :  { %7906 = vtanh.f32 %v4784_v54  ;;  %v11191_v53 = vpack.c.bf16 %v11055_v30, %v11053_v13  ;;  %v11193_v62 = vpack.c.bf16 %v4684_v52, %v4683_v19  ;;  %v11195_v48 = vmul.f32 0.796875, %v4609_v60  ;;  %v3414_v30 = vpop.f32.mrf.mxu3  ;;  %v3473_v19 = vpop.f32.mrf.mxu2 }
 0xb38   :  { %v7901_v31 = vpop.eup %7900  ;;  %v11197_v59 = vmul.f32 0.796875, %v4610_v33  ;;  %v11199_v2 = vmul.f32 0.796875, %v4607_v49  ;;  %v4417_v0 = vunpack.c.l.bf16 %v4354_v38  ;;  %v3636_v41 = vpack.c.bf16 %v3592_v18, %v3533_v40  ;;  %v3534_v49 = vpop.f32.mrf.mxu0 }
 0xb39   :  { %v7903_v45 = vpop.eup %7902  ;;  %v11203_v39 = vpack.c.bf16 %v11104_v1, %v11092_v42  ;;  %v11205_v36 = vmul.f32 0.796875, %v4608_v51  ;;  %v11207_v15 = vpack.c.bf16 %v4694_v6, %v4693_v28  ;;  %v11211_v52 = vpack.c.bf16 %v3744_v46, %v11162_v3  ;;  %v3593_v46 = vpop.f32.mrf.mxu1 }
 0xb3a   :  { %v4418_v32 = vunpack.c.h.bf16 %v4354_v38  ;;  %v4415_v10 = vunpack.c.l.bf16 %v11185_v56  ;;  %v11214_v25 = vunpack.c.l.bf16 %v3636_v41  ;;  %v11216_v11 = vunpack.c.h.bf16 %v3636_v41 }
 0xb3b   :  { %12420 = vst [vmem:[#allocation67_spill] sm:$0xff] %v11207_v15  ;;  %v7905_v26 = vpop.eup %7904  ;;  %v3415_v1 = vadd.f32 %v3414_v30, %v10233_v34  ;;  %v3474_v61 = vadd.f32 %v3473_v19, %v10235_v35  ;;  %v4935_v50 = vpack.c.bf16 %v7903_v45, %v7901_v31  ;;  %v11222_v60 = vadd.f32 %v4417_v0, %v11113_v17 }
 0xb3c   :  { %12421 = vst [vmem:[#allocation68_spill] sm:$0xff] %v11214_v25  ;;  %v3901_v3 = vmul.f32 0.044677734, %v11214_v25  ;;  %v3902_v33 = vmul.f32 0.044677734, %v11216_v11  ;;  %v3535_v14 = vadd.f32 %v3534_v49, %v10216_v27  ;;  %v3594_v55 = vadd.f32 %v3593_v46, %v10222_v57 }
 0xb3d   :  { %12422 = vst [vmem:[#allocation69_spill] sm:$0xff] %v11216_v11  ;;  %v7907_v54 = vpop.eup %7906  ;;  %v3635_v47 = vpack.c.bf16 %v3474_v61, %v3415_v1  ;;  %v11230_v51 = vadd.f32 %v4418_v32, %v11115_v63  ;;  %v4416_v28 = vunpack.c.h.bf16 %v11185_v56  ;;  %v11234_v6 = vadd.f32 %v4415_v10, %v11139_v43 }
 0xb3e   :  { %v4937_v16 = vpack.c.bf16 %v7907_v54, %v7905_v26  ;;  %v3956_v40 = vpack.c.bf16 %v3902_v33, %v3901_v3  ;;  %v3638_v45 = vpack.c.bf16 %v3594_v55, %v3535_v14  ;;  %v4979_v0 = vunpack.c.l.bf16 %v4935_v50 }
 0xb3f   :  { %v11236_v18 = vunpack.c.l.bf16 %v3635_v47  ;;  %v11238_v31 = vunpack.c.h.bf16 %v3635_v47  ;;  %v4980_v19 = vunpack.c.h.bf16 %v4935_v50  ;;  %v3416_v10 = vpop.f32.mrf.mxu3  ;;  %v3475_v54 = vpop.f32.mrf.mxu2 }
 0xb40   :  { %v4021_v41 = vunpack.c.l.bf16 %v3956_v40  ;;  %v4022_v30 = vunpack.c.h.bf16 %v3956_v40  ;;  %v4983_v1 = vunpack.c.l.bf16 %v4937_v16  ;;  %v11242_v61 = vunpack.c.l.bf16 %v3638_v45 }
 0xb41   :  { %12423 = vst [vmem:[#allocation70_spill] sm:$0xff] %v11236_v18  ;;  %v3899_v26 = vmul.f32 0.044677734, %v11236_v18  ;;  %v3900_v32 = vmul.f32 0.044677734, %v11238_v31  ;;  %v11244_v56 = vunpack.c.h.bf16 %v3638_v45  ;;  %v3417_v49 = vadd.f32 %v3416_v10, %v10233_v34 }
 0xb42   :  { %12424 = vst [vmem:[#allocation71_spill] sm:$0xff] %v11238_v31  ;;  %v4101_v3 = vmul.f32 %v4021_v41, %v11214_v25  ;;  %v4102_v33 = vmul.f32 %v4022_v30, %v11216_v11  ;;  %v3476_v46 = vadd.f32 %v3475_v54, %v10235_v35  ;;  %v3905_v47 = vmul.f32 0.044677734, %v11242_v61 }
 0xb43   :  { %12425 = vst [vmem:[#allocation72_spill] sm:$0xff] %v11242_v61  ;;  %v3955_v50 = vpack.c.bf16 %v3900_v32, %v3899_v26  ;;  %v3906_v14 = vmul.f32 0.044677734, %v11244_v56  ;;  %v4984_v55 = vunpack.c.h.bf16 %v4937_v16  ;;  %v5059_v45 = vadd.f32 1.0, %v4979_v0 }
 0xb44   :  { %12426 = vst [vmem:[#allocation73_spill] sm:$0xff] %v11244_v56  ;;  %v4156_v40 = vpack.c.bf16 %v4102_v33, %v4101_v3  ;;  %v3637_v38 = vpack.c.bf16 %v3476_v46, %v3417_v49  ;;  %v5060_v42 = vadd.f32 1.0, %v4980_v19  ;;  %v5063_v41 = vadd.f32 1.0, %v4983_v1 }
 0xb45   :  { %v4019_v13 = vunpack.c.l.bf16 %v3955_v50  ;;  %v4020_v15 = vunpack.c.h.bf16 %v3955_v50  ;;  %v3958_v63 = vpack.c.bf16 %v3906_v14, %v3905_v47  ;;  %v5064_v46 = vadd.f32 1.0, %v4984_v55 }
 0xb46   :  { %v4221_v17 = vunpack.c.l.bf16 %v4156_v40  ;;  %v4222_v30 = vunpack.c.h.bf16 %v4156_v40  ;;  %v11252_v8 = vunpack.c.l.bf16 %v3637_v38  ;;  %v11254_v10 = vunpack.c.h.bf16 %v3637_v38 }
 0xb47   :  { %v4099_v26 = vmul.f32 %v4019_v13, %v11236_v18  ;;  %v4100_v32 = vmul.f32 %v4020_v15, %v11238_v31  ;;  %v4025_v54 = vunpack.c.l.bf16 %v3958_v63  ;;  %v4026_v16 = vunpack.c.h.bf16 %v3958_v63 }
 0xb48   :  { %12427 = vst [vmem:[#allocation74_spill] sm:$0xff] %v11252_v8  ;;  %v4301_v3 = vmul.f32 %v4221_v17, %v11214_v25  ;;  %v4302_v0 = vmul.f32 %v4222_v30, %v11216_v11  ;;  %v3903_v19 = vmul.f32 0.044677734, %v11252_v8  ;;  %v3904_v1 = vmul.f32 0.044677734, %v11254_v10 }
 0xb49   :  { %12428 = vst [vmem:[#allocation75_spill] sm:$0xff] %v11254_v10  ;;  %v4155_v33 = vpack.c.bf16 %v4100_v32, %v4099_v26  ;;  %v4105_v49 = vmul.f32 %v4025_v54, %v11242_v61  ;;  %v4106_v38 = vmul.f32 %v4026_v16, %v11244_v56  ;;  %v4496_v13 = vadd.f32 %v4416_v28, %v11141_v23 }
 0xb4a   :  { %v4356_v50 = vpack.c.bf16 %v4302_v0, %v4301_v3  ;;  %v3957_v15 = vpack.c.bf16 %v3904_v1, %v3903_v19  ;;  %v5135_v47 = vpack.c.bf16 %v5060_v42, %v5059_v45  ;;  %v5137_v40 = vpack.c.bf16 %v5064_v46, %v5063_v41 }
 0xb4b   :  { %v4219_v63 = vunpack.c.l.bf16 %v4155_v33  ;;  %v4220_v14 = vunpack.c.h.bf16 %v4155_v33  ;;  %v4158_v17 = vpack.c.bf16 %v4106_v38, %v4105_v49  ;;  %v12429_v55 = vunpack.c.l.bf16 %v11183_v4 }
 0xb4c   :  { %v4421_v30 = vunpack.c.l.bf16 %v4356_v50  ;;  %v4422_v35 = vunpack.c.h.bf16 %v4356_v50  ;;  %v4023_v34 = vunpack.c.l.bf16 %v3957_v15  ;;  %v4024_v24 = vunpack.c.h.bf16 %v3957_v15 }
 0xb4d   :  { %v4299_v26 = vmul.f32 %v4219_v63, %v11236_v18  ;;  %v4300_v32 = vmul.f32 %v4220_v14, %v11238_v31  ;;  %v4225_v54 = vunpack.c.l.bf16 %v4158_v17  ;;  %v4226_v16 = vunpack.c.h.bf16 %v4158_v17 }
 0xb4e   :  { %v4691_v28 = vmul.f32 0.796875, %v12429_v55  ;;  %v4554_v42 = vpack.c.bf16 %v11230_v51, %v11222_v60  ;;  %v4103_v45 = vmul.f32 %v4023_v34, %v11252_v8  ;;  %v4104_v41 = vmul.f32 %v4024_v24, %v11254_v10 }
 0xb4f   :  { %v4553_v3 = vpack.c.bf16 %v4496_v13, %v11234_v6  ;;  %v4355_v0 = vpack.c.bf16 %v4300_v32, %v4299_v26  ;;  %v4305_v19 = vmul.f32 %v4225_v54, %v11242_v61  ;;  %v4306_v1 = vmul.f32 %v4226_v16, %v11244_v56 }
 0xb50   :  { %v12430_v33 = vunpack.c.h.bf16 %v11183_v4  ;;  %v4501_v38 = vadd.f32 %v4421_v30, %v11214_v25  ;;  %v4502_v46 = vadd.f32 %v4422_v35, %v11216_v11  ;;  %v4157_v50 = vpack.c.bf16 %v4104_v41, %v4103_v45  ;;  %v12432_v11 = vld [vmem:[#allocation33_spill] sm:$0xff] }
 0xb51   :  { %v4419_v60 = vunpack.c.l.bf16 %v4355_v0  ;;  %v4420_v51 = vunpack.c.h.bf16 %v4355_v0  ;;  %v5259_v34 = vunpack.c.l.bf16 %v5135_v47  ;;  %v5263_v15 = vunpack.c.l.bf16 %v5137_v40 }
 0xb52   :  { %v4692_v49 = vmul.f32 0.796875, %v12430_v33  ;;  %v4223_v24 = vunpack.c.l.bf16 %v4157_v50  ;;  %v4224_v63 = vunpack.c.h.bf16 %v4157_v50  ;;  %v5183_v6 = vunpack.c.l.bf16 %v11211_v52 }
 0xb53   :  { %v5180_v13 = vunpack.c.h.bf16 %v11203_v39  ;;  %v4617_v14 = vunpack.c.l.bf16 %v4554_v42  ;;  %v4618_v17 = vunpack.c.h.bf16 %v4554_v42  ;;  %v4615_v26 = vunpack.c.l.bf16 %v4553_v3 }
 0xb54   :  { %v4358_v4 = vpack.c.bf16 %v4306_v1, %v4305_v19  ;;  %v11282_v32 = vpack.c.bf16 %v4502_v46, %v4501_v38  ;;  %v4303_v30 = vmul.f32 %v4223_v24, %v11252_v8  ;;  %v4304_v35 = vmul.f32 %v4224_v63, %v11254_v10 }
 0xb55   :  { %v5260_v54 = vunpack.c.h.bf16 %v5135_v47  ;;  %v4499_v16 = vadd.f32 %v4419_v60, %v11236_v18  ;;  %v4500_v55 = vadd.f32 %v4420_v51, %v11238_v31  ;;  %v12431_v45 = vunpack.c.l.bf16 %v11203_v39 }
 0xb56   :  { %v5343_v0 = vmul.f32 %v5263_v15, %v5183_v6  ;;  %v4616_v33 = vunpack.c.h.bf16 %v4553_v3  ;;  %v4357_v50 = vpack.c.bf16 %v4304_v35, %v4303_v30  ;;  %v5184_v42 = vunpack.c.h.bf16 %v11211_v52 }
 0xb57   :  { %v5339_v41 = vmul.f32 %v5259_v34, %v12431_v45  ;;  %v5264_v19 = vunpack.c.h.bf16 %v5137_v40  ;;  %v11291_v1 = vpack.c.bf16 %v4692_v49, %v4691_v28  ;;  %v4425_v38 = vunpack.c.l.bf16 %v4358_v4  ;;  %v12435_v45 = vld [vmem:[#allocation42_spill] sm:$0xff] }
 0xb58   :  { %v4426_v46 = vunpack.c.h.bf16 %v4358_v4  ;;  %v11293_v63 = vmul.f32 0.796875, %v4617_v14  ;;  %v5340_v47 = vmul.f32 %v5260_v54, %v5180_v13  ;;  %v3741_v51 = vmul.f32 0.5, %v12432_v11  ;;  %v12433_v13 = vld [vmem:[#allocation34_spill] sm:$0xff] }
 0xb59   :  { %v5415_v24 = vpack.c.bf16 %v5343_v0, %v5339_v41  ;;  %v5344_v60 = vmul.f32 %v5264_v19, %v5184_v42  ;;  %v11296_v25 = vmul.f32 0.796875, %v4618_v17  ;;  %v11298_v39 = vmul.f32 0.796875, %v4615_v26  ;;  %v12434_v26 = vld [vmem:[#allocation37_spill] sm:$0xff] }
 0xb5a   :  { %v4621_v3 = vunpack.c.l.bf16 %v11282_v32  ;;  %v11301_v34 = vpack.c.bf16 %v4500_v55, %v4499_v16  ;;  %v11303_v52 = vmul.f32 0.796875, %v4616_v33  ;;  %v4423_v40 = vunpack.c.l.bf16 %v4357_v50 }
 0xb5b   :  { %5720 = vmatmul.bf16.gmra.mxu3 %v5415_v24  ;;  %v4424_v28 = vunpack.c.h.bf16 %v4357_v50  ;;  %v5416_v49 = vpack.c.bf16 %v5344_v60, %v5340_v47  ;;  %v4505_v6 = vadd.f32 %v4425_v38, %v11242_v61  ;;  %v4506_v11 = vadd.f32 %v4426_v46, %v11244_v56  ;;  %v12438_v47 = vld [vmem:[#allocation47_spill] sm:$0xff] }
 0xb5c   :  { %v3742_v14 = vmul.f32 0.5, %v12433_v13  ;;  %v3745_v17 = vmul.f32 0.5, %v10439_v5  ;;  %v3746_v4 = vmul.f32 0.5, %v12434_v26  ;;  %v4738_v30 = vpack.c.bf16 %v10607_v12, %v10599_v37  ;;  %v12436_v37 = vld [vmem:[#allocation43_spill] sm:$0xff] }
 0xb5d   :  { %5779 = vmatmul.bf16.gmra.mxu2 %v5416_v49  ;;  %v4781_v35 = vunpack.c.l.bf16 %v10570_v7  ;;  %v11314_v54 = vmul.f32 0.796875, %v4621_v3  ;;  %v4782_v55 = vunpack.c.h.bf16 %v10570_v7  ;;  %v3747_v41 = vmul.f32 0.5, %v12435_v45  ;;  %v12437_v7 = vld [vmem:[#allocation46_spill] sm:$0xff]  ;;  %v12440_v49 = vld [vmem:[#allocation49_spill] sm:$0xff] }
 0xb5e   :  { %v4503_v0 = vadd.f32 %v4423_v40, %v11252_v8  ;;  %v4504_v33 = vadd.f32 %v4424_v28, %v11254_v10  ;;  %v4785_v5 = vunpack.c.l.bf16 %v4738_v30  ;;  %v4786_v50 = vunpack.c.h.bf16 %v4738_v30  ;;  %v12439_v40 = vld [vmem:[#allocation41_spill] sm:$0xff] }
 0xb5f   :  { %v11322_v19 = vpack.c.bf16 %v3742_v14, %v3741_v51  ;;  %7908 = vtanh.f32 %v4781_v35  ;;  %v3748_v12 = vmul.f32 0.5, %v12436_v37  ;;  %v11325_v38 = vpack.c.bf16 %v4506_v11, %v4505_v6  ;;  %v12441_v35 = vld [vmem:[#allocation38_spill] sm:$0xff] }
 0xb60   :  { %v11327_v46 = vpack.c.bf16 %v3746_v4, %v3745_v17  ;;  %7910 = vtanh.f32 %v4782_v55  ;;  %v3751_v24 = vmul.f32 0.5, %v12437_v7  ;;  %v3752_v60 = vmul.f32 0.5, %v12438_v47  ;;  %v12443_v37 = vld [vmem:[#allocation50_spill] sm:$0xff]  ;;  %v12445_v47 = vld [vmem:[#allocation48_spill] sm:$0xff] }
 0xb61   :  { %7912 = vtanh.f32 %v4785_v5  ;;  %v11331_v3 = vpack.c.bf16 %v3748_v12, %v3747_v41  ;;  %v4741_v28 = vpack.c.bf16 %v10795_v44, %v12439_v40  ;;  %v11335_v51 = vpack.c.bf16 %v4504_v33, %v4503_v0  ;;  %v12442_v5 = vld [vmem:[#allocation39_spill] sm:$0xff] }
 0xb62   :  { %7914 = vtanh.f32 %v4786_v50  ;;  %v4787_v13 = vunpack.c.l.bf16 %v12440_v49  ;;  %v4788_v6 = vunpack.c.h.bf16 %v12440_v49  ;;  %v3749_v44 = vmul.f32 0.5, %v12441_v35  ;;  %v12444_v12 = vld [vmem:[#allocation51_spill] sm:$0xff]  ;;  %v12447_v35 = vld [vmem:[#allocation45_spill] sm:$0xff] }
 0xb63   :  { %v4791_v17 = vunpack.c.l.bf16 %v4741_v28  ;;  %v4792_v26 = vunpack.c.h.bf16 %v4741_v28  ;;  %v11344_v45 = vpack.c.bf16 %v3752_v60, %v3751_v24  ;;  %v3750_v50 = vmul.f32 0.5, %v12442_v5 }
 0xb64   :  { %7916 = vtanh.f32 %v4787_v13  ;;  %v4742_v7 = vpack.c.bf16 %v12444_v12, %v12443_v37  ;;  %v4789_v40 = vunpack.c.l.bf16 %v12445_v47  ;;  %v12446_v13 = vld [vmem:[#allocation44_spill] sm:$0xff]  ;;  %v4790_v60 = vunpack.c.h.bf16 %v12445_v47 }
 0xb65   :  { %v7909_v55 = vpop.eup %7908  ;;  %7918 = vtanh.f32 %v4788_v6  ;;  %v3753_v24 = vmul.f32 0.5, %v12446_v13  ;;  %v3754_v15 = vmul.f32 0.5, %v12447_v35  ;;  %v12454_v8 = vunpack.c.h.bf16 %v11322_v19 }
 0xb66   :  { %v7911_v33 = vpop.eup %7910  ;;  %7920 = vtanh.f32 %v4791_v17  ;;  %v4793_v42 = vunpack.c.l.bf16 %v4742_v7  ;;  %v4794_v16 = vunpack.c.h.bf16 %v4742_v7 }
 0xb67   :  { %v7913_v28 = vpop.eup %7912  ;;  %v4936_v49 = vpack.c.bf16 %v7911_v33, %v7909_v55  ;;  %7922 = vtanh.f32 %v4792_v26  ;;  %v11357_v26 = vpack.c.bf16 %v3750_v50, %v3749_v44  ;;  %v12449_v55 = vld [vmem:[#allocation55_spill] sm:$0xff] }
 0xb68   :  { %v7915_v6 = vpop.eup %7914  ;;  %7924 = vtanh.f32 %v4789_v40  ;;  %v11359_v40 = vpack.c.bf16 %v3754_v15, %v3753_v24  ;;  %v3756_v44 = vmul.f32 0.5, %v12449_v55  ;;  %v12451_v24 = vld [vmem:[#allocation58_spill] sm:$0xff]  ;;  %v12452_v55 = vunpack.c.l.bf16 %v11322_v19 }
 0xb69   :  { %v4938_v17 = vpack.c.bf16 %v7915_v6, %v7913_v28  ;;  %v4981_v5 = vunpack.c.l.bf16 %v4936_v49  ;;  %v4982_v0 = vunpack.c.h.bf16 %v4936_v49  ;;  %7926 = vtanh.f32 %v4790_v60  ;;  %v12448_v28 = vld [vmem:[#allocation54_spill] sm:$0xff] }
 0xb6a   :  { %v7917_v37 = vpop.eup %7916  ;;  %7928 = vtanh.f32 %v4793_v42  ;;  %v3755_v49 = vmul.f32 0.5, %v12448_v28  ;;  %v12457_v19 = vunpack.c.h.bf16 %v11331_v3 }
 0xb6b   :  { %v7919_v33 = vpop.eup %7918  ;;  %v4985_v47 = vunpack.c.l.bf16 %v4938_v17  ;;  %v4986_v13 = vunpack.c.h.bf16 %v4938_v17  ;;  %v5061_v41 = vadd.f32 1.0, %v4981_v5  ;;  %v5062_v35 = vadd.f32 1.0, %v4982_v0  ;;  %v12450_v17 = vld [vmem:[#allocation40_spill] sm:$0xff] }
 0xb6c   :  { %v7921_v30 = vpop.eup %7920  ;;  %v4939_v7 = vpack.c.bf16 %v7919_v33, %v7917_v37  ;;  %7930 = vtanh.f32 %v4794_v16  ;;  %v3759_v5 = vmul.f32 0.5, %v12450_v17  ;;  %v3760_v16 = vmul.f32 0.5, %v12451_v24 }
 0xb6d   :  { %v7923_v60 = vpop.eup %7922  ;;  %v5065_v6 = vadd.f32 1.0, %v4985_v47  ;;  %v5066_v12 = vadd.f32 1.0, %v4986_v13  ;;  %v5136_v14 = vpack.c.bf16 %v5062_v35, %v5061_v41 }
 0xb6e   :  { %v7925_v50 = vpop.eup %7924  ;;  %v4941_v42 = vpack.c.bf16 %v7923_v60, %v7921_v30  ;;  %v4987_v4 = vunpack.c.l.bf16 %v4939_v7  ;;  %v4988_v11 = vunpack.c.h.bf16 %v4939_v7  ;;  %v11367_v60 = vpack.c.bf16 %v3756_v44, %v3755_v49 }
 0xb6f   :  { %v7927_v0 = vpop.eup %7926  ;;  %v5138_v56 = vpack.c.bf16 %v5066_v12, %v5065_v6  ;;  %v5261_v37 = vunpack.c.l.bf16 %v5136_v14  ;;  %v5262_v15 = vunpack.c.h.bf16 %v5136_v14  ;;  %v12453_v14 = vunpack.c.l.bf16 %v11327_v46 }
 0xb70   :  { %v7929_v33 = vpop.eup %7928  ;;  %v4991_v28 = vunpack.c.l.bf16 %v4941_v42  ;;  %v4992_v61 = vunpack.c.h.bf16 %v4941_v42  ;;  %v5067_v47 = vadd.f32 1.0, %v4987_v4  ;;  %v5068_v13 = vadd.f32 1.0, %v4988_v11 }
 0xb71   :  { %v5265_v41 = vunpack.c.l.bf16 %v5138_v56  ;;  %v5341_v35 = vmul.f32 %v5261_v37, %v12452_v55  ;;  %v5266_v30 = vunpack.c.h.bf16 %v5138_v56  ;;  %v4940_v6 = vpack.c.bf16 %v7927_v0, %v7925_v50 }
 0xb72   :  { %v7931_v7 = vpop.eup %7930  ;;  %v5071_v17 = vadd.f32 1.0, %v4991_v28  ;;  %v5072_v10 = vadd.f32 1.0, %v4992_v61  ;;  %v5139_v12 = vpack.c.bf16 %v5068_v13, %v5067_v47  ;;  %v5342_v42 = vmul.f32 %v5262_v15, %v12454_v8 }
 0xb73   :  { %v5345_v24 = vmul.f32 %v5265_v41, %v12453_v14  ;;  %v12455_v11 = vunpack.c.h.bf16 %v11327_v46  ;;  %v4942_v31 = vpack.c.bf16 %v7931_v7, %v7929_v33  ;;  %v4989_v49 = vunpack.c.l.bf16 %v4940_v6 }
 0xb74   :  { %v5141_v18 = vpack.c.bf16 %v5072_v10, %v5071_v17  ;;  %v5267_v37 = vunpack.c.l.bf16 %v5139_v12  ;;  %v5268_v56 = vunpack.c.h.bf16 %v5139_v12  ;;  %v4990_v28 = vunpack.c.h.bf16 %v4940_v6  ;;  %v12460_v17 = vld [vmem:[#allocation64_spill] sm:$0xff]  ;;  %v12461_v6 = vld [vmem:[#allocation31_spill] sm:$0xff] }
 0xb75   :  { %v5346_v4 = vmul.f32 %v5266_v30, %v12455_v11  ;;  %v5417_v44 = vpack.c.bf16 %v5345_v24, %v5341_v35  ;;  %v4993_v61 = vunpack.c.l.bf16 %v4942_v31  ;;  %v12456_v50 = vunpack.c.l.bf16 %v11331_v3 }
 0xb76   :  { %v5271_v47 = vunpack.c.l.bf16 %v5141_v18  ;;  %v5272_v13 = vunpack.c.h.bf16 %v5141_v18  ;;  %v5348_v8 = vmul.f32 %v5268_v56, %v12457_v19  ;;  %v4994_v46 = vunpack.c.h.bf16 %v4942_v31  ;;  %v12463_v19 = vld [vmem:[#allocation53_spill] sm:$0xff] }
 0xb77   :  { %v5418_v55 = vpack.c.bf16 %v5346_v4, %v5342_v42  ;;  %v5347_v0 = vmul.f32 %v5267_v37, %v12456_v50  ;;  %5838 = vmatmul.bf16.gmra.mxu0 %v5417_v44  ;;  %v5069_v15 = vadd.f32 1.0, %v4989_v49  ;;  %v5070_v10 = vadd.f32 1.0, %v4990_v28 }
 0xb78   :  { %v5073_v33 = vadd.f32 1.0, %v4993_v61  ;;  %v12458_v41 = vunpack.c.l.bf16 %v11344_v45  ;;  %v12459_v30 = vunpack.c.h.bf16 %v11344_v45  ;;  %v4745_v12 = vpack.c.bf16 %v12460_v17, %v10991_v22 }
 0xb79   :  { %5897 = vmatmul.bf16.gmra.mxu1 %v5418_v55  ;;  %v4795_v18 = vunpack.c.l.bf16 %v12461_v6  ;;  %v5074_v14 = vadd.f32 1.0, %v4994_v46  ;;  %v5140_v3 = vpack.c.bf16 %v5070_v10, %v5069_v15  ;;  %v5189_v24 = vunpack.c.l.bf16 %v11357_v26 }
 0xb7a   :  { %v5351_v35 = vmul.f32 %v5271_v47, %v12458_v41  ;;  %v5352_v7 = vmul.f32 %v5272_v13, %v12459_v30  ;;  %v4796_v31 = vunpack.c.h.bf16 %v12461_v6  ;;  %v5193_v4 = vunpack.c.l.bf16 %v11359_v40  ;;  %v12467_v41 = vld [vmem:[#allocation32_spill] sm:$0xff]  ;;  %v12468_v30 = vld [vmem:[#allocation59_spill] sm:$0xff] }
 0xb7b   :  { %v4799_v37 = vunpack.c.l.bf16 %v4745_v12  ;;  %v5142_v56 = vpack.c.bf16 %v5074_v14, %v5073_v33  ;;  %v5190_v45 = vunpack.c.h.bf16 %v11357_v26  ;;  %v4800_v49 = vunpack.c.h.bf16 %v4745_v12  ;;  %v12466_v33 = vld [vmem:[#allocation63_spill] sm:$0xff] }
 0xb7c   :  { %v5419_v42 = vpack.c.bf16 %v5351_v35, %v5347_v0  ;;  %v5420_v11 = vpack.c.bf16 %v5352_v7, %v5348_v8  ;;  %7932 = vtanh.f32 %v4795_v18  ;;  %v5194_v22 = vunpack.c.h.bf16 %v11359_v40  ;;  %v12462_v0 = vld [vmem:[#allocation52_spill] sm:$0xff]  ;;  %v12465_v40 = vld [vmem:[#allocation57_spill] sm:$0xff] }
 0xb7d   :  { %v11391_v44 = vpack.c.bf16 %v3760_v16, %v3759_v5  ;;  %7934 = vtanh.f32 %v4796_v31  ;;  %v5195_v55 = vunpack.c.l.bf16 %v11367_v60  ;;  %v5269_v28 = vunpack.c.l.bf16 %v5140_v3  ;;  %v12464_v8 = vld [vmem:[#allocation56_spill] sm:$0xff] }
 0xb7e   :  { %5725 = vmatmul.bf16.gmra.mxu3 %v5419_v42  ;;  %5784 = vmatmul.bf16.gmra.mxu2 %v5420_v11  ;;  %v5273_v61 = vunpack.c.l.bf16 %v5142_v56  ;;  %v5270_v47 = vunpack.c.h.bf16 %v5140_v3  ;;  %v5274_v50 = vunpack.c.h.bf16 %v5142_v56  ;;  %7936 = vtanh.f32 %v4799_v37 }
 0xb7f   :  { %v3757_v13 = vmul.f32 0.5, %v12462_v0  ;;  %v3758_v26 = vmul.f32 0.5, %v12463_v19  ;;  %v3761_v46 = vmul.f32 0.5, %v12464_v8  ;;  %7938 = vtanh.f32 %v4800_v49 }
 0xb80   :  { %v5353_v15 = vmul.f32 %v5273_v61, %v5193_v4  ;;  %v5354_v10 = vmul.f32 %v5274_v50, %v5194_v22  ;;  %v3762_v5 = vmul.f32 0.5, %v12465_v40  ;;  %v4746_v35 = vpack.c.bf16 %v12467_v41, %v12466_v33 }
 0xb81   :  { %v11398_v16 = vpack.c.bf16 %v3758_v26, %v3757_v13  ;;  %v4797_v7 = vunpack.c.l.bf16 %v12468_v30  ;;  %v4798_v17 = vunpack.c.h.bf16 %v12468_v30  ;;  %v5349_v6 = vmul.f32 %v5269_v28, %v5189_v24  ;;  %v12469_v28 = vld [vmem:[#allocation60_spill] sm:$0xff]  ;;  %v12470_v30 = vld [vmem:[#allocation61_spill] sm:$0xff] }
 0xb82   :  { %v7933_v12 = vpop.eup %7932  ;;  %v5199_v18 = vunpack.c.l.bf16 %v11391_v44  ;;  %v5196_v14 = vunpack.c.h.bf16 %v11367_v60  ;;  %v11406_v3 = vpack.c.bf16 %v3762_v5, %v3761_v46  ;;  %v5350_v42 = vmul.f32 %v5270_v47, %v5190_v45 }
 0xb83   :  { %v7935_v31 = vpop.eup %7934  ;;  %v4801_v11 = vunpack.c.l.bf16 %v4746_v35  ;;  %v4802_v4 = vunpack.c.h.bf16 %v4746_v35  ;;  %7940 = vtanh.f32 %v4797_v7  ;;  %v5421_v37 = vpack.c.bf16 %v5353_v15, %v5349_v6 }
 0xb84   :  { %v4943_v56 = vpack.c.bf16 %v7935_v31, %v7933_v12  ;;  %v5200_v49 = vunpack.c.h.bf16 %v11391_v44  ;;  %7942 = vtanh.f32 %v4798_v17  ;;  %v7937_v22 = vpop.eup %7936  ;;  %v5422_v61 = vpack.c.bf16 %v5354_v10, %v5350_v42 }
 0xb85   :  { %7944 = vtanh.f32 %v4801_v11  ;;  %v5197_v24 = vunpack.c.l.bf16 %v11398_v16  ;;  %v3763_v50 = vmul.f32 0.5, %v12469_v28  ;;  %v7939_v0 = vpop.eup %7938  ;;  %v5201_v45 = vunpack.c.l.bf16 %v11406_v3 }
 0xb86   :  { %v4995_v13 = vunpack.c.l.bf16 %v4943_v56  ;;  %v4996_v19 = vunpack.c.h.bf16 %v4943_v56  ;;  %7946 = vtanh.f32 %v4802_v4  ;;  %v4945_v47 = vpack.c.bf16 %v7939_v0, %v7937_v22 }
 0xb87   :  { %v5198_v26 = vunpack.c.h.bf16 %v11398_v16  ;;  %v4749_v8 = vpack.c.bf16 %v11205_v36, %v11199_v2  ;;  %v4803_v46 = vunpack.c.l.bf16 %v11193_v62  ;;  %5843 = vmatmul.bf16.gmra.mxu0 %v5421_v37  ;;  %v5202_v40 = vunpack.c.h.bf16 %v11406_v3 }
 0xb88   :  { %v5075_v15 = vadd.f32 1.0, %v4995_v13  ;;  %v5076_v10 = vadd.f32 1.0, %v4996_v19  ;;  %v4804_v5 = vunpack.c.h.bf16 %v11193_v62  ;;  %v4999_v41 = vunpack.c.l.bf16 %v4945_v47 }
 0xb89   :  { %5902 = vmatmul.bf16.gmra.mxu1 %v5422_v61  ;;  %v7941_v33 = vpop.eup %7940  ;;  %v5000_v35 = vunpack.c.h.bf16 %v4945_v47  ;;  %v3764_v7 = vmul.f32 0.5, %v12470_v30  ;;  %v4807_v17 = vunpack.c.l.bf16 %v4749_v8  ;;  %v3767_v2 = vmul.f32 0.5, %v10952_v29  ;;  %v12472_v30 = vld [vmem:[#allocation28_spill] sm:$0xff] }
 0xb8a   :  { %v7943_v12 = vpop.eup %7942  ;;  %v5143_v6 = vpack.c.bf16 %v5076_v10, %v5075_v15  ;;  %v4808_v36 = vunpack.c.h.bf16 %v4749_v8  ;;  %7948 = vtanh.f32 %v4803_v46  ;;  %v5079_v42 = vadd.f32 1.0, %v4999_v41 }
 0xb8b   :  { %v7945_v31 = vpop.eup %7944  ;;  %v5080_v11 = vadd.f32 1.0, %v5000_v35  ;;  %v4944_v4 = vpack.c.bf16 %v7943_v12, %v7941_v33  ;;  %7950 = vtanh.f32 %v4804_v5  ;;  %v3768_v22 = vmul.f32 0.5, %v10954_v20  ;;  %v12471_v20 = vld [vmem:[#allocation27_spill] sm:$0xff] }
 0xb8c   :  { %v7947_v37 = vpop.eup %7946  ;;  %v5275_v56 = vunpack.c.l.bf16 %v5143_v6  ;;  %v5276_v62 = vunpack.c.h.bf16 %v5143_v6  ;;  %7952 = vtanh.f32 %v4807_v17  ;;  %v11423_v47 = vpack.c.bf16 %v3764_v7, %v3763_v50 }
 0xb8d   :  { %v5145_v61 = vpack.c.bf16 %v5080_v11, %v5079_v42  ;;  %v4946_v28 = vpack.c.bf16 %v7947_v37, %v7945_v31  ;;  %v4997_v0 = vunpack.c.l.bf16 %v4944_v4  ;;  %v4998_v13 = vunpack.c.h.bf16 %v4944_v4  ;;  %v12473_v42 = vld [vmem:[#allocation62_spill] sm:$0xff] }
 0xb8e   :  { %v5355_v29 = vmul.f32 %v5275_v56, %v5195_v55  ;;  %v5356_v19 = vmul.f32 %v5276_v62, %v5196_v14  ;;  %7954 = vtanh.f32 %v4808_v36  ;;  %v3765_v35 = vmul.f32 0.5, %v12471_v20 }
 0xb8f   :  { %v5279_v8 = vunpack.c.l.bf16 %v5145_v61  ;;  %v5280_v46 = vunpack.c.h.bf16 %v5145_v61  ;;  %v5001_v15 = vunpack.c.l.bf16 %v4946_v28  ;;  %v5002_v10 = vunpack.c.h.bf16 %v4946_v28 }
 0xb90   :  { %v7949_v5 = vpop.eup %7948  ;;  %v5077_v33 = vadd.f32 1.0, %v4997_v0  ;;  %v5078_v41 = vadd.f32 1.0, %v4998_v13  ;;  %v3766_v17 = vmul.f32 0.5, %v12472_v30  ;;  %v3829_v36 = vpack.c.bf16 %v3768_v22, %v3767_v2 }
 0xb91   :  { %v7951_v12 = vpop.eup %7950  ;;  %v5359_v60 = vmul.f32 %v5279_v8, %v5199_v18  ;;  %v5360_v55 = vmul.f32 %v5280_v46, %v5200_v49  ;;  %v5081_v14 = vadd.f32 1.0, %v5001_v15  ;;  %v5082_v50 = vadd.f32 1.0, %v5002_v10 }
 0xb92   :  { %v7953_v7 = vpop.eup %7952  ;;  %v5144_v6 = vpack.c.bf16 %v5078_v41, %v5077_v33  ;;  %v4947_v31 = vpack.c.bf16 %v7951_v12, %v7949_v5  ;;  %v3769_v11 = vmul.f32 0.5, %v12473_v42  ;;  %v3770_v62 = vmul.f32 0.5, %v10886_v58 }
 0xb93   :  { %v5423_v4 = vpack.c.bf16 %v5359_v60, %v5355_v29  ;;  %v5424_v37 = vpack.c.bf16 %v5360_v55, %v5356_v19  ;;  %v5146_v56 = vpack.c.bf16 %v5082_v50, %v5081_v14  ;;  %v11431_v46 = vpack.c.bf16 %v3766_v17, %v3765_v35 }
 0xb94   :  { %v7955_v61 = vpop.eup %7954  ;;  %v5277_v28 = vunpack.c.l.bf16 %v5144_v6  ;;  %v5278_v0 = vunpack.c.h.bf16 %v5144_v6  ;;  %v5003_v13 = vunpack.c.l.bf16 %v4947_v31  ;;  %v5004_v44 = vunpack.c.h.bf16 %v4947_v31 }
 0xb95   :  { %5730 = vmatmul.bf16.gmra.mxu3 %v5423_v4  ;;  %5789 = vmatmul.bf16.gmra.mxu2 %v5424_v37  ;;  %v5281_v18 = vunpack.c.l.bf16 %v5146_v56  ;;  %v5282_v49 = vunpack.c.h.bf16 %v5146_v56  ;;  %v4949_v8 = vpack.c.bf16 %v7955_v61, %v7953_v7  ;;  %v4750_v41 = vpack.c.bf16 %v11197_v59, %v11195_v48  ;;  %v3537_v48 = vpop.f32.mrf.mxu0  ;;  %v3596_v59 = vpop.f32.mrf.mxu1 }
 0xb96   :  { %v5357_v2 = vmul.f32 %v5277_v28, %v5197_v24  ;;  %v5358_v22 = vmul.f32 %v5278_v0, %v5198_v26  ;;  %v5083_v29 = vadd.f32 1.0, %v5003_v13  ;;  %v5084_v58 = vadd.f32 1.0, %v5004_v44 }
 0xb97   :  { %v5361_v19 = vmul.f32 %v5281_v18, %v5201_v45  ;;  %v5362_v15 = vmul.f32 %v5282_v49, %v5202_v40  ;;  %v5007_v10 = vunpack.c.l.bf16 %v4949_v8  ;;  %v5008_v5 = vunpack.c.h.bf16 %v4949_v8 }
 0xb98   :  { %v5147_v33 = vpack.c.bf16 %v5084_v58, %v5083_v29  ;;  %v4805_v20 = vunpack.c.l.bf16 %v11191_v53  ;;  %v4806_v24 = vunpack.c.h.bf16 %v11191_v53  ;;  %v5203_v17 = vunpack.c.l.bf16 %v11423_v47 }
 0xb99   :  { %v5425_v16 = vpack.c.bf16 %v5361_v19, %v5357_v2  ;;  %v5426_v26 = vpack.c.bf16 %v5362_v15, %v5358_v22  ;;  %v5087_v35 = vadd.f32 1.0, %v5007_v10  ;;  %v5088_v30 = vadd.f32 1.0, %v5008_v5 }
 0xb9a   :  { %v11446_v45 = vpack.c.bf16 %v3770_v62, %v3769_v11  ;;  %v4809_v3 = vunpack.c.l.bf16 %v4750_v41  ;;  %v4810_v40 = vunpack.c.h.bf16 %v4750_v41  ;;  %v5207_v60 = vunpack.c.l.bf16 %v3829_v36 }
 0xb9b   :  { %5848 = vmatmul.bf16.gmra.mxu0 %v5425_v16  ;;  %5907 = vmatmul.bf16.gmra.mxu1 %v5426_v26  ;;  %v5149_v12 = vpack.c.bf16 %v5088_v30, %v5087_v35  ;;  %v5283_v55 = vunpack.c.l.bf16 %v5147_v33  ;;  %7956 = vtanh.f32 %v4805_v20  ;;  %v5204_v53 = vunpack.c.h.bf16 %v11423_v47 }
 0xb9c   :  { %v5208_v14 = vunpack.c.h.bf16 %v3829_v36  ;;  %v5284_v50 = vunpack.c.h.bf16 %v5147_v33  ;;  %7958 = vtanh.f32 %v4806_v24  ;;  %v5205_v31 = vunpack.c.l.bf16 %v11431_v46 }
 0xb9d   :  { %v5287_v7 = vunpack.c.l.bf16 %v5149_v12  ;;  %v5288_v6 = vunpack.c.h.bf16 %v5149_v12  ;;  %7960 = vtanh.f32 %v4809_v3  ;;  %v5209_v42 = vunpack.c.l.bf16 %v11446_v45 }
 0xb9e   :  { %7962 = vtanh.f32 %v4810_v40  ;;  %v3538_v11 = vadd.f32 %v3537_v48, %v10216_v27  ;;  %v3597_v4 = vadd.f32 %v3596_v59, %v10222_v57  ;;  %v5363_v37 = vmul.f32 %v5283_v55, %v5203_v17 }
 0xb9f   :  { %v5367_v56 = vmul.f32 %v5287_v7, %v5207_v60  ;;  %v5368_v62 = vmul.f32 %v5288_v6, %v5208_v14  ;;  %v3771_v47 = vmul.f32 0.5, %v11074_v9  ;;  %v3772_v61 = vmul.f32 0.5, %v11076_v21 }
 0xba0   :  { %v3640_v36 = vpack.c.bf16 %v3597_v4, %v3538_v11  ;;  %v4753_v28 = vpack.c.bf16 %v11303_v52, %v11298_v39  ;;  %v4811_v0 = vunpack.c.l.bf16 %v11291_v1  ;;  %v5364_v44 = vmul.f32 %v5284_v50, %v5204_v53  ;;  %v12474_v53 = vld [vmem:[#allocation65_spill] sm:$0xff]  ;;  %v12475_v11 = vld [vmem:[#allocation66_spill] sm:$0xff] }
 0xba1   :  { %v7957_v13 = vpop.eup %7956  ;;  %v3775_v18 = vmul.f32 0.5, %v11139_v43  ;;  %v3776_v49 = vmul.f32 0.5, %v11141_v23  ;;  %v4812_v8 = vunpack.c.h.bf16 %v11291_v1  ;;  %v5427_v22 = vpack.c.bf16 %v5367_v56, %v5363_v37  ;;  %v12476_v37 = vld [vmem:[#allocation35_spill] sm:$0xff] }
 0xba2   :  { %v7959_v2 = vpop.eup %7958  ;;  %v11461_v29 = vunpack.c.l.bf16 %v3640_v36  ;;  %v11463_v9 = vunpack.c.h.bf16 %v3640_v36  ;;  %v4815_v21 = vunpack.c.l.bf16 %v4753_v28  ;;  %v5428_v19 = vpack.c.bf16 %v5368_v62, %v5364_v44  ;;  %v12477_v44 = vld [vmem:[#allocation36_spill] sm:$0xff] }
 0xba3   :  { %v7961_v58 = vpop.eup %7960  ;;  %v4948_v39 = vpack.c.bf16 %v7959_v2, %v7957_v13  ;;  %v4816_v52 = vunpack.c.h.bf16 %v4753_v28  ;;  %7964 = vtanh.f32 %v4811_v0  ;;  %v11467_v23 = vpack.c.bf16 %v3772_v61, %v3771_v47 }
 0xba4   :  { %v7963_v15 = vpop.eup %7962  ;;  %v3909_v10 = vmul.f32 0.044677734, %v11461_v29  ;;  %v3910_v43 = vmul.f32 0.044677734, %v11463_v9  ;;  %7966 = vtanh.f32 %v4812_v8  ;;  %v5206_v41 = vunpack.c.h.bf16 %v11431_v46  ;;  %v12478_v8 = vld [vmem:[#allocation67_spill] sm:$0xff] }
 0xba5   :  { %5735 = vmatmul.bf16.gmra.mxu3 %v5427_v22  ;;  %5794 = vmatmul.bf16.gmra.mxu2 %v5428_v19  ;;  %v4950_v1 = vpack.c.bf16 %v7963_v15, %v7961_v58  ;;  %v5005_v5 = vunpack.c.l.bf16 %v4948_v39  ;;  %v5006_v33 = vunpack.c.h.bf16 %v4948_v39  ;;  %7968 = vtanh.f32 %v4815_v21 }
 0xba6   :  { %v5210_v20 = vunpack.c.h.bf16 %v11446_v45  ;;  %v3960_v24 = vpack.c.bf16 %v3910_v43, %v3909_v10  ;;  %7970 = vtanh.f32 %v4816_v52  ;;  %v11471_v40 = vpack.c.bf16 %v3776_v49, %v3775_v18 }
 0xba7   :  { %v5009_v16 = vunpack.c.l.bf16 %v4950_v1  ;;  %v5010_v26 = vunpack.c.h.bf16 %v4950_v1  ;;  %v5085_v35 = vadd.f32 1.0, %v5005_v5  ;;  %v5086_v30 = vadd.f32 1.0, %v5006_v33 }
 0xba8   :  { %v4029_v17 = vunpack.c.l.bf16 %v3960_v24  ;;  %v4030_v3 = vunpack.c.h.bf16 %v3960_v24  ;;  %v5211_v12 = vunpack.c.l.bf16 %v11467_v23  ;;  %v3773_v14 = vmul.f32 0.5, %v12474_v53 }
 0xba9   :  { %v7965_v60 = vpop.eup %7964  ;;  %v5089_v55 = vadd.f32 1.0, %v5009_v16  ;;  %v5090_v48 = vadd.f32 1.0, %v5010_v26  ;;  %v5148_v59 = vpack.c.bf16 %v5086_v30, %v5085_v35  ;;  %v3774_v4 = vmul.f32 0.5, %v12475_v11  ;;  %v3478_v16 = vpop.f32.mrf.mxu2 }
 0xbaa   :  { %v7967_v50 = vpop.eup %7966  ;;  %v4109_v7 = vmul.f32 %v4029_v17, %v11461_v29  ;;  %v4110_v6 = vmul.f32 %v4030_v3, %v11463_v9  ;;  %v3777_v56 = vmul.f32 0.5, %v12476_v37  ;;  %v3778_v18 = vmul.f32 0.5, %v12477_v44 }
 0xbab   :  { %v7969_v62 = vpop.eup %7968  ;;  %v5150_v47 = vpack.c.bf16 %v5090_v48, %v5089_v55  ;;  %v5285_v36 = vunpack.c.l.bf16 %v5148_v59  ;;  %v5286_v61 = vunpack.c.h.bf16 %v5148_v59  ;;  %v4951_v28 = vpack.c.bf16 %v7967_v50, %v7965_v60 }
 0xbac   :  { %v7971_v0 = vpop.eup %7970  ;;  %v4160_v13 = vpack.c.bf16 %v4110_v6, %v4109_v7  ;;  %v4754_v49 = vpack.c.bf16 %v11296_v25, %v11293_v63  ;;  %v4813_v2 = vunpack.c.l.bf16 %v12478_v8  ;;  %v4814_v33 = vunpack.c.h.bf16 %v12478_v8  ;;  %v12481_v8 = vld [vmem:[#allocation29_spill] sm:$0xff] }
 0xbad   :  { %v5289_v22 = vunpack.c.l.bf16 %v5150_v47  ;;  %v5365_v21 = vmul.f32 %v5285_v36, %v5205_v31  ;;  %v5290_v58 = vunpack.c.h.bf16 %v5150_v47  ;;  %v5366_v19 = vmul.f32 %v5286_v61, %v5206_v41  ;;  %v3419_v31 = vpop.f32.mrf.mxu3 }
 0xbae   :  { %v4229_v39 = vunpack.c.l.bf16 %v4160_v13  ;;  %v4230_v52 = vunpack.c.h.bf16 %v4160_v13  ;;  %v4953_v15 = vpack.c.bf16 %v7971_v0, %v7969_v62  ;;  %v5011_v10 = vunpack.c.l.bf16 %v4951_v28 }
 0xbaf   :  { %v5369_v43 = vmul.f32 %v5289_v22, %v5209_v42  ;;  %v5370_v1 = vmul.f32 %v5290_v58, %v5210_v20  ;;  %v5012_v5 = vunpack.c.h.bf16 %v4951_v28  ;;  %v4817_v42 = vunpack.c.l.bf16 %v4754_v49  ;;  %v12482_v22 = vld [vmem:[#allocation30_spill] sm:$0xff]  ;;  %v3598_v58 = vpop.f32.mrf.mxu1 }
 0xbb0   :  { %v4309_v25 = vmul.f32 %v4229_v39, %v11461_v29  ;;  %v4310_v63 = vmul.f32 %v4230_v52, %v11463_v9  ;;  %v5015_v24 = vunpack.c.l.bf16 %v4953_v15  ;;  %v5016_v46 = vunpack.c.h.bf16 %v4953_v15 }
 0xbb1   :  { %v5429_v41 = vpack.c.bf16 %v5369_v43, %v5365_v21  ;;  %v5430_v26 = vpack.c.bf16 %v5370_v1, %v5366_v19  ;;  %v5091_v35 = vadd.f32 1.0, %v5011_v10  ;;  %v5092_v30 = vadd.f32 1.0, %v5012_v5  ;;  %v3480_v10 = vpop.f32.mrf.mxu2 }
 0xbb2   :  { %v4360_v17 = vpack.c.bf16 %v4310_v63, %v4309_v25  ;;  %v5095_v3 = vadd.f32 1.0, %v5015_v24  ;;  %v5096_v45 = vadd.f32 1.0, %v5016_v46  ;;  %v5215_v60 = vunpack.c.l.bf16 %v11471_v40 }
 0xbb3   :  { %5853 = vmatmul.bf16.gmra.mxu0 %v5429_v41  ;;  %5912 = vmatmul.bf16.gmra.mxu1 %v5430_v26  ;;  %v5151_v20 = vpack.c.bf16 %v5092_v30, %v5091_v35  ;;  %v4818_v55 = vunpack.c.h.bf16 %v4754_v49  ;;  %7972 = vtanh.f32 %v4813_v2  ;;  %v5212_v59 = vunpack.c.h.bf16 %v11467_v23 }
 0xbb4   :  { %v5153_v48 = vpack.c.bf16 %v5096_v45, %v5095_v3  ;;  %v5216_v53 = vunpack.c.h.bf16 %v11471_v40  ;;  %7974 = vtanh.f32 %v4814_v33  ;;  %v11493_v6 = vpack.c.bf16 %v3774_v4, %v3773_v14 }
 0xbb5   :  { %v5291_v50 = vunpack.c.l.bf16 %v5151_v20  ;;  %v5292_v7 = vunpack.c.h.bf16 %v5151_v20  ;;  %7976 = vtanh.f32 %v4817_v42  ;;  %v4429_v11 = vunpack.c.l.bf16 %v4360_v17  ;;  %v3421_v15 = vpop.f32.mrf.mxu3 }
 0xbb6   :  { %v5295_v37 = vunpack.c.l.bf16 %v5153_v48  ;;  %v5296_v62 = vunpack.c.h.bf16 %v5153_v48  ;;  %v11495_v47 = vpack.c.bf16 %v3778_v18, %v3777_v56  ;;  %v12479_v36 = vunpack.c.l.bf16 %v11301_v34 }
 0xbb7   :  { %v12480_v28 = vunpack.c.h.bf16 %v11301_v34  ;;  %v4430_v40 = vunpack.c.h.bf16 %v4360_v17  ;;  %7978 = vtanh.f32 %v4818_v55  ;;  %v5371_v14 = vmul.f32 %v5291_v50, %v5211_v12  ;;  %v3539_v34 = vpop.f32.mrf.mxu0 }
 0xbb8   :  { %v11499_v61 = vmul.f32 0.796875, %v12479_v36  ;;  %v5375_v4 = vmul.f32 %v5295_v37, %v5215_v60  ;;  %v5372_v13 = vmul.f32 %v5292_v7, %v5212_v59  ;;  %v5376_v44 = vmul.f32 %v5296_v62, %v5216_v53 }
 0xbb9   :  { %v11503_v0 = vmul.f32 0.796875, %v12480_v28  ;;  %v7973_v49 = vpop.eup %7972  ;;  %v4623_v56 = vunpack.c.l.bf16 %v11335_v51  ;;  %v5213_v18 = vunpack.c.l.bf16 %v11493_v6  ;;  %v3420_v2 = vadd.f32 %v3419_v31, %v12481_v8 }
 0xbba   :  { %v3479_v21 = vadd.f32 %v3478_v16, %v12482_v22  ;;  %v7975_v19 = vpop.eup %7974  ;;  %v11512_v39 = vadd.f32 %v4429_v11, %v11461_v29  ;;  %v5431_v23 = vpack.c.bf16 %v5375_v4, %v5371_v14  ;;  %v5432_v12 = vpack.c.bf16 %v5376_v44, %v5372_v13 }
 0xbbb   :  { %v5217_v52 = vunpack.c.l.bf16 %v11495_v47  ;;  %v7977_v43 = vpop.eup %7976  ;;  %v4952_v1 = vpack.c.bf16 %v7975_v19, %v7973_v49  ;;  %v3540_v33 = vadd.f32 %v3539_v34, %v10216_v27  ;;  %v3599_v25 = vadd.f32 %v3598_v58, %v10222_v57  ;;  %v3601_v19 = vpop.f32.mrf.mxu1 }
 0xbbc   :  { %v3639_v5 = vpack.c.bf16 %v3479_v21, %v3420_v2  ;;  %v11518_v63 = vadd.f32 %v4430_v40, %v11463_v9  ;;  %5740 = vmatmul.bf16.gmra.mxu3 %v5431_v23  ;;  %5799 = vmatmul.bf16.gmra.mxu2 %v5432_v12  ;;  %v5214_v24 = vunpack.c.h.bf16 %v11493_v6  ;;  %v3422_v46 = vadd.f32 %v3421_v15, %v12481_v8 }
 0xbbd   :  { %v3481_v31 = vadd.f32 %v3480_v10, %v12482_v22  ;;  %v7979_v16 = vpop.eup %7978  ;;  %v5013_v41 = vunpack.c.l.bf16 %v4952_v1  ;;  %v5014_v26 = vunpack.c.h.bf16 %v4952_v1  ;;  %v5218_v3 = vunpack.c.h.bf16 %v11495_v47 }
 0xbbe   :  { %v11523_v35 = vunpack.c.l.bf16 %v3639_v5  ;;  %v11525_v30 = vunpack.c.h.bf16 %v3639_v5  ;;  %v4954_v17 = vpack.c.bf16 %v7979_v16, %v7977_v43  ;;  %v3642_v45 = vpack.c.bf16 %v3599_v25, %v3540_v33 }
 0xbbf   :  { %v3641_v42 = vpack.c.bf16 %v3481_v31, %v3422_v46  ;;  %v5093_v20 = vadd.f32 1.0, %v5013_v41  ;;  %v5094_v60 = vadd.f32 1.0, %v5014_v26  ;;  %v3542_v58 = vpop.f32.mrf.mxu0  ;;  %v3602_v16 = vadd.f32 %v3601_v19, %v10222_v57 }
 0xbc0   :  { %v3907_v55 = vmul.f32 0.044677734, %v11523_v35  ;;  %v3908_v48 = vmul.f32 0.044677734, %v11525_v30  ;;  %v5017_v59 = vunpack.c.l.bf16 %v4954_v17  ;;  %v5018_v53 = vunpack.c.h.bf16 %v4954_v17 }
 0xbc1   :  { %v11530_v50 = vunpack.c.l.bf16 %v3642_v45  ;;  %v11532_v7 = vunpack.c.h.bf16 %v3642_v45  ;;  %v5152_v6 = vpack.c.bf16 %v5094_v60, %v5093_v20  ;;  %v11534_v37 = vunpack.c.l.bf16 %v3641_v42 }
 0xbc2   :  { %v3959_v11 = vpack.c.bf16 %v3908_v48, %v3907_v55  ;;  %v11536_v62 = vunpack.c.h.bf16 %v3641_v42  ;;  %v5097_v47 = vadd.f32 1.0, %v5017_v59  ;;  %v5098_v36 = vadd.f32 1.0, %v5018_v53 }
 0xbc3   :  { %v3913_v28 = vmul.f32 0.044677734, %v11530_v50  ;;  %v3914_v40 = vmul.f32 0.044677734, %v11532_v7  ;;  %v5293_v14 = vunpack.c.l.bf16 %v5152_v6  ;;  %v5294_v4 = vunpack.c.h.bf16 %v5152_v6 }
 0xbc4   :  { %v4027_v13 = vunpack.c.l.bf16 %v3959_v11  ;;  %v4028_v44 = vunpack.c.h.bf16 %v3959_v11  ;;  %v5154_v49 = vpack.c.bf16 %v5098_v36, %v5097_v47  ;;  %v3911_v21 = vmul.f32 0.044677734, %v11534_v37 }
 0xbc5   :  { %v3962_v2 = vpack.c.bf16 %v3914_v40, %v3913_v28  ;;  %v3912_v34 = vmul.f32 0.044677734, %v11536_v62  ;;  %v5373_v23 = vmul.f32 %v5293_v14, %v5213_v18  ;;  %v5374_v12 = vmul.f32 %v5294_v4, %v5214_v24 }
 0xbc6   :  { %v4107_v15 = vmul.f32 %v4027_v13, %v11523_v35  ;;  %v4108_v10 = vmul.f32 %v4028_v44, %v11525_v30  ;;  %v5297_v43 = vunpack.c.l.bf16 %v5154_v49  ;;  %v5298_v1 = vunpack.c.h.bf16 %v5154_v49 }
 0xbc7   :  { %v4033_v5 = vunpack.c.l.bf16 %v3962_v2  ;;  %v4034_v33 = vunpack.c.h.bf16 %v3962_v2  ;;  %v3961_v46 = vpack.c.bf16 %v3912_v34, %v3911_v21  ;;  %v3543_v31 = vadd.f32 %v3542_v58, %v10216_v27 }
 0xbc8   :  { %v4159_v25 = vpack.c.bf16 %v4108_v10, %v4107_v15  ;;  %v5377_v41 = vmul.f32 %v5297_v43, %v5217_v52  ;;  %v5378_v26 = vmul.f32 %v5298_v1, %v5218_v3  ;;  %v4624_v40 = vunpack.c.h.bf16 %v11335_v51 }
 0xbc9   :  { %v4113_v17 = vmul.f32 %v4033_v5, %v11530_v50  ;;  %v4114_v18 = vmul.f32 %v4034_v33, %v11532_v7  ;;  %v4031_v42 = vunpack.c.l.bf16 %v3961_v46  ;;  %v4032_v20 = vunpack.c.h.bf16 %v3961_v46 }
 0xbca   :  { %v4227_v24 = vunpack.c.l.bf16 %v4159_v25  ;;  %v4228_v45 = vunpack.c.h.bf16 %v4159_v25  ;;  %v5433_v60 = vpack.c.bf16 %v5377_v41, %v5373_v23  ;;  %v5434_v55 = vpack.c.bf16 %v5378_v26, %v5374_v12 }
 0xbcb   :  { %v4162_v48 = vpack.c.bf16 %v4114_v18, %v4113_v17  ;;  %v3644_v59 = vpack.c.bf16 %v3602_v16, %v3543_v31  ;;  %v4111_v11 = vmul.f32 %v4031_v42, %v11534_v37  ;;  %v4112_v52 = vmul.f32 %v4032_v20, %v11536_v62 }
 0xbcc   :  { %v4307_v53 = vmul.f32 %v4227_v24, %v11523_v35  ;;  %v4308_v6 = vmul.f32 %v4228_v45, %v11525_v30  ;;  %5858 = vmatmul.bf16.gmra.mxu0 %v5433_v60  ;;  %5917 = vmatmul.bf16.gmra.mxu1 %v5434_v55  ;;  %v4560_v14 = vpack.c.bf16 %v11518_v63, %v11512_v39  ;;  %v12483_v12 = vunpack.c.h.bf16 %v11282_v32 }
 0xbcd   :  { %v4233_v3 = vunpack.c.l.bf16 %v4162_v48  ;;  %v4234_v47 = vunpack.c.h.bf16 %v4162_v48  ;;  %v11552_v36 = vunpack.c.l.bf16 %v3644_v59  ;;  %v11554_v28 = vunpack.c.h.bf16 %v3644_v59 }
 0xbce   :  { %v4359_v4 = vpack.c.bf16 %v4308_v6, %v4307_v53  ;;  %v4161_v13 = vpack.c.bf16 %v4112_v52, %v4111_v11  ;;  %v4702_v15 = vmul.f32 0.796875, %v12483_v12  ;;  %v4625_v10 = vunpack.c.l.bf16 %v11325_v38 }
 0xbcf   :  { %v4313_v44 = vmul.f32 %v4233_v3, %v11530_v50  ;;  %v4314_v49 = vmul.f32 %v4234_v47, %v11532_v7  ;;  %v3917_v2 = vmul.f32 0.044677734, %v11552_v36  ;;  %v3918_v21 = vmul.f32 0.044677734, %v11554_v28  ;;  %v12484_v3 = vld [vmem:[#allocation70_spill] sm:$0xff] }
 0xbd0   :  { %v4427_v34 = vunpack.c.l.bf16 %v4359_v4  ;;  %v4428_v58 = vunpack.c.h.bf16 %v4359_v4  ;;  %v4231_v19 = vunpack.c.l.bf16 %v4161_v13  ;;  %v4232_v23 = vunpack.c.h.bf16 %v4161_v13  ;;  %v12485_v13 = vld [vmem:[#allocation71_spill] sm:$0xff] }
 0xbd1   :  { %v4362_v39 = vpack.c.bf16 %v4314_v49, %v4313_v44  ;;  %v3964_v63 = vpack.c.bf16 %v3918_v21, %v3917_v2  ;;  %v4703_v43 = vmul.f32 0.796875, %v4623_v56  ;;  %v4704_v1 = vmul.f32 0.796875, %v4624_v40  ;;  %v12486_v49 = vld [vmem:[#allocation74_spill] sm:$0xff]  ;;  %v12487_v21 = vld [vmem:[#allocation75_spill] sm:$0xff] }
 0xbd2   :  { %v4507_v5 = vadd.f32 %v4427_v34, %v11523_v35  ;;  %v4508_v33 = vadd.f32 %v4428_v58, %v11525_v30  ;;  %v4311_v25 = vmul.f32 %v4231_v19, %v11534_v37  ;;  %v4312_v46 = vmul.f32 %v4232_v23, %v11536_v62 }
 0xbd3   :  { %v4037_v31 = vunpack.c.l.bf16 %v3964_v63  ;;  %v4038_v16 = vunpack.c.h.bf16 %v3964_v63  ;;  %v4755_v32 = vpack.c.bf16 %v11503_v0, %v11499_v61  ;;  %v4629_v41 = vunpack.c.l.bf16 %v4560_v14 }
 0xbd4   :  { %v4433_v26 = vunpack.c.l.bf16 %v4362_v39  ;;  %v4434_v17 = vunpack.c.h.bf16 %v4362_v39  ;;  %v4630_v18 = vunpack.c.h.bf16 %v4560_v14  ;;  %v4559_v51 = vpack.c.bf16 %v4508_v33, %v4507_v5 }
 0xbd5   :  { %v4117_v56 = vmul.f32 %v4037_v31, %v11552_v36  ;;  %v4118_v24 = vmul.f32 %v4038_v16, %v11554_v28  ;;  %v4756_v45 = vpack.c.bf16 %v4702_v15, %v11314_v54  ;;  %v4626_v42 = vunpack.c.h.bf16 %v11325_v38  ;;  %v12488_v31 = vld [vmem:[#allocation68_spill] sm:$0xff] }
 0xbd6   :  { %v4705_v20 = vmul.f32 0.796875, %v4625_v10  ;;  %v4361_v60 = vpack.c.bf16 %v4312_v46, %v4311_v25  ;;  %v4757_v48 = vpack.c.bf16 %v4704_v1, %v4703_v43  ;;  %v4709_v59 = vmul.f32 0.796875, %v4629_v41 }
 0xbd7   :  { %v4164_v55 = vpack.c.bf16 %v4118_v24, %v4117_v56  ;;  %v4513_v61 = vadd.f32 %v4433_v26, %v11530_v50  ;;  %v4514_v0 = vadd.f32 %v4434_v17, %v11532_v7  ;;  %v4819_v53 = vunpack.c.l.bf16 %v4755_v32  ;;  %v12490_v26 = vld [vmem:[#allocation72_spill] sm:$0xff] }
 0xbd8   :  { %v4710_v6 = vmul.f32 0.796875, %v4630_v18  ;;  %v4627_v11 = vunpack.c.l.bf16 %v4559_v51  ;;  %v4628_v52 = vunpack.c.h.bf16 %v4559_v51  ;;  %v3779_v47 = vmul.f32 0.5, %v12484_v3  ;;  %v12491_v18 = vld [vmem:[#allocation73_spill] sm:$0xff] }
 0xbd9   :  { %v4237_v40 = vunpack.c.l.bf16 %v4164_v55  ;;  %v4238_v14 = vunpack.c.h.bf16 %v4164_v55  ;;  %v4820_v54 = vunpack.c.h.bf16 %v4755_v32  ;;  %v4823_v4 = vunpack.c.l.bf16 %v4757_v48  ;;  %v12489_v32 = vld [vmem:[#allocation69_spill] sm:$0xff] }
 0xbda   :  { %v4431_v38 = vunpack.c.l.bf16 %v4361_v60  ;;  %v3780_v44 = vmul.f32 0.5, %v12485_v13  ;;  %v3783_v2 = vmul.f32 0.5, %v12486_v49  ;;  %v3784_v34 = vmul.f32 0.5, %v12487_v21 }
 0xbdb   :  { %v11584_v58 = vpack.c.bf16 %v4514_v0, %v4513_v61  ;;  %v4432_v19 = vunpack.c.h.bf16 %v4361_v60  ;;  %v4824_v23 = vunpack.c.h.bf16 %v4757_v48  ;;  %7980 = vtanh.f32 %v4819_v53  ;;  %v3424_v61 = vpop.f32.mrf.mxu3 }
 0xbdc   :  { %v4706_v12 = vmul.f32 0.796875, %v4626_v42  ;;  %v11586_v15 = vpack.c.bf16 %v4710_v6, %v4709_v59  ;;  %v4707_v10 = vmul.f32 0.796875, %v4627_v11  ;;  %7982 = vtanh.f32 %v4820_v54 }
 0xbdd   :  { %v4708_v39 = vmul.f32 0.796875, %v4628_v52  ;;  %v4317_v63 = vmul.f32 %v4237_v40, %v11552_v36  ;;  %v4318_v43 = vmul.f32 %v4238_v14, %v11554_v28  ;;  %7984 = vtanh.f32 %v4823_v4  ;;  %v3483_v40 = vpop.f32.mrf.mxu2 }
 0xbde   :  { %v11591_v1 = vadd.f32 %v4431_v38, %v11534_v37  ;;  %v11593_v5 = vpack.c.bf16 %v3780_v44, %v3779_v47  ;;  %v11595_v33 = vpack.c.bf16 %v3784_v34, %v3783_v2  ;;  %7986 = vtanh.f32 %v4824_v23 }
 0xbdf   :  { %v4633_v25 = vunpack.c.l.bf16 %v11584_v58  ;;  %v11599_v46 = vadd.f32 %v4432_v19, %v11536_v62  ;;  %v3781_v16 = vmul.f32 0.5, %v12488_v31  ;;  %v3782_v41 = vmul.f32 0.5, %v12489_v32 }
 0xbe0   :  { %v3785_v17 = vmul.f32 0.5, %v12490_v26  ;;  %v3786_v51 = vmul.f32 0.5, %v12491_v18  ;;  %v4758_v56 = vpack.c.bf16 %v4706_v12, %v4705_v20  ;;  %v4821_v24 = vunpack.c.l.bf16 %v4756_v45  ;;  %v3603_v18 = vpop.f32.mrf.mxu1 }
 0xbe1   :  { %v7981_v42 = vpop.eup %7980  ;;  %v11605_v60 = vpack.c.bf16 %v4708_v39, %v4707_v10  ;;  %v4634_v55 = vunpack.c.h.bf16 %v11584_v58  ;;  %v11608_v48 = vpack.c.bf16 %v4318_v43, %v4317_v63  ;;  %v4822_v59 = vunpack.c.h.bf16 %v4756_v45 }
 0xbe2   :  { %v7983_v0 = vpop.eup %7982  ;;  %v5219_v53 = vunpack.c.l.bf16 %v11593_v5  ;;  %v4825_v6 = vunpack.c.l.bf16 %v4758_v56  ;;  %v4826_v11 = vunpack.c.h.bf16 %v4758_v56  ;;  %7988 = vtanh.f32 %v4821_v24 }
 0xbe3   :  { %v7985_v52 = vpop.eup %7984  ;;  %v4955_v3 = vpack.c.bf16 %v7983_v0, %v7981_v42  ;;  %v5223_v20 = vunpack.c.l.bf16 %v11595_v33  ;;  %v5220_v47 = vunpack.c.h.bf16 %v11593_v5  ;;  %7990 = vtanh.f32 %v4822_v59 }
 0xbe4   :  { %v7987_v14 = vpop.eup %7986  ;;  %v11613_v54 = vpack.c.bf16 %v3782_v41, %v3781_v16  ;;  %v11615_v4 = vpack.c.bf16 %v3786_v51, %v3785_v17  ;;  %7992 = vtanh.f32 %v4825_v6  ;;  %v3425_v45 = vadd.f32 %v3424_v61, %v12481_v8  ;;  %v3544_v17 = vpop.f32.mrf.mxu0 }
 0xbe5   :  { %v4957_v38 = vpack.c.bf16 %v7987_v14, %v7985_v52  ;;  %v5019_v13 = vunpack.c.l.bf16 %v4955_v3  ;;  %v5020_v44 = vunpack.c.h.bf16 %v4955_v3  ;;  %7994 = vtanh.f32 %v4826_v11 }
 0xbe6   :  { %v4437_v49 = vunpack.c.l.bf16 %v11608_v48  ;;  %v4438_v2 = vunpack.c.h.bf16 %v11608_v48  ;;  %v5224_v21 = vunpack.c.h.bf16 %v11595_v33  ;;  %v3484_v34 = vadd.f32 %v3483_v40, %v12482_v22 }
 0xbe7   :  { %v5023_v19 = vunpack.c.l.bf16 %v4957_v38  ;;  %v5024_v23 = vunpack.c.h.bf16 %v4957_v38  ;;  %v5099_v12 = vadd.f32 1.0, %v5019_v13  ;;  %v5100_v10 = vadd.f32 1.0, %v5020_v44 }
 0xbe8   :  { %v7989_v39 = vpop.eup %7988  ;;  %v5221_v63 = vunpack.c.l.bf16 %v11613_v54  ;;  %v5225_v43 = vunpack.c.l.bf16 %v11615_v4  ;;  %v5222_v5 = vunpack.c.h.bf16 %v11613_v54  ;;  %v3643_v31 = vpack.c.bf16 %v3484_v34, %v3425_v45 }
 0xbe9   :  { %v7991_v16 = vpop.eup %7990  ;;  %v5103_v32 = vadd.f32 1.0, %v5023_v19  ;;  %v5104_v41 = vadd.f32 1.0, %v5024_v23  ;;  %v5155_v26 = vpack.c.bf16 %v5100_v10, %v5099_v12  ;;  %v5226_v33 = vunpack.c.h.bf16 %v11615_v4 }
 0xbea   :  { %v7993_v51 = vpop.eup %7992  ;;  %v4956_v56 = vpack.c.bf16 %v7991_v16, %v7989_v39  ;;  %v11626_v24 = vunpack.c.l.bf16 %v3643_v31  ;;  %v11628_v42 = vunpack.c.h.bf16 %v3643_v31  ;;  %v3545_v59 = vadd.f32 %v3544_v17, %v10216_v27 }
 0xbeb   :  { %v7995_v61 = vpop.eup %7994  ;;  %v5157_v0 = vpack.c.bf16 %v5104_v41, %v5103_v32  ;;  %v5299_v6 = vunpack.c.l.bf16 %v5155_v26  ;;  %v5300_v11 = vunpack.c.h.bf16 %v5155_v26  ;;  %v3604_v52 = vadd.f32 %v3603_v18, %v10222_v57  ;;  %v3426_v32 = vpop.f32.mrf.mxu3 }
 0xbec   :  { %v4958_v3 = vpack.c.bf16 %v7995_v61, %v7993_v51  ;;  %v5021_v40 = vunpack.c.l.bf16 %v4956_v56  ;;  %v5022_v14 = vunpack.c.h.bf16 %v4956_v56  ;;  %v3915_v54 = vmul.f32 0.044677734, %v11626_v24  ;;  %v3485_v41 = vpop.f32.mrf.mxu2 }
 0xbed   :  { %v5303_v45 = vunpack.c.l.bf16 %v5157_v0  ;;  %v5379_v38 = vmul.f32 %v5299_v6, %v5219_v53  ;;  %v5304_v13 = vunpack.c.h.bf16 %v5157_v0  ;;  %v5380_v44 = vmul.f32 %v5300_v11, %v5220_v47 }
 0xbee   :  { %v5025_v34 = vunpack.c.l.bf16 %v4958_v3  ;;  %v5026_v19 = vunpack.c.h.bf16 %v4958_v3  ;;  %v5101_v23 = vadd.f32 1.0, %v5021_v40  ;;  %v5102_v12 = vadd.f32 1.0, %v5022_v14  ;;  %v3547_v40 = vpop.f32.mrf.mxu0  ;;  %v3606_v14 = vpop.f32.mrf.mxu1 }
 0xbef   :  { %v5383_v10 = vmul.f32 %v5303_v45, %v5223_v20  ;;  %v5384_v39 = vmul.f32 %v5304_v13, %v5224_v21  ;;  %v3916_v31 = vmul.f32 0.044677734, %v11628_v42  ;;  %v3646_v16 = vpack.c.bf16 %v3604_v52, %v3545_v59 }
 0xbf0   :  { %v5105_v26 = vadd.f32 1.0, %v5025_v34  ;;  %v5106_v17 = vadd.f32 1.0, %v5026_v19  ;;  %v5156_v18 = vpack.c.bf16 %v5102_v12, %v5101_v23  ;;  %v3427_v51 = vadd.f32 %v3426_v32, %v12481_v8 }
 0xbf1   :  { %v5435_v56 = vpack.c.bf16 %v5383_v10, %v5379_v38  ;;  %v5436_v53 = vpack.c.bf16 %v5384_v39, %v5380_v44  ;;  %v3963_v61 = vpack.c.bf16 %v3916_v31, %v3915_v54  ;;  %v11635_v47 = vunpack.c.l.bf16 %v3646_v16 }
 0xbf2   :  { %v5158_v0 = vpack.c.bf16 %v5106_v17, %v5105_v26  ;;  %v5301_v6 = vunpack.c.l.bf16 %v5156_v18  ;;  %v5302_v11 = vunpack.c.h.bf16 %v5156_v18  ;;  %v11637_v20 = vunpack.c.h.bf16 %v3646_v16 }
 0xbf3   :  { %5745 = vmatmul.bf16.gmra.mxu3 %v5435_v56  ;;  %5804 = vmatmul.bf16.gmra.mxu2 %v5436_v53  ;;  %v4035_v21 = vunpack.c.l.bf16 %v3963_v61  ;;  %v4036_v59 = vunpack.c.h.bf16 %v3963_v61  ;;  %v3921_v52 = vmul.f32 0.044677734, %v11635_v47  ;;  %v3486_v3 = vadd.f32 %v3485_v41, %v12482_v22  ;;  %v3429_v41 = vpop.f32.mrf.mxu3 }
 0xbf4   :  { %v5305_v45 = vunpack.c.l.bf16 %v5158_v0  ;;  %v5381_v38 = vmul.f32 %v5301_v6, %v5221_v63  ;;  %v5306_v54 = vunpack.c.h.bf16 %v5158_v0  ;;  %v5382_v13 = vmul.f32 %v5302_v11, %v5222_v5  ;;  %v3488_v53 = vpop.f32.mrf.mxu2 }
 0xbf5   :  { %v4115_v44 = vmul.f32 %v4035_v21, %v11626_v24  ;;  %v4116_v34 = vmul.f32 %v4036_v59, %v11628_v42  ;;  %v3922_v19 = vmul.f32 0.044677734, %v11637_v20  ;;  %v3645_v23 = vpack.c.bf16 %v3486_v3, %v3427_v51 }
 0xbf6   :  { %v5385_v12 = vmul.f32 %v5305_v45, %v5225_v43  ;;  %v5386_v10 = vmul.f32 %v5306_v54, %v5226_v33  ;;  %v3548_v39 = vadd.f32 %v3547_v40, %v10216_v27  ;;  %v3607_v31 = vadd.f32 %v3606_v14, %v10222_v57 }
 0xbf7   :  { %v4163_v16 = vpack.c.bf16 %v4116_v34, %v4115_v44  ;;  %v3966_v32 = vpack.c.bf16 %v3922_v19, %v3921_v52  ;;  %v11648_v63 = vunpack.c.l.bf16 %v3645_v23  ;;  %v11650_v5 = vunpack.c.h.bf16 %v3645_v23 }
 0xbf8   :  { %v5437_v26 = vpack.c.bf16 %v5385_v12, %v5381_v38  ;;  %v5438_v17 = vpack.c.bf16 %v5386_v10, %v5382_v13  ;;  %v3648_v18 = vpack.c.bf16 %v3607_v31, %v3548_v39  ;;  %v3430_v51 = vadd.f32 %v3429_v41, %v12481_v8 }
 0xbf9   :  { %v4235_v56 = vunpack.c.l.bf16 %v4163_v16  ;;  %v4236_v4 = vunpack.c.h.bf16 %v4163_v16  ;;  %v4041_v43 = vunpack.c.l.bf16 %v3966_v32  ;;  %v4042_v33 = vunpack.c.h.bf16 %v3966_v32 }
 0xbfa   :  { %5863 = vmatmul.bf16.gmra.mxu0 %v5437_v26  ;;  %5922 = vmatmul.bf16.gmra.mxu1 %v5438_v17  ;;  %v3919_v61 = vmul.f32 0.044677734, %v11648_v63  ;;  %v3920_v0 = vmul.f32 0.044677734, %v11650_v5  ;;  %v11655_v6 = vunpack.c.l.bf16 %v3648_v18  ;;  %v11657_v11 = vunpack.c.h.bf16 %v3648_v18 }
 0xbfb   :  { %v4315_v21 = vmul.f32 %v4235_v56, %v11626_v24  ;;  %v4316_v59 = vmul.f32 %v4236_v4, %v11628_v42  ;;  %v4121_v52 = vmul.f32 %v4041_v43, %v11635_v47  ;;  %v4122_v3 = vmul.f32 %v4042_v33, %v11637_v20 }
 0xbfc   :  { %v3965_v40 = vpack.c.bf16 %v3920_v0, %v3919_v61  ;;  %v3925_v14 = vmul.f32 0.044677734, %v11655_v6  ;;  %v3926_v45 = vmul.f32 0.044677734, %v11657_v11  ;;  %v3489_v38 = vadd.f32 %v3488_v53, %v12482_v22 }
 0xbfd   :  { %v4517_v54 = vadd.f32 %v4437_v49, %v11552_v36  ;;  %v4518_v13 = vadd.f32 %v4438_v2, %v11554_v28  ;;  %v4363_v44 = vpack.c.bf16 %v4316_v59, %v4315_v21  ;;  %v4166_v34 = vpack.c.bf16 %v4122_v3, %v4121_v52 }
 0xbfe   :  { %v4039_v19 = vunpack.c.l.bf16 %v3965_v40  ;;  %v4040_v23 = vunpack.c.h.bf16 %v3965_v40  ;;  %v3968_v12 = vpack.c.bf16 %v3926_v45, %v3925_v14  ;;  %v3647_v10 = vpack.c.bf16 %v3489_v38, %v3430_v51 }
 0xbff   :  { %v4435_v39 = vunpack.c.l.bf16 %v4363_v44  ;;  %v4436_v31 = vunpack.c.h.bf16 %v4363_v44  ;;  %v4241_v16 = vunpack.c.l.bf16 %v4166_v34  ;;  %v4242_v32 = vunpack.c.h.bf16 %v4166_v34 }
 0xc00   :  { %v4119_v41 = vmul.f32 %v4039_v19, %v11648_v63  ;;  %v4120_v26 = vmul.f32 %v4040_v23, %v11650_v5  ;;  %v4045_v17 = vunpack.c.l.bf16 %v3968_v12  ;;  %v4046_v49 = vunpack.c.h.bf16 %v3968_v12 }
 0xc01   :  { %v4515_v18 = vadd.f32 %v4435_v39, %v11626_v24  ;;  %v4516_v48 = vadd.f32 %v4436_v31, %v11628_v42  ;;  %v4321_v2 = vmul.f32 %v4241_v16, %v11635_v47  ;;  %v4322_v56 = vmul.f32 %v4242_v32, %v11637_v20 }
 0xc02   :  { %v4165_v4 = vpack.c.bf16 %v4120_v26, %v4119_v41  ;;  %v4125_v51 = vmul.f32 %v4045_v17, %v11655_v6  ;;  %v4126_v43 = vmul.f32 %v4046_v49, %v11657_v11  ;;  %v11680_v33 = vunpack.c.l.bf16 %v3647_v10 }
 0xc03   :  { %v11684_v53 = vmul.f32 0.796875, %v4633_v25  ;;  %v11688_v61 = vpack.c.bf16 %v11599_v46, %v11591_v1  ;;  %v4564_v0 = vpack.c.bf16 %v4518_v13, %v4517_v54  ;;  %v4366_v21 = vpack.c.bf16 %v4322_v56, %v4321_v2  ;;  %v3549_v1 = vpop.f32.mrf.mxu0  ;;  %v3608_v46 = vpop.f32.mrf.mxu1 }
 0xc04   :  { %v4239_v59 = vunpack.c.l.bf16 %v4165_v4  ;;  %v4240_v52 = vunpack.c.h.bf16 %v4165_v4  ;;  %v4168_v3 = vpack.c.bf16 %v4126_v43, %v4125_v51  ;;  %v11690_v40 = vunpack.c.h.bf16 %v3647_v10  ;;  %v3431_v43 = vpop.f32.mrf.mxu3 }
 0xc05   :  { %v4563_v14 = vpack.c.bf16 %v4516_v48, %v4515_v18  ;;  %v4441_v45 = vunpack.c.l.bf16 %v4366_v21  ;;  %v4442_v38 = vunpack.c.h.bf16 %v4366_v21  ;;  %v3923_v44 = vmul.f32 0.044677734, %v11680_v33  ;;  %v3490_v21 = vpop.f32.mrf.mxu2 }
 0xc06   :  { %v4319_v34 = vmul.f32 %v4239_v59, %v11648_v63  ;;  %v4320_v25 = vmul.f32 %v4240_v52, %v11650_v5  ;;  %v4245_v19 = vunpack.c.l.bf16 %v4168_v3  ;;  %v4246_v23 = vunpack.c.h.bf16 %v4168_v3 }
 0xc07   :  { %v11697_v54 = vmul.f32 0.796875, %v4634_v55  ;;  %v4631_v13 = vunpack.c.l.bf16 %v11688_v61  ;;  %v4521_v12 = vadd.f32 %v4441_v45, %v11635_v47  ;;  %v4522_v10 = vadd.f32 %v4442_v38, %v11637_v20 }
 0xc08   :  { %v4365_v39 = vpack.c.bf16 %v4320_v25, %v4319_v34  ;;  %v4325_v31 = vmul.f32 %v4245_v19, %v11655_v6  ;;  %v4326_v16 = vmul.f32 %v4246_v23, %v11657_v11  ;;  %v3924_v32 = vmul.f32 0.044677734, %v11690_v40 }
 0xc09   :  { %v4637_v41 = vunpack.c.l.bf16 %v4564_v0  ;;  %v4638_v26 = vunpack.c.h.bf16 %v4564_v0  ;;  %v3550_v17 = vadd.f32 %v3549_v1, %v10216_v27  ;;  %v3609_v58 = vadd.f32 %v3608_v46, %v10222_v57 }
 0xc0a   :  { %v4632_v55 = vunpack.c.h.bf16 %v11688_v61  ;;  %v4635_v49 = vunpack.c.l.bf16 %v4563_v14  ;;  %v4368_v18 = vpack.c.bf16 %v4326_v16, %v4325_v31  ;;  %v3967_v48 = vpack.c.bf16 %v3924_v32, %v3923_v44 }
 0xc0b   :  { %v11708_v2 = vmul.f32 0.796875, %v4631_v13  ;;  %v4636_v56 = vunpack.c.h.bf16 %v4563_v14  ;;  %v4566_v4 = vpack.c.bf16 %v4522_v10, %v4521_v12  ;;  %v3650_v51 = vpack.c.bf16 %v3609_v58, %v3550_v17 }
 0xc0c   :  { %v4439_v59 = vunpack.c.l.bf16 %v4365_v39  ;;  %v4440_v52 = vunpack.c.h.bf16 %v4365_v39  ;;  %v4445_v3 = vunpack.c.l.bf16 %v4368_v18  ;;  %v4446_v0 = vunpack.c.h.bf16 %v4368_v18  ;;  %v5834_v39 = vpop.f32.mrf.mxu0  ;;  %v5893_v18 = vpop.f32.mrf.mxu1 }
 0xc0d   :  { %v4717_v45 = vmul.f32 0.796875, %v4637_v41  ;;  %v4718_v27 = vmul.f32 0.796875, %v4638_v26  ;;  %v4043_v38 = vunpack.c.l.bf16 %v3967_v48  ;;  %v4044_v57 = vunpack.c.h.bf16 %v3967_v48 }
 0xc0e   :  { %v4715_v34 = vmul.f32 0.796875, %v4635_v49  ;;  %v4525_v61 = vadd.f32 %v4445_v3, %v11655_v6  ;;  %v4526_v44 = vadd.f32 %v4446_v0, %v11657_v11  ;;  %v11712_v25 = vunpack.c.l.bf16 %v3650_v51  ;;  %v5775_v3 = vpop.f32.mrf.mxu2 }
 0xc0f   :  { %v4716_v14 = vmul.f32 0.796875, %v4636_v56  ;;  %v4123_v19 = vmul.f32 %v4043_v38, %v11680_v33  ;;  %v4124_v23 = vmul.f32 %v4044_v57, %v11690_v40  ;;  %v11716_v1 = vunpack.c.h.bf16 %v3650_v51 }
 0xc10   :  { %v4641_v46 = vunpack.c.l.bf16 %v4566_v4  ;;  %v4519_v13 = vadd.f32 %v4439_v59, %v11648_v63  ;;  %v4520_v12 = vadd.f32 %v4440_v52, %v11650_v5  ;;  %v3929_v10 = vmul.f32 0.044677734, %v11712_v25  ;;  %v5716_v52 = vpop.f32.mrf.mxu3 }
 0xc11   :  { %v4167_v31 = vpack.c.bf16 %v4124_v23, %v4123_v19  ;;  %v3930_v16 = vmul.f32 0.044677734, %v11716_v1  ;;  %v3432_v32 = vadd.f32 %v3431_v43, %v12481_v8  ;;  %v3491_v41 = vadd.f32 %v3490_v21, %v12482_v22 }
 0xc12   :  { %v11724_v26 = vmul.f32 0.796875, %v4632_v55  ;;  %v11726_v17 = vpack.c.bf16 %v4718_v27, %v4717_v45  ;;  %v4642_v58 = vunpack.c.h.bf16 %v4566_v4  ;;  %v4568_v49 = vpack.c.bf16 %v4526_v44, %v4525_v61 }
 0xc13   :  { %v4243_v48 = vunpack.c.l.bf16 %v4167_v31  ;;  %v4244_v56 = vunpack.c.h.bf16 %v4167_v31  ;;  %v3970_v51 = vpack.c.bf16 %v3930_v16, %v3929_v10  ;;  %v3649_v59 = vpack.c.bf16 %v3491_v41, %v3432_v32 }
 0xc14   :  { %v11728_v0 = vpack.c.bf16 %v4716_v14, %v4715_v34  ;;  %v11730_v38 = vmul.f32 0.796875, %v4641_v46  ;;  %v11732_v8 = vpack.c.bf16 %v4520_v12, %v4519_v13  ;;  %v5776_v22 = vadd.f32 %v5775_v3, %v5716_v52 }
 0xc15   :  { %v4323_v55 = vmul.f32 %v4243_v48, %v11680_v33  ;;  %v4324_v43 = vmul.f32 %v4244_v56, %v11690_v40  ;;  %v4049_v4 = vunpack.c.l.bf16 %v3970_v51  ;;  %v4050_v21 = vunpack.c.h.bf16 %v3970_v51  ;;  %v5836_v48 = vpop.f32.mrf.mxu0 }
 0xc16   :  { %v4645_v45 = vunpack.c.l.bf16 %v4568_v49  ;;  %v11736_v27 = vunpack.c.l.bf16 %v3649_v59  ;;  %v11738_v57 = vunpack.c.h.bf16 %v3649_v59  ;;  %v5835_v61 = vadd.f32 %v5834_v39, %v5776_v22  ;;  %v5777_v22 = vpop.f32.mrf.mxu2 }
 0xc17   :  { %v4722_v44 = vmul.f32 0.796875, %v4642_v58  ;;  %v4367_v34 = vpack.c.bf16 %v4324_v43, %v4323_v55  ;;  %v4129_v14 = vmul.f32 %v4049_v4, %v11712_v25  ;;  %v4130_v19 = vmul.f32 %v4050_v21, %v11716_v1 }
 0xc18   :  { %v4639_v23 = vunpack.c.l.bf16 %v11732_v8  ;;  %v3927_v46 = vmul.f32 0.044677734, %v11736_v27  ;;  %v3928_v13 = vmul.f32 0.044677734, %v11738_v57  ;;  %v11745_v12 = vadd.f32 %v5893_v18, %v5835_v61  ;;  %v5718_v18 = vpop.f32.mrf.mxu3 }
 0xc19   :  { %v4646_v10 = vunpack.c.h.bf16 %v4568_v49  ;;  %v4443_v31 = vunpack.c.l.bf16 %v4367_v34  ;;  %v4444_v16 = vunpack.c.h.bf16 %v4367_v34  ;;  %v4170_v32 = vpack.c.bf16 %v4130_v19, %v4129_v14 }
 0xc1a   :  { %v4640_v39 = vunpack.c.h.bf16 %v11732_v8  ;;  %v4725_v41 = vmul.f32 0.796875, %v4645_v45  ;;  %v3969_v58 = vpack.c.bf16 %v3928_v13, %v3927_v46  ;;  %v4762_v56 = vpack.c.bf16 %v11697_v54, %v11684_v53  ;;  %v5895_v53 = vpop.f32.mrf.mxu1 }
 0xc1b   :  { %v4523_v51 = vadd.f32 %v4443_v31, %v11680_v33  ;;  %v4524_v59 = vadd.f32 %v4444_v16, %v11690_v40  ;;  %v4249_v52 = vunpack.c.l.bf16 %v4170_v32  ;;  %v4250_v3 = vunpack.c.h.bf16 %v4170_v32 }
 0xc1c   :  { %v4047_v49 = vunpack.c.l.bf16 %v3969_v58  ;;  %v4048_v55 = vunpack.c.h.bf16 %v3969_v58  ;;  %v5778_v43 = vadd.f32 %v5777_v22, %v5718_v18  ;;  %v4829_v4 = vunpack.c.l.bf16 %v11586_v15 }
 0xc1d   :  { %v4726_v8 = vmul.f32 0.796875, %v4646_v10  ;;  %v4567_v21 = vpack.c.bf16 %v4524_v59, %v4523_v51  ;;  %v4329_v45 = vmul.f32 %v4249_v52, %v11712_v25  ;;  %v4330_v61 = vmul.f32 %v4250_v3, %v11716_v1 }
 0xc1e   :  { %v4127_v54 = vmul.f32 %v4047_v49, %v11736_v27  ;;  %v4128_v34 = vmul.f32 %v4048_v55, %v11738_v57  ;;  %v5837_v14 = vadd.f32 %v5836_v48, %v5778_v43  ;;  %v4830_v19 = vunpack.c.h.bf16 %v11586_v15  ;;  %v5780_v55 = vpop.f32.mrf.mxu2 }
 0xc1f   :  { %v4370_v46 = vpack.c.bf16 %v4330_v61, %v4329_v45  ;;  %v3789_v13 = vmul.f32 0.5, %v11461_v29  ;;  %v3790_v31 = vmul.f32 0.5, %v11463_v9  ;;  %v4833_v16 = vunpack.c.l.bf16 %v4762_v56  ;;  %v5839_v45 = vpop.f32.mrf.mxu0 }
 0xc20   :  { %v4169_v10 = vpack.c.bf16 %v4128_v34, %v4127_v54  ;;  %v11760_v32 = vadd.f32 %v5895_v53, %v5837_v14  ;;  %v4834_v58 = vunpack.c.h.bf16 %v4762_v56  ;;  %7996 = vtanh.f32 %v4829_v4  ;;  %v5721_v49 = vpop.f32.mrf.mxu3 }
 0xc21   :  { %v4449_v51 = vunpack.c.l.bf16 %v4370_v46  ;;  %v4450_v59 = vunpack.c.h.bf16 %v4370_v46  ;;  %v3793_v52 = vmul.f32 0.5, %v11530_v50  ;;  %v3794_v3 = vmul.f32 0.5, %v11532_v7 }
 0xc22   :  { %v4643_v48 = vunpack.c.l.bf16 %v4567_v21  ;;  %v4247_v18 = vunpack.c.l.bf16 %v4169_v10  ;;  %v4248_v15 = vunpack.c.h.bf16 %v4169_v10  ;;  %7998 = vtanh.f32 %v4830_v19  ;;  %v5898_v46 = vpop.f32.mrf.mxu1 }
 0xc23   :  { %v4644_v22 = vunpack.c.h.bf16 %v4567_v21  ;;  %v4529_v29 = vadd.f32 %v4449_v51, %v11712_v25  ;;  %v4530_v9 = vadd.f32 %v4450_v59, %v11716_v1  ;;  %8000 = vtanh.f32 %v4833_v16 }
 0xc24   :  { %v11767_v56 = vpack.c.bf16 %v4722_v44, %v11730_v38  ;;  %v4327_v43 = vmul.f32 %v4247_v18, %v11736_v27  ;;  %v4328_v50 = vmul.f32 %v4248_v15, %v11738_v57  ;;  %8002 = vtanh.f32 %v4834_v58 }
 0xc25   :  { %v11771_v7 = vmul.f32 0.796875, %v4639_v23  ;;  %v11773_v4 = vmul.f32 0.796875, %v4640_v39  ;;  %v4570_v21 = vpack.c.bf16 %v4530_v9, %v4529_v29  ;;  %v5781_v61 = vadd.f32 %v5780_v55, %v5721_v49 }
 0xc26   :  { %v7997_v53 = vpop.eup %7996  ;;  %v11775_v54 = vpack.c.bf16 %v4726_v8, %v4725_v41  ;;  %v4369_v34 = vpack.c.bf16 %v4328_v50, %v4327_v43  ;;  %v11777_v14 = vpack.c.bf16 %v3790_v31, %v3789_v13  ;;  %v11779_v38 = vpack.c.bf16 %v3794_v3, %v3793_v52  ;;  %v5782_v43 = vpop.f32.mrf.mxu2 }
 0xc27   :  { %v4723_v44 = vmul.f32 0.796875, %v4643_v48  ;;  %v4724_v19 = vmul.f32 0.796875, %v4644_v22  ;;  %v5840_v16 = vadd.f32 %v5839_v45, %v5781_v61  ;;  %v3787_v23 = vmul.f32 0.5, %v11523_v35 }
 0xc28   :  { %v7999_v10 = vpop.eup %7998  ;;  %v4447_v39 = vunpack.c.l.bf16 %v4369_v34  ;;  %v4448_v58 = vunpack.c.h.bf16 %v4369_v34  ;;  %v3788_v51 = vmul.f32 0.5, %v11525_v30  ;;  %v4761_v41 = vpack.c.bf16 %v11724_v26, %v11708_v2  ;;  %v5723_v55 = vpop.f32.mrf.mxu3 }
 0xc29   :  { %v8001_v8 = vpop.eup %8000  ;;  %v4649_v59 = vunpack.c.l.bf16 %v4570_v21  ;;  %v4650_v13 = vunpack.c.h.bf16 %v4570_v21  ;;  %v4960_v31 = vpack.c.bf16 %v7999_v10, %v7997_v53  ;;  %v11785_v52 = vadd.f32 %v5898_v46, %v5840_v16 }
 0xc2a   :  { %v8003_v3 = vpop.eup %8002  ;;  %v4527_v48 = vadd.f32 %v4447_v39, %v11736_v27  ;;  %v4528_v18 = vadd.f32 %v4448_v58, %v11738_v57  ;;  %v4827_v35 = vunpack.c.l.bf16 %v11605_v60  ;;  %v4828_v15 = vunpack.c.h.bf16 %v11605_v60 }
 0xc2b   :  { %v4962_v22 = vpack.c.bf16 %v8003_v3, %v8001_v8  ;;  %v5029_v30 = vunpack.c.l.bf16 %v4960_v31  ;;  %v5030_v29 = vunpack.c.h.bf16 %v4960_v31  ;;  %v3791_v2 = vmul.f32 0.5, %v11534_v37  ;;  %v5841_v37 = vpop.f32.mrf.mxu0  ;;  %v5900_v31 = vpop.f32.mrf.mxu1 }
 0xc2c   :  { %v3792_v26 = vmul.f32 0.5, %v11536_v62  ;;  %v4831_v9 = vunpack.c.l.bf16 %v4761_v41  ;;  %v4832_v49 = vunpack.c.h.bf16 %v4761_v41  ;;  %8004 = vtanh.f32 %v4827_v35 }
 0xc2d   :  { %v5033_v50 = vunpack.c.l.bf16 %v4962_v22  ;;  %v5034_v21 = vunpack.c.h.bf16 %v4962_v22  ;;  %v5109_v45 = vadd.f32 1.0, %v5029_v30  ;;  %v5110_v61 = vadd.f32 1.0, %v5030_v29 }
 0xc2e   :  { %v4729_v53 = vmul.f32 0.796875, %v4649_v59  ;;  %v4730_v34 = vmul.f32 0.796875, %v4650_v13  ;;  %v11793_v46 = vpack.c.bf16 %v4528_v18, %v4527_v48  ;;  %8006 = vtanh.f32 %v4828_v15 }
 0xc2f   :  { %v5113_v60 = vadd.f32 1.0, %v5033_v50  ;;  %v5114_v16 = vadd.f32 1.0, %v5034_v21  ;;  %v5160_v10 = vpack.c.bf16 %v5110_v61, %v5109_v45  ;;  %8008 = vtanh.f32 %v4831_v9 }
 0xc30   :  { %v11795_v62 = vpack.c.bf16 %v4724_v19, %v4723_v44  ;;  %v5229_v39 = vunpack.c.l.bf16 %v11777_v14  ;;  %v5233_v58 = vunpack.c.l.bf16 %v11779_v38  ;;  %8010 = vtanh.f32 %v4832_v49 }
 0xc31   :  { %v5162_v41 = vpack.c.bf16 %v5114_v16, %v5113_v60  ;;  %v5309_v8 = vunpack.c.l.bf16 %v5160_v10  ;;  %v5230_v59 = vunpack.c.h.bf16 %v11777_v14  ;;  %v5310_v13 = vunpack.c.h.bf16 %v5160_v10 }
 0xc32   :  { %v8005_v3 = vpop.eup %8004  ;;  %v5234_v48 = vunpack.c.h.bf16 %v11779_v38  ;;  %v11801_v18 = vpack.c.bf16 %v3788_v51, %v3787_v23  ;;  %v11803_v35 = vpack.c.bf16 %v3792_v26, %v3791_v2  ;;  %v5783_v44 = vadd.f32 %v5782_v43, %v5723_v55 }
 0xc33   :  { %v11805_v19 = vpack.c.bf16 %v4730_v34, %v4729_v53  ;;  %v4647_v15 = vunpack.c.l.bf16 %v11793_v46  ;;  %v5313_v22 = vunpack.c.l.bf16 %v5162_v41  ;;  %v5314_v30 = vunpack.c.h.bf16 %v5162_v41  ;;  %v5726_v53 = vpop.f32.mrf.mxu3  ;;  %v5785_v34 = vpop.f32.mrf.mxu2 }
 0xc34   :  { %v8007_v29 = vpop.eup %8006  ;;  %v4648_v9 = vunpack.c.h.bf16 %v11793_v46  ;;  %v5389_v14 = vmul.f32 %v5309_v8, %v5229_v39  ;;  %v5390_v49 = vmul.f32 %v5310_v13, %v5230_v59  ;;  %v5842_v50 = vadd.f32 %v5841_v37, %v5783_v44  ;;  %v7392_v13 = vld [vmem:[%s12220_s12 + $0xf0] sm:$0xf] }
 0xc35   :  { %v8009_v21 = vpop.eup %8008  ;;  %v5393_v45 = vmul.f32 %v5313_v22, %v5233_v58  ;;  %v5394_v38 = vmul.f32 %v5314_v30, %v5234_v48  ;;  %v4959_v23 = vpack.c.bf16 %v8007_v29, %v8005_v3  ;;  %v4837_v51 = vunpack.c.l.bf16 %v11726_v17  ;;  %v7384_v48 = vld [vmem:[%s12220_s12 + $0xe0] sm:$0xf]  ;;  %v5903_v30 = vpop.f32.mrf.mxu1  ;;  %v7360_v46 = vld [vmem:[%s12220_s12 + $0xb0] sm:$0xf] }
 0xc36   :  { %v8011_v2 = vpop.eup %8010  ;;  %v11810_v26 = vadd.f32 %v5900_v31, %v5842_v50  ;;  %v3797_v55 = vmul.f32 0.5, %v11552_v36  ;;  %v4838_v43 = vunpack.c.h.bf16 %v11726_v17  ;;  %v4841_v61 = vunpack.c.l.bf16 %v11767_v56  ;;  %v5844_v17 = vpop.f32.mrf.mxu0  ;;  %v7685_v31 = vld [vmem:[%s12220_s12 + $0xf4] sm:$0xf0] }
 0xc37   :  { %v5441_v60 = vpack.c.bf16 %v5393_v45, %v5389_v14  ;;  %v5442_v16 = vpack.c.bf16 %v5394_v38, %v5390_v49  ;;  %v4961_v10 = vpack.c.bf16 %v8011_v2, %v8009_v21  ;;  %v5027_v37 = vunpack.c.l.bf16 %v4959_v23  ;;  %v7683_v14 = vld [vmem:[%s12220_s12 + $0xe4] sm:$0xf0] }
 0xc38   :  { %v5028_v39 = vunpack.c.h.bf16 %v4959_v23  ;;  %v3798_v58 = vmul.f32 0.5, %v11554_v28  ;;  %v4842_v41 = vunpack.c.h.bf16 %v11767_v56  ;;  %8012 = vtanh.f32 %v4837_v51 }
 0xc39   :  { %5868 = vmatmul.bf16.gmra.mxu0 %v5441_v60  ;;  %5927 = vmatmul.bf16.gmra.mxu1 %v5442_v16  ;;  %v5031_v8 = vunpack.c.l.bf16 %v4961_v10  ;;  %v5032_v36 = vunpack.c.h.bf16 %v4961_v10  ;;  %v5107_v59 = vadd.f32 1.0, %v5027_v37  ;;  %8014 = vtanh.f32 %v4838_v43 }
 0xc3a   :  { %v5108_v3 = vadd.f32 1.0, %v5028_v39  ;;  %v5227_v28 = vunpack.c.l.bf16 %v11801_v18  ;;  %v3801_v56 = vmul.f32 0.5, %v11635_v47  ;;  %8016 = vtanh.f32 %v4841_v61 }
 0xc3b   :  { %v5111_v44 = vadd.f32 1.0, %v5031_v8  ;;  %v5112_v22 = vadd.f32 1.0, %v5032_v36  ;;  %v3802_v29 = vmul.f32 0.5, %v11637_v20  ;;  %8018 = vtanh.f32 %v4842_v41  ;;  %v5728_v41 = vpop.f32.mrf.mxu3  ;;  %v5787_v8 = vpop.f32.mrf.mxu2 }
 0xc3c   :  { %v5159_v49 = vpack.c.bf16 %v5108_v3, %v5107_v59  ;;  %v11832_v50 = vpack.c.bf16 %v3798_v58, %v3797_v55  ;;  %v7393_v21 = vor.u32 %v7685_v31, %v7392_v13  ;;  %v5786_v47 = vadd.f32 %v5785_v34, %v5726_v53 }
 0xc3d   :  { %v5161_v45 = vpack.c.bf16 %v5112_v22, %v5111_v44  ;;  %v5231_v38 = vunpack.c.l.bf16 %v11803_v35  ;;  %v5228_v23 = vunpack.c.h.bf16 %v11801_v18  ;;  %v5232_v51 = vunpack.c.h.bf16 %v11803_v35 }
 0xc3e   :  { %v8013_v2 = vpop.eup %8012  ;;  %v5307_v43 = vunpack.c.l.bf16 %v5159_v49  ;;  %v5308_v20 = vunpack.c.h.bf16 %v5159_v49  ;;  %6269 = vmatpush.bf16.msrb.mxu0 %v7393_v21  ;;  %v5845_v61 = vadd.f32 %v5844_v17, %v5786_v47  ;;  %v7385_v60 = vor.u32 %v7683_v14, %v7384_v48  ;;  %v7376_v47 = vld [vmem:[%s12220_s12 + $0xd0] sm:$0xf] }
 0xc3f   :  { %v8015_v16 = vpop.eup %8014  ;;  %v5311_v10 = vunpack.c.l.bf16 %v5161_v45  ;;  %v5312_v37 = vunpack.c.h.bf16 %v5161_v45  ;;  %v11837_v55 = vpack.c.bf16 %v3802_v29, %v3801_v56  ;;  %v4765_v53 = vpack.c.bf16 %v11773_v4, %v11771_v7  ;;  %v7681_v45 = vld [vmem:[%s12220_s12 + $0xd4] sm:$0xf0] }
 0xc40   :  { %v8017_v34 = vpop.eup %8016  ;;  %v5387_v39 = vmul.f32 %v5307_v43, %v5227_v28  ;;  %v4964_v58 = vpack.c.bf16 %v8015_v16, %v8013_v2  ;;  %v5237_v18 = vunpack.c.l.bf16 %v11832_v50  ;;  %v11842_v35 = vadd.f32 %v5903_v30, %v5845_v61  ;;  %v5846_v30 = vpop.f32.mrf.mxu0  ;;  %v7368_v61 = vld [vmem:[%s12220_s12 + $0xc0] sm:$0xf] }
 0xc41   :  { %v8019_v36 = vpop.eup %8018  ;;  %v5391_v59 = vmul.f32 %v5311_v10, %v5231_v38  ;;  %v5388_v17 = vmul.f32 %v5308_v20, %v5228_v23  ;;  %v5392_v13 = vmul.f32 %v5312_v37, %v5232_v51  ;;  %v4835_v31 = vunpack.c.l.bf16 %v11728_v0  ;;  %v5905_v51 = vpop.f32.mrf.mxu1 }
 0xc42   :  { %v4966_v3 = vpack.c.bf16 %v8019_v36, %v8017_v34  ;;  %v5037_v56 = vunpack.c.l.bf16 %v4964_v58  ;;  %v5038_v48 = vunpack.c.h.bf16 %v4964_v58  ;;  %6270 = vmatpush.bf16.msrb.mxu0 %v7385_v60  ;;  %v4836_v7 = vunpack.c.h.bf16 %v11728_v0  ;;  %v7679_v60 = vld [vmem:[%s12220_s12 + $0xc4] sm:$0xf0] }
 0xc43   :  { %v5439_v4 = vpack.c.bf16 %v5391_v59, %v5387_v39  ;;  %v5440_v28 = vpack.c.bf16 %v5392_v13, %v5388_v17  ;;  %v4839_v44 = vunpack.c.l.bf16 %v4765_v53  ;;  %v4840_v22 = vunpack.c.h.bf16 %v4765_v53 }
 0xc44   :  { %v5041_v29 = vunpack.c.l.bf16 %v4966_v3  ;;  %v5042_v14 = vunpack.c.h.bf16 %v4966_v3  ;;  %v5117_v49 = vadd.f32 1.0, %v5037_v56  ;;  %v5118_v21 = vadd.f32 1.0, %v5038_v48 }
 0xc45   :  { %5750 = vmatmul.bf16.gmra.mxu3 %v5439_v4  ;;  %5809 = vmatmul.bf16.gmra.mxu2 %v5440_v28  ;;  %v3795_v0 = vmul.f32 0.5, %v11626_v24  ;;  %v3796_v38 = vmul.f32 0.5, %v11628_v42  ;;  %v3799_v23 = vmul.f32 0.5, %v11648_v63  ;;  %8020 = vtanh.f32 %v4835_v31  ;;  %v5790_v31 = vpop.f32.mrf.mxu2 }
 0xc46   :  { %v5121_v2 = vadd.f32 1.0, %v5041_v29  ;;  %v5122_v43 = vadd.f32 1.0, %v5042_v14  ;;  %v5164_v20 = vpack.c.bf16 %v5118_v21, %v5117_v49  ;;  %8022 = vtanh.f32 %v4836_v7 }
 0xc47   :  { %v3800_v24 = vmul.f32 0.5, %v11650_v5  ;;  %8024 = vtanh.f32 %v4839_v44  ;;  %v7377_v42 = vor.u32 %v7681_v45, %v7376_v47  ;;  %v5788_v16 = vadd.f32 %v5787_v8, %v5728_v41  ;;  %v5731_v5 = vpop.f32.mrf.mxu3 }
 0xc48   :  { %v5166_v63 = vpack.c.bf16 %v5122_v43, %v5121_v2  ;;  %v5317_v10 = vunpack.c.l.bf16 %v5164_v20  ;;  %v5318_v37 = vunpack.c.h.bf16 %v5164_v20  ;;  %8026 = vtanh.f32 %v4840_v22  ;;  %v5849_v29 = vpop.f32.mrf.mxu0 }
 0xc49   :  { %v5241_v53 = vunpack.c.l.bf16 %v11837_v55  ;;  %v5238_v34 = vunpack.c.h.bf16 %v11832_v50  ;;  %6271 = vmatpush.bf16.msrb.mxu0 %v7377_v42  ;;  %v5847_v39 = vadd.f32 %v5846_v30, %v5788_v16  ;;  %v7369_v58 = vor.u32 %v7679_v60, %v7368_v61  ;;  %v7352_v60 = vld [vmem:[%s12220_s12 + $0xa0] sm:$0xf] }
 0xc4a   :  { %v5321_v36 = vunpack.c.l.bf16 %v5166_v63  ;;  %v5242_v59 = vunpack.c.h.bf16 %v11837_v55  ;;  %v5322_v17 = vunpack.c.h.bf16 %v5166_v63  ;;  %v11865_v13 = vpack.c.bf16 %v3796_v38, %v3795_v0 }
 0xc4b   :  { %v8021_v41 = vpop.eup %8020  ;;  %v5397_v8 = vmul.f32 %v5317_v10, %v5237_v18  ;;  %v5398_v3 = vmul.f32 %v5318_v37, %v5238_v34  ;;  %v11867_v56 = vpack.c.bf16 %v3800_v24, %v3799_v23  ;;  %v11869_v48 = vadd.f32 %v5905_v51, %v5847_v39  ;;  %v5908_v23 = vpop.f32.mrf.mxu1  ;;  %v7675_v24 = vld [vmem:[%s12220_s12 + $0xa4] sm:$0xf0] }
 0xc4c   :  { %v8023_v7 = vpop.eup %8022  ;;  %v5401_v50 = vmul.f32 %v5321_v36, %v5241_v53  ;;  %v5402_v4 = vmul.f32 %v5322_v17, %v5242_v59  ;;  %v4845_v28 = vunpack.c.l.bf16 %v11775_v54  ;;  %v4846_v44 = vunpack.c.h.bf16 %v11775_v54 }
 0xc4d   :  { %v8025_v55 = vpop.eup %8024  ;;  %v4727_v22 = vmul.f32 0.796875, %v4647_v15  ;;  %v4728_v30 = vmul.f32 0.796875, %v4648_v9  ;;  %v4963_v18 = vpack.c.bf16 %v8023_v7, %v8021_v41  ;;  %6272 = vmatpush.bf16.msrb.mxu0 %v7369_v58  ;;  %v4849_v14 = vunpack.c.l.bf16 %v11805_v19  ;;  %v7677_v15 = vld [vmem:[%s12220_s12 + $0xb4] sm:$0xf0]  ;;  %v5792_v41 = vpop.f32.mrf.mxu2 }
 0xc4e   :  { %v8027_v49 = vpop.eup %8026  ;;  %v5445_v21 = vpack.c.bf16 %v5401_v50, %v5397_v8  ;;  %v5446_v47 = vpack.c.bf16 %v5402_v4, %v5398_v3  ;;  %v4850_v45 = vunpack.c.h.bf16 %v11805_v19  ;;  %8028 = vtanh.f32 %v4845_v28 }
 0xc4f   :  { %v4965_v0 = vpack.c.bf16 %v8027_v49, %v8025_v55  ;;  %v5035_v54 = vunpack.c.l.bf16 %v4963_v18  ;;  %v5036_v38 = vunpack.c.h.bf16 %v4963_v18  ;;  %8030 = vtanh.f32 %v4846_v44  ;;  %v5733_v17 = vpop.f32.mrf.mxu3 }
 0xc50   :  { %5873 = vmatmul.bf16.gmra.mxu0 %v5445_v21  ;;  %5932 = vmatmul.bf16.gmra.mxu1 %v5446_v47  ;;  %v5235_v9 = vunpack.c.l.bf16 %v11865_v13  ;;  %v5239_v19 = vunpack.c.l.bf16 %v11867_v56  ;;  %v3805_v51 = vmul.f32 0.5, %v11655_v6  ;;  %8032 = vtanh.f32 %v4849_v14  ;;  %v5851_v18 = vpop.f32.mrf.mxu0 }
 0xc51   :  { %v5039_v2 = vunpack.c.l.bf16 %v4965_v0  ;;  %v5040_v43 = vunpack.c.h.bf16 %v4965_v0  ;;  %v5115_v20 = vadd.f32 1.0, %v5035_v54  ;;  %v5116_v61 = vadd.f32 1.0, %v5036_v38 }
 0xc52   :  { %v3806_v42 = vmul.f32 0.5, %v11657_v11  ;;  %8034 = vtanh.f32 %v4850_v45  ;;  %v7361_v16 = vor.u32 %v7677_v15, %v7360_v46  ;;  %v5791_v63 = vadd.f32 %v5790_v31, %v5731_v5 }
 0xc53   :  { %v5119_v10 = vadd.f32 1.0, %v5039_v2  ;;  %v5120_v6 = vadd.f32 1.0, %v5040_v43  ;;  %v5163_v37 = vpack.c.bf16 %v5116_v61, %v5115_v20  ;;  %v5236_v53 = vunpack.c.h.bf16 %v11865_v13  ;;  %v5910_v0 = vpop.f32.mrf.mxu1 }
 0xc54   :  { %v8029_v34 = vpop.eup %8028  ;;  %v5240_v39 = vunpack.c.h.bf16 %v11867_v56  ;;  %v3809_v58 = vmul.f32 0.5, %v11712_v25  ;;  %6273 = vmatpush.bf16.msrb.mxu0 %v7361_v16  ;;  %v5850_v36 = vadd.f32 %v5849_v29, %v5791_v63  ;;  %v7353_v59 = vor.u32 %v7675_v24, %v7352_v60  ;;  %v7336_v63 = vld [vmem:[%s12220_s12 + $0x80] sm:$0xf] }
 0xc55   :  { %v8031_v8 = vpop.eup %8030  ;;  %v5165_v11 = vpack.c.bf16 %v5120_v6, %v5119_v10  ;;  %v5315_v3 = vunpack.c.l.bf16 %v5163_v37  ;;  %v5316_v7 = vunpack.c.h.bf16 %v5163_v37  ;;  %v4769_v5 = vpack.c.bf16 %v4728_v30, %v4727_v22  ;;  %v5795_v24 = vpop.f32.mrf.mxu2  ;;  %v7671_v10 = vld [vmem:[%s12220_s12 + $0x84] sm:$0xf0] }
 0xc56   :  { %v8033_v31 = vpop.eup %8032  ;;  %v3810_v50 = vmul.f32 0.5, %v11716_v1  ;;  %v3848_v4 = vpack.c.bf16 %v3806_v42, %v3805_v51  ;;  %v4968_v13 = vpack.c.bf16 %v8031_v8, %v8029_v34  ;;  %v11899_v28 = vadd.f32 %v5908_v23, %v5850_v36 }
 0xc57   :  { %v5319_v56 = vunpack.c.l.bf16 %v5165_v11  ;;  %v5395_v44 = vmul.f32 %v5315_v3, %v5235_v9  ;;  %v5320_v25 = vunpack.c.h.bf16 %v5165_v11  ;;  %v5396_v55 = vmul.f32 %v5316_v7, %v5236_v53  ;;  %v5736_v60 = vpop.f32.mrf.mxu3 }
 0xc58   :  { %v8035_v29 = vpop.eup %8034  ;;  %v5045_v14 = vunpack.c.l.bf16 %v4968_v13  ;;  %v5046_v49 = vunpack.c.h.bf16 %v4968_v13  ;;  %6274 = vmatpush.bf16.msrb.mxu0 %v7353_v59  ;;  %v4843_v21 = vunpack.c.l.bf16 %v11795_v62  ;;  %v4844_v22 = vunpack.c.h.bf16 %v11795_v62  ;;  %v7344_v62 = vld [vmem:[%s12220_s12 + $0x90] sm:$0xf] }
 0xc59   :  { %v5399_v30 = vmul.f32 %v5319_v56, %v5239_v19  ;;  %v5400_v47 = vmul.f32 %v5320_v25, %v5240_v39  ;;  %v4970_v1 = vpack.c.bf16 %v8035_v29, %v8033_v31  ;;  %v4847_v45 = vunpack.c.l.bf16 %v4769_v5  ;;  %v7673_v19 = vld [vmem:[%s12220_s12 + $0x94] sm:$0xf0]  ;;  %v5854_v31 = vpop.f32.mrf.mxu0 }
 0xc5a   :  { %v5125_v54 = vadd.f32 1.0, %v5045_v14  ;;  %v5126_v38 = vadd.f32 1.0, %v5046_v49  ;;  %v4848_v23 = vunpack.c.h.bf16 %v4769_v5  ;;  %8036 = vtanh.f32 %v4843_v21 }
 0xc5b   :  { %v5443_v46 = vpack.c.bf16 %v5399_v30, %v5395_v44  ;;  %v5444_v15 = vpack.c.bf16 %v5400_v47, %v5396_v55  ;;  %v5049_v9 = vunpack.c.l.bf16 %v4970_v1  ;;  %v5050_v51 = vunpack.c.h.bf16 %v4970_v1 }
 0xc5c   :  { %v3850_v2 = vpack.c.bf16 %v3810_v50, %v3809_v58  ;;  %v5168_v43 = vpack.c.bf16 %v5126_v38, %v5125_v54  ;;  %8038 = vtanh.f32 %v4844_v22  ;;  %v5245_v37 = vunpack.c.l.bf16 %v3848_v4 }
 0xc5d   :  { %5755 = vmatmul.bf16.gmra.mxu3 %v5443_v46  ;;  %5814 = vmatmul.bf16.gmra.mxu2 %v5444_v15  ;;  %v5129_v20 = vadd.f32 1.0, %v5049_v9  ;;  %v5130_v61 = vadd.f32 1.0, %v5050_v51  ;;  %8040 = vtanh.f32 %v4847_v45  ;;  %v7345_v53 = vor.u32 %v7673_v19, %v7344_v62 }
 0xc5e   :  { %v5325_v42 = vunpack.c.l.bf16 %v5168_v43  ;;  %v5326_v16 = vunpack.c.h.bf16 %v5168_v43  ;;  %8042 = vtanh.f32 %v4848_v23  ;;  %v5793_v34 = vadd.f32 %v5792_v41, %v5733_v17 }
 0xc5f   :  { %v5170_v6 = vpack.c.bf16 %v5130_v61, %v5129_v20  ;;  %v5249_v58 = vunpack.c.l.bf16 %v3850_v2  ;;  %v5246_v36 = vunpack.c.h.bf16 %v3848_v4  ;;  %v5250_v59 = vunpack.c.h.bf16 %v3850_v2  ;;  %6275 = vmatpush.bf16.msrb.mxu0 %v7345_v53  ;;  %v5913_v4 = vpop.f32.mrf.mxu1  ;;  %v12492_v53 = vld [vmem:[#allocation9_spill] sm:$0xff] }
 0xc60   :  { %v8037_v39 = vpop.eup %8036  ;;  %v5796_v8 = vadd.f32 %v5795_v24, %v5736_v60  ;;  %v5852_v7 = vadd.f32 %v5851_v18, %v5793_v34  ;;  %v7337_v5 = vor.u32 %v7671_v10, %v7336_v63  ;;  %v5405_v13 = vmul.f32 %v5325_v42, %v5245_v37 }
 0xc61   :  { %v5329_v11 = vunpack.c.l.bf16 %v5170_v6  ;;  %v5330_v3 = vunpack.c.h.bf16 %v5170_v6  ;;  %v5406_v56 = vmul.f32 %v5326_v16, %v5246_v36  ;;  %v3803_v44 = vmul.f32 0.5, %v11680_v33  ;;  %v5738_v36 = vpop.f32.mrf.mxu3 }
 0xc62   :  { %v8039_v50 = vpop.eup %8038  ;;  %v5855_v25 = vadd.f32 %v5854_v31, %v5796_v8  ;;  %v11916_v14 = vadd.f32 %v5910_v0, %v5852_v7  ;;  %v3804_v21 = vmul.f32 0.5, %v11690_v40  ;;  %v3807_v18 = vmul.f32 0.5, %v11736_v27 }
 0xc63   :  { %v8041_v55 = vpop.eup %8040  ;;  %v5409_v29 = vmul.f32 %v5329_v11, %v5249_v58  ;;  %v5410_v17 = vmul.f32 %v5330_v3, %v5250_v59  ;;  %v4967_v41 = vpack.c.bf16 %v8039_v50, %v8037_v39  ;;  %v3808_v22 = vmul.f32 0.5, %v11738_v57  ;;  %6276 = vmatpush.bf16.msrb.mxu0 %v7337_v5  ;;  %v5856_v39 = vpop.f32.mrf.mxu0 }
 0xc64   :  { %v8043_v49 = vpop.eup %8042  ;;  %v11921_v30 = vadd.f32 %v5913_v4, %v5855_v25  ;;  %v3847_v46 = vpack.c.bf16 %v3804_v21, %v3803_v44  ;;  %v11925_v34 = vpack.c.bf16 %v12492_v53, %v12492_v53  ;;  %v5797_v59 = vpop.f32.mrf.mxu2 }
 0xc65   :  { %v5449_v47 = vpack.c.bf16 %v5409_v29, %v5405_v13  ;;  %v5450_v1 = vpack.c.bf16 %v5410_v17, %v5406_v56  ;;  %v4969_v33 = vpack.c.bf16 %v8043_v49, %v8041_v55  ;;  %v5043_v45 = vunpack.c.l.bf16 %v4967_v41 }
 0xc66   :  { %v5044_v54 = vunpack.c.h.bf16 %v4967_v41  ;;  %v3849_v15 = vpack.c.bf16 %v3808_v22, %v3807_v18  ;;  %v5243_v2 = vunpack.c.l.bf16 %v3847_v46  ;;  %v5244_v61 = vunpack.c.h.bf16 %v3847_v46 }
 0xc67   :  { %5878 = vmatmul.bf16.gmra.mxu0 %v5449_v47  ;;  %5937 = vmatmul.bf16.gmra.mxu1 %v5450_v1  ;;  %v5047_v0 = vunpack.c.l.bf16 %v4969_v33  ;;  %v5048_v38 = vunpack.c.h.bf16 %v4969_v33  ;;  %v5123_v23 = vadd.f32 1.0, %v5043_v45  ;;  %v5915_v8 = vpop.f32.mrf.mxu1 }
 0xc68   :  { %v5124_v40 = vadd.f32 1.0, %v5044_v54  ;;  %v5247_v43 = vunpack.c.l.bf16 %v3849_v15  ;;  %v5248_v60 = vunpack.c.h.bf16 %v3849_v15 }
 0xc69   :  { %v5127_v9 = vadd.f32 1.0, %v5047_v0  ;;  %v5128_v27 = vadd.f32 1.0, %v5048_v38  ;;  %v5741_v3 = vpop.f32.mrf.mxu3 }
 0xc6a   :  { %v5167_v51 = vpack.c.bf16 %v5124_v40, %v5123_v23 }
 0xc6b   :  { %v5169_v57 = vpack.c.bf16 %v5128_v27, %v5127_v9  ;;  %v5859_v58 = vpop.f32.mrf.mxu0 }
 0xc6c   :  { %v5323_v62 = vunpack.c.l.bf16 %v5167_v51  ;;  %v5324_v19 = vunpack.c.h.bf16 %v5167_v51  ;;  %v5800_v7 = vpop.f32.mrf.mxu2 }
 0xc6d   :  { %v5327_v20 = vunpack.c.l.bf16 %v5169_v57  ;;  %v5328_v24 = vunpack.c.h.bf16 %v5169_v57  ;;  %v5801_v9 = vadd.f32 %v5800_v7, %v5741_v3 }
 0xc6e   :  { %v5403_v42 = vmul.f32 %v5323_v62, %v5243_v2  ;;  %v5404_v63 = vmul.f32 %v5324_v19, %v5244_v61  ;;  %v11933_v61 = vld [vmem:[%s12218_s10] sm:$0xff] }
 0xc6f   :  { %v5407_v16 = vmul.f32 %v5327_v20, %v5247_v43  ;;  %v5408_v10 = vmul.f32 %v5328_v24, %v5248_v60  ;;  %v5918_v5 = vpop.f32.mrf.mxu1  ;;  %v5798_v43 = vadd.f32 %v5797_v59, %v5738_v36  ;;  %v11936_v60 = vperm.slane %v11933_v61, 7  ;;  %v12495_v59 = vld [vmem:[#allocation20_spill] sm:$0xff] }
 0xc70   :  { %v5860_v24 = vadd.f32 %v5859_v58, %v5801_v9 }
 0xc71   :  { %v5447_v6 = vpack.c.bf16 %v5407_v16, %v5403_v42  ;;  %v5448_v37 = vpack.c.bf16 %v5408_v10, %v5404_v63  ;;  %v5743_v50 = vpop.f32.mrf.mxu3  ;;  %v12493_v16 = vld [vmem:[#allocation22_spill] sm:$0xff]  ;;  %v12494_v10 = vld [vmem:[#allocation21_spill] sm:$0xff] }
 0xc72   :  { %v5919_v7 = vadd.f32 %v5918_v5, %v5860_v24 }
 0xc73   :  { %5760 = vmatmul.bf16.gmra.mxu3 %v5447_v6  ;;  %5819 = vmatmul.bf16.gmra.mxu2 %v5448_v37  ;;  %v5861_v11 = vpop.f32.mrf.mxu0  ;;  %v5857_v37 = vadd.f32 %v5856_v39, %v5798_v43 }
 0xc74   :  { %v5802_v13 = vpop.f32.mrf.mxu2 }
 0xc75   :  { %v5803_v46 = vadd.f32 %v5802_v13, %v5743_v50  ;;  %v12496_v50 = vld [vmem:[#allocation19_spill] sm:$0xff]  ;;  %v5916_v58 = vadd.f32 %v5915_v8, %v5857_v37 }
 0xc77   :  { %6277 = vmatmul.bf16.vlgmr.msrb.gmra.mxu0 %v11925_v34  ;;  %v5920_v56 = vpop.f32.mrf.mxu1  ;;  %v5862_v62 = vadd.f32 %v5861_v11, %v5803_v46 }
 0xc79   :  { %v5746_v25 = vpop.f32.mrf.mxu3  ;;  %v5921_v53 = vadd.f32 %v5920_v56, %v5862_v62  ;;  %v12498_v56 = vld [vmem:[#allocation17_spill] sm:$0xff]  ;;  %v12505_v62 = vld [vmem:[#allocation10_spill] sm:$0xff] }
 0xc7b   :  { %v5864_v31 = vpop.f32.mrf.mxu0 }
 0xc7c   :  { %v5805_v55 = vpop.f32.mrf.mxu2 }
 0xc7d   :  { %v5806_v45 = vadd.f32 %v5805_v55, %v5746_v25  ;;  %v12497_v25 = vld [vmem:[#allocation18_spill] sm:$0xff] }
 0xc7e   :  { %v5954_v55 = vadd.f32 %v5921_v53, %v12497_v25 }
 0xc7f   :  { %v5923_v29 = vpop.f32.mrf.mxu1  ;;  %v5865_v27 = vadd.f32 %v5864_v31, %v5806_v45 }
 0xc80   :  { %v5975_v5 = vadd.f32 %v11936_v60, %v5954_v55 }
 0xc81   :  { %v5748_v41 = vpop.f32.mrf.mxu3  ;;  %v5924_v42 = vadd.f32 %v5923_v29, %v5865_v27  ;;  %v5953_v29 = vadd.f32 %v5919_v7, %v12498_v56  ;;  %v12504_v27 = vld [vmem:[#allocation11_spill] sm:$0xff] }
 0xc83   :  { %v5866_v44 = vpop.f32.mrf.mxu0  ;;  %v5955_v13 = vadd.f32 %v5924_v42, %v12496_v50  ;;  %v5974_v8 = vadd.f32 %v11936_v60, %v5953_v29 }
 0xc84   :  { %v5807_v4 = vpop.f32.mrf.mxu2 }
 0xc85   :  { %v5808_v33 = vadd.f32 %v5807_v4, %v5748_v41  ;;  %v5976_v39 = vadd.f32 %v11936_v60, %v5955_v13  ;;  %v12499_v41 = vld [vmem:[#allocation16_spill] sm:$0xff] }
 0xc86   :  { %v5952_v4 = vadd.f32 %v5916_v58, %v12499_v41 }
 0xc87   :  { %v5925_v49 = vpop.f32.mrf.mxu1  ;;  %v5867_v15 = vadd.f32 %v5866_v44, %v5808_v33  ;;  %v12501_v33 = vld [vmem:[#allocation14_spill] sm:$0xff] }
 0xc88   :  { %v5950_v45 = vadd.f32 %v11916_v14, %v12501_v33  ;;  %v12512_v33 = vld [vmem:[#allocation23_spill] sm:$0xff] }
 0xc89   :  { %v5926_v19 = vadd.f32 %v5925_v49, %v5867_v15  ;;  %v12503_v15 = vld [vmem:[#allocation12_spill] sm:$0xff] }
 0xc8b   :  { %v5956_v11 = vadd.f32 %v5926_v19, %v12495_v59 }
 0xc8d   :  { %v5977_v44 = vadd.f32 %v11936_v60, %v5956_v11 }
 0xcb6   :  { %v5869_v17 = vpop.f32.mrf.mxu0  ;;  %v5928_v47 = vpop.f32.mrf.mxu1 }
 0xcbe   :  { %v5871_v21 = vpop.f32.mrf.mxu0  ;;  %v5930_v2 = vpop.f32.mrf.mxu1 }
 0xcc8   :  { %v5751_v18 = vpop.f32.mrf.mxu3  ;;  %v5810_v22 = vpop.f32.mrf.mxu2 }
 0xcc9   :  { %v5811_v1 = vadd.f32 %v5810_v22, %v5751_v18 }
 0xccb   :  { %v5870_v54 = vadd.f32 %v5869_v17, %v5811_v1  ;;  %v5973_v1 = vadd.f32 %v11936_v60, %v5952_v4 }
 0xccd   :  { %v11928_v0 = vpop.f32.mrf.mxu0  ;;  %v5929_v51 = vadd.f32 %v5928_v47, %v5870_v54  ;;  %v5933_v22 = vpop.f32.mrf.mxu1  ;;  %v5984_v54 = vld [vmem:[%s12219_s11] sm:$0xff] }
 0xcce   :  { %5986 = vst [vmem:[#allocation1] ss:$2 sm:$0xff] %v5984_v54 }
 0xccf   :  { %v5957_v6 = vadd.f32 %v5929_v51, %v12494_v10  ;;  %v5947_v51 = vadd.f32 %v11842_v35, %v12504_v27  ;;  %v12508_v10 = vld [vmem:[#allocation7_spill] sm:$0xff]  ;;  %v7668_v27 = vld [vmem:[%s12220_s12 + $0x74] sm:$0xf] }
 0xcd0   :  { %v5753_v38 = vpop.f32.mrf.mxu3  ;;  %v5812_v23 = vpop.f32.mrf.mxu2 }
 0xcd1   :  { %v5813_v40 = vadd.f32 %v5812_v23, %v5753_v38  ;;  %v5978_v31 = vadd.f32 %v11936_v60, %v5957_v6  ;;  %v12502_v23 = vld [vmem:[#allocation13_spill] sm:$0xff]  ;;  %v5943_v6 = vadd.f32 %v11745_v12, %v12508_v10 }
 0xcd2   :  { %v5949_v46 = vadd.f32 %v11899_v28, %v12502_v23  ;;  %v5946_v28 = vadd.f32 %v11810_v26, %v12505_v62 }
 0xcd3   :  { %v5872_v57 = vadd.f32 %v5871_v21, %v5813_v40  ;;  %v12500_v21 = vld [vmem:[#allocation15_spill] sm:$0xff]  ;;  %v5948_v40 = vadd.f32 %v11869_v48, %v12503_v15  ;;  %v12506_v48 = vld [vmem:[#allocation8_spill] sm:$0xff]  ;;  %v7328_v15 = vld [vmem:[%s12220_s12 + $0x70] sm:$0xf] }
 0xcd4   :  { %v5951_v18 = vadd.f32 %v11921_v30, %v12500_v21  ;;  %v5971_v30 = vadd.f32 %v11936_v60, %v5950_v45  ;;  %v5970_v14 = vadd.f32 %v11936_v60, %v5949_v46  ;;  %v5945_v24 = vadd.f32 %v11785_v52, %v12506_v48 }
 0xcd5   :  { %v5931_v20 = vadd.f32 %v5930_v2, %v5872_v57  ;;  %v11942_v3 = vpop.f32.mrf.mxu0  ;;  %v5969_v43 = vadd.f32 %v11936_v60, %v5948_v40  ;;  %v5935_v19 = vpop.f32.mrf.mxu1  ;;  %v5967_v42 = vadd.f32 %v11936_v60, %v5946_v28  ;;  %v5964_v52 = vadd.f32 %v11936_v60, %v5943_v6  ;;  %v5987_v59 = vld.sshfl [vmem:[#allocation1] sm:$0xff pattern:$0x75316420]  ;;  %v7669_v40 = vld [vmem:[%s12220_s12 + $0x74] sm:$0xf0] }
 0xcd6   :  { %v5972_v38 = vadd.f32 %v11936_v60, %v5951_v18  ;;  %v12510_v18 = vld [vmem:[#allocation25_spill] sm:$0xff] }
 0xcd7   :  { %v5958_v63 = vadd.f32 %v5931_v20, %v12493_v16  ;;  %v5968_v20 = vadd.f32 %v11936_v60, %v5947_v51  ;;  %v12507_v16 = vld [vmem:[#allocation6_spill] sm:$0xff]  ;;  %v7296_v6 = vld [vmem:[%s12220_s12 + $0x30] sm:$0xf] }
 0xcd8   :  { %v5944_v35 = vadd.f32 %v11760_v32, %v12507_v16 }
 0xcd9   :  { %v5979_v36 = vadd.f32 %v11936_v60, %v5958_v63  ;;  %v5966_v63 = vadd.f32 %v11936_v60, %v5945_v24 }
 0xcda   :  { %v5965_v37 = vadd.f32 %v11936_v60, %v5944_v35 }
 0xcdb   :  { %5992 = vmatpush.msra.mxu3 %v5979_v36 }
 0xcdd   :  { %5993 = vmatpush.msra.mxu3 %v5978_v31 }
 0xcdf   :  { %5994 = vmatpush.msra.mxu3 %v5977_v44 }
 0xce0   :  { %v5756_v17 = vpop.f32.mrf.mxu3  ;;  %v5815_v49 = vpop.f32.mrf.mxu2 }
 0xce1   :  { %5995 = vmatpush.msra.mxu3 %v5976_v39  ;;  %v5816_v50 = vadd.f32 %v5815_v49, %v5756_v17  ;;  %v12511_v49 = vld [vmem:[#allocation24_spill] sm:$0xff] }
 0xce3   :  { %5996 = vmatpush.msra.mxu3 %v5975_v5  ;;  %v5875_v55 = vadd.f32 %v11928_v0, %v5816_v50 }
 0xce4   :  { %v5879_v47 = vpop.f32.mrf.mxu0  ;;  %v5938_v11 = vpop.f32.mrf.mxu1 }
 0xce5   :  { %5997 = vmatpush.msra.mxu3 %v5974_v8  ;;  %v5934_v4 = vadd.f32 %v5933_v22, %v5875_v55  ;;  %v12509_v8 = vld [vmem:[#allocation26_spill] sm:$0xff]  ;;  %v5988_v22 = vld.sshfl [vmem:[#allocation1 + $0x8] sm:$0xff pattern:$0x75316420] }
 0xce7   :  { %5998 = vmatpush.msra.mxu3 %v5973_v1  ;;  %v5959_v45 = vadd.f32 %v5934_v4, %v12512_v33  ;;  %v7660_v4 = vld [vmem:[%s12220_s12 + $0x34] sm:$0xf]  ;;  %v7290_v33 = vld [vmem:[%s12220_s12 + $0x28] sm:$0xf0] }
 0xce8   :  { %v5758_v9 = vpop.f32.mrf.mxu3  ;;  %v5817_v57 = vpop.f32.mrf.mxu2 }
 0xce9   :  { %5999 = vmatpush.msra.mxu3 %v5972_v38  ;;  %v5818_v32 = vadd.f32 %v5817_v57, %v5758_v9  ;;  %v5980_v54 = vadd.f32 %v11936_v60, %v5959_v45  ;;  %v7329_v9 = vor.u32 %v7669_v40, %v7328_v15  ;;  %v7330_v57 = vld [vmem:[%s12220_s12 + $0x78] sm:$0xf0]  ;;  %v7682_v45 = vld [vmem:[%s12220_s12 + $0xe4] sm:$0xf] }
 0xcea   :  { %v7333_v62 = vor.u32 %v7668_v27, %v7330_v57  ;;  %v7678_v57 = vld [vmem:[%s12220_s12 + $0xc4] sm:$0xf] }
 0xceb   :  { %6000 = vmatpush.msra.mxu3 %v5971_v30  ;;  %v5877_v44 = vadd.f32 %v11942_v3, %v5818_v32  ;;  %6256 = vmatpush.bf16.msra.mxu2 %v7329_v9  ;;  %v7664_v32 = vld [vmem:[%s12220_s12 + $0x54] sm:$0xf] }
 0xcec   :  { %v5881_v2 = vpop.f32.mrf.mxu0  ;;  %v5940_v29 = vpop.f32.mrf.mxu1 }
 0xced   :  { %6001 = vmatpush.msra.mxu3 %v5970_v14  ;;  %v5936_v5 = vadd.f32 %v5935_v19, %v5877_v44  ;;  %v7667_v14 = vld [vmem:[%s12220_s12 + $0x64] sm:$0xf0]  ;;  %v7304_v19 = vld [vmem:[%s12220_s12 + $0x40] sm:$0xf]  ;;  %v7662_v44 = vld [vmem:[%s12220_s12 + $0x44] sm:$0xf] }
 0xcef   :  { %6002 = vmatpush.msra.mxu3 %v5969_v43  ;;  %v7665_v43 = vld [vmem:[%s12220_s12 + $0x54] sm:$0xf0] }
 0xcf1   :  { %6003 = vmatpush.msra.mxu3 %v5968_v20  ;;  %v7663_v20 = vld [vmem:[%s12220_s12 + $0x44] sm:$0xf0] }
 0xcf2   :  { %v7305_v48 = vor.u32 %v7663_v20, %v7304_v19  ;;  %v7676_v20 = vld [vmem:[%s12220_s12 + $0xb4] sm:$0xf] }
 0xcf3   :  { %6004 = vmatpush.msra.mxu3 %v5967_v42  ;;  %v12513_v42 = vld [vmem:[#allocation5_spill] sm:$0xff] }
 0xcf4   :  { %v11982_v26 = vpop.f32.mrf.mxu0 }
 0xcf5   :  { %6005 = vmatpush.msra.mxu3 %v5966_v63 }
 0xcf6   :  { %v5761_v53 = vpop.f32.mrf.mxu3  ;;  %v5820_v36 = vpop.f32.mrf.mxu2 }
 0xcf7   :  { %6006 = vmatpush.msra.mxu3 %v5965_v37  ;;  %v5821_v7 = vadd.f32 %v5820_v36, %v5761_v53  ;;  %v7661_v37 = vld [vmem:[%s12220_s12 + $0x34] sm:$0xf0]  ;;  %v7666_v53 = vld [vmem:[%s12220_s12 + $0x64] sm:$0xf] }
 0xcf8   :  { %v7297_v36 = vor.u32 %v7661_v37, %v7296_v6  ;;  %v7674_v37 = vld [vmem:[%s12220_s12 + $0xa4] sm:$0xf] }
 0xcf9   :  { %6007 = vmatpush.msra.mxu3 %v5964_v52  ;;  %v5880_v13 = vadd.f32 %v5879_v47, %v5821_v7  ;;  %v5960_v47 = vadd.f32 %v5936_v5, %v12511_v49  ;;  %v7322_v52 = vld [vmem:[%s12220_s12 + $0x68] sm:$0xf0]  ;;  %v7272_v5 = vld [vmem:[%s12220_s12] sm:$0xf] }
 0xcfa   :  { %6008 = vmatmul.f32.vlgmr.msra.gmra.mxu3 %v5987_v59  ;;  %v7288_v59 = vld [vmem:[%s12220_s12 + $0x20] sm:$0xf]  ;;  %v7325_v7 = vor.u32 %v7666_v53, %v7322_v52  ;;  %v7691_v52 = vld [vmem:[%s12221_s13 + $0x28] sm:$0xff] }
 0xcfb   :  { %v5939_v39 = vadd.f32 %v5938_v11, %v5880_v13  ;;  %v5981_v0 = vadd.f32 %v11936_v60, %v5960_v47  ;;  %v7659_v11 = vld [vmem:[%s12220_s12 + $0x24] sm:$0xf0] }
 0xcfc   :  { %v6280_v31 = vpop.f32.mrf.mxu0  ;;  %v7289_v50 = vor.u32 %v7659_v11, %v7288_v59  ;;  %v7700_v59 = vld [vmem:[%s12221_s13 + $0x70] sm:$0xff] }
 0xcfd   :  { %v5961_v1 = vadd.f32 %v5939_v39, %v12510_v18  ;;  %v7314_v31 = vld [vmem:[%s12220_s12 + $0x58] sm:$0xf0] }
 0xcfe   :  { %v5763_v12 = vpop.f32.mrf.mxu3  ;;  %v5822_v58 = vpop.f32.mrf.mxu2  ;;  %v7317_v13 = vor.u32 %v7664_v32, %v7314_v31  ;;  %v7394_v18 = vld [vmem:[%s12220_s12 + $0xf8] sm:$0xf0] }
 0xcff   :  { %v5823_v25 = vadd.f32 %v5822_v58, %v5763_v12  ;;  %v5982_v3 = vadd.f32 %v11936_v60, %v5961_v1  ;;  %v7280_v12 = vld [vmem:[%s12220_s12 + $0x10] sm:$0xf]  ;;  %v7657_v58 = vld [vmem:[%s12220_s12 + $0x14] sm:$0xf0] }
 0xd00   :  { %v7281_v39 = vor.u32 %v7657_v58, %v7280_v12  ;;  %v7690_v12 = vld [vmem:[%s12221_s13 + $0x20] sm:$0xff] }
 0xd01   :  { %v5882_v56 = vadd.f32 %v5881_v2, %v5823_v25  ;;  %v7312_v2 = vld [vmem:[%s12220_s12 + $0x50] sm:$0xf]  ;;  %v7306_v25 = vld [vmem:[%s12220_s12 + $0x48] sm:$0xf0] }
 0xd02   :  { %v7313_v28 = vor.u32 %v7665_v43, %v7312_v2  ;;  %v7370_v2 = vld [vmem:[%s12220_s12 + $0xc8] sm:$0xf0]  ;;  %v7693_v43 = vld [vmem:[%s12221_s13 + $0x38] sm:$0xff] }
 0xd03   :  { %v5941_v41 = vadd.f32 %v5940_v29, %v5882_v56  ;;  %v7309_v29 = vor.u32 %v7662_v44, %v7306_v25  ;;  %v7373_v19 = vor.u32 %v7678_v57, %v7370_v2  ;;  %6441 = vmatpush.bf16.msra.mxu0 %v7693_v43  ;;  %v7670_v44 = vld [vmem:[%s12220_s12 + $0x84] sm:$0xf]  ;;  %v7338_v25 = vld [vmem:[%s12220_s12 + $0x88] sm:$0xf0] }
 0xd05   :  { %v5962_v21 = vadd.f32 %v5941_v41, %v12509_v8  ;;  %v7655_v41 = vld [vmem:[%s12220_s12 + $0x4] sm:$0xf0]  ;;  %v7298_v8 = vld [vmem:[%s12220_s12 + $0x38] sm:$0xf0] }
 0xd06   :  { %v7301_v49 = vor.u32 %v7660_v4, %v7298_v8  ;;  %v7686_v4 = vld [vmem:[%s12221_s13] sm:$0xff]  ;;  %v7696_v8 = vld [vmem:[%s12221_s13 + $0x50] sm:$0xff] }
 0xd07   :  { %v5983_v17 = vadd.f32 %v11936_v60, %v5962_v21  ;;  %v7320_v60 = vld [vmem:[%s12220_s12 + $0x60] sm:$0xf]  ;;  %v7684_v21 = vld [vmem:[%s12220_s12 + $0xf4] sm:$0xf] }
 0xd08   :  { %v7321_v51 = vor.u32 %v7667_v14, %v7320_v60  ;;  %v7397_v47 = vor.u32 %v7684_v21, %v7394_v18  ;;  %v7654_v14 = vld [vmem:[%s12220_s12 + $0x4] sm:$0xf]  ;;  %v7695_v21 = vld [vmem:[%s12221_s13 + $0x48] sm:$0xff] }
 0xd09   :  { %6024 = vmatpush.msrb.mxu3 %v5983_v17  ;;  %v7273_v17 = vor.u32 %v7655_v41, %v7272_v5  ;;  %v7687_v5 = vld [vmem:[%s12221_s13 + $0x8] sm:$0xff]  ;;  %v7698_v41 = vld [vmem:[%s12221_s13 + $0x60] sm:$0xff] }
 0xd0a   :  { %6257 = vmatpush.bf16.msra.mxu2 %v7321_v51  ;;  %v7274_v51 = vld [vmem:[%s12220_s12 + $0x8] sm:$0xf0]  ;;  %v7694_v18 = vld [vmem:[%s12221_s13 + $0x40] sm:$0xff] }
 0xd0b   :  { %6025 = vmatpush.msrb.mxu3 %v5982_v3  ;;  %v7658_v3 = vld [vmem:[%s12220_s12 + $0x24] sm:$0xf] }
 0xd0d   :  { %6026 = vmatpush.msrb.mxu3 %v5981_v0  ;;  %v7386_v0 = vld [vmem:[%s12220_s12 + $0xe8] sm:$0xf0] }
 0xd0e   :  { %6258 = vmatpush.bf16.msra.mxu2 %v7313_v28  ;;  %v7277_v28 = vor.u32 %v7654_v14, %v7274_v51 }
 0xd0f   :  { %6027 = vmatpush.msrb.mxu3 %v5980_v54  ;;  %v7293_v54 = vor.u32 %v7658_v3, %v7290_v33 }
 0xd10   :  { %7269 = vmatmul.msk.f32.vlgmr.msrb.gmra.mxu3 %vm205_vm14, %v5988_v22  ;;  %v7389_v22 = vor.u32 %v7682_v45, %v7386_v0 }
 0xd11   :  { %6282 = vmatpush.bf16.msra.mxu3 %v7333_v62 }
 0xd12   :  { %6259 = vmatpush.bf16.msra.mxu2 %v7305_v48 }
 0xd15   :  { %6283 = vmatpush.bf16.msra.mxu3 %v7325_v7  ;;  %v6056_v7 = vperm.slane %v11933_v61, 5 }
 0xd16   :  { %6260 = vmatpush.bf16.msra.mxu2 %v7297_v36  ;;  %v7354_v36 = vld [vmem:[%s12220_s12 + $0xa8] sm:$0xf0] }
 0xd17   :  { %v7357_v31 = vor.u32 %v7674_v37, %v7354_v36 }
 0xd19   :  { %6284 = vmatpush.bf16.msra.mxu3 %v7317_v13  ;;  %v7346_v13 = vld [vmem:[%s12220_s12 + $0x98] sm:$0xf0] }
 0xd1a   :  { %6261 = vmatpush.bf16.msra.mxu2 %v7289_v50  ;;  %v7672_v50 = vld [vmem:[%s12220_s12 + $0x94] sm:$0xf] }
 0xd1d   :  { %6285 = vmatpush.bf16.msra.mxu3 %v7309_v29  ;;  %v7699_v29 = vld [vmem:[%s12221_s13 + $0x68] sm:$0xff] }
 0xd1e   :  { %6262 = vmatpush.bf16.msra.mxu2 %v7281_v39  ;;  %v7341_v39 = vor.u32 %v7670_v44, %v7338_v25 }
 0xd21   :  { %6286 = vmatpush.bf16.msra.mxu3 %v7301_v49 }
 0xd22   :  { %6263 = vmatpush.bf16.msra.mxu2 %v7273_v17 }
 0xd25   :  { %6287 = vmatpush.bf16.msra.mxu3 %v7293_v54 }
 0xd26   :  { %6295 = vmatpush.bf16.msrb.mxu2 %v7397_v47 }
 0xd2a   :  { %6296 = vmatpush.bf16.msrb.mxu2 %v7389_v22 }
 0xd7d   :  { %v6009_v38 = vpop.f32.mrf.mxu3 }
 0xd93   :  { %v6029_v23 = vpop.f32.mrf.mxu3 }
 0xd94   :  { %v6030_v46 = vadd.f32 %v6029_v23, %v6009_v38  ;;  %v7656_v38 = vld [vmem:[%s12220_s12 + $0x14] sm:$0xf]  ;;  %v7282_v23 = vld [vmem:[%s12220_s12 + $0x18] sm:$0xf0] }
 0xd95   :  { %v7285_v60 = vor.u32 %v7656_v38, %v7282_v23 }
 0xd96   :  { %v6032_v30 = vsel %vm2068_vm11, %v6030_v46, 0.0 }
 0xd97   :  { %6033 = vadd.xlane.f32.xlu2 %v6032_v30  ;;  %v7378_v30 = vld [vmem:[%s12220_s12 + $0xd8] sm:$0xf0]  ;;  %6288 = vmatpush.bf16.msra.mxu3 %v7285_v60 }
 0xd9b   :  { %6289 = vmatpush.bf16.msra.mxu3 %v7277_v28 }
 0xe0a   :  { %v6034_v24 = vpop.xlane.xlu2 %6033 }
 0xe0b   :  { %v6035_v16 = vmul.f32 %v6034_v24, %v12513_v42  ;;  %v7362_v24 = vld [vmem:[%s12220_s12 + $0xb8] sm:$0xf0] }
 0xe0c   :  { %v7365_v6 = vor.u32 %v7676_v20, %v7362_v24 }
 0xe0d   :  { %v12029_v35 = vsub.f32 %v6030_v46, %v6035_v16  ;;  %v7680_v46 = vld [vmem:[%s12220_s12 + $0xd4] sm:$0xf]  ;;  %v7701_v16 = vld [vmem:[%s12221_s13 + $0x78] sm:$0xff] }
 0xe0e   :  { %v7381_v9 = vor.u32 %v7680_v46, %v7378_v30  ;;  %6454 = vmatpush.bf16.msrb.mxu3 %v7701_v16 }
 0xe0f   :  { %v6037_v63 = vmul.f32 %v12029_v35, %v12029_v35 }
 0xe10   :  { %6297 = vmatpush.bf16.msrb.mxu2 %v7381_v9 }
 0xe11   :  { %v6038_v10 = vsel %vm2068_vm11, %v6037_v63, 0.0 }
 0xe12   :  { %6039 = vadd.xlane.f32.xlu0 %v6038_v10  ;;  %v6054_v10 = vperm.slane %v11933_v61, 4  ;;  %6455 = vmatpush.bf16.msrb.mxu3 %v7700_v59  ;;  %v7349_v61 = vor.u32 %v7672_v50, %v7346_v13 }
 0xe14   :  { %6298 = vmatpush.bf16.msrb.mxu2 %v7373_v19 }
 0xe16   :  { %6456 = vmatpush.bf16.msrb.mxu3 %v7699_v29 }
 0xe18   :  { %6299 = vmatpush.bf16.msrb.mxu2 %v7365_v6 }
 0xe1a   :  { %6457 = vmatpush.bf16.msrb.mxu3 %v7698_v41 }
 0xe1c   :  { %6300 = vmatpush.bf16.msrb.mxu2 %v7357_v31 }
 0xe20   :  { %6301 = vmatpush.bf16.msrb.mxu2 %v7349_v61 }
 0xe24   :  { %6302 = vmatpush.bf16.msrb.mxu2 %v7341_v39 }
 0xe85   :  { %v6040_v55 = vpop.xlane.xlu0 %6039 }
 0xe86   :  { %v6041_v56 = vmul.f32 %v6040_v55, %v12513_v42  ;;  %v7692_v42 = vld [vmem:[%s12221_s13 + $0x30] sm:$0xff]  ;;  %v7689_v55 = vld [vmem:[%s12221_s13 + $0x18] sm:$0xff] }
 0xe87   :  { %6442 = vmatpush.bf16.msra.mxu0 %v7692_v42 }
 0xe88   :  { %v6042_v1 = vadd.f32 1e-06, %v6041_v56  ;;  %v7688_v56 = vld [vmem:[%s12221_s13 + $0x10] sm:$0xff] }
 0xe8a   :  { %8044 = vrsqrt.f32 %v6042_v1  ;;  %vm6049_vm11 = vweird.f32 %v6042_v1 }
 0xe8b   :  { %6443 = vmatpush.bf16.msra.mxu0 %v7691_v52 }
 0xe8f   :  { %6444 = vmatpush.bf16.msra.mxu0 %v7690_v12 }
 0xe90   :  { %v8045_v15 = vpop.eup %8044 }
 0xe91   :  { %v6044_v40 = vmul.f32 %v8045_v15, %v6042_v1  ;;  %vm6050_vm14 = vweird.f32 %v8045_v15  ;;  %v8052_v1 = vld [vmem:[%s12218_s10 + $0x10] sm:$0xff]  ;;  %s8080_s10 = smov [#allocation2]  }
 0xe92   :  { %vm6051_vm13 = vmor %vm6049_vm11, %vm6050_vm14  ;;  %v6094_v17 = vperm.slane %v8052_v1, 1  ;;  %v6060_v54 = vrot.slane %v8052_v1, 1  ;;  %v6344_v51 = vperm.slane %v8052_v1, 3 }
 0xe93   :  { %v6045_v27 = vmul.f32 %v8045_v15, %v6044_v40  ;;  %6445 = vmatpush.bf16.msra.mxu0 %v7689_v55 }
 0xe94   :  { %v6095_v23 = vperm.slane %v6060_v54, 1 }
 0xe95   :  { %v6046_v62 = vmul.f32 0.5, %v6045_v27 }
 0xe97   :  { %v6047_v48 = vsub.f32 1.5, %v6046_v62  ;;  %6446 = vmatpush.bf16.msra.mxu0 %v7688_v56 }
 0xe99   :  { %v6048_v63 = vmul.f32 %v8045_v15, %v6047_v48 }
 0xe9b   :  { %v6052_v53 = vsel %vm6051_vm13, %v8045_v15, %v6048_v63  ;;  %6447 = vmatpush.bf16.msra.mxu0 %v7687_v5 }
 0xe9c   :  { %v6053_v11 = vmul.f32 %v6052_v53, %v12029_v35 }
 0xe9e   :  { %v6055_v32 = vmul.f32 %v6054_v10, %v6053_v11 }
 0xe9f   :  { %6448 = vmatpush.bf16.msra.mxu0 %v7686_v4 }
 0xea0   :  { %v6057_v35 = vadd.f32 %v6056_v7, %v6055_v32 }
 0xea2   :  { %v6058_v58 = vpack.c.bf16 %v6057_v35, %v6057_v35 }
 0xea4   :  { %6264 = vmatmul.bf16.vlgmr.msra.gmra.mxu2 %v6058_v58  ;;  %6290 = vmatmul.bf16.vlgmr.msra.gmra.mxu3 %v6058_v58 }
 0xeb4   :  { %6303 = vmatmul.bf16.vlgmr.msrb.gmra.mxu2 %v11925_v34  ;;  %v7697_v34 = vld [vmem:[%s12221_s13 + $0x58] sm:$0xff]  ;;  %s6473_s13 = sshll.u32 %s8080_s10, 4  ;;  %s6474_s13 = int_to_ptr.vmem [resolvable:$true] %s6473_s13 }
 0xeb5   :  { %6458 = vmatpush.bf16.msrb.mxu3 %v7697_v34 }
 0xeb9   :  { %6459 = vmatpush.bf16.msrb.mxu3 %v7696_v8 }
 0xebd   :  { %6460 = vmatpush.bf16.msrb.mxu3 %v7695_v21 }
 0xec1   :  { %6461 = vmatpush.bf16.msrb.mxu3 %v7694_v18 }
 0xf27   :  { %v6265_v49 = vpop.f32.mrf.mxu2  ;;  %v6291_v47 = vpop.f32.mrf.mxu3 }
 0xf28   :  { %v6266_v3 = vadd.f32 %v6265_v49, %v6094_v17  ;;  %v6292_v46 = vadd.f32 %v6291_v47, %v6095_v23 }
 0xf2a   :  { %v6279_v33 = vadd.f32 %v11982_v26, %v6266_v3 }
 0xf2c   :  { %v6308_v45 = vmax.f32 %v6279_v33, 0.0 }
 0xf2e   :  { %v6310_v0 = vpack.c.bf16 %v6308_v45, %v6308_v45 }
 0xf2f   :  { %v6267_v22 = vpop.f32.mrf.mxu2  ;;  %v6293_v38 = vpop.f32.mrf.mxu3 }
 0xf30   :  { %6449 = vmatmul.bf16.vlgmr.msra.gmra.mxu0 %v6310_v0 }
 0xf37   :  { %v6304_v30 = vpop.f32.mrf.mxu2 }
 0xf38   :  { %v6305_v15 = vadd.f32 %v6304_v30, %v6292_v46 }
 0xf3a   :  { %v6309_v40 = vmax.f32 %v6305_v15, 0.0 }
 0xf3c   :  { %v6311_v60 = vpack.c.bf16 %v6309_v40, %v6309_v40 }
 0xf3e   :  { %6462 = vmatmul.bf16.vlgmr.msrb.gmra.mxu3 %v6311_v60 }
 0xf3f   :  { %v6306_v9 = vpop.f32.mrf.mxu2 }
 0xfad   :  { %v6450_v14 = vpop.f32.mrf.mxu0 }
 0xfae   :  { %v6451_v26 = vadd.f32 %v6450_v14, %v6344_v51 }
 0xfb5   :  { %v6452_v27 = vpop.f32.mrf.mxu0 }
 0xfc1   :  { %v6463_v57 = vpop.f32.mrf.mxu3 }
 0xfc2   :  { %v6464_v2 = vadd.f32 %v6463_v57, %v6451_v26 }
 0xfc4   :  { %6467 = vst [vmem:[#allocation2] sm:$0xf] %v6464_v2 }
 0xfc5   :  { %6478 = dma.vmem_to_hbm [thread:$0]  %s6474_s13, 64, %s6476_s29, [#allocation3]  }
 0xfc9   :  { %v6465_v43 = vpop.f32.mrf.mxu3 }
 0xfca   :  { %8077 = dma.done.wait [#allocation3], 64  }
 0xfcb   :  { %8078 = vsyncadd [#allocation3], 4294967232 }
 0xfcc   :  { %6483 = vsyncpa [#allocation3], 1 }

</bundles_post_ra>
